<compile_context>
chip_gen: v5e
topology: v5e:2x2
jax: 0.10.0
libtpu: 0.0.40
codegen_flags: <defaults>
</compile_context>

<pallas_src>
import functools

import jax
import jax.numpy as jnp
from jax.experimental import pallas as pl
from jax.experimental.pallas import tpu as pltpu

HIDDEN = 1000
HIDDEN_PAD = 1024   # 1000 padded to a multiple of 128 (lane-dense)
OUT_DIM = 784       # 28 * 28
OUT_PAD = 896       # 784 padded to a multiple of 128 (unmasked output stores)
LEAKY_SLOPE = 0.01  # PyTorch nn.LeakyReLU default negative_slope


def _decoder_kernel(x_ref, w1_ref, b1_ref, w2_ref, b2_ref, w3_ref, b3_ref, o_ref):
    # Layer 1: Linear(z_label -> 1024pad) + LeakyReLU. bf16 operands, f32 acc.
    h = jnp.dot(x_ref[...], w1_ref[...], preferred_element_type=jnp.float32)
    h = h + b1_ref[...]
    h = jnp.where(h > 0, h, LEAKY_SLOPE * h)

    # Layer 2: Linear(1024pad -> 1024pad) + LeakyReLU.
    h = jnp.dot(h.astype(jnp.bfloat16), w2_ref[...], preferred_element_type=jnp.float32)
    h = h + b2_ref[...]
    h = jnp.where(h > 0, h, LEAKY_SLOPE * h)

    # Layer 3: Linear(1024pad -> 896pad) + Sigmoid (elementwise kept in f32).
    h = jnp.dot(h.astype(jnp.bfloat16), w3_ref[...], preferred_element_type=jnp.float32)
    h = h + b3_ref[...]
    o_ref[...] = jax.nn.sigmoid(h).astype(o_ref.dtype)


def _round_up(n, m):
    return (n + m - 1) // m * m


def _pad_to(a, shape):
    pads = [(0, t - s) for s, t in zip(a.shape, shape)]
    return jnp.pad(a, pads)


@functools.partial(jax.jit, static_argnames=("tm",))
def decoder_forward(x, w1, b1, w2, b2, w3, b3, *, tm=256):
    """3-layer MLP decoder in a single Pallas kernel.

    Args:
      x:  [B, z_label] float32
      w1: [z_label, 1000], b1: [1, 1000]   (weights stored [in, out], i.e. W_torch.T)
      w2: [1000, 1000],    b2: [1, 1000]
      w3: [1000, 784],     b3: [1, 784]
    Returns:
      [B, 1, 28, 28] float32 (NCHW, matching PyTorch's x.view(-1, 1, 28, 28))
    """
    B, z = x.shape

    # bf16 weights (halves HBM traffic on the memory-bound path), f32 biases.
    # Padded columns/rows are zero, so they contribute nothing to the matmuls.
    w1p = _pad_to(w1, (z, HIDDEN_PAD)).astype(jnp.bfloat16)
    w2p = _pad_to(w2, (HIDDEN_PAD, HIDDEN_PAD)).astype(jnp.bfloat16)
    w3p = _pad_to(w3, (HIDDEN_PAD, OUT_PAD)).astype(jnp.bfloat16)
    b1p = _pad_to(b1.reshape(1, -1), (1, HIDDEN_PAD)).astype(jnp.float32)
    b2p = _pad_to(b2.reshape(1, -1), (1, HIDDEN_PAD)).astype(jnp.float32)
    b3p = _pad_to(b3.reshape(1, -1), (1, OUT_PAD)).astype(jnp.float32)

    # Batch tiling: tm rows per grid step; weights stay VMEM-resident across
    # steps (constant index_map), so only x/out tiles stream per step.
    tm_eff = min(tm, _round_up(B, 8))
    bp = _round_up(B, tm_eff)
    xp = _pad_to(x, (bp, z)).astype(jnp.bfloat16)
    grid = (bp // tm_eff,)

    flops = 2 * B * (z * HIDDEN + HIDDEN * HIDDEN + HIDDEN * OUT_DIM)
    bytes_accessed = (
        (w1p.size + w2p.size + w3p.size) * 2
        + (b1p.size + b2p.size + b3p.size) * 4
        + bp * z * 2
        + bp * OUT_PAD * 4
    )
    cost = pl.CostEstimate(
        flops=flops, transcendentals=B * OUT_DIM, bytes_accessed=bytes_accessed
    )

    flat = pl.pallas_call(
        _decoder_kernel,
        out_shape=jax.ShapeDtypeStruct((bp, OUT_PAD), jnp.float32),
        grid=grid,
        in_specs=[
            pl.BlockSpec((tm_eff, z), lambda i: (i, 0)),
            pl.BlockSpec((z, HIDDEN_PAD), lambda i: (0, 0)),
            pl.BlockSpec((1, HIDDEN_PAD), lambda i: (0, 0)),
            pl.BlockSpec((HIDDEN_PAD, HIDDEN_PAD), lambda i: (0, 0)),
            pl.BlockSpec((1, HIDDEN_PAD), lambda i: (0, 0)),
            pl.BlockSpec((HIDDEN_PAD, OUT_PAD), lambda i: (0, 0)),
            pl.BlockSpec((1, OUT_PAD), lambda i: (0, 0)),
        ],
        out_specs=pl.BlockSpec((tm_eff, OUT_PAD), lambda i: (i, 0)),
        compiler_params=pltpu.CompilerParams(
            dimension_semantics=("parallel",),
            vmem_limit_bytes=32 << 20,
        ),
        cost_estimate=cost,
    )(xp, w1p, b1p, w2p, b2p, w3p, b3p)

    # Drop batch/lane padding; reshape to NCHW like PyTorch's x.view(-1,1,28,28).
    return flat[:B, :OUT_DIM].reshape(B, 1, 28, 28)


def _init_linear(key, fan_in, fan_out):
    """Deterministic init mimicking PyTorch nn.Linear defaults (U(-k, k), k=1/sqrt(fan_in))."""
    kw, kb = jax.random.split(key)
    bound = 1.0 / jnp.sqrt(jnp.float32(fan_in))
    w = jax.random.uniform(kw, (fan_in, fan_out), jnp.float32, -bound, bound)
    b = jax.random.uniform(kb, (1, fan_out), jnp.float32, -bound, bound)
    return w, b


def _reference_forward_f32(x, w1, b1, w2, b2, w3, b3):
    """Pure-f32 JAX reference (matches the PyTorch module exactly)."""
    h = x @ w1 + b1
    h = jnp.where(h > 0, h, LEAKY_SLOPE * h)
    h = h @ w2 + b2
    h = jnp.where(h > 0, h, LEAKY_SLOPE * h)
    h = h @ w3 + b3
    return jax.nn.sigmoid(h).reshape(-1, 1, 28, 28)


def _reference_forward_bf16(x, w1, b1, w2, b2, w3, b3):
    """JAX reference with the same bf16 operand / f32 accumulate quantization as the kernel."""
    bf = jnp.bfloat16
    h = jnp.dot(x.astype(bf), w1.astype(bf), preferred_element_type=jnp.float32) + b1
    h = jnp.where(h > 0, h, LEAKY_SLOPE * h)
    h = jnp.dot(h.astype(bf), w2.astype(bf), preferred_element_type=jnp.float32) + b2
    h = jnp.where(h > 0, h, LEAKY_SLOPE * h)
    h = jnp.dot(h.astype(bf), w3.astype(bf), preferred_element_type=jnp.float32) + b3
    return jax.nn.sigmoid(h).reshape(-1, 1, 28, 28)


if __name__ == "__main__":
    # z_label = latent dim + one-hot label dim (e.g. 2 + 10) = 12, batch = 8
    Z_LABEL = 12
    BATCH = 8

    root = jax.random.PRNGKey(0)
    kx, k1, k2, k3 = jax.random.split(root, 4)

    x = jax.random.normal(kx, (BATCH, Z_LABEL), jnp.float32)
    w1, b1 = _init_linear(k1, Z_LABEL, HIDDEN)
    w2, b2 = _init_linear(k2, HIDDEN, HIDDEN)
    w3, b3 = _init_linear(k3, HIDDEN, OUT_DIM)

    out = decoder_forward(x, w1, b1, w2, b2, w3, b3)
    out = jax.block_until_ready(out)
    assert out.shape == (BATCH, 1, 28, 28), out.shape

    # Tight check vs a reference applying the same bf16 quantization.
    ref_q = _reference_forward_bf16(x, w1, b1, w2, b2, w3, b3)
    err_q = float(jnp.max(jnp.abs(out - ref_q)))
    assert err_q < 2e-3, err_q

    # Loose check vs the exact f32 PyTorch-equivalent reference.
    ref_f = _reference_forward_f32(x, w1, b1, w2, b2, w3, b3)
    err_f = float(jnp.max(jnp.abs(out - ref_f)))
    assert err_f < 5e-2, err_f

    print("KERNEL_OK")
</pallas_src>

<mosaic_0001>
module attributes {stable_mosaic.version = 11 : i64} {
  func.func @_decoder_kernel(%arg0: i32, %arg1: memref<8x12xbf16, #tpu.memory_space<vmem>>, %arg2: memref<12x1024xbf16, #tpu.memory_space<vmem>>, %arg3: memref<1x1024xf32, #tpu.memory_space<vmem>>, %arg4: memref<1024x1024xbf16, #tpu.memory_space<vmem>>, %arg5: memref<1x1024xf32, #tpu.memory_space<vmem>>, %arg6: memref<1024x896xbf16, #tpu.memory_space<vmem>>, %arg7: memref<1x896xf32, #tpu.memory_space<vmem>>, %arg8: memref<8x896xf32, #tpu.memory_space<vmem>>) attributes {dimension_semantics = [#tpu.dimension_semantics<parallel>], iteration_bounds = array<i64: 1>, scalar_prefetch = 0 : i64, scratch_operands = 0 : i64, tpu.core_type = #tpu.core_type<tc>, window_params = [{transform_indices = @transform_0, window_bounds = array<i64: 8, 12>}, {pipeline_mode = #tpu.pipeline_mode<synchronous>, transform_indices = @transform_1, window_bounds = array<i64: 12, 1024>}, {pipeline_mode = #tpu.pipeline_mode<synchronous>, transform_indices = @transform_2, window_bounds = array<i64: 1, 1024>}, {pipeline_mode = #tpu.pipeline_mode<synchronous>, transform_indices = @transform_3, window_bounds = array<i64: 1024, 1024>}, {pipeline_mode = #tpu.pipeline_mode<synchronous>, transform_indices = @transform_4, window_bounds = array<i64: 1, 1024>}, {pipeline_mode = #tpu.pipeline_mode<synchronous>, transform_indices = @transform_5, window_bounds = array<i64: 1024, 896>}, {pipeline_mode = #tpu.pipeline_mode<synchronous>, transform_indices = @transform_6, window_bounds = array<i64: 1, 896>}, {transform_indices = @transform_7, window_bounds = array<i64: 8, 896>}]} {
    %c0 = arith.constant 0 : index
    %c0_0 = arith.constant 0 : index
    %0 = vector.load %arg1[%c0, %c0_0] : memref<8x12xbf16, #tpu.memory_space<vmem>>, vector<8x12xbf16>
    %c0_1 = arith.constant 0 : index
    %c0_2 = arith.constant 0 : index
    %1 = vector.load %arg2[%c0_1, %c0_2] : memref<12x1024xbf16, #tpu.memory_space<vmem>>, vector<12x1024xbf16>
    %cst = arith.constant dense<0.000000e+00> : vector<8x1024xf32>
    %2 = tpu.matmul %0, %1, %cst {dimension_numbers = #tpu.dot_dimension_numbers<[1], [0], [0], [1], [0, 0, 1, 1], [], []>} : vector<8x12xbf16>, vector<12x1024xbf16>, vector<8x1024xf32> -> vector<8x1024xf32>
    %c0_3 = arith.constant 0 : index
    %c0_4 = arith.constant 0 : index
    %3 = vector.load %arg3[%c0_3, %c0_4] : memref<1x1024xf32, #tpu.memory_space<vmem>>, vector<1x1024xf32>
    %4 = vector.broadcast %3 : vector<1x1024xf32> to vector<8x1024xf32>
    %5 = arith.addf %2, %4 : vector<8x1024xf32>
    %cst_5 = arith.constant 0.000000e+00 : f32
    %6 = vector.broadcast %cst_5 : f32 to vector<8x1024xf32>
    %7 = arith.cmpf ogt, %5, %6 : vector<8x1024xf32>
    %cst_6 = arith.constant 0.00999999977 : f32
    %8 = vector.broadcast %cst_6 : f32 to vector<8x1024xf32>
    %9 = arith.mulf %8, %5 : vector<8x1024xf32>
    %10 = arith.select %7, %5, %9 : vector<8x1024xi1>, vector<8x1024xf32>
    %11 = arith.truncf %10 : vector<8x1024xf32> to vector<8x1024xbf16>
    %c0_7 = arith.constant 0 : index
    %c0_8 = arith.constant 0 : index
    %12 = vector.load %arg4[%c0_7, %c0_8] : memref<1024x1024xbf16, #tpu.memory_space<vmem>>, vector<1024x1024xbf16>
    %cst_9 = arith.constant dense<0.000000e+00> : vector<8x1024xf32>
    %13 = tpu.matmul %11, %12, %cst_9 {dimension_numbers = #tpu.dot_dimension_numbers<[1], [0], [0], [1], [0, 0, 1, 1], [], []>} : vector<8x1024xbf16>, vector<1024x1024xbf16>, vector<8x1024xf32> -> vector<8x1024xf32>
    %c0_10 = arith.constant 0 : index
    %c0_11 = arith.constant 0 : index
    %14 = vector.load %arg5[%c0_10, %c0_11] : memref<1x1024xf32, #tpu.memory_space<vmem>>, vector<1x1024xf32>
    %15 = vector.broadcast %14 : vector<1x1024xf32> to vector<8x1024xf32>
    %16 = arith.addf %13, %15 : vector<8x1024xf32>
    %cst_12 = arith.constant 0.000000e+00 : f32
    %17 = vector.broadcast %cst_12 : f32 to vector<8x1024xf32>
    %18 = arith.cmpf ogt, %16, %17 : vector<8x1024xf32>
    %cst_13 = arith.constant 0.00999999977 : f32
    %19 = vector.broadcast %cst_13 : f32 to vector<8x1024xf32>
    %20 = arith.mulf %19, %16 : vector<8x1024xf32>
    %21 = arith.select %18, %16, %20 : vector<8x1024xi1>, vector<8x1024xf32>
    %22 = arith.truncf %21 : vector<8x1024xf32> to vector<8x1024xbf16>
    %c0_14 = arith.constant 0 : index
    %c0_15 = arith.constant 0 : index
    %23 = vector.load %arg6[%c0_14, %c0_15] : memref<1024x896xbf16, #tpu.memory_space<vmem>>, vector<1024x896xbf16>
    %cst_16 = arith.constant dense<0.000000e+00> : vector<8x896xf32>
    %24 = tpu.matmul %22, %23, %cst_16 {dimension_numbers = #tpu.dot_dimension_numbers<[1], [0], [0], [1], [0, 0, 1, 1], [], []>} : vector<8x1024xbf16>, vector<1024x896xbf16>, vector<8x896xf32> -> vector<8x896xf32>
    %c0_17 = arith.constant 0 : index
    %c0_18 = arith.constant 0 : index
    %25 = vector.load %arg7[%c0_17, %c0_18] : memref<1x896xf32, #tpu.memory_space<vmem>>, vector<1x896xf32>
    %26 = vector.broadcast %25 : vector<1x896xf32> to vector<8x896xf32>
    %27 = arith.addf %24, %26 : vector<8x896xf32>
    %28 = arith.negf %27 : vector<8x896xf32>
    %29 = math.exp %28 : vector<8x896xf32>
    %cst_19 = arith.constant 1.000000e+00 : f32
    %30 = vector.broadcast %cst_19 : f32 to vector<8x896xf32>
    %31 = arith.addf %30, %29 : vector<8x896xf32>
    %32 = arith.divf %30, %31 : vector<8x896xf32>
    %c0_20 = arith.constant 0 : index
    %c0_21 = arith.constant 0 : index
    %33 = vector.load %arg8[%c0_20, %c0_21] : memref<8x896xf32, #tpu.memory_space<vmem>>, vector<8x896xf32>
    tpu.vector_store %arg8[%c0_20, %c0_21], %32 {strides = array<i32>} : memref<8x896xf32, #tpu.memory_space<vmem>>, vector<8x896xf32>,
    return
  }
  func.func @transform_0(%arg0: i32) -> (i32, i32) {
    %c0_i32 = arith.constant 0 : i32
    %c0_i32_0 = arith.constant 0 : i32
    return %arg0, %c0_i32 : i32, i32
  }
  func.func @transform_1(%arg0: i32) -> (i32, i32) {
    %c0_i32 = arith.constant 0 : i32
    %c0_i32_0 = arith.constant 0 : i32
    %c0_i32_1 = arith.constant 0 : i32
    return %c0_i32, %c0_i32_0 : i32, i32
  }
  func.func @transform_2(%arg0: i32) -> (i32, i32) {
    %c0_i32 = arith.constant 0 : i32
    %c0_i32_0 = arith.constant 0 : i32
    %c0_i32_1 = arith.constant 0 : i32
    return %c0_i32, %c0_i32_0 : i32, i32
  }
  func.func @transform_3(%arg0: i32) -> (i32, i32) {
    %c0_i32 = arith.constant 0 : i32
    %c0_i32_0 = arith.constant 0 : i32
    %c0_i32_1 = arith.constant 0 : i32
    return %c0_i32, %c0_i32_0 : i32, i32
  }
  func.func @transform_4(%arg0: i32) -> (i32, i32) {
    %c0_i32 = arith.constant 0 : i32
    %c0_i32_0 = arith.constant 0 : i32
    %c0_i32_1 = arith.constant 0 : i32
    return %c0_i32, %c0_i32_0 : i32, i32
  }
  func.func @transform_5(%arg0: i32) -> (i32, i32) {
    %c0_i32 = arith.constant 0 : i32
    %c0_i32_0 = arith.constant 0 : i32
    %c0_i32_1 = arith.constant 0 : i32
    return %c0_i32, %c0_i32_0 : i32, i32
  }
  func.func @transform_6(%arg0: i32) -> (i32, i32) {
    %c0_i32 = arith.constant 0 : i32
    %c0_i32_0 = arith.constant 0 : i32
    %c0_i32_1 = arith.constant 0 : i32
    return %c0_i32, %c0_i32_0 : i32, i32
  }
  func.func @transform_7(%arg0: i32) -> (i32, i32) {
    %c0_i32 = arith.constant 0 : i32
    %c0_i32_0 = arith.constant 0 : i32
    return %arg0, %c0_i32 : i32, i32
  }
}

</mosaic_0001>

<bundles_post_ra>
// kernel: decoder_forward.1
= control target key start
LH: loop header
LB: loop body
LE: loop exit
PB: predicated region body
PF: predicated region fallthrough
CT: control target
= control target key end

     0   :  { %vm90_vm0 = vcmask 1045504   ;;  %vm86_vm1 = vcmask 97280   ;;  %s19094_s1 = inlined_call_operand.vmem [shape: bf16[12,1024], index: 1, kind: input, shape index: {}]   ;;  %s19095_s0 = inlined_call_operand.vmem [shape: bf16[8,12], index: 0, kind: input, shape index: {}]   ;;  %s19096_s3 = inlined_call_operand.vmem [shape: bf16[1024,1024], index: 3, kind: input, shape index: {}]   ;;  %s19097_s2 = inlined_call_operand.vmem [shape: f32[1,1024], index: 2, kind: input, shape index: {}]   ;;  %s19098_s4 = inlined_call_operand.vmem [shape: f32[1,1024], index: 4, kind: input, shape index: {}]   ;;  %s19099_s5 = inlined_call_operand.vmem [shape: bf16[1024,896], index: 5, kind: input, shape index: {}]   ;;  %s19100_s6 = inlined_call_operand.vmem [shape: f32[1,896], index: 6, kind: input, shape index: {}]   ;;  %s19101_s7 = inlined_call_operand.vmem [shape: f32[8,896], index: 7, kind: output, shape index: {}]  }
   0x1   :  { %v7911_v0 = vld [vmem:[%s19094_s1] sm:$0xf]  ;;  %v11796_v2 = vld [vmem:[%s19094_s1 + $0x4] sm:$0xf]  ;;  %v7919_v5 = vld [vmem:[%s19094_s1 + $0x8] sm:$0xf] }
   0x2   :  { %v11800_v1 = vld [vmem:[%s19094_s1 + $0x1c] sm:$0x30]  ;;  %v7913_v4 = vld [vmem:[%s19094_s1 + $0x20] sm:$0x30]  ;;  %v11801_v6 = vld [vmem:[%s19094_s1 + $0x24] sm:$0x30] }
   0x3   :  { %v7912_v3 = vor.u32 %v11800_v1, %v7911_v0  ;;  %v7916_v7 = vor.u32 %v11796_v2, %v7913_v4  ;;  %v7920_v8 = vor.u32 %v11801_v6, %v7919_v5  ;;  %v11797_v9 = vld [vmem:[%s19094_s1 + $0xc] sm:$0xf]  ;;  %v12863_v11 = vld [vmem:[%s19095_s0] sm:$0xf]  ;;  %v7927_v14 = vld [vmem:[%s19094_s1 + $0x10] sm:$0xf] }
   0x4   :  { %v7921_v10 = vld [vmem:[%s19094_s1 + $0x28] sm:$0x30]  ;;  %v11802_v15 = vld [vmem:[%s19094_s1 + $0x2c] sm:$0x30]  ;;  %v11798_v19 = vld [vmem:[%s19094_s1 + $0x14] sm:$0xf] }
   0x5   :  { %v92_v12 = vsel %vm90_vm0, %v7912_v3, 0  ;;  %v7924_v13 = vor.u32 %v11797_v9, %v7921_v10  ;;  %v95_v16 = vsel %vm90_vm0, %v7916_v7, 0  ;;  %v98_v17 = vsel %vm90_vm0, %v7920_v8, 0  ;;  %v7929_v20 = vld [vmem:[%s19094_s1 + $0x30] sm:$0x30] }
   0x6   :  { %122 = vmatpush.bf16.msra.mxu0 %v92_v12  ;;  %v7928_v18 = vor.u32 %v11802_v15, %v7927_v14  ;;  %135 = vmatpush.bf16.msra.mxu1 %v95_v16  ;;  %v7932_v22 = vor.u32 %v11798_v19, %v7929_v20  ;;  %v7935_v23 = vld [vmem:[%s19094_s1 + $0x18] sm:$0xf]  ;;  %v11799_v27 = vld [vmem:[%s19094_s1 + $0x1c] sm:$0xf]  ;;  %v8175_v31 = vld [vmem:[%s19096_s3 + $0x1c0] sm:$0xf] }
   0x7   :  { %148 = vmatpush.bf16.msra.mxu2 %v98_v17  ;;  %v101_v21 = vsel %vm90_vm0, %v7924_v13, 0  ;;  %v11803_v24 = vld [vmem:[%s19094_s1 + $0x34] sm:$0x30]  ;;  %v7937_v28 = vld [vmem:[%s19094_s1 + $0x38] sm:$0x30] }
   0x8   :  { %161 = vmatpush.bf16.msra.mxu3 %v101_v21  ;;  %v104_v25 = vsel %vm90_vm0, %v7928_v18, 0  ;;  %v7936_v26 = vor.u32 %v11803_v24, %v7935_v23  ;;  %v107_v29 = vsel %vm90_vm0, %v7932_v22, 0  ;;  %v7940_v30 = vor.u32 %v11799_v27, %v7937_v28  ;;  %v11864_v32 = vld [vmem:[%s19096_s3 + $0x1dc] sm:$0xf0] }
   0x9   :  { %7941 = vmatmul.msk.bf16.vlgmr.msra.gmra.mxu0 %vm86_vm1, %v12863_v11  ;;  %7942 = vmatmul.msk.bf16.vlgmr.msra.gmra.mxu1 %vm86_vm1, %v12863_v11  ;;  %v8176_v34 = vor.u32 %v11864_v32, %v8175_v31  ;;  %v8431_v35 = vld [vmem:[%s19096_s3 + $0x3c0] sm:$0xf] }
   0xa   :  { %7943 = vmatmul.msk.bf16.vlgmr.msra.gmra.mxu2 %vm86_vm1, %v12863_v11  ;;  %v110_v33 = vsel %vm90_vm0, %v7936_v26, 0  ;;  %v11928_v36 = vld [vmem:[%s19096_s3 + $0x3dc] sm:$0xf0]  ;;  %174 = vmatpush.bf16.msrb.mxu0 %v104_v25  ;;  %v113_v37 = vsel %vm90_vm0, %v7940_v30, 0 }
   0xb   :  { %7944 = vmatmul.msk.bf16.vlgmr.msra.gmra.mxu3 %vm86_vm1, %v12863_v11  ;;  %v8432_v38 = vor.u32 %v11928_v36, %v8431_v35  ;;  %v8143_v39 = vld [vmem:[%s19096_s3 + $0x180] sm:$0xf]  ;;  %187 = vmatpush.bf16.msrb.mxu1 %v107_v29 }
   0xc   :  { %v11856_v40 = vld [vmem:[%s19096_s3 + $0x19c] sm:$0xf0]  ;;  %200 = vmatpush.bf16.msrb.mxu2 %v110_v33  ;;  %213 = vmatpush.bf16.msrb.mxu3 %v113_v37 }
   0xd   :  { %v8399_v41 = vld [vmem:[%s19096_s3 + $0x380] sm:$0xf]  ;;  %v8144_v44 = vor.u32 %v11856_v40, %v8143_v39 }
   0xe   :  { %v11920_v42 = vld [vmem:[%s19096_s3 + $0x39c] sm:$0xf0]  ;;  %3341 = vmatpush.bf16.msra.mxu0 %v8176_v34 }
   0xf   :  { %v8687_v43 = vld [vmem:[%s19096_s3 + $0x5c0] sm:$0xf]  ;;  %3354 = vmatpush.bf16.msra.mxu1 %v8432_v38  ;;  %v8400_v48 = vor.u32 %v11920_v42, %v8399_v41 }
  0x10   :  { %v11992_v45 = vld [vmem:[%s19096_s3 + $0x5dc] sm:$0xf0] }
  0x11   :  { %v8943_v46 = vld [vmem:[%s19096_s3 + $0x7c0] sm:$0xf]  ;;  %v8688_v49 = vor.u32 %v11992_v45, %v8687_v43 }
  0x12   :  { %v12056_v47 = vld [vmem:[%s19096_s3 + $0x7dc] sm:$0xf0]  ;;  %3342 = vmatpush.bf16.msra.mxu0 %v8144_v44 }
  0x13   :  { %v8944_v50 = vor.u32 %v12056_v47, %v8943_v46  ;;  %v8111_v51 = vld [vmem:[%s19096_s3 + $0x140] sm:$0xf]  ;;  %3367 = vmatpush.bf16.msra.mxu2 %v8688_v49  ;;  %3355 = vmatpush.bf16.msra.mxu1 %v8400_v48 }
  0x14   :  { %v11848_v52 = vld [vmem:[%s19096_s3 + $0x15c] sm:$0xf0] }
  0x15   :  { %v8367_v53 = vld [vmem:[%s19096_s3 + $0x340] sm:$0xf]  ;;  %3380 = vmatpush.bf16.msra.mxu3 %v8944_v50  ;;  %v8112_v60 = vor.u32 %v11848_v52, %v8111_v51 }
  0x16   :  { %v11912_v54 = vld [vmem:[%s19096_s3 + $0x35c] sm:$0xf0] }
  0x17   :  { %v8655_v55 = vld [vmem:[%s19096_s3 + $0x580] sm:$0xf]  ;;  %v8368_v62 = vor.u32 %v11912_v54, %v8367_v53  ;;  %3343 = vmatpush.bf16.msra.mxu0 %v8112_v60 }
  0x18   :  { %v11984_v56 = vld [vmem:[%s19096_s3 + $0x59c] sm:$0xf0] }
  0x19   :  { %v8656_v57 = vor.u32 %v11984_v56, %v8655_v55  ;;  %v8911_v58 = vld [vmem:[%s19096_s3 + $0x780] sm:$0xf]  ;;  %3356 = vmatpush.bf16.msra.mxu1 %v8368_v62  ;;  %7945 = vmatmul.msk.bf16.vlgmr.msrb.gmra.mxu0 %vm86_vm1, %v12863_v11 }
  0x1a   :  { %v12048_v59 = vld [vmem:[%s19096_s3 + $0x79c] sm:$0xf0]  ;;  %7946 = vmatmul.msk.bf16.vlgmr.msrb.gmra.mxu1 %vm86_vm1, %v12863_v11  ;;  %7947 = vmatmul.msk.bf16.vlgmr.msrb.gmra.mxu2 %vm86_vm1, %v12863_v11 }
  0x1b   :  { %v8912_v61 = vor.u32 %v12048_v59, %v8911_v58  ;;  %v8623_v63 = vld [vmem:[%s19096_s3 + $0x540] sm:$0xf]  ;;  %3368 = vmatpush.bf16.msra.mxu2 %v8656_v57  ;;  %7948 = vmatmul.msk.bf16.vlgmr.msrb.gmra.mxu3 %vm86_vm1, %v12863_v11 }
  0x1c   :  { %v11976_v0 = vld [vmem:[%s19096_s3 + $0x55c] sm:$0xf0] }
  0x1d   :  { %v8879_v1 = vld [vmem:[%s19096_s3 + $0x740] sm:$0xf]  ;;  %3381 = vmatpush.bf16.msra.mxu3 %v8912_v61  ;;  %v8624_v6 = vor.u32 %v11976_v0, %v8623_v63 }
  0x1e   :  { %v12040_v2 = vld [vmem:[%s19096_s3 + $0x75c] sm:$0xf0] }
  0x1f   :  { %v8079_v3 = vld [vmem:[%s19096_s3 + $0x100] sm:$0xf]  ;;  %v8880_v7 = vor.u32 %v12040_v2, %v8879_v1  ;;  %3369 = vmatpush.bf16.msra.mxu2 %v8624_v6 }
  0x20   :  { %v11840_v4 = vld [vmem:[%s19096_s3 + $0x11c] sm:$0xf0] }
  0x21   :  { %v8335_v5 = vld [vmem:[%s19096_s3 + $0x300] sm:$0xf]  ;;  %v8080_v14 = vor.u32 %v11840_v4, %v8079_v3  ;;  %3382 = vmatpush.bf16.msra.mxu3 %v8880_v7 }
  0x22   :  { %v11904_v8 = vld [vmem:[%s19096_s3 + $0x31c] sm:$0xf0] }
  0x23   :  { %v8591_v9 = vld [vmem:[%s19096_s3 + $0x500] sm:$0xf]  ;;  %v8336_v15 = vor.u32 %v11904_v8, %v8335_v5  ;;  %3344 = vmatpush.bf16.msra.mxu0 %v8080_v14 }
  0x24   :  { %v11968_v10 = vld [vmem:[%s19096_s3 + $0x51c] sm:$0xf0] }
  0x25   :  { %v8847_v12 = vld [vmem:[%s19096_s3 + $0x700] sm:$0xf]  ;;  %v8592_v19 = vor.u32 %v11968_v10, %v8591_v9  ;;  %3357 = vmatpush.bf16.msra.mxu1 %v8336_v15 }
  0x26   :  { %v12032_v13 = vld [vmem:[%s19096_s3 + $0x71c] sm:$0xf0] }
  0x27   :  { %v8047_v16 = vld [vmem:[%s19096_s3 + $0xc0] sm:$0xf]  ;;  %v8848_v21 = vor.u32 %v12032_v13, %v8847_v12  ;;  %3370 = vmatpush.bf16.msra.mxu2 %v8592_v19 }
  0x28   :  { %v11832_v17 = vld [vmem:[%s19096_s3 + $0xdc] sm:$0xf0] }
  0x29   :  { %v8303_v18 = vld [vmem:[%s19096_s3 + $0x2c0] sm:$0xf]  ;;  %v8048_v26 = vor.u32 %v11832_v17, %v8047_v16  ;;  %3383 = vmatpush.bf16.msra.mxu3 %v8848_v21 }
  0x2a   :  { %v11896_v20 = vld [vmem:[%s19096_s3 + $0x2dc] sm:$0xf0] }
  0x2b   :  { %v8559_v22 = vld [vmem:[%s19096_s3 + $0x4c0] sm:$0xf]  ;;  %v8304_v27 = vor.u32 %v11896_v20, %v8303_v18  ;;  %3345 = vmatpush.bf16.msra.mxu0 %v8048_v26 }
  0x2c   :  { %v11960_v23 = vld [vmem:[%s19096_s3 + $0x4dc] sm:$0xf0] }
  0x2d   :  { %v8815_v24 = vld [vmem:[%s19096_s3 + $0x6c0] sm:$0xf]  ;;  %v8560_v31 = vor.u32 %v11960_v23, %v8559_v22  ;;  %3358 = vmatpush.bf16.msra.mxu1 %v8304_v27 }
  0x2e   :  { %v12024_v25 = vld [vmem:[%s19096_s3 + $0x6dc] sm:$0xf0] }
  0x2f   :  { %v8015_v28 = vld [vmem:[%s19096_s3 + $0x80] sm:$0xf]  ;;  %v8816_v32 = vor.u32 %v12024_v25, %v8815_v24  ;;  %3371 = vmatpush.bf16.msra.mxu2 %v8560_v31 }
  0x30   :  { %v11824_v29 = vld [vmem:[%s19096_s3 + $0x9c] sm:$0xf0] }
  0x31   :  { %v8271_v30 = vld [vmem:[%s19096_s3 + $0x280] sm:$0xf]  ;;  %v8016_v37 = vor.u32 %v11824_v29, %v8015_v28  ;;  %3384 = vmatpush.bf16.msra.mxu3 %v8816_v32 }
  0x32   :  { %v11888_v11 = vld [vmem:[%s19096_s3 + $0x29c] sm:$0xf0] }
  0x33   :  { %v8527_v33 = vld [vmem:[%s19096_s3 + $0x480] sm:$0xf]  ;;  %v8272_v38 = vor.u32 %v11888_v11, %v8271_v30  ;;  %3346 = vmatpush.bf16.msra.mxu0 %v8016_v37 }
  0x34   :  { %v11952_v34 = vld [vmem:[%s19096_s3 + $0x49c] sm:$0xf0] }
  0x35   :  { %v8783_v35 = vld [vmem:[%s19096_s3 + $0x680] sm:$0xf]  ;;  %v8528_v42 = vor.u32 %v11952_v34, %v8527_v33  ;;  %3359 = vmatpush.bf16.msra.mxu1 %v8272_v38 }
  0x36   :  { %v12016_v36 = vld [vmem:[%s19096_s3 + $0x69c] sm:$0xf0] }
  0x37   :  { %v7983_v39 = vld [vmem:[%s19096_s3 + $0x40] sm:$0xf]  ;;  %v8784_v44 = vor.u32 %v12016_v36, %v8783_v35  ;;  %3372 = vmatpush.bf16.msra.mxu2 %v8528_v42 }
  0x38   :  { %v11816_v40 = vld [vmem:[%s19096_s3 + $0x5c] sm:$0xf0] }
  0x39   :  { %v8239_v41 = vld [vmem:[%s19096_s3 + $0x240] sm:$0xf]  ;;  %v7984_v49 = vor.u32 %v11816_v40, %v7983_v39  ;;  %3385 = vmatpush.bf16.msra.mxu3 %v8784_v44 }
  0x3a   :  { %v11880_v43 = vld [vmem:[%s19096_s3 + $0x25c] sm:$0xf0] }
  0x3b   :  { %v8495_v45 = vld [vmem:[%s19096_s3 + $0x440] sm:$0xf]  ;;  %v8240_v52 = vor.u32 %v11880_v43, %v8239_v41  ;;  %3347 = vmatpush.bf16.msra.mxu0 %v7984_v49 }
  0x3c   :  { %v11944_v46 = vld [vmem:[%s19096_s3 + $0x45c] sm:$0xf0] }
  0x3d   :  { %v8751_v47 = vld [vmem:[%s19096_s3 + $0x640] sm:$0xf]  ;;  %v8496_v56 = vor.u32 %v11944_v46, %v8495_v45  ;;  %3360 = vmatpush.bf16.msra.mxu1 %v8240_v52 }
  0x3e   :  { %v12008_v48 = vld [vmem:[%s19096_s3 + $0x65c] sm:$0xf0] }
  0x3f   :  { %v7951_v50 = vld [vmem:[%s19096_s3] sm:$0xf]  ;;  %v8752_v60 = vor.u32 %v12008_v48, %v8751_v47  ;;  %3373 = vmatpush.bf16.msra.mxu2 %v8496_v56 }
  0x40   :  { %v11808_v51 = vld [vmem:[%s19096_s3 + $0x1c] sm:$0xf0] }
  0x41   :  { %v8207_v53 = vld [vmem:[%s19096_s3 + $0x200] sm:$0xf]  ;;  %v7952_v0 = vor.u32 %v11808_v51, %v7951_v50  ;;  %3386 = vmatpush.bf16.msra.mxu3 %v8752_v60 }
  0x42   :  { %v11872_v54 = vld [vmem:[%s19096_s3 + $0x21c] sm:$0xf0] }
  0x43   :  { %v9199_v55 = vld [vmem:[%s19096_s3 + $0x9c0] sm:$0xf]  ;;  %v8208_v4 = vor.u32 %v11872_v54, %v8207_v53  ;;  %3348 = vmatpush.bf16.msra.mxu0 %v7952_v0 }
  0x44   :  { %v12120_v57 = vld [vmem:[%s19096_s3 + $0x9dc] sm:$0xf0] }
  0x45   :  { %v9455_v58 = vld [vmem:[%s19096_s3 + $0xbc0] sm:$0xf]  ;;  %v9200_v5 = vor.u32 %v12120_v57, %v9199_v55  ;;  %3361 = vmatpush.bf16.msra.mxu1 %v8208_v4 }
  0x46   :  { %v12184_v59 = vld [vmem:[%s19096_s3 + $0xbdc] sm:$0xf0] }
  0x47   :  { %v8463_v61 = vld [vmem:[%s19096_s3 + $0x400] sm:$0xf]  ;;  %v9456_v8 = vor.u32 %v12184_v59, %v9455_v58  ;;  %3393 = vmatpush.bf16.msrb.mxu0 %v9200_v5 }
  0x48   :  { %v11936_v62 = vld [vmem:[%s19096_s3 + $0x41c] sm:$0xf0] }
  0x49   :  { %v8719_v63 = vld [vmem:[%s19096_s3 + $0x600] sm:$0xf]  ;;  %v8464_v12 = vor.u32 %v11936_v62, %v8463_v61  ;;  %3406 = vmatpush.bf16.msrb.mxu1 %v9456_v8 }
  0x4a   :  { %v12000_v1 = vld [vmem:[%s19096_s3 + $0x61c] sm:$0xf0] }
  0x4b   :  { %v9711_v2 = vld [vmem:[%s19096_s3 + $0xdc0] sm:$0xf]  ;;  %v8720_v15 = vor.u32 %v12000_v1, %v8719_v63  ;;  %3374 = vmatpush.bf16.msra.mxu2 %v8464_v12 }
  0x4c   :  { %v12248_v3 = vld [vmem:[%s19096_s3 + $0xddc] sm:$0xf0] }
  0x4d   :  { %v9967_v6 = vld [vmem:[%s19096_s3 + $0xfc0] sm:$0xf]  ;;  %v9712_v16 = vor.u32 %v12248_v3, %v9711_v2  ;;  %3387 = vmatpush.bf16.msra.mxu3 %v8720_v15 }
  0x4e   :  { %v12312_v7 = vld [vmem:[%s19096_s3 + $0xfdc] sm:$0xf0] }
  0x4f   :  { %v9167_v9 = vld [vmem:[%s19096_s3 + $0x980] sm:$0xf]  ;;  %v9968_v17 = vor.u32 %v12312_v7, %v9967_v6  ;;  %3419 = vmatpush.bf16.msrb.mxu2 %v9712_v16 }
  0x50   :  { %v12112_v10 = vld [vmem:[%s19096_s3 + $0x99c] sm:$0xf0] }
  0x51   :  { %v9423_v13 = vld [vmem:[%s19096_s3 + $0xb80] sm:$0xf]  ;;  %v9168_v20 = vor.u32 %v12112_v10, %v9167_v9  ;;  %3432 = vmatpush.bf16.msrb.mxu3 %v9968_v17 }
  0x52   :  { %v12176_v14 = vld [vmem:[%s19096_s3 + $0xb9c] sm:$0xf0] }
  0x53   :  { %v9679_v18 = vld [vmem:[%s19096_s3 + $0xd80] sm:$0xf]  ;;  %v9424_v23 = vor.u32 %v12176_v14, %v9423_v13  ;;  %3394 = vmatpush.bf16.msrb.mxu0 %v9168_v20 }
  0x54   :  { %v12240_v19 = vld [vmem:[%s19096_s3 + $0xd9c] sm:$0xf0] }
  0x55   :  { %v9935_v21 = vld [vmem:[%s19096_s3 + $0xf80] sm:$0xf]  ;;  %v9680_v28 = vor.u32 %v12240_v19, %v9679_v18  ;;  %3407 = vmatpush.bf16.msrb.mxu1 %v9424_v23 }
  0x56   :  { %v12304_v22 = vld [vmem:[%s19096_s3 + $0xf9c] sm:$0xf0] }
  0x57   :  { %v9135_v24 = vld [vmem:[%s19096_s3 + $0x940] sm:$0xf]  ;;  %v9936_v29 = vor.u32 %v12304_v22, %v9935_v21  ;;  %3420 = vmatpush.bf16.msrb.mxu2 %v9680_v28 }
  0x58   :  { %v12104_v25 = vld [vmem:[%s19096_s3 + $0x95c] sm:$0xf0] }
  0x59   :  { %v9391_v26 = vld [vmem:[%s19096_s3 + $0xb40] sm:$0xf]  ;;  %v9136_v11 = vor.u32 %v12104_v25, %v9135_v24  ;;  %3433 = vmatpush.bf16.msrb.mxu3 %v9936_v29 }
  0x5a   :  { %v12168_v27 = vld [vmem:[%s19096_s3 + $0xb5c] sm:$0xf0] }
  0x5b   :  { %v9647_v30 = vld [vmem:[%s19096_s3 + $0xd40] sm:$0xf]  ;;  %v9392_v34 = vor.u32 %v12168_v27, %v9391_v26  ;;  %3395 = vmatpush.bf16.msrb.mxu0 %v9136_v11 }
  0x5c   :  { %v12232_v31 = vld [vmem:[%s19096_s3 + $0xd5c] sm:$0xf0] }
  0x5d   :  { %v9903_v32 = vld [vmem:[%s19096_s3 + $0xf40] sm:$0xf]  ;;  %v9648_v39 = vor.u32 %v12232_v31, %v9647_v30  ;;  %3408 = vmatpush.bf16.msrb.mxu1 %v9392_v34 }
  0x5e   :  { %v12296_v33 = vld [vmem:[%s19096_s3 + $0xf5c] sm:$0xf0] }
  0x5f   :  { %v9103_v35 = vld [vmem:[%s19096_s3 + $0x900] sm:$0xf]  ;;  %v9904_v40 = vor.u32 %v12296_v33, %v9903_v32  ;;  %3421 = vmatpush.bf16.msrb.mxu2 %v9648_v39 }
  0x60   :  { %v12096_v36 = vld [vmem:[%s19096_s3 + $0x91c] sm:$0xf0] }
  0x61   :  { %v9359_v37 = vld [vmem:[%s19096_s3 + $0xb00] sm:$0xf]  ;;  %v9104_v43 = vor.u32 %v12096_v36, %v9103_v35  ;;  %3434 = vmatpush.bf16.msrb.mxu3 %v9904_v40  ;;  %v11860_v40 = vld [vmem:[%s19096_s3 + $0x1c4] sm:$0xf] }
  0x62   :  { %v12160_v38 = vld [vmem:[%s19096_s3 + $0xb1c] sm:$0xf0] }
  0x63   :  { %v9615_v41 = vld [vmem:[%s19096_s3 + $0xd00] sm:$0xf]  ;;  %v9360_v46 = vor.u32 %v12160_v38, %v9359_v37  ;;  %3396 = vmatpush.bf16.msrb.mxu0 %v9104_v43 }
  0x64   :  { %v12224_v42 = vld [vmem:[%s19096_s3 + $0xd1c] sm:$0xf0] }
  0x65   :  { %v9871_v44 = vld [vmem:[%s19096_s3 + $0xf00] sm:$0xf]  ;;  %v9616_v51 = vor.u32 %v12224_v42, %v9615_v41  ;;  %3409 = vmatpush.bf16.msrb.mxu1 %v9360_v46  ;;  %v8177_v41 = vld [vmem:[%s19096_s3 + $0x1e0] sm:$0xf0] }
  0x66   :  { %v12288_v45 = vld [vmem:[%s19096_s3 + $0xf1c] sm:$0xf0]  ;;  %v11924_v42 = vld [vmem:[%s19096_s3 + $0x3c4] sm:$0xf] }
  0x67   :  { %v9071_v47 = vld [vmem:[%s19096_s3 + $0x8c0] sm:$0xf]  ;;  %v9872_v52 = vor.u32 %v12288_v45, %v9871_v44  ;;  %3422 = vmatpush.bf16.msrb.mxu2 %v9616_v51  ;;  %v8433_v44 = vld [vmem:[%s19096_s3 + $0x3e0] sm:$0xf0] }
  0x68   :  { %v12088_v48 = vld [vmem:[%s19096_s3 + $0x8dc] sm:$0xf0] }
  0x69   :  { %v9327_v49 = vld [vmem:[%s19096_s3 + $0xac0] sm:$0xf]  ;;  %v9072_v53 = vor.u32 %v12088_v48, %v9071_v47  ;;  %3435 = vmatpush.bf16.msrb.mxu3 %v9872_v52  ;;  %v8436_v52 = vor.u32 %v11924_v42, %v8433_v44  ;;  %v8881_v42 = vld [vmem:[%s19096_s3 + $0x760] sm:$0xf0] }
  0x6a   :  { %v12152_v50 = vld [vmem:[%s19096_s3 + $0xadc] sm:$0xf0] }
  0x6b   :  { %v9328_v54 = vor.u32 %v12152_v50, %v9327_v49  ;;  %v9039_v55 = vld [vmem:[%s19096_s3 + $0x880] sm:$0xf]  ;;  %3397 = vmatpush.bf16.msrb.mxu0 %v9072_v53  ;;  %v8180_v49 = vor.u32 %v11860_v40, %v8177_v41  ;;  %v11852_v53 = vld [vmem:[%s19096_s3 + $0x184] sm:$0xf] }
  0x6c   :  { %v12080_v56 = vld [vmem:[%s19096_s3 + $0x89c] sm:$0xf0]  ;;  %v8625_v40 = vld [vmem:[%s19096_s3 + $0x560] sm:$0xf0] }
  0x6d   :  { %v9295_v57 = vld [vmem:[%s19096_s3 + $0xa80] sm:$0xf]  ;;  %v9040_v59 = vor.u32 %v12080_v56, %v9039_v55  ;;  %3410 = vmatpush.bf16.msrb.mxu1 %v9328_v54  ;;  %v8145_v54 = vld [vmem:[%s19096_s3 + $0x1a0] sm:$0xf0] }
  0x6e   :  { %v12144_v58 = vld [vmem:[%s19096_s3 + $0xa9c] sm:$0xf0]  ;;  %v12036_v41 = vld [vmem:[%s19096_s3 + $0x744] sm:$0xf] }
  0x6f   :  { %v9296_v60 = vor.u32 %v12144_v58, %v9295_v57  ;;  %3398 = vmatpush.bf16.msrb.mxu0 %v9040_v59  ;;  %v9583_v61 = vld [vmem:[%s19096_s3 + $0xcc0] sm:$0xf]  ;;  %v11916_v57 = vld [vmem:[%s19096_s3 + $0x384] sm:$0xf] }
  0x70   :  { %v12216_v62 = vld [vmem:[%s19096_s3 + $0xcdc] sm:$0xf0]  ;;  %v8401_v58 = vld [vmem:[%s19096_s3 + $0x3a0] sm:$0xf0] }
  0x71   :  { %3411 = vmatpush.bf16.msrb.mxu1 %v9296_v60  ;;  %v9839_v63 = vld [vmem:[%s19096_s3 + $0xec0] sm:$0xf]  ;;  %v9584_v0 = vor.u32 %v12216_v62, %v9583_v61  ;;  %v11988_v62 = vld [vmem:[%s19096_s3 + $0x5c4] sm:$0xf] }
  0x72   :  { %v12280_v1 = vld [vmem:[%s19096_s3 + $0xedc] sm:$0xf0] }
  0x73   :  { %v9840_v2 = vor.u32 %v12280_v1, %v9839_v63  ;;  %v9007_v3 = vld [vmem:[%s19096_s3 + $0x840] sm:$0xf]  ;;  %3423 = vmatpush.bf16.msrb.mxu2 %v9584_v0  ;;  %v8689_v63 = vld [vmem:[%s19096_s3 + $0x5e0] sm:$0xf0] }
  0x74   :  { %v12072_v4 = vld [vmem:[%s19096_s3 + $0x85c] sm:$0xf0]  ;;  %v12052_v0 = vld [vmem:[%s19096_s3 + $0x7c4] sm:$0xf] }
  0x75   :  { %v9263_v5 = vld [vmem:[%s19096_s3 + $0xa40] sm:$0xf]  ;;  %v9008_v6 = vor.u32 %v12072_v4, %v9007_v3  ;;  %3436 = vmatpush.bf16.msrb.mxu3 %v9840_v2  ;;  %v8148_v3 = vor.u32 %v11852_v53, %v8145_v54  ;;  %v8945_v4 = vld [vmem:[%s19096_s3 + $0x7e0] sm:$0xf0] }
  0x76   :  { %v12136_v7 = vld [vmem:[%s19096_s3 + $0xa5c] sm:$0xf0] }
  0x77   :  { %v9264_v8 = vor.u32 %v12136_v7, %v9263_v5  ;;  %v9551_v9 = vld [vmem:[%s19096_s3 + $0xc80] sm:$0xf]  ;;  %3399 = vmatpush.bf16.msrb.mxu0 %v9008_v6  ;;  %v11844_v5 = vld [vmem:[%s19096_s3 + $0x144] sm:$0xf] }
  0x78   :  { %v12208_v10 = vld [vmem:[%s19096_s3 + $0xc9c] sm:$0xf0]  ;;  %v8113_v6 = vld [vmem:[%s19096_s3 + $0x160] sm:$0xf0] }
  0x79   :  { %v9807_v12 = vld [vmem:[%s19096_s3 + $0xe80] sm:$0xf]  ;;  %v9552_v13 = vor.u32 %v12208_v10, %v9551_v9  ;;  %3412 = vmatpush.bf16.msrb.mxu1 %v9264_v8  ;;  %v8404_v8 = vor.u32 %v11916_v57, %v8401_v58  ;;  %v11908_v9 = vld [vmem:[%s19096_s3 + $0x344] sm:$0xf]  ;;  %v8884_v57 = vor.u32 %v12036_v41, %v8881_v42 }
  0x7a   :  { %v12272_v14 = vld [vmem:[%s19096_s3 + $0xe9c] sm:$0xf0]  ;;  %v11964_v58 = vld [vmem:[%s19096_s3 + $0x504] sm:$0xf] }
  0x7b   :  { %v9808_v15 = vor.u32 %v12272_v14, %v9807_v12  ;;  %v8975_v16 = vld [vmem:[%s19096_s3 + $0x800] sm:$0xf]  ;;  %3424 = vmatpush.bf16.msrb.mxu2 %v9552_v13  ;;  %v8369_v12 = vld [vmem:[%s19096_s3 + $0x360] sm:$0xf0]  ;;  %v8692_v14 = vor.u32 %v11988_v62, %v8689_v63 }
  0x7c   :  { %v12064_v17 = vld [vmem:[%s19096_s3 + $0x81c] sm:$0xf0]  ;;  %v11804_v41 = vld [vmem:[%s19096_s3 + $0x4] sm:$0xf] }
  0x7d   :  { %v9231_v18 = vld [vmem:[%s19096_s3 + $0xa00] sm:$0xf]  ;;  %v8976_v19 = vor.u32 %v12064_v17, %v8975_v16  ;;  %3437 = vmatpush.bf16.msrb.mxu3 %v9808_v15  ;;  %v7953_v42 = vld [vmem:[%s19096_s3 + $0x20] sm:$0xf0] }
  0x7e   :  { %v12128_v20 = vld [vmem:[%s19096_s3 + $0xa1c] sm:$0xf0] }
  0x7f   :  { %v9232_v21 = vor.u32 %v12128_v20, %v9231_v18  ;;  %3400 = vmatpush.bf16.msrb.mxu0 %v8976_v19  ;;  %v9519_v22 = vld [vmem:[%s19096_s3 + $0xc40] sm:$0xf]  ;;  %v8948_v19 = vor.u32 %v12052_v0, %v8945_v4  ;;  %v8116_v20 = vor.u32 %v11844_v5, %v8113_v6  ;;  %v12028_v0 = vld [vmem:[%s19096_s3 + $0x704] sm:$0xf] }
  0x80   :  { %v12200_v23 = vld [vmem:[%s19096_s3 + $0xc5c] sm:$0xf0]  ;;  %v8017_v4 = vld [vmem:[%s19096_s3 + $0xa0] sm:$0xf0] }
  0x81   :  { %v9775_v24 = vld [vmem:[%s19096_s3 + $0xe40] sm:$0xf]  ;;  %3413 = vmatpush.bf16.msrb.mxu1 %v9232_v21  ;;  %v9520_v25 = vor.u32 %v12200_v23, %v9519_v22  ;;  %v11980_v21 = vld [vmem:[%s19096_s3 + $0x584] sm:$0xf] }
  0x82   :  { %v12264_v26 = vld [vmem:[%s19096_s3 + $0xe5c] sm:$0xf0]  ;;  %v8657_v22 = vld [vmem:[%s19096_s3 + $0x5a0] sm:$0xf0] }
  0x83   :  { %v9776_v27 = vor.u32 %v12264_v26, %v9775_v24  ;;  %3425 = vmatpush.bf16.msrb.mxu2 %v9520_v25  ;;  %v9487_v28 = vld [vmem:[%s19096_s3 + $0xc00] sm:$0xf]  ;;  %v12044_v23 = vld [vmem:[%s19096_s3 + $0x784] sm:$0xf]  ;;  %v8372_v25 = vor.u32 %v11908_v9, %v8369_v12 }
  0x84   :  { %v12192_v29 = vld [vmem:[%s19096_s3 + $0xc1c] sm:$0xf0]  ;;  %v8913_v26 = vld [vmem:[%s19096_s3 + $0x7a0] sm:$0xf0] }
  0x85   :  { %3438 = vmatpush.bf16.msrb.mxu3 %v9776_v27  ;;  %v9488_v30 = vor.u32 %v12192_v29, %v9487_v28  ;;  %v9743_v31 = vld [vmem:[%s19096_s3 + $0xe00] sm:$0xf]  ;;  %v11836_v27 = vld [vmem:[%s19096_s3 + $0x104] sm:$0xf] }
  0x86   :  { %v12256_v11 = vld [vmem:[%s19096_s3 + $0xe1c] sm:$0xf0]  ;;  %v124_v36 = vpop.f32.mrf.mxu0  ;;  %v137_v38 = vpop.f32.mrf.mxu1  ;;  %v8081_v28 = vld [vmem:[%s19096_s3 + $0x120] sm:$0xf0] }
  0x87   :  { %v9744_v32 = vor.u32 %v12256_v11, %v9743_v31  ;;  %3426 = vmatpush.bf16.msrb.mxu2 %v9488_v30  ;;  %v13300_v33 = vld [vmem:[%s19097_s2] sm:$0xff] }
  0x88   :  { %v38_v34 = vperm.slane %v13300_v33, 0  ;;  %v39_v35 = vperm.slane %v13300_v33, 1  ;;  %v40_v46 = vperm.slane %v13300_v33, 2  ;;  %v41_v48 = vperm.slane %v13300_v33, 3  ;;  %v11900_v30 = vld [vmem:[%s19096_s3 + $0x304] sm:$0xf] }
  0x89   :  { %3439 = vmatpush.bf16.msrb.mxu3 %v9744_v32  ;;  %v42_v15 = vperm.slane %v13300_v33, 4  ;;  %v43_v16 = vperm.slane %v13300_v33, 5  ;;  %v8337_v31 = vld [vmem:[%s19096_s3 + $0x320] sm:$0xf0] }
  0x8a   :  { %v125_v37 = vadd.f32 %v124_v36, %v38_v34  ;;  %v138_v39 = vadd.f32 %v137_v38, %v39_v35  ;;  %v8660_v34 = vor.u32 %v11980_v21, %v8657_v22  ;;  %v11972_v35 = vld [vmem:[%s19096_s3 + $0x544] sm:$0xf]  ;;  %v8916_v38 = vor.u32 %v12044_v23, %v8913_v26 }
  0x8b   :  { %v8340_v44 = vor.u32 %v11900_v30, %v8337_v31  ;;  %v8628_v53 = vor.u32 %v11972_v35, %v8625_v40  ;;  %v11884_v5 = vld [vmem:[%s19096_s3 + $0x284] sm:$0xf] }
  0x8c   :  { %vm219_vm2 = vcmp.gt.f32.partialorder %v125_v37, 0.0  ;;  %v227_v43 = vmul.f32 0.01, %v125_v37  ;;  %vm220_vm3 = vcmp.gt.f32.partialorder %v138_v39, 0.0  ;;  %v228_v45 = vmul.f32 0.01, %v138_v39 }
  0x8d   :  { %v150_v56 = vpop.f32.mrf.mxu2  ;;  %v8273_v6 = vld [vmem:[%s19096_s3 + $0x2a0] sm:$0xf0] }
  0x8e   :  { %v235_v47 = vsel %vm219_vm2, %v125_v37, %v227_v43  ;;  %v236_v51 = vsel %vm220_vm3, %v138_v39, %v228_v45  ;;  %v151_v59 = vadd.f32 %v150_v56, %v40_v46  ;;  %v163_v60 = vpop.f32.mrf.mxu3  ;;  %v126_v61 = vpop.f32.mrf.mxu0  ;;  %v8084_v39 = vor.u32 %v11836_v27, %v8081_v28  ;;  %v11828_v45 = vld [vmem:[%s19096_s3 + $0xc4] sm:$0xf] }
  0x8f   :  { %v13318_v50 = vpack.c.bf16 %v235_v47, %v235_v47  ;;  %v13326_v55 = vpack.c.bf16 %v236_v51, %v236_v51  ;;  %v164_v1 = vadd.f32 %v163_v60, %v41_v48  ;;  %v139_v2 = vpop.f32.mrf.mxu1  ;;  %v8049_v46 = vld [vmem:[%s19096_s3 + $0xe0] sm:$0xf0]  ;;  %v45_v56 = vperm.slane %v13300_v33, 7 }
  0x90   :  { %vm221_vm4 = vcmp.gt.f32.partialorder %v151_v59, 0.0  ;;  %v229_v7 = vmul.f32 0.01, %v151_v59  ;;  %v11892_v47 = vld [vmem:[%s19096_s3 + $0x2c4] sm:$0xf]  ;;  %v8052_v62 = vor.u32 %v11828_v45, %v8049_v46 }
  0x91   :  { %3349 = vmatmul.bf16.vlgmr.msra.gmra.mxu0 %v13318_v50  ;;  %3362 = vmatmul.bf16.vlgmr.msra.gmra.mxu1 %v13326_v55  ;;  %vm222_vm5 = vcmp.gt.f32.partialorder %v164_v1, 0.0  ;;  %v230_v10 = vmul.f32 0.01, %v164_v1  ;;  %v8561_v12 = vld [vmem:[%s19096_s3 + $0x4e0] sm:$0xf0] }
  0x92   :  { %3445 = vmatpush.bf16.msra.mxu0 %v8180_v49  ;;  %3458 = vmatpush.bf16.msra.mxu1 %v8436_v52  ;;  %v237_v13 = vsel %vm221_vm4, %v151_v59, %v229_v7  ;;  %v8305_v49 = vld [vmem:[%s19096_s3 + $0x2e0] sm:$0xf0]  ;;  %v44_v52 = vperm.slane %v13300_v33, 6 }
  0x93   :  { %v13362_v17 = vpack.c.bf16 %v237_v13, %v237_v13  ;;  %v238_v18 = vsel %vm222_vm5, %v164_v1, %v230_v10  ;;  %v8593_v59 = vld [vmem:[%s19096_s3 + $0x520] sm:$0xf0]  ;;  %v8308_v63 = vor.u32 %v11892_v47, %v8305_v49 }
  0x94   :  { %v13373_v24 = vpack.c.bf16 %v238_v18, %v238_v18  ;;  %v8849_v33 = vld [vmem:[%s19096_s3 + $0x720] sm:$0xf0]  ;;  %v8596_v9 = vor.u32 %v11964_v58, %v8593_v59 }
  0x95   :  { %v152_v29 = vpop.f32.mrf.mxu2  ;;  %3375 = vmatmul.bf16.vlgmr.msra.gmra.mxu2 %v13362_v17  ;;  %v11820_v1 = vld [vmem:[%s19096_s3 + $0x84] sm:$0xf] }
  0x96   :  { %3446 = vmatpush.bf16.msra.mxu0 %v8148_v3  ;;  %3459 = vmatpush.bf16.msra.mxu1 %v8404_v8  ;;  %v165_v11 = vpop.f32.mrf.mxu3  ;;  %v176_v32 = vpop.f32.mrf.mxu0  ;;  %v11956_v10 = vld [vmem:[%s19096_s3 + $0x4c4] sm:$0xf]  ;;  %v8020_v23 = vor.u32 %v11820_v1, %v8017_v4 }
  0x97   :  { %3388 = vmatmul.bf16.vlgmr.msra.gmra.mxu3 %v13373_v24  ;;  %3471 = vmatpush.bf16.msra.mxu2 %v8692_v14  ;;  %v177_v36 = vadd.f32 %v176_v32, %v42_v15  ;;  %v189_v37 = vpop.f32.mrf.mxu1  ;;  %v12020_v13 = vld [vmem:[%s19096_s3 + $0x6c4] sm:$0xf]  ;;  %v8564_v30 = vor.u32 %v11956_v10, %v8561_v12 }
  0x98   :  { %3484 = vmatpush.bf16.msra.mxu3 %v8948_v19  ;;  %v190_v43 = vadd.f32 %v189_v37, %v43_v16  ;;  %v8852_v16 = vor.u32 %v12028_v0, %v8849_v33  ;;  %v8817_v18 = vld [vmem:[%s19096_s3 + $0x6e0] sm:$0xf0] }
  0x99   :  { %vm223_vm6 = vcmp.gt.f32.partialorder %v177_v36, 0.0  ;;  %v231_v48 = vmul.f32 0.01, %v177_v36  ;;  %v11812_v19 = vld [vmem:[%s19096_s3 + $0x44] sm:$0xf]  ;;  %v8820_v32 = vor.u32 %v12020_v13, %v8817_v18 }
  0x9a   :  { %3447 = vmatpush.bf16.msra.mxu0 %v8116_v20  ;;  %3460 = vmatpush.bf16.msra.mxu1 %v8372_v25  ;;  %vm224_vm7 = vcmp.gt.f32.partialorder %v190_v43, 0.0  ;;  %v232_v51 = vmul.f32 0.01, %v190_v43  ;;  %v7985_v20 = vld [vmem:[%s19096_s3 + $0x60] sm:$0xf0]  ;;  %v8276_v25 = vor.u32 %v11884_v5, %v8273_v6 }
  0x9b   :  { %3472 = vmatpush.bf16.msra.mxu2 %v8660_v34  ;;  %v239_v54 = vsel %vm223_vm6, %v177_v36, %v231_v48  ;;  %v11876_v26 = vld [vmem:[%s19096_s3 + $0x244] sm:$0xf] }
  0x9c   :  { %3485 = vmatpush.bf16.msra.mxu3 %v8916_v38  ;;  %v13424_v60 = vpack.c.bf16 %v239_v54, %v239_v54  ;;  %v240_v61 = vsel %vm224_vm7, %v190_v43, %v232_v51  ;;  %v8241_v28 = vld [vmem:[%s19096_s3 + $0x260] sm:$0xf0]  ;;  %v7988_v38 = vor.u32 %v11812_v19, %v7985_v20 }
  0x9d   :  { %v13435_v2 = vpack.c.bf16 %v240_v61, %v240_v61  ;;  %v202_v3 = vpop.f32.mrf.mxu2  ;;  %v11948_v34 = vld [vmem:[%s19096_s3 + $0x484] sm:$0xf] }
  0x9e   :  { %3448 = vmatpush.bf16.msra.mxu0 %v8084_v39  ;;  %3461 = vmatpush.bf16.msra.mxu1 %v8340_v44  ;;  %v203_v7 = vadd.f32 %v202_v3, %v44_v52  ;;  %v215_v8 = vpop.f32.mrf.mxu3  ;;  %v178_v14 = vpop.f32.mrf.mxu0  ;;  %v8529_v35 = vld [vmem:[%s19096_s3 + $0x4a0] sm:$0xf0]  ;;  %v8244_v39 = vor.u32 %v11876_v26, %v8241_v28 }
  0x9f   :  { %3473 = vmatpush.bf16.msra.mxu2 %v8628_v53  ;;  %v216_v15 = vadd.f32 %v215_v8, %v45_v56  ;;  %v191_v21 = vpop.f32.mrf.mxu1  ;;  %v12012_v36 = vld [vmem:[%s19096_s3 + $0x684] sm:$0xf]  ;;  %v8532_v47 = vor.u32 %v11948_v34, %v8529_v35 }
  0xa0   :  { %3486 = vmatpush.bf16.msra.mxu3 %v8884_v57  ;;  %vm225_vm8 = vcmp.gt.f32.partialorder %v203_v7, 0.0  ;;  %v233_v22 = vmul.f32 0.01, %v203_v7  ;;  %v8785_v40 = vld [vmem:[%s19096_s3 + $0x6a0] sm:$0xf0]  ;;  %v7956_v57 = vor.u32 %v11804_v41, %v7953_v42 }
  0xa1   :  { %3401 = vmatmul.bf16.vlgmr.msrb.gmra.mxu0 %v13424_v60  ;;  %3414 = vmatmul.bf16.vlgmr.msrb.gmra.mxu1 %v13435_v2  ;;  %vm226_vm9 = vcmp.gt.f32.partialorder %v216_v15, 0.0  ;;  %v234_v27 = vmul.f32 0.01, %v216_v15  ;;  %v11868_v44 = vld [vmem:[%s19096_s3 + $0x204] sm:$0xf]  ;;  %v8788_v53 = vor.u32 %v12012_v36, %v8785_v40 }
  0xa2   :  { %3449 = vmatpush.bf16.msra.mxu0 %v8052_v62  ;;  %3462 = vmatpush.bf16.msra.mxu1 %v8308_v63  ;;  %v241_v29 = vsel %vm225_vm8, %v203_v7, %v233_v22  ;;  %v8209_v45 = vld [vmem:[%s19096_s3 + $0x220] sm:$0xf0] }
  0xa3   :  { %3474 = vmatpush.bf16.msra.mxu2 %v8596_v9  ;;  %v13472_v31 = vpack.c.bf16 %v241_v29, %v241_v29  ;;  %v242_v11 = vsel %vm226_vm9, %v216_v15, %v234_v27  ;;  %v12116_v46 = vld [vmem:[%s19096_s3 + $0x9c4] sm:$0xf]  ;;  %v8212_v58 = vor.u32 %v11868_v44, %v8209_v45 }
  0xa4   :  { %3487 = vmatpush.bf16.msra.mxu3 %v8852_v16  ;;  %v13483_v37 = vpack.c.bf16 %v242_v11, %v242_v11  ;;  %v9201_v49 = vld [vmem:[%s19096_s3 + $0x9e0] sm:$0xf0] }
  0xa5   :  { %3427 = vmatmul.bf16.vlgmr.msrb.gmra.mxu2 %v13472_v31  ;;  %v204_v43 = vpop.f32.mrf.mxu2  ;;  %v12180_v51 = vld [vmem:[%s19096_s3 + $0xbc4] sm:$0xf]  ;;  %v9204_v62 = vor.u32 %v12116_v46, %v9201_v49 }
  0xa6   :  { %3450 = vmatpush.bf16.msra.mxu0 %v8020_v23  ;;  %3463 = vmatpush.bf16.msra.mxu1 %v8276_v25  ;;  %v217_v48 = vpop.f32.mrf.mxu3  ;;  %v9457_v52 = vld [vmem:[%s19096_s3 + $0xbe0] sm:$0xf0] }
  0xa7   :  { %3440 = vmatmul.bf16.vlgmr.msrb.gmra.mxu3 %v13483_v37  ;;  %3475 = vmatpush.bf16.msra.mxu2 %v8564_v30  ;;  %v11940_v54 = vld [vmem:[%s19096_s3 + $0x444] sm:$0xf]  ;;  %v9460_v63 = vor.u32 %v12180_v51, %v9457_v52 }
  0xa8   :  { %3488 = vmatpush.bf16.msra.mxu3 %v8820_v32  ;;  %v8497_v56 = vld [vmem:[%s19096_s3 + $0x460] sm:$0xf0] }
  0xa9   :  { %v12004_v59 = vld [vmem:[%s19096_s3 + $0x644] sm:$0xf]  ;;  %v8500_v33 = vor.u32 %v11940_v54, %v8497_v56 }
  0xaa   :  { %3451 = vmatpush.bf16.msra.mxu0 %v7988_v38  ;;  %3464 = vmatpush.bf16.msra.mxu1 %v8244_v39  ;;  %v8753_v61 = vld [vmem:[%s19096_s3 + $0x660] sm:$0xf0] }
  0xab   :  { %v12108_v0 = vld [vmem:[%s19096_s3 + $0x984] sm:$0xf]  ;;  %3476 = vmatpush.bf16.msra.mxu2 %v8532_v47  ;;  %v8756_v5 = vor.u32 %v12004_v59, %v8753_v61 }
  0xac   :  { %v9169_v1 = vld [vmem:[%s19096_s3 + $0x9a0] sm:$0xf0]  ;;  %3489 = vmatpush.bf16.msra.mxu3 %v8788_v53 }
  0xad   :  { %v12172_v3 = vld [vmem:[%s19096_s3 + $0xb84] sm:$0xf]  ;;  %v9172_v13 = vor.u32 %v12108_v0, %v9169_v1 }
  0xae   :  { %v9425_v4 = vld [vmem:[%s19096_s3 + $0xba0] sm:$0xf0]  ;;  %3452 = vmatpush.bf16.msra.mxu0 %v7956_v57  ;;  %3465 = vmatpush.bf16.msra.mxu1 %v8212_v58 }
  0xaf   :  { %v11932_v6 = vld [vmem:[%s19096_s3 + $0x404] sm:$0xf]  ;;  %v9428_v14 = vor.u32 %v12172_v3, %v9425_v4  ;;  %3477 = vmatpush.bf16.msra.mxu2 %v8500_v33 }
  0xb0   :  { %v8465_v7 = vld [vmem:[%s19096_s3 + $0x420] sm:$0xf0]  ;;  %3490 = vmatpush.bf16.msra.mxu3 %v8756_v5 }
  0xb1   :  { %v11996_v8 = vld [vmem:[%s19096_s3 + $0x604] sm:$0xf]  ;;  %v8468_v19 = vor.u32 %v11932_v6, %v8465_v7  ;;  %3453 = vmatmul.bf16.vlgmr.msra.gmra.mxu0 %v13318_v50  ;;  %3466 = vmatmul.bf16.vlgmr.msra.gmra.mxu1 %v13326_v55 }
  0xb2   :  { %v8721_v9 = vld [vmem:[%s19096_s3 + $0x620] sm:$0xf0]  ;;  %3497 = vmatpush.bf16.msrb.mxu0 %v9204_v62  ;;  %3510 = vmatpush.bf16.msrb.mxu1 %v9460_v63 }
  0xb3   :  { %v12244_v10 = vld [vmem:[%s19096_s3 + $0xdc4] sm:$0xf]  ;;  %v8724_v23 = vor.u32 %v11996_v8, %v8721_v9  ;;  %3478 = vmatpush.bf16.msra.mxu2 %v8468_v19 }
  0xb4   :  { %v9713_v12 = vld [vmem:[%s19096_s3 + $0xde0] sm:$0xf0] }
  0xb5   :  { %v12308_v15 = vld [vmem:[%s19096_s3 + $0xfc4] sm:$0xf]  ;;  %v9716_v25 = vor.u32 %v12244_v10, %v9713_v12  ;;  %3491 = vmatpush.bf16.msra.mxu3 %v8724_v23 }
  0xb6   :  { %v9969_v16 = vld [vmem:[%s19096_s3 + $0xfe0] sm:$0xf0]  ;;  %3498 = vmatpush.bf16.msrb.mxu0 %v9172_v13  ;;  %3511 = vmatpush.bf16.msrb.mxu1 %v9428_v14 }
  0xb7   :  { %v12100_v18 = vld [vmem:[%s19096_s3 + $0x944] sm:$0xf]  ;;  %v9972_v26 = vor.u32 %v12308_v15, %v9969_v16  ;;  %3523 = vmatpush.bf16.msrb.mxu2 %v9716_v25 }
  0xb8   :  { %v9137_v20 = vld [vmem:[%s19096_s3 + $0x960] sm:$0xf0]  ;;  %3479 = vmatmul.bf16.vlgmr.msra.gmra.mxu2 %v13362_v17  ;;  %3492 = vmatmul.bf16.vlgmr.msra.gmra.mxu3 %v13373_v24 }
  0xb9   :  { %v12164_v21 = vld [vmem:[%s19096_s3 + $0xb44] sm:$0xf]  ;;  %v9140_v29 = vor.u32 %v12100_v18, %v9137_v20  ;;  %3536 = vmatpush.bf16.msrb.mxu3 %v9972_v26 }
  0xba   :  { %v9393_v22 = vld [vmem:[%s19096_s3 + $0xb60] sm:$0xf0] }
  0xbb   :  { %v12236_v27 = vld [vmem:[%s19096_s3 + $0xd84] sm:$0xf]  ;;  %v9396_v30 = vor.u32 %v12164_v21, %v9393_v22  ;;  %3499 = vmatpush.bf16.msrb.mxu0 %v9140_v29  ;;  %v8183_v29 = vld [vmem:[%s19096_s3 + $0x1c8] sm:$0xf] }
  0xbc   :  { %v9681_v28 = vld [vmem:[%s19096_s3 + $0xda0] sm:$0xf0] }
  0xbd   :  { %v12300_v11 = vld [vmem:[%s19096_s3 + $0xf84] sm:$0xf]  ;;  %v9684_v39 = vor.u32 %v12236_v27, %v9681_v28  ;;  %3512 = vmatpush.bf16.msrb.mxu1 %v9396_v30 }
  0xbe   :  { %v9937_v32 = vld [vmem:[%s19096_s3 + $0xfa0] sm:$0xf0] }
  0xbf   :  { %v12092_v34 = vld [vmem:[%s19096_s3 + $0x904] sm:$0xf]  ;;  %v9940_v40 = vor.u32 %v12300_v11, %v9937_v32  ;;  %3524 = vmatpush.bf16.msrb.mxu2 %v9684_v39  ;;  %v11865_v11 = vld [vmem:[%s19096_s3 + $0x1e4] sm:$0xf0] }
  0xc0   :  { %v9105_v35 = vld [vmem:[%s19096_s3 + $0x920] sm:$0xf0]  ;;  %v8439_v32 = vld [vmem:[%s19096_s3 + $0x3c8] sm:$0xf] }
  0xc1   :  { %v12156_v36 = vld [vmem:[%s19096_s3 + $0xb04] sm:$0xf]  ;;  %v9108_v43 = vor.u32 %v12092_v34, %v9105_v35  ;;  %3537 = vmatpush.bf16.msrb.mxu3 %v9940_v40  ;;  %v11929_v34 = vld [vmem:[%s19096_s3 + $0x3e4] sm:$0xf0] }
  0xc2   :  { %v9361_v38 = vld [vmem:[%s19096_s3 + $0xb20] sm:$0xf0] }
  0xc3   :  { %v12228_v41 = vld [vmem:[%s19096_s3 + $0xd44] sm:$0xf]  ;;  %v9364_v44 = vor.u32 %v12156_v36, %v9361_v38  ;;  %3500 = vmatpush.bf16.msrb.mxu0 %v9108_v43  ;;  %v8184_v43 = vor.u32 %v11865_v11, %v8183_v29  ;;  %v8055_v29 = vld [vmem:[%s19096_s3 + $0xc8] sm:$0xf] }
  0xc4   :  { %v9649_v42 = vld [vmem:[%s19096_s3 + $0xd60] sm:$0xf0] }
  0xc5   :  { %v12292_v45 = vld [vmem:[%s19096_s3 + $0xf44] sm:$0xf]  ;;  %v9652_v52 = vor.u32 %v12228_v41, %v9649_v42  ;;  %3513 = vmatpush.bf16.msrb.mxu1 %v9364_v44  ;;  %v8440_v44 = vor.u32 %v11929_v34, %v8439_v32  ;;  %v8311_v32 = vld [vmem:[%s19096_s3 + $0x2c8] sm:$0xf] }
  0xc6   :  { %v9905_v46 = vld [vmem:[%s19096_s3 + $0xf60] sm:$0xf0]  ;;  %v11897_v34 = vld [vmem:[%s19096_s3 + $0x2e4] sm:$0xf0] }
  0xc7   :  { %v12084_v47 = vld [vmem:[%s19096_s3 + $0x8c4] sm:$0xf]  ;;  %v9908_v53 = vor.u32 %v12292_v45, %v9905_v46  ;;  %3525 = vmatpush.bf16.msrb.mxu2 %v9652_v52  ;;  %v8151_v45 = vld [vmem:[%s19096_s3 + $0x188] sm:$0xf] }
  0xc8   :  { %v9073_v48 = vld [vmem:[%s19096_s3 + $0x8e0] sm:$0xf0] }
  0xc9   :  { %v12148_v49 = vld [vmem:[%s19096_s3 + $0xac4] sm:$0xf]  ;;  %v9076_v57 = vor.u32 %v12084_v47, %v9073_v48  ;;  %3538 = vmatpush.bf16.msrb.mxu3 %v9908_v53  ;;  %v11857_v47 = vld [vmem:[%s19096_s3 + $0x1a4] sm:$0xf0] }
  0xca   :  { %v9329_v51 = vld [vmem:[%s19096_s3 + $0xae0] sm:$0xf0]  ;;  %v8407_v48 = vld [vmem:[%s19096_s3 + $0x388] sm:$0xf] }
  0xcb   :  { %v12220_v54 = vld [vmem:[%s19096_s3 + $0xd04] sm:$0xf]  ;;  %v9332_v58 = vor.u32 %v12148_v49, %v9329_v51  ;;  %3501 = vmatpush.bf16.msrb.mxu0 %v9076_v57  ;;  %v11921_v49 = vld [vmem:[%s19096_s3 + $0x3a4] sm:$0xf0] }
  0xcc   :  { %v9617_v56 = vld [vmem:[%s19096_s3 + $0xd20] sm:$0xf0]  ;;  %v8695_v57 = vld [vmem:[%s19096_s3 + $0x5c8] sm:$0xf] }
  0xcd   :  { %v12284_v59 = vld [vmem:[%s19096_s3 + $0xf04] sm:$0xf]  ;;  %v9620_v1 = vor.u32 %v12220_v54, %v9617_v56  ;;  %3514 = vmatpush.bf16.msrb.mxu1 %v9332_v58  ;;  %v11993_v58 = vld [vmem:[%s19096_s3 + $0x5e4] sm:$0xf0] }
  0xce   :  { %v9873_v61 = vld [vmem:[%s19096_s3 + $0xf20] sm:$0xf0] }
  0xcf   :  { %v12076_v62 = vld [vmem:[%s19096_s3 + $0x884] sm:$0xf]  ;;  %v9876_v3 = vor.u32 %v12284_v59, %v9873_v61  ;;  %3526 = vmatpush.bf16.msrb.mxu2 %v9620_v1  ;;  %v8152_v59 = vor.u32 %v11857_v47, %v8151_v45  ;;  %v8408_v61 = vor.u32 %v11921_v49, %v8407_v48  ;;  %v11849_v1 = vld [vmem:[%s19096_s3 + $0x164] sm:$0xf0] }
  0xd0   :  { %v9041_v63 = vld [vmem:[%s19096_s3 + $0x8a0] sm:$0xf0]  ;;  %v11889_v47 = vld [vmem:[%s19096_s3 + $0x2a4] sm:$0xf0] }
  0xd1   :  { %v12140_v0 = vld [vmem:[%s19096_s3 + $0xa84] sm:$0xf]  ;;  %v9044_v6 = vor.u32 %v12076_v62, %v9041_v63  ;;  %3539 = vmatpush.bf16.msrb.mxu3 %v9876_v3  ;;  %v8951_v62 = vld [vmem:[%s19096_s3 + $0x7c8] sm:$0xf] }
  0xd2   :  { %v9297_v33 = vld [vmem:[%s19096_s3 + $0xaa0] sm:$0xf0]  ;;  %v12057_v63 = vld [vmem:[%s19096_s3 + $0x7e4] sm:$0xf0] }
  0xd3   :  { %v12212_v4 = vld [vmem:[%s19096_s3 + $0xcc4] sm:$0xf]  ;;  %v9300_v7 = vor.u32 %v12140_v0, %v9297_v33  ;;  %3502 = vmatpush.bf16.msrb.mxu0 %v9044_v6  ;;  %v8119_v33 = vld [vmem:[%s19096_s3 + $0x148] sm:$0xf] }
  0xd4   :  { %v9585_v5 = vld [vmem:[%s19096_s3 + $0xce0] sm:$0xf0]  ;;  %v11913_v6 = vld [vmem:[%s19096_s3 + $0x364] sm:$0xf0] }
  0xd5   :  { %v12276_v8 = vld [vmem:[%s19096_s3 + $0xec4] sm:$0xf]  ;;  %v9588_v15 = vor.u32 %v12212_v4, %v9585_v5  ;;  %3515 = vmatpush.bf16.msrb.mxu1 %v9300_v7  ;;  %v8696_v4 = vor.u32 %v11993_v58, %v8695_v57  ;;  %v8375_v5 = vld [vmem:[%s19096_s3 + $0x348] sm:$0xf]  ;;  %v8952_v7 = vor.u32 %v12057_v63, %v8951_v62 }
  0xd6   :  { %v9841_v9 = vld [vmem:[%s19096_s3 + $0xee0] sm:$0xf0]  ;;  %v8567_v49 = vld [vmem:[%s19096_s3 + $0x4c8] sm:$0xf] }
  0xd7   :  { %v12068_v10 = vld [vmem:[%s19096_s3 + $0x844] sm:$0xf]  ;;  %v9844_v16 = vor.u32 %v12276_v8, %v9841_v9  ;;  %3527 = vmatpush.bf16.msrb.mxu2 %v9588_v15  ;;  %v8663_v8 = vld [vmem:[%s19096_s3 + $0x588] sm:$0xf] }
  0xd8   :  { %v9009_v12 = vld [vmem:[%s19096_s3 + $0x860] sm:$0xf0]  ;;  %v11985_v9 = vld [vmem:[%s19096_s3 + $0x5a4] sm:$0xf0] }
  0xd9   :  { %v12132_v13 = vld [vmem:[%s19096_s3 + $0xa44] sm:$0xf]  ;;  %v9012_v21 = vor.u32 %v12068_v10, %v9009_v12  ;;  %3540 = vmatpush.bf16.msrb.mxu3 %v9844_v16  ;;  %v8120_v10 = vor.u32 %v11849_v1, %v8119_v33  ;;  %v8919_v12 = vld [vmem:[%s19096_s3 + $0x788] sm:$0xf] }
  0xda   :  { %v9265_v14 = vld [vmem:[%s19096_s3 + $0xa60] sm:$0xf0]  ;;  %v8087_v15 = vld [vmem:[%s19096_s3 + $0x108] sm:$0xf] }
  0xdb   :  { %v12204_v18 = vld [vmem:[%s19096_s3 + $0xc84] sm:$0xf]  ;;  %v9268_v22 = vor.u32 %v12132_v13, %v9265_v14  ;;  %3503 = vmatpush.bf16.msrb.mxu0 %v9012_v21  ;;  %v12049_v13 = vld [vmem:[%s19096_s3 + $0x7a4] sm:$0xf0]  ;;  %v8376_v14 = vor.u32 %v11913_v6, %v8375_v5 }
  0xdc   :  { %v9553_v19 = vld [vmem:[%s19096_s3 + $0xca0] sm:$0xf0]  ;;  %v11841_v16 = vld [vmem:[%s19096_s3 + $0x124] sm:$0xf0]  ;;  %v8920_v21 = vor.u32 %v12049_v13, %v8919_v12 }
  0xdd   :  { %v12268_v20 = vld [vmem:[%s19096_s3 + $0xe84] sm:$0xf]  ;;  %v9556_v30 = vor.u32 %v12204_v18, %v9553_v19  ;;  %3516 = vmatpush.bf16.msrb.mxu1 %v9268_v22  ;;  %v8664_v18 = vor.u32 %v11985_v9, %v8663_v8  ;;  %v8343_v19 = vld [vmem:[%s19096_s3 + $0x308] sm:$0xf] }
  0xde   :  { %v9809_v23 = vld [vmem:[%s19096_s3 + $0xea0] sm:$0xf0]  ;;  %v8631_v22 = vld [vmem:[%s19096_s3 + $0x548] sm:$0xf] }
  0xdf   :  { %v12060_v25 = vld [vmem:[%s19096_s3 + $0x804] sm:$0xf]  ;;  %v9812_v35 = vor.u32 %v12268_v20, %v9809_v23  ;;  %3528 = vmatpush.bf16.msrb.mxu2 %v9556_v30  ;;  %v11905_v20 = vld [vmem:[%s19096_s3 + $0x324] sm:$0xf0] }
  0xe0   :  { %v8977_v26 = vld [vmem:[%s19096_s3 + $0x820] sm:$0xf0]  ;;  %v11977_v23 = vld [vmem:[%s19096_s3 + $0x564] sm:$0xf0] }
  0xe1   :  { %v12124_v27 = vld [vmem:[%s19096_s3 + $0xa04] sm:$0xf]  ;;  %v8980_v39 = vor.u32 %v12060_v25, %v8977_v26  ;;  %3541 = vmatpush.bf16.msrb.mxu3 %v9812_v35  ;;  %v8088_v25 = vor.u32 %v11841_v16, %v8087_v15  ;;  %v8887_v26 = vld [vmem:[%s19096_s3 + $0x748] sm:$0xf]  ;;  %v8632_v11 = vor.u32 %v11977_v23, %v8631_v22 }
  0xe2   :  { %v9233_v28 = vld [vmem:[%s19096_s3 + $0xa20] sm:$0xf0]  ;;  %v11833_v30 = vld [vmem:[%s19096_s3 + $0xe4] sm:$0xf0] }
  0xe3   :  { %v12196_v36 = vld [vmem:[%s19096_s3 + $0xc44] sm:$0xf]  ;;  %v9236_v40 = vor.u32 %v12124_v27, %v9233_v28  ;;  %3504 = vmatpush.bf16.msrb.mxu0 %v8980_v39  ;;  %v12041_v27 = vld [vmem:[%s19096_s3 + $0x764] sm:$0xf0]  ;;  %v8344_v28 = vor.u32 %v11905_v20, %v8343_v19  ;;  %v8056_v39 = vor.u32 %v11833_v30, %v8055_v29 }
  0xe4   :  { %v9521_v38 = vld [vmem:[%s19096_s3 + $0xc60] sm:$0xf0]  ;;  %v8888_v35 = vor.u32 %v12041_v27, %v8887_v26  ;;  %v7991_v57 = vld [vmem:[%s19096_s3 + $0x48] sm:$0xf] }
  0xe5   :  { %v12260_v41 = vld [vmem:[%s19096_s3 + $0xe44] sm:$0xf]  ;;  %v9524_v46 = vor.u32 %v12196_v36, %v9521_v38  ;;  %3517 = vmatpush.bf16.msrb.mxu1 %v9236_v40  ;;  %v8599_v36 = vld [vmem:[%s19096_s3 + $0x508] sm:$0xf] }
  0xe6   :  { %v9777_v42 = vld [vmem:[%s19096_s3 + $0xe60] sm:$0xf0]  ;;  %3505 = vmatmul.bf16.vlgmr.msrb.gmra.mxu0 %v13424_v60  ;;  %v11969_v38 = vld [vmem:[%s19096_s3 + $0x524] sm:$0xf0] }
  0xe7   :  { %v9780_v51 = vor.u32 %v12260_v41, %v9777_v42  ;;  %v12188_v52 = vld [vmem:[%s19096_s3 + $0xc04] sm:$0xf]  ;;  %3549 = vmatpush.bf16.msra.mxu0 %v8184_v43  ;;  %3529 = vmatpush.bf16.msrb.mxu2 %v9524_v46  ;;  %v8855_v40 = vld [vmem:[%s19096_s3 + $0x708] sm:$0xf]  ;;  %v8312_v42 = vor.u32 %v11897_v34, %v8311_v32  ;;  %v8600_v45 = vor.u32 %v11969_v38, %v8599_v36 }
  0xe8   :  { %v9489_v53 = vld [vmem:[%s19096_s3 + $0xc20] sm:$0xf0]  ;;  %3518 = vmatmul.bf16.vlgmr.msrb.gmra.mxu1 %v13435_v2  ;;  %v12033_v41 = vld [vmem:[%s19096_s3 + $0x724] sm:$0xf0] }
  0xe9   :  { %v12252_v54 = vld [vmem:[%s19096_s3 + $0xe04] sm:$0xf]  ;;  %3562 = vmatpush.bf16.msra.mxu1 %v8440_v44  ;;  %v9492_v0 = vor.u32 %v12188_v52, %v9489_v53  ;;  %3542 = vmatpush.bf16.msrb.mxu3 %v9780_v51  ;;  %v8023_v43 = vld [vmem:[%s19096_s3 + $0x88] sm:$0xf]  ;;  %v8856_v48 = vor.u32 %v12033_v41, %v8855_v40 }
  0xea   :  { %v9745_v56 = vld [vmem:[%s19096_s3 + $0xe20] sm:$0xf0]  ;;  %v11825_v44 = vld [vmem:[%s19096_s3 + $0xa4] sm:$0xf0] }
  0xeb   :  { %v9748_v3 = vor.u32 %v12252_v54, %v9745_v56  ;;  %3550 = vmatpush.bf16.msra.mxu0 %v8152_v59  ;;  %3530 = vmatpush.bf16.msrb.mxu2 %v9492_v0  ;;  %v8279_v46 = vld [vmem:[%s19096_s3 + $0x288] sm:$0xf]  ;;  %v8024_v52 = vor.u32 %v11825_v44, %v8023_v43 }
  0xec   :  { %v11961_v51 = vld [vmem:[%s19096_s3 + $0x4e4] sm:$0xf0]  ;;  %v8280_v56 = vor.u32 %v11889_v47, %v8279_v46 }
  0xed   :  { %3563 = vmatpush.bf16.msra.mxu1 %v8408_v61  ;;  %3543 = vmatpush.bf16.msrb.mxu3 %v9748_v3  ;;  %v8823_v53 = vld [vmem:[%s19096_s3 + $0x6c8] sm:$0xf]  ;;  %v8568_v59 = vor.u32 %v11961_v51, %v8567_v49 }
  0xee   :  { %3531 = vmatmul.bf16.vlgmr.msrb.gmra.mxu2 %v13472_v31  ;;  %v12025_v54 = vld [vmem:[%s19096_s3 + $0x6e4] sm:$0xf0] }
  0xef   :  { %3575 = vmatpush.bf16.msra.mxu2 %v8696_v4  ;;  %3551 = vmatpush.bf16.msra.mxu0 %v8120_v10  ;;  %v11817_v58 = vld [vmem:[%s19096_s3 + $0x64] sm:$0xf0]  ;;  %v8824_v63 = vor.u32 %v12025_v54, %v8823_v53 }
  0xf0   :  { %3544 = vmatmul.bf16.vlgmr.msrb.gmra.mxu3 %v13483_v37  ;;  %v8247_v61 = vld [vmem:[%s19096_s3 + $0x248] sm:$0xf]  ;;  %v7992_v1 = vor.u32 %v11817_v58, %v7991_v57 }
  0xf1   :  { %3588 = vmatpush.bf16.msra.mxu3 %v8952_v7  ;;  %3564 = vmatpush.bf16.msra.mxu1 %v8376_v14  ;;  %v11881_v62 = vld [vmem:[%s19096_s3 + $0x264] sm:$0xf0] }
  0xf2   :  { %v8535_v0 = vld [vmem:[%s19096_s3 + $0x488] sm:$0xf]  ;;  %v8248_v6 = vor.u32 %v11881_v62, %v8247_v61 }
  0xf3   :  { %3576 = vmatpush.bf16.msra.mxu2 %v8664_v18  ;;  %3552 = vmatpush.bf16.msra.mxu0 %v8088_v25  ;;  %v11953_v33 = vld [vmem:[%s19096_s3 + $0x4a4] sm:$0xf0] }
  0xf4   :  { %v8791_v3 = vld [vmem:[%s19096_s3 + $0x688] sm:$0xf]  ;;  %v8536_v10 = vor.u32 %v11953_v33, %v8535_v0 }
  0xf5   :  { %3589 = vmatpush.bf16.msra.mxu3 %v8920_v21  ;;  %3565 = vmatpush.bf16.msra.mxu1 %v8344_v28  ;;  %v12017_v4 = vld [vmem:[%s19096_s3 + $0x6a4] sm:$0xf0] }
  0xf6   :  { %v7959_v5 = vld [vmem:[%s19096_s3 + $0x8] sm:$0xf]  ;;  %v8792_v15 = vor.u32 %v12017_v4, %v8791_v3 }
  0xf7   :  { %3577 = vmatpush.bf16.msra.mxu2 %v8632_v11  ;;  %3553 = vmatpush.bf16.msra.mxu0 %v8056_v39  ;;  %v11809_v7 = vld [vmem:[%s19096_s3 + $0x24] sm:$0xf0] }
  0xf8   :  { %v8215_v8 = vld [vmem:[%s19096_s3 + $0x208] sm:$0xf]  ;;  %v7960_v20 = vor.u32 %v11809_v7, %v7959_v5 }
  0xf9   :  { %3590 = vmatpush.bf16.msra.mxu3 %v8888_v35  ;;  %3566 = vmatpush.bf16.msra.mxu1 %v8312_v42  ;;  %v11873_v9 = vld [vmem:[%s19096_s3 + $0x224] sm:$0xf0] }
  0xfa   :  { %v9207_v12 = vld [vmem:[%s19096_s3 + $0x9c8] sm:$0xf]  ;;  %v8216_v23 = vor.u32 %v11873_v9, %v8215_v8 }
  0xfb   :  { %3578 = vmatpush.bf16.msra.mxu2 %v8600_v45  ;;  %3554 = vmatpush.bf16.msra.mxu0 %v8024_v52  ;;  %v12121_v13 = vld [vmem:[%s19096_s3 + $0x9e4] sm:$0xf0] }
  0xfc   :  { %v9463_v14 = vld [vmem:[%s19096_s3 + $0xbc8] sm:$0xf]  ;;  %v9208_v25 = vor.u32 %v12121_v13, %v9207_v12 }
  0xfd   :  { %3591 = vmatpush.bf16.msra.mxu3 %v8856_v48  ;;  %3567 = vmatpush.bf16.msra.mxu1 %v8280_v56  ;;  %v12185_v16 = vld [vmem:[%s19096_s3 + $0xbe4] sm:$0xf0] }
  0xfe   :  { %v8503_v18 = vld [vmem:[%s19096_s3 + $0x448] sm:$0xf]  ;;  %v9464_v27 = vor.u32 %v12185_v16, %v9463_v14 }
  0xff   :  { %3579 = vmatpush.bf16.msra.mxu2 %v8568_v59  ;;  %v11945_v19 = vld [vmem:[%s19096_s3 + $0x464] sm:$0xf0]  ;;  %3555 = vmatpush.bf16.msra.mxu0 %v7992_v1 }
 0x100   :  { %v8759_v21 = vld [vmem:[%s19096_s3 + $0x648] sm:$0xf]  ;;  %v8504_v28 = vor.u32 %v11945_v19, %v8503_v18 }
 0x101   :  { %3592 = vmatpush.bf16.msra.mxu3 %v8824_v63  ;;  %v12009_v22 = vld [vmem:[%s19096_s3 + $0x664] sm:$0xf0]  ;;  %3568 = vmatpush.bf16.msra.mxu1 %v8248_v6 }
 0x102   :  { %v9175_v26 = vld [vmem:[%s19096_s3 + $0x988] sm:$0xf]  ;;  %v8760_v32 = vor.u32 %v12009_v22, %v8759_v21 }
 0x103   :  { %3580 = vmatpush.bf16.msra.mxu2 %v8536_v10  ;;  %v12113_v29 = vld [vmem:[%s19096_s3 + $0x9a4] sm:$0xf0]  ;;  %3556 = vmatpush.bf16.msra.mxu0 %v7960_v20 }
 0x104   :  { %v9431_v30 = vld [vmem:[%s19096_s3 + $0xb88] sm:$0xf]  ;;  %v9176_v41 = vor.u32 %v12113_v29, %v9175_v26 }
 0x105   :  { %v12177_v11 = vld [vmem:[%s19096_s3 + $0xba4] sm:$0xf0]  ;;  %3593 = vmatpush.bf16.msra.mxu3 %v8792_v15  ;;  %3569 = vmatpush.bf16.msra.mxu1 %v8216_v23 }
 0x106   :  { %v8471_v34 = vld [vmem:[%s19096_s3 + $0x408] sm:$0xf]  ;;  %v9432_v44 = vor.u32 %v12177_v11, %v9431_v30  ;;  %3557 = vmatmul.bf16.vlgmr.msra.gmra.mxu0 %v13318_v50 }
 0x107   :  { %v11937_v35 = vld [vmem:[%s19096_s3 + $0x424] sm:$0xf0]  ;;  %3601 = vmatpush.bf16.msrb.mxu0 %v9208_v25  ;;  %3581 = vmatpush.bf16.msra.mxu2 %v8504_v28 }
 0x108   :  { %v8727_v36 = vld [vmem:[%s19096_s3 + $0x608] sm:$0xf]  ;;  %v8472_v45 = vor.u32 %v11937_v35, %v8471_v34  ;;  %3570 = vmatmul.bf16.vlgmr.msra.gmra.mxu1 %v13326_v55 }
 0x109   :  { %v12001_v38 = vld [vmem:[%s19096_s3 + $0x624] sm:$0xf0]  ;;  %3614 = vmatpush.bf16.msrb.mxu1 %v9464_v27  ;;  %3594 = vmatpush.bf16.msra.mxu3 %v8760_v32 }
 0x10a   :  { %v9719_v39 = vld [vmem:[%s19096_s3 + $0xdc8] sm:$0xf]  ;;  %v8728_v48 = vor.u32 %v12001_v38, %v8727_v36 }
 0x10b   :  { %v12249_v40 = vld [vmem:[%s19096_s3 + $0xde4] sm:$0xf0]  ;;  %3602 = vmatpush.bf16.msrb.mxu0 %v9176_v41  ;;  %3582 = vmatpush.bf16.msra.mxu2 %v8472_v45 }
 0x10c   :  { %v9975_v42 = vld [vmem:[%s19096_s3 + $0xfc8] sm:$0xf]  ;;  %v9720_v49 = vor.u32 %v12249_v40, %v9719_v39 }
 0x10d   :  { %v12313_v43 = vld [vmem:[%s19096_s3 + $0xfe4] sm:$0xf0]  ;;  %3615 = vmatpush.bf16.msrb.mxu1 %v9432_v44  ;;  %3595 = vmatpush.bf16.msra.mxu3 %v8728_v48 }
 0x10e   :  { %v9143_v46 = vld [vmem:[%s19096_s3 + $0x948] sm:$0xf]  ;;  %v9976_v53 = vor.u32 %v12313_v43, %v9975_v42  ;;  %3583 = vmatmul.bf16.vlgmr.msra.gmra.mxu2 %v13362_v17 }
 0x10f   :  { %v12105_v47 = vld [vmem:[%s19096_s3 + $0x964] sm:$0xf0]  ;;  %3627 = vmatpush.bf16.msrb.mxu2 %v9720_v49 }
 0x110   :  { %v9399_v51 = vld [vmem:[%s19096_s3 + $0xb48] sm:$0xf]  ;;  %v9144_v57 = vor.u32 %v12105_v47, %v9143_v46  ;;  %3596 = vmatmul.bf16.vlgmr.msra.gmra.mxu3 %v13373_v24 }
 0x111   :  { %v12169_v52 = vld [vmem:[%s19096_s3 + $0xb64] sm:$0xf0]  ;;  %3640 = vmatpush.bf16.msrb.mxu3 %v9976_v53 }
 0x112   :  { %v9687_v54 = vld [vmem:[%s19096_s3 + $0xd88] sm:$0xf]  ;;  %v9400_v61 = vor.u32 %v12169_v52, %v9399_v51  ;;  %3603 = vmatpush.bf16.msrb.mxu0 %v9144_v57 }
 0x113   :  { %v12241_v56 = vld [vmem:[%s19096_s3 + $0xda4] sm:$0xf0] }
 0x114   :  { %v9943_v58 = vld [vmem:[%s19096_s3 + $0xf88] sm:$0xf]  ;;  %v9688_v0 = vor.u32 %v12241_v56, %v9687_v54  ;;  %3616 = vmatpush.bf16.msrb.mxu1 %v9400_v61  ;;  %v11925_v61 = vld [vmem:[%s19096_s3 + $0x3cc] sm:$0xf] }
 0x115   :  { %v12305_v59 = vld [vmem:[%s19096_s3 + $0xfa4] sm:$0xf0] }
 0x116   :  { %v9111_v62 = vld [vmem:[%s19096_s3 + $0x908] sm:$0xf]  ;;  %v9944_v3 = vor.u32 %v12305_v59, %v9943_v58  ;;  %3628 = vmatpush.bf16.msrb.mxu2 %v9688_v0  ;;  %v11861_v58 = vld [vmem:[%s19096_s3 + $0x1cc] sm:$0xf] }
 0x117   :  { %v12097_v63 = vld [vmem:[%s19096_s3 + $0x924] sm:$0xf0]  ;;  %v8185_v59 = vld [vmem:[%s19096_s3 + $0x1e8] sm:$0xf0] }
 0x118   :  { %v9367_v33 = vld [vmem:[%s19096_s3 + $0xb08] sm:$0xf]  ;;  %v9112_v6 = vor.u32 %v12097_v63, %v9111_v62  ;;  %3641 = vmatpush.bf16.msrb.mxu3 %v9944_v3  ;;  %v8441_v63 = vld [vmem:[%s19096_s3 + $0x3e8] sm:$0xf0] }
 0x119   :  { %v12161_v1 = vld [vmem:[%s19096_s3 + $0xb24] sm:$0xf0] }
 0x11a   :  { %v9655_v4 = vld [vmem:[%s19096_s3 + $0xd48] sm:$0xf]  ;;  %v9368_v9 = vor.u32 %v12161_v1, %v9367_v33  ;;  %3604 = vmatpush.bf16.msrb.mxu0 %v9112_v6  ;;  %v8188_v6 = vor.u32 %v11861_v58, %v8185_v59  ;;  %v12037_v59 = vld [vmem:[%s19096_s3 + $0x74c] sm:$0xf] }
 0x11b   :  { %v12233_v5 = vld [vmem:[%s19096_s3 + $0xd64] sm:$0xf0] }
 0x11c   :  { %v9911_v7 = vld [vmem:[%s19096_s3 + $0xf48] sm:$0xf]  ;;  %v9656_v13 = vor.u32 %v12233_v5, %v9655_v4  ;;  %3617 = vmatpush.bf16.msrb.mxu1 %v9368_v9 }
 0x11d   :  { %v12297_v8 = vld [vmem:[%s19096_s3 + $0xf64] sm:$0xf0] }
 0x11e   :  { %v9079_v10 = vld [vmem:[%s19096_s3 + $0x8c8] sm:$0xf]  ;;  %v9912_v16 = vor.u32 %v12297_v8, %v9911_v7  ;;  %3629 = vmatpush.bf16.msrb.mxu2 %v9656_v13  ;;  %v11853_v7 = vld [vmem:[%s19096_s3 + $0x18c] sm:$0xf]  ;;  %v8444_v8 = vor.u32 %v11925_v61, %v8441_v63 }
 0x11f   :  { %v12089_v12 = vld [vmem:[%s19096_s3 + $0x8e4] sm:$0xf0]  ;;  %v8409_v13 = vld [vmem:[%s19096_s3 + $0x3a8] sm:$0xf0] }
 0x120   :  { %v9335_v14 = vld [vmem:[%s19096_s3 + $0xac8] sm:$0xf]  ;;  %v9080_v20 = vor.u32 %v12089_v12, %v9079_v10  ;;  %3642 = vmatpush.bf16.msrb.mxu3 %v9912_v16  ;;  %v8153_v10 = vld [vmem:[%s19096_s3 + $0x1a8] sm:$0xf0] }
 0x121   :  { %v12153_v15 = vld [vmem:[%s19096_s3 + $0xae4] sm:$0xf0]  ;;  %v11917_v12 = vld [vmem:[%s19096_s3 + $0x38c] sm:$0xf] }
 0x122   :  { %v9623_v18 = vld [vmem:[%s19096_s3 + $0xd08] sm:$0xf]  ;;  %v9336_v23 = vor.u32 %v12153_v15, %v9335_v14  ;;  %3605 = vmatpush.bf16.msrb.mxu0 %v9080_v20  ;;  %v11989_v20 = vld [vmem:[%s19096_s3 + $0x5cc] sm:$0xf] }
 0x123   :  { %v12225_v19 = vld [vmem:[%s19096_s3 + $0xd24] sm:$0xf0]  ;;  %v8889_v61 = vld [vmem:[%s19096_s3 + $0x768] sm:$0xf0] }
 0x124   :  { %v9879_v21 = vld [vmem:[%s19096_s3 + $0xf08] sm:$0xf]  ;;  %v9624_v27 = vor.u32 %v12225_v19, %v9623_v18  ;;  %3618 = vmatpush.bf16.msrb.mxu1 %v9336_v23  ;;  %v12053_v23 = vld [vmem:[%s19096_s3 + $0x7cc] sm:$0xf] }
 0x125   :  { %v12289_v22 = vld [vmem:[%s19096_s3 + $0xf24] sm:$0xf0]  ;;  %v11829_v63 = vld [vmem:[%s19096_s3 + $0xcc] sm:$0xf] }
 0x126   :  { %v9047_v25 = vld [vmem:[%s19096_s3 + $0x888] sm:$0xf]  ;;  %v9880_v30 = vor.u32 %v12289_v22, %v9879_v21  ;;  %3630 = vmatpush.bf16.msrb.mxu2 %v9624_v27  ;;  %v8697_v21 = vld [vmem:[%s19096_s3 + $0x5e8] sm:$0xf0]  ;;  %v8156_v22 = vor.u32 %v11853_v7, %v8153_v10 }
 0x127   :  { %v12081_v26 = vld [vmem:[%s19096_s3 + $0x8a4] sm:$0xf0]  ;;  %v8601_v7 = vld [vmem:[%s19096_s3 + $0x528] sm:$0xf0] }
 0x128   :  { %v9303_v28 = vld [vmem:[%s19096_s3 + $0xa88] sm:$0xf]  ;;  %v9048_v34 = vor.u32 %v12081_v26, %v9047_v25  ;;  %3643 = vmatpush.bf16.msrb.mxu3 %v9880_v30  ;;  %v8953_v25 = vld [vmem:[%s19096_s3 + $0x7e8] sm:$0xf0]  ;;  %v8412_v26 = vor.u32 %v11917_v12, %v8409_v13  ;;  %v14159_v30 = vld [vmem:[%s19098_s4] sm:$0xff] }
 0x129   :  { %v12145_v29 = vld [vmem:[%s19096_s3 + $0xaa4] sm:$0xf0]  ;;  %v8857_v10 = vld [vmem:[%s19096_s3 + $0x728] sm:$0xf0] }
 0x12a   :  { %v9591_v11 = vld [vmem:[%s19096_s3 + $0xcc8] sm:$0xf]  ;;  %v9304_v38 = vor.u32 %v12145_v29, %v9303_v28  ;;  %3606 = vmatpush.bf16.msrb.mxu0 %v9048_v34  ;;  %v11845_v28 = vld [vmem:[%s19096_s3 + $0x14c] sm:$0xf] }
 0x12b   :  { %v12217_v32 = vld [vmem:[%s19096_s3 + $0xce4] sm:$0xf0]  ;;  %v8121_v29 = vld [vmem:[%s19096_s3 + $0x168] sm:$0xf0] }
 0x12c   :  { %v9847_v35 = vld [vmem:[%s19096_s3 + $0xec8] sm:$0xf]  ;;  %v9592_v41 = vor.u32 %v12217_v32, %v9591_v11  ;;  %3619 = vmatpush.bf16.msrb.mxu1 %v9304_v38  ;;  %v8700_v32 = vor.u32 %v11989_v20, %v8697_v21  ;;  %v11909_v34 = vld [vmem:[%s19096_s3 + $0x34c] sm:$0xf] }
 0x12d   :  { %v12281_v36 = vld [vmem:[%s19096_s3 + $0xee4] sm:$0xf0]  ;;  %v11981_v38 = vld [vmem:[%s19096_s3 + $0x58c] sm:$0xf] }
 0x12e   :  { %v9015_v39 = vld [vmem:[%s19096_s3 + $0x848] sm:$0xf]  ;;  %v9848_v44 = vor.u32 %v12281_v36, %v9847_v35  ;;  %3631 = vmatpush.bf16.msrb.mxu2 %v9592_v41  ;;  %v8377_v35 = vld [vmem:[%s19096_s3 + $0x368] sm:$0xf0]  ;;  %v8956_v36 = vor.u32 %v12053_v23, %v8953_v25  ;;  %v765_v41 = vperm.slane %v14159_v30, 0 }
 0x12f   :  { %v12073_v40 = vld [vmem:[%s19096_s3 + $0x864] sm:$0xf0]  ;;  %v11821_v13 = vld [vmem:[%s19096_s3 + $0x8c] sm:$0xf] }
 0x130   :  { %v9271_v42 = vld [vmem:[%s19096_s3 + $0xa48] sm:$0xf]  ;;  %v9016_v47 = vor.u32 %v12073_v40, %v9015_v39  ;;  %3644 = vmatpush.bf16.msrb.mxu3 %v9848_v44  ;;  %v8665_v39 = vld [vmem:[%s19096_s3 + $0x5a8] sm:$0xf0]  ;;  %v8124_v40 = vor.u32 %v11845_v28, %v8121_v29  ;;  %v8380_v44 = vor.u32 %v11909_v34, %v8377_v35 }
 0x131   :  { %v12137_v43 = vld [vmem:[%s19096_s3 + $0xa64] sm:$0xf0]  ;;  %v11957_v21 = vld [vmem:[%s19096_s3 + $0x4cc] sm:$0xf] }
 0x132   :  { %v9559_v45 = vld [vmem:[%s19096_s3 + $0xc88] sm:$0xf]  ;;  %v9272_v52 = vor.u32 %v12137_v43, %v9271_v42  ;;  %3607 = vmatpush.bf16.msrb.mxu0 %v9016_v47  ;;  %v12045_v42 = vld [vmem:[%s19096_s3 + $0x78c] sm:$0xf]  ;;  %v8668_v47 = vor.u32 %v11981_v38, %v8665_v39 }
 0x133   :  { %v12209_v46 = vld [vmem:[%s19096_s3 + $0xca4] sm:$0xf0]  ;;  %v8921_v43 = vld [vmem:[%s19096_s3 + $0x7a8] sm:$0xf0] }
 0x134   :  { %v9815_v48 = vld [vmem:[%s19096_s3 + $0xe88] sm:$0xf]  ;;  %v9560_v57 = vor.u32 %v12209_v46, %v9559_v45  ;;  %3620 = vmatpush.bf16.msrb.mxu1 %v9272_v52  ;;  %v11837_v45 = vld [vmem:[%s19096_s3 + $0x10c] sm:$0xf]  ;;  %v8924_v52 = vor.u32 %v12045_v42, %v8921_v43 }
 0x135   :  { %v12273_v49 = vld [vmem:[%s19096_s3 + $0xea4] sm:$0xf0]  ;;  %v8089_v46 = vld [vmem:[%s19096_s3 + $0x128] sm:$0xf0] }
 0x136   :  { %v8983_v51 = vld [vmem:[%s19096_s3 + $0x808] sm:$0xf]  ;;  %v9816_v62 = vor.u32 %v12273_v49, %v9815_v48  ;;  %3632 = vmatpush.bf16.msrb.mxu2 %v9560_v57  ;;  %v11901_v48 = vld [vmem:[%s19096_s3 + $0x30c] sm:$0xf]  ;;  %v3363_v57 = vpop.f32.mrf.mxu1  ;;  %v8092_v58 = vor.u32 %v11837_v45, %v8089_v46  ;;  %v3389_v46 = vpop.f32.mrf.mxu3 }
 0x137   :  { %v12065_v53 = vld [vmem:[%s19096_s3 + $0x824] sm:$0xf0]  ;;  %v8345_v49 = vld [vmem:[%s19096_s3 + $0x328] sm:$0xf0] }
 0x138   :  { %v9239_v54 = vld [vmem:[%s19096_s3 + $0xa08] sm:$0xf]  ;;  %v8984_v1 = vor.u32 %v12065_v53, %v8983_v51  ;;  %3645 = vmatpush.bf16.msrb.mxu3 %v9816_v62  ;;  %v3350_v51 = vpop.f32.mrf.mxu0  ;;  %v11973_v53 = vld [vmem:[%s19096_s3 + $0x54c] sm:$0xf]  ;;  %v8348_v62 = vor.u32 %v11901_v48, %v8345_v49 }
 0x139   :  { %v12129_v56 = vld [vmem:[%s19096_s3 + $0xa24] sm:$0xf0]  ;;  %v11813_v29 = vld [vmem:[%s19096_s3 + $0x4c] sm:$0xf] }
 0x13a   :  { %v9527_v0 = vld [vmem:[%s19096_s3 + $0xc48] sm:$0xf]  ;;  %v9240_v5 = vor.u32 %v12129_v56, %v9239_v54  ;;  %3608 = vmatpush.bf16.msrb.mxu0 %v8984_v1  ;;  %v8633_v54 = vld [vmem:[%s19096_s3 + $0x568] sm:$0xf0]  ;;  %v3351_v56 = vadd.f32 %v3350_v51, %v765_v41 }
 0x13b   :  { %v12201_v33 = vld [vmem:[%s19096_s3 + $0xc64] sm:$0xf0]  ;;  %v8636_v1 = vor.u32 %v11973_v53, %v8633_v54  ;;  %v11877_v34 = vld [vmem:[%s19096_s3 + $0x24c] sm:$0xf] }
 0x13c   :  { %v9783_v3 = vld [vmem:[%s19096_s3 + $0xe48] sm:$0xf]  ;;  %v9528_v9 = vor.u32 %v12201_v33, %v9527_v0  ;;  %3621 = vmatpush.bf16.msrb.mxu1 %v9240_v5  ;;  %v8057_v0 = vld [vmem:[%s19096_s3 + $0xe8] sm:$0xf0]  ;;  %v3364_v33 = vadd.f32 %v3363_v57, %v3351_v56  ;;  %v8892_v5 = vor.u32 %v12037_v59, %v8889_v61 }
 0x13d   :  { %v12265_v4 = vld [vmem:[%s19096_s3 + $0xe64] sm:$0xf0]  ;;  %3609 = vmatmul.bf16.vlgmr.msrb.gmra.mxu0 %v13424_v60  ;;  %v8249_v35 = vld [vmem:[%s19096_s3 + $0x268] sm:$0xf0] }
 0x13e   :  { %v9784_v14 = vor.u32 %v12265_v4, %v9783_v3  ;;  %v9495_v15 = vld [vmem:[%s19096_s3 + $0xc08] sm:$0xf]  ;;  %3653 = vmatpush.bf16.msra.mxu0 %v8188_v6  ;;  %3633 = vmatpush.bf16.msrb.mxu2 %v9528_v9  ;;  %v11893_v3 = vld [vmem:[%s19096_s3 + $0x2cc] sm:$0xf]  ;;  %v3365_v23 = vpop.f32.mrf.mxu1 }
 0x13f   :  { %v12193_v16 = vld [vmem:[%s19096_s3 + $0xc24] sm:$0xf0]  ;;  %3622 = vmatmul.bf16.vlgmr.msrb.gmra.mxu1 %v13435_v2  ;;  %v8313_v4 = vld [vmem:[%s19096_s3 + $0x2e8] sm:$0xf0] }
 0x140   :  { %v9751_v18 = vld [vmem:[%s19096_s3 + $0xe08] sm:$0xf]  ;;  %3666 = vmatpush.bf16.msra.mxu1 %v8444_v8  ;;  %v9496_v27 = vor.u32 %v12193_v16, %v9495_v15  ;;  %3646 = vmatpush.bf16.msrb.mxu3 %v9784_v14  ;;  %v11965_v6 = vld [vmem:[%s19096_s3 + $0x50c] sm:$0xf]  ;;  %v8060_v8 = vor.u32 %v11829_v63, %v8057_v0  ;;  %v8316_v12 = vor.u32 %v11893_v3, %v8313_v4 }
 0x141   :  { %v12257_v19 = vld [vmem:[%s19096_s3 + $0xe24] sm:$0xf0]  ;;  %v12029_v9 = vld [vmem:[%s19096_s3 + $0x70c] sm:$0xf]  ;;  %v8604_v15 = vor.u32 %v11965_v6, %v8601_v7 }
 0x142   :  { %v9752_v11 = vor.u32 %v12257_v19, %v9751_v18  ;;  %3654 = vmatpush.bf16.msra.mxu0 %v8156_v22  ;;  %3634 = vmatpush.bf16.msrb.mxu2 %v9496_v27  ;;  %v8025_v14 = vld [vmem:[%s19096_s3 + $0xa8] sm:$0xf0]  ;;  %v3352_v19 = vpop.f32.mrf.mxu0  ;;  %v8860_v20 = vor.u32 %v12029_v9, %v8857_v10 }
 0x143   :  { %v11885_v16 = vld [vmem:[%s19096_s3 + $0x28c] sm:$0xf]  ;;  %v8028_v25 = vor.u32 %v11821_v13, %v8025_v14 }
 0x144   :  { %3667 = vmatpush.bf16.msra.mxu1 %v8412_v26  ;;  %3647 = vmatpush.bf16.msrb.mxu3 %v9752_v11  ;;  %v8281_v18 = vld [vmem:[%s19096_s3 + $0x2a8] sm:$0xf0] }
 0x145   :  { %3635 = vmatmul.bf16.vlgmr.msrb.gmra.mxu2 %v13472_v31  ;;  %v8569_v22 = vld [vmem:[%s19096_s3 + $0x4e8] sm:$0xf0]  ;;  %v8284_v28 = vor.u32 %v11885_v16, %v8281_v18 }
 0x146   :  { %3679 = vmatpush.bf16.msra.mxu2 %v8700_v32  ;;  %3655 = vmatpush.bf16.msra.mxu0 %v8124_v40  ;;  %v12021_v26 = vld [vmem:[%s19096_s3 + $0x6cc] sm:$0xf]  ;;  %v8572_v32 = vor.u32 %v11957_v21, %v8569_v22  ;;  %v3376_v40 = vpop.f32.mrf.mxu2  ;;  %v3415_v0 = vpop.f32.mrf.mxu1 }
 0x147   :  { %3648 = vmatmul.bf16.vlgmr.msrb.gmra.mxu3 %v13483_v37  ;;  %v8825_v27 = vld [vmem:[%s19096_s3 + $0x6e8] sm:$0xf0]  ;;  %v3377_v45 = vadd.f32 %v3376_v40, %v3364_v33 }
 0x148   :  { %3692 = vmatpush.bf16.msra.mxu3 %v8956_v36  ;;  %3668 = vmatpush.bf16.msra.mxu1 %v8380_v44  ;;  %v7993_v11 = vld [vmem:[%s19096_s3 + $0x68] sm:$0xf0]  ;;  %v8828_v36 = vor.u32 %v12021_v26, %v8825_v27 }
 0x149   :  { %v11949_v38 = vld [vmem:[%s19096_s3 + $0x48c] sm:$0xf]  ;;  %v7996_v41 = vor.u32 %v11813_v29, %v7993_v11  ;;  %v3390_v57 = vadd.f32 %v3389_v46, %v3377_v45 }
 0x14a   :  { %3680 = vmatpush.bf16.msra.mxu2 %v8668_v47  ;;  %3656 = vmatpush.bf16.msra.mxu0 %v8092_v58  ;;  %v8537_v39 = vld [vmem:[%s19096_s3 + $0x4a8] sm:$0xf0]  ;;  %v8252_v47 = vor.u32 %v11877_v34, %v8249_v35  ;;  %v3402_v58 = vpop.f32.mrf.mxu0 }
 0x14b   :  { %v12013_v42 = vld [vmem:[%s19096_s3 + $0x68c] sm:$0xf]  ;;  %v3403_v4 = vadd.f32 %v3402_v58, %v3390_v57 }
 0x14c   :  { %3693 = vmatpush.bf16.msra.mxu3 %v8924_v52  ;;  %3669 = vmatpush.bf16.msra.mxu1 %v8348_v62  ;;  %v8793_v43 = vld [vmem:[%s19096_s3 + $0x6a8] sm:$0xf0]  ;;  %v8540_v52 = vor.u32 %v11949_v38, %v8537_v39 }
 0x14d   :  { %v11805_v44 = vld [vmem:[%s19096_s3 + $0xc] sm:$0xf]  ;;  %v8796_v59 = vor.u32 %v12013_v42, %v8793_v43  ;;  %v3416_v14 = vadd.f32 %v3415_v0, %v3403_v4 }
 0x14e   :  { %3681 = vmatpush.bf16.msra.mxu2 %v8636_v1  ;;  %3657 = vmatpush.bf16.msra.mxu0 %v8060_v8  ;;  %v7961_v48 = vld [vmem:[%s19096_s3 + $0x28] sm:$0xf0] }
 0x14f   :  { %v11869_v49 = vld [vmem:[%s19096_s3 + $0x20c] sm:$0xf]  ;;  %v7964_v33 = vor.u32 %v11805_v44, %v7961_v48 }
 0x150   :  { %3694 = vmatpush.bf16.msra.mxu3 %v8892_v5  ;;  %3670 = vmatpush.bf16.msra.mxu1 %v8316_v12  ;;  %v8217_v51 = vld [vmem:[%s19096_s3 + $0x228] sm:$0xf0] }
 0x151   :  { %v12117_v53 = vld [vmem:[%s19096_s3 + $0x9cc] sm:$0xf]  ;;  %v8220_v5 = vor.u32 %v11869_v49, %v8217_v51 }
 0x152   :  { %3682 = vmatpush.bf16.msra.mxu2 %v8604_v15  ;;  %3658 = vmatpush.bf16.msra.mxu0 %v8028_v25  ;;  %v9209_v54 = vld [vmem:[%s19096_s3 + $0x9e8] sm:$0xf0]  ;;  %v3391_v25 = vpop.f32.mrf.mxu3  ;;  %v3404_v35 = vpop.f32.mrf.mxu0 }
 0x153   :  { %v12181_v56 = vld [vmem:[%s19096_s3 + $0xbcc] sm:$0xf]  ;;  %v9212_v6 = vor.u32 %v12117_v53, %v9209_v54 }
 0x154   :  { %3695 = vmatpush.bf16.msra.mxu3 %v8860_v20  ;;  %3671 = vmatpush.bf16.msra.mxu1 %v8284_v28  ;;  %v9465_v61 = vld [vmem:[%s19096_s3 + $0xbe8] sm:$0xf0]  ;;  %v3378_v20 = vpop.f32.mrf.mxu2 }
 0x155   :  { %v11941_v62 = vld [vmem:[%s19096_s3 + $0x44c] sm:$0xf]  ;;  %v9468_v8 = vor.u32 %v12181_v56, %v9465_v61 }
 0x156   :  { %3683 = vmatpush.bf16.msra.mxu2 %v8572_v32  ;;  %v8505_v63 = vld [vmem:[%s19096_s3 + $0x468] sm:$0xf0]  ;;  %3659 = vmatpush.bf16.msra.mxu0 %v7996_v41  ;;  %v3417_v41 = vpop.f32.mrf.mxu1 }
 0x157   :  { %v12005_v1 = vld [vmem:[%s19096_s3 + $0x64c] sm:$0xf]  ;;  %v8508_v9 = vor.u32 %v11941_v62, %v8505_v63  ;;  %v766_v63 = vperm.slane %v14159_v30, 1 }
 0x158   :  { %3696 = vmatpush.bf16.msra.mxu3 %v8828_v36  ;;  %v8761_v3 = vld [vmem:[%s19096_s3 + $0x668] sm:$0xf0]  ;;  %3672 = vmatpush.bf16.msra.mxu1 %v8252_v47 }
 0x159   :  { %v12109_v7 = vld [vmem:[%s19096_s3 + $0x98c] sm:$0xf]  ;;  %v8764_v15 = vor.u32 %v12005_v1, %v8761_v3 }
 0x15a   :  { %3684 = vmatpush.bf16.msra.mxu2 %v8540_v52  ;;  %v9177_v10 = vld [vmem:[%s19096_s3 + $0x9a8] sm:$0xf0]  ;;  %3660 = vmatpush.bf16.msra.mxu0 %v7964_v33  ;;  %v3441_v62 = vpop.f32.mrf.mxu3 }
 0x15b   :  { %v12173_v12 = vld [vmem:[%s19096_s3 + $0xb8c] sm:$0xf]  ;;  %v9180_v26 = vor.u32 %v12109_v7, %v9177_v10  ;;  %v3454_v10 = vpop.f32.mrf.mxu0 }
 0x15c   :  { %v9433_v13 = vld [vmem:[%s19096_s3 + $0xba8] sm:$0xf0]  ;;  %3697 = vmatpush.bf16.msra.mxu3 %v8796_v59  ;;  %3673 = vmatpush.bf16.msra.mxu1 %v8220_v5  ;;  %v3428_v56 = vpop.f32.mrf.mxu2 }
 0x15d   :  { %v11933_v16 = vld [vmem:[%s19096_s3 + $0x40c] sm:$0xf]  ;;  %v9436_v29 = vor.u32 %v12173_v12, %v9433_v13  ;;  %3661 = vmatmul.bf16.vlgmr.msra.gmra.mxu0 %v13318_v50  ;;  %v3429_v61 = vadd.f32 %v3428_v56, %v3416_v14 }
 0x15e   :  { %v8473_v18 = vld [vmem:[%s19096_s3 + $0x428] sm:$0xf0]  ;;  %3705 = vmatpush.bf16.msrb.mxu0 %v9212_v6  ;;  %3685 = vmatpush.bf16.msra.mxu2 %v8508_v9 }
 0x15f   :  { %v11997_v19 = vld [vmem:[%s19096_s3 + $0x60c] sm:$0xf]  ;;  %v8476_v11 = vor.u32 %v11933_v16, %v8473_v18  ;;  %3674 = vmatmul.bf16.vlgmr.msra.gmra.mxu1 %v13326_v55  ;;  %v14411_v6 = vadd.f32 %v3441_v62, %v3429_v61  ;;  %v3467_v16 = vpop.f32.mrf.mxu1 }
 0x160   :  { %v8729_v21 = vld [vmem:[%s19096_s3 + $0x628] sm:$0xf0]  ;;  %3718 = vmatpush.bf16.msrb.mxu1 %v9468_v8  ;;  %3698 = vmatpush.bf16.msra.mxu3 %v8764_v15  ;;  %v3455_v15 = vadd.f32 %v3454_v10, %v766_v63  ;;  %v8191_v63 = vld [vmem:[%s19096_s3 + $0x1d0] sm:$0xf] }
 0x161   :  { %v12245_v22 = vld [vmem:[%s19096_s3 + $0xdcc] sm:$0xf]  ;;  %v8732_v36 = vor.u32 %v11997_v19, %v8729_v21  ;;  %vm4173_vm10 = vcmp.gt.f32.partialorder %v14411_v6, 0.0 }
 0x162   :  { %v9721_v23 = vld [vmem:[%s19096_s3 + $0xde8] sm:$0xf0]  ;;  %3706 = vmatpush.bf16.msrb.mxu0 %v9180_v26  ;;  %3686 = vmatpush.bf16.msra.mxu2 %v8476_v11  ;;  %v3468_v25 = vadd.f32 %v3467_v16, %v3455_v15  ;;  %v3443_v35 = vpop.f32.mrf.mxu3  ;;  %v8159_v16 = vld [vmem:[%s19096_s3 + $0x190] sm:$0xf] }
 0x163   :  { %v12309_v27 = vld [vmem:[%s19096_s3 + $0xfcc] sm:$0xf]  ;;  %v9724_v38 = vor.u32 %v12245_v22, %v9721_v23  ;;  %v8959_v35 = vld [vmem:[%s19096_s3 + $0x7d0] sm:$0xf] }
 0x164   :  { %v9977_v28 = vld [vmem:[%s19096_s3 + $0xfe8] sm:$0xf0]  ;;  %3719 = vmatpush.bf16.msrb.mxu1 %v9436_v29  ;;  %3699 = vmatpush.bf16.msra.mxu3 %v8732_v36  ;;  %v3430_v29 = vpop.f32.mrf.mxu2 }
 0x165   :  { %v12101_v32 = vld [vmem:[%s19096_s3 + $0x94c] sm:$0xf]  ;;  %v9980_v42 = vor.u32 %v12309_v27, %v9977_v28  ;;  %3687 = vmatmul.bf16.vlgmr.msra.gmra.mxu2 %v13362_v17 }
 0x166   :  { %v9145_v34 = vld [vmem:[%s19096_s3 + $0x968] sm:$0xf0]  ;;  %3731 = vmatpush.bf16.msrb.mxu2 %v9724_v38 }
 0x167   :  { %v12165_v39 = vld [vmem:[%s19096_s3 + $0xb4c] sm:$0xf]  ;;  %v9148_v45 = vor.u32 %v12101_v32, %v9145_v34  ;;  %3700 = vmatmul.bf16.vlgmr.msra.gmra.mxu3 %v13373_v24 }
 0x168   :  { %v9401_v40 = vld [vmem:[%s19096_s3 + $0xb68] sm:$0xf0]  ;;  %3744 = vmatpush.bf16.msrb.mxu3 %v9980_v42 }
 0x169   :  { %v12237_v43 = vld [vmem:[%s19096_s3 + $0xd8c] sm:$0xf]  ;;  %v9404_v48 = vor.u32 %v12165_v39, %v9401_v40  ;;  %3707 = vmatpush.bf16.msrb.mxu0 %v9148_v45 }
 0x16a   :  { %v9689_v44 = vld [vmem:[%s19096_s3 + $0xda8] sm:$0xf0] }
 0x16b   :  { %v12301_v46 = vld [vmem:[%s19096_s3 + $0xf8c] sm:$0xf]  ;;  %v9692_v52 = vor.u32 %v12237_v43, %v9689_v44  ;;  %3720 = vmatpush.bf16.msrb.mxu1 %v9404_v48 }
 0x16c   :  { %v9945_v47 = vld [vmem:[%s19096_s3 + $0xfa8] sm:$0xf0] }
 0x16d   :  { %v12093_v49 = vld [vmem:[%s19096_s3 + $0x90c] sm:$0xf]  ;;  %v9948_v57 = vor.u32 %v12301_v46, %v9945_v47  ;;  %3732 = vmatpush.bf16.msrb.mxu2 %v9692_v52  ;;  %v3456_v46 = vpop.f32.mrf.mxu0 }
 0x16e   :  { %v9113_v51 = vld [vmem:[%s19096_s3 + $0x928] sm:$0xf0] }
 0x16f   :  { %v12157_v53 = vld [vmem:[%s19096_s3 + $0xb0c] sm:$0xf]  ;;  %v9116_v0 = vor.u32 %v12093_v49, %v9113_v51  ;;  %3745 = vmatpush.bf16.msrb.mxu3 %v9948_v57  ;;  %v3469_v51 = vpop.f32.mrf.mxu1 }
 0x170   :  { %v9369_v54 = vld [vmem:[%s19096_s3 + $0xb28] sm:$0xf0]  ;;  %v11986_v51 = vld [vmem:[%s19096_s3 + $0x5ac] sm:$0xf0] }
 0x171   :  { %v12229_v58 = vld [vmem:[%s19096_s3 + $0xd4c] sm:$0xf]  ;;  %v9372_v3 = vor.u32 %v12157_v53, %v9369_v54  ;;  %3708 = vmatpush.bf16.msrb.mxu0 %v9116_v0  ;;  %v11866_v0 = vld [vmem:[%s19096_s3 + $0x1ec] sm:$0xf0] }
 0x172   :  { %v9657_v59 = vld [vmem:[%s19096_s3 + $0xd68] sm:$0xf0]  ;;  %v8192_v15 = vor.u32 %v11866_v0, %v8191_v63  ;;  %v8639_v0 = vld [vmem:[%s19096_s3 + $0x550] sm:$0xf] }
 0x173   :  { %v12293_v33 = vld [vmem:[%s19096_s3 + $0xf4c] sm:$0xf]  ;;  %v9660_v7 = vor.u32 %v12229_v58, %v9657_v59  ;;  %3721 = vmatpush.bf16.msrb.mxu1 %v9372_v3  ;;  %v11930_v3 = vld [vmem:[%s19096_s3 + $0x3ec] sm:$0xf0] }
 0x174   :  { %v9913_v1 = vld [vmem:[%s19096_s3 + $0xf68] sm:$0xf0] }
 0x175   :  { %v12085_v4 = vld [vmem:[%s19096_s3 + $0x8cc] sm:$0xf]  ;;  %v9916_v12 = vor.u32 %v12293_v33, %v9913_v1  ;;  %3733 = vmatpush.bf16.msrb.mxu2 %v9660_v7  ;;  %v8447_v33 = vld [vmem:[%s19096_s3 + $0x3d0] sm:$0xf]  ;;  %v3480_v7 = vpop.f32.mrf.mxu2 }
 0x176   :  { %v9081_v5 = vld [vmem:[%s19096_s3 + $0x8e8] sm:$0xf0] }
 0x177   :  { %v12149_v8 = vld [vmem:[%s19096_s3 + $0xacc] sm:$0xf]  ;;  %v9084_v18 = vor.u32 %v12085_v4, %v9081_v5  ;;  %3746 = vmatpush.bf16.msrb.mxu3 %v9916_v12 }
 0x178   :  { %v9337_v9 = vld [vmem:[%s19096_s3 + $0xae8] sm:$0xf0] }
 0x179   :  { %v12221_v13 = vld [vmem:[%s19096_s3 + $0xd0c] sm:$0xf]  ;;  %v9340_v21 = vor.u32 %v12149_v8, %v9337_v9  ;;  %3709 = vmatpush.bf16.msrb.mxu0 %v9084_v18  ;;  %v3493_v8 = vpop.f32.mrf.mxu3  ;;  %v8448_v18 = vor.u32 %v11930_v3, %v8447_v33  ;;  %v11978_v33 = vld [vmem:[%s19096_s3 + $0x56c] sm:$0xf0] }
 0x17a   :  { %v9625_v14 = vld [vmem:[%s19096_s3 + $0xd28] sm:$0xf0]  ;;  %v8895_v3 = vld [vmem:[%s19096_s3 + $0x750] sm:$0xf] }
 0x17b   :  { %v12285_v19 = vld [vmem:[%s19096_s3 + $0xf0c] sm:$0xf]  ;;  %v9628_v26 = vor.u32 %v12221_v13, %v9625_v14  ;;  %3722 = vmatpush.bf16.msrb.mxu1 %v9340_v21  ;;  %v3481_v13 = vadd.f32 %v3480_v7, %v3468_v25  ;;  %v8415_v21 = vld [vmem:[%s19096_s3 + $0x390] sm:$0xf] }
 0x17c   :  { %v9881_v20 = vld [vmem:[%s19096_s3 + $0xf28] sm:$0xf0]  ;;  %v8063_v7 = vld [vmem:[%s19096_s3 + $0xd0] sm:$0xf] }
 0x17d   :  { %v12077_v22 = vld [vmem:[%s19096_s3 + $0x88c] sm:$0xf]  ;;  %v9884_v11 = vor.u32 %v12285_v19, %v9881_v20  ;;  %3734 = vmatpush.bf16.msrb.mxu2 %v9628_v26  ;;  %v11858_v20 = vld [vmem:[%s19096_s3 + $0x1ac] sm:$0xf0]  ;;  %v3482_v46 = vpop.f32.mrf.mxu2 }
 0x17e   :  { %v9049_v23 = vld [vmem:[%s19096_s3 + $0x8a8] sm:$0xf0] }
 0x17f   :  { %v12141_v27 = vld [vmem:[%s19096_s3 + $0xa8c] sm:$0xf]  ;;  %v9052_v36 = vor.u32 %v12077_v22, %v9049_v23  ;;  %3747 = vmatpush.bf16.msrb.mxu3 %v9884_v11  ;;  %v11922_v22 = vld [vmem:[%s19096_s3 + $0x3ac] sm:$0xf0]  ;;  %v14527_v23 = vadd.f32 %v3493_v8, %v3481_v13  ;;  %v3506_v13 = vpop.f32.mrf.mxu0 }
 0x180   :  { %v9305_v28 = vld [vmem:[%s19096_s3 + $0xaa8] sm:$0xf0]  ;;  %v8703_v11 = vld [vmem:[%s19096_s3 + $0x5d0] sm:$0xf] }
 0x181   :  { %v12213_v32 = vld [vmem:[%s19096_s3 + $0xccc] sm:$0xf]  ;;  %v9308_v40 = vor.u32 %v12141_v27, %v9305_v28  ;;  %3710 = vmatpush.bf16.msrb.mxu0 %v9052_v36  ;;  %v12058_v36 = vld [vmem:[%s19096_s3 + $0x7ec] sm:$0xf0] }
 0x182   :  { %v9593_v34 = vld [vmem:[%s19096_s3 + $0xce8] sm:$0xf0]  ;;  %v11834_v8 = vld [vmem:[%s19096_s3 + $0xec] sm:$0xf0] }
 0x183   :  { %v12277_v38 = vld [vmem:[%s19096_s3 + $0xecc] sm:$0xf]  ;;  %v9596_v43 = vor.u32 %v12213_v32, %v9593_v34  ;;  %3723 = vmatpush.bf16.msrb.mxu1 %v9308_v40  ;;  %v11994_v32 = vld [vmem:[%s19096_s3 + $0x5ec] sm:$0xf0]  ;;  %v8160_v34 = vor.u32 %v11858_v20, %v8159_v16  ;;  %v8064_v20 = vor.u32 %v11834_v8, %v8063_v7 }
 0x184   :  { %v9849_v39 = vld [vmem:[%s19096_s3 + $0xee8] sm:$0xf0]  ;;  %v8127_v40 = vld [vmem:[%s19096_s3 + $0x150] sm:$0xf] }
 0x185   :  { %v12069_v41 = vld [vmem:[%s19096_s3 + $0x84c] sm:$0xf]  ;;  %v9852_v47 = vor.u32 %v12277_v38, %v9849_v39  ;;  %3735 = vmatpush.bf16.msrb.mxu2 %v9596_v43  ;;  %v8416_v38 = vor.u32 %v11922_v22, %v8415_v21  ;;  %v8704_v43 = vor.u32 %v11994_v32, %v8703_v11  ;;  %v11970_v16 = vld [vmem:[%s19096_s3 + $0x52c] sm:$0xf0] }
 0x186   :  { %v9017_v42 = vld [vmem:[%s19096_s3 + $0x868] sm:$0xf0]  ;;  %v8863_v21 = vld [vmem:[%s19096_s3 + $0x710] sm:$0xf] }
 0x187   :  { %v12133_v44 = vld [vmem:[%s19096_s3 + $0xa4c] sm:$0xf]  ;;  %v9020_v52 = vor.u32 %v12069_v41, %v9017_v42  ;;  %3748 = vmatpush.bf16.msrb.mxu3 %v9852_v47  ;;  %v11850_v41 = vld [vmem:[%s19096_s3 + $0x16c] sm:$0xf0]  ;;  %v3495_v47 = vpop.f32.mrf.mxu3  ;;  %v3508_v46 = vpop.f32.mrf.mxu0 }
 0x188   :  { %v9273_v45 = vld [vmem:[%s19096_s3 + $0xa68] sm:$0xf0]  ;;  %v12034_v22 = vld [vmem:[%s19096_s3 + $0x72c] sm:$0xf0] }
 0x189   :  { %v12205_v48 = vld [vmem:[%s19096_s3 + $0xc8c] sm:$0xf]  ;;  %v9276_v57 = vor.u32 %v12133_v44, %v9273_v45  ;;  %3711 = vmatpush.bf16.msrb.mxu0 %v9020_v52  ;;  %v8383_v44 = vld [vmem:[%s19096_s3 + $0x350] sm:$0xf]  ;;  %v8128_v52 = vor.u32 %v11850_v41, %v8127_v40  ;;  %v8864_v32 = vor.u32 %v12034_v22, %v8863_v21 }
 0x18a   :  { %v9561_v49 = vld [vmem:[%s19096_s3 + $0xca8] sm:$0xf0]  ;;  %v11914_v45 = vld [vmem:[%s19096_s3 + $0x36c] sm:$0xf0] }
 0x18b   :  { %v12269_v53 = vld [vmem:[%s19096_s3 + $0xe8c] sm:$0xf]  ;;  %v9564_v62 = vor.u32 %v12205_v48, %v9561_v49  ;;  %3724 = vmatpush.bf16.msrb.mxu1 %v9276_v57  ;;  %v8960_v48 = vor.u32 %v12058_v36, %v8959_v35  ;;  %v8671_v49 = vld [vmem:[%s19096_s3 + $0x590] sm:$0xf] }
 0x18c   :  { %v9817_v54 = vld [vmem:[%s19096_s3 + $0xea8] sm:$0xf0]  ;;  %v8095_v57 = vld [vmem:[%s19096_s3 + $0x110] sm:$0xf] }
 0x18d   :  { %v12061_v56 = vld [vmem:[%s19096_s3 + $0x80c] sm:$0xf]  ;;  %v9820_v1 = vor.u32 %v12269_v53, %v9817_v54  ;;  %3736 = vmatpush.bf16.msrb.mxu2 %v9564_v62  ;;  %v8927_v53 = vld [vmem:[%s19096_s3 + $0x790] sm:$0xf] }
 0x18e   :  { %v8985_v58 = vld [vmem:[%s19096_s3 + $0x828] sm:$0xf0]  ;;  %v12050_v54 = vld [vmem:[%s19096_s3 + $0x7ac] sm:$0xf0] }
 0x18f   :  { %v12125_v59 = vld [vmem:[%s19096_s3 + $0xa0c] sm:$0xf]  ;;  %v8988_v9 = vor.u32 %v12061_v56, %v8985_v58  ;;  %3749 = vmatpush.bf16.msrb.mxu3 %v9820_v1  ;;  %v8384_v56 = vor.u32 %v11914_v45, %v8383_v44  ;;  %v11842_v58 = vld [vmem:[%s19096_s3 + $0x12c] sm:$0xf0]  ;;  %v8928_v63 = vor.u32 %v12050_v54, %v8927_v53 }
 0x190   :  { %v9241_v61 = vld [vmem:[%s19096_s3 + $0xa28] sm:$0xf0]  ;;  %v11906_v62 = vld [vmem:[%s19096_s3 + $0x32c] sm:$0xf0]  ;;  %v8096_v1 = vor.u32 %v11842_v58, %v8095_v57 }
 0x191   :  { %v12197_v4 = vld [vmem:[%s19096_s3 + $0xc4c] sm:$0xf]  ;;  %v9244_v14 = vor.u32 %v12125_v59, %v9241_v61  ;;  %3712 = vmatpush.bf16.msrb.mxu0 %v8988_v9  ;;  %v8672_v59 = vor.u32 %v11986_v51, %v8671_v49  ;;  %v8351_v61 = vld [vmem:[%s19096_s3 + $0x310] sm:$0xf]  ;;  %v8640_v9 = vor.u32 %v11978_v33, %v8639_v0 }
 0x192   :  { %v9529_v5 = vld [vmem:[%s19096_s3 + $0xc68] sm:$0xf0]  ;;  %v11890_v11 = vld [vmem:[%s19096_s3 + $0x2ac] sm:$0xf0] }
 0x193   :  { %v12261_v10 = vld [vmem:[%s19096_s3 + $0xe4c] sm:$0xf]  ;;  %v9532_v19 = vor.u32 %v12197_v4, %v9529_v5  ;;  %3725 = vmatpush.bf16.msrb.mxu1 %v9244_v14  ;;  %v12042_v4 = vld [vmem:[%s19096_s3 + $0x76c] sm:$0xf0]  ;;  %v8352_v5 = vor.u32 %v11906_v62, %v8351_v61 }
 0x194   :  { %v9785_v12 = vld [vmem:[%s19096_s3 + $0xe68] sm:$0xf0]  ;;  %3713 = vmatmul.bf16.vlgmr.msrb.gmra.mxu0 %v13424_v60  ;;  %v8896_v14 = vor.u32 %v12042_v4, %v8895_v3  ;;  %v11962_v35 = vld [vmem:[%s19096_s3 + $0x4ec] sm:$0xf0] }
 0x195   :  { %v9788_v25 = vor.u32 %v12261_v10, %v9785_v12  ;;  %v12189_v26 = vld [vmem:[%s19096_s3 + $0xc0c] sm:$0xf]  ;;  %3757 = vmatpush.bf16.msra.mxu0 %v8192_v15  ;;  %3737 = vmatpush.bf16.msrb.mxu2 %v9532_v19  ;;  %v8319_v10 = vld [vmem:[%s19096_s3 + $0x2d0] sm:$0xf]  ;;  %v3519_v19 = vpop.f32.mrf.mxu1 }
 0x196   :  { %v9497_v27 = vld [vmem:[%s19096_s3 + $0xc28] sm:$0xf0]  ;;  %3726 = vmatmul.bf16.vlgmr.msrb.gmra.mxu1 %v13435_v2  ;;  %v11898_v12 = vld [vmem:[%s19096_s3 + $0x2ec] sm:$0xf0] }
 0x197   :  { %v12253_v28 = vld [vmem:[%s19096_s3 + $0xe0c] sm:$0xf]  ;;  %3770 = vmatpush.bf16.msra.mxu1 %v8448_v18  ;;  %v9500_v39 = vor.u32 %v12189_v26, %v9497_v27  ;;  %3750 = vmatpush.bf16.msrb.mxu3 %v9788_v25  ;;  %v8607_v15 = vld [vmem:[%s19096_s3 + $0x510] sm:$0xf]  ;;  %v3507_v18 = vadd.f32 %v3506_v13, %v14527_v23  ;;  %v8320_v25 = vor.u32 %v11898_v12, %v8319_v10 }
 0x198   :  { %v9753_v29 = vld [vmem:[%s19096_s3 + $0xe28] sm:$0xf0]  ;;  %v8031_v26 = vld [vmem:[%s19096_s3 + $0x90] sm:$0xf] }
 0x199   :  { %v9756_v42 = vor.u32 %v12253_v28, %v9753_v29  ;;  %3758 = vmatpush.bf16.msra.mxu0 %v8160_v34  ;;  %3738 = vmatpush.bf16.msrb.mxu2 %v9500_v39  ;;  %v11826_v23 = vld [vmem:[%s19096_s3 + $0xac] sm:$0xf0]  ;;  %v3520_v27 = vadd.f32 %v3519_v19, %v3507_v18  ;;  %v8608_v28 = vor.u32 %v11970_v16, %v8607_v15 }
 0x19a   :  { %v8287_v29 = vld [vmem:[%s19096_s3 + $0x290] sm:$0xf]  ;;  %v8032_v36 = vor.u32 %v11826_v23, %v8031_v26 }
 0x19b   :  { %3771 = vmatpush.bf16.msra.mxu1 %v8416_v38  ;;  %3751 = vmatpush.bf16.msrb.mxu3 %v9756_v42  ;;  %v8575_v34 = vld [vmem:[%s19096_s3 + $0x4d0] sm:$0xf]  ;;  %v8288_v40 = vor.u32 %v11890_v11, %v8287_v29 }
 0x19c   :  { %3739 = vmatmul.bf16.vlgmr.msrb.gmra.mxu2 %v13472_v31  ;;  %v8831_v38 = vld [vmem:[%s19096_s3 + $0x6d0] sm:$0xf] }
 0x19d   :  { %3783 = vmatpush.bf16.msra.mxu2 %v8704_v43  ;;  %3759 = vmatpush.bf16.msra.mxu0 %v8128_v52  ;;  %v12026_v39 = vld [vmem:[%s19096_s3 + $0x6ec] sm:$0xf0]  ;;  %v8576_v43 = vor.u32 %v11962_v35, %v8575_v34  ;;  %v3521_v51 = vpop.f32.mrf.mxu1 }
 0x19e   :  { %3752 = vmatmul.bf16.vlgmr.msrb.gmra.mxu3 %v13483_v37  ;;  %v7999_v41 = vld [vmem:[%s19096_s3 + $0x50] sm:$0xf]  ;;  %v8832_v47 = vor.u32 %v12026_v39, %v8831_v38 }
 0x19f   :  { %3796 = vmatpush.bf16.msra.mxu3 %v8960_v48  ;;  %3772 = vmatpush.bf16.msra.mxu1 %v8384_v56  ;;  %v11818_v42 = vld [vmem:[%s19096_s3 + $0x6c] sm:$0xf0] }
 0x1a0   :  { %v8255_v44 = vld [vmem:[%s19096_s3 + $0x250] sm:$0xf]  ;;  %v8000_v52 = vor.u32 %v11818_v42, %v7999_v41 }
 0x1a1   :  { %3784 = vmatpush.bf16.msra.mxu2 %v8672_v59  ;;  %3760 = vmatpush.bf16.msra.mxu0 %v8096_v1  ;;  %v11882_v45 = vld [vmem:[%s19096_s3 + $0x26c] sm:$0xf0]  ;;  %v3532_v1 = vpop.f32.mrf.mxu2 }
 0x1a2   :  { %v8543_v48 = vld [vmem:[%s19096_s3 + $0x490] sm:$0xf]  ;;  %v8256_v57 = vor.u32 %v11882_v45, %v8255_v44  ;;  %v3533_v8 = vadd.f32 %v3532_v1, %v3520_v27  ;;  %v767_v1 = vperm.slane %v14159_v30, 2 }
 0x1a3   :  { %3797 = vmatpush.bf16.msra.mxu3 %v8928_v63  ;;  %3773 = vmatpush.bf16.msra.mxu1 %v8352_v5  ;;  %v11954_v49 = vld [vmem:[%s19096_s3 + $0x4ac] sm:$0xf0] }
 0x1a4   :  { %v8799_v53 = vld [vmem:[%s19096_s3 + $0x690] sm:$0xf]  ;;  %v8544_v62 = vor.u32 %v11954_v49, %v8543_v48 }
 0x1a5   :  { %3785 = vmatpush.bf16.msra.mxu2 %v8640_v9  ;;  %3761 = vmatpush.bf16.msra.mxu0 %v8064_v20  ;;  %v12018_v54 = vld [vmem:[%s19096_s3 + $0x6ac] sm:$0xf0]  ;;  %v3545_v9 = vpop.f32.mrf.mxu3 }
 0x1a6   :  { %v7967_v56 = vld [vmem:[%s19096_s3 + $0x10] sm:$0xf]  ;;  %v8800_v3 = vor.u32 %v12018_v54, %v8799_v53  ;;  %v14717_v18 = vadd.f32 %v3545_v9, %v3533_v8 }
 0x1a7   :  { %3798 = vmatpush.bf16.msra.mxu3 %v8896_v14  ;;  %3774 = vmatpush.bf16.msra.mxu1 %v8320_v25  ;;  %v11810_v58 = vld [vmem:[%s19096_s3 + $0x2c] sm:$0xf0] }
 0x1a8   :  { %v8223_v59 = vld [vmem:[%s19096_s3 + $0x210] sm:$0xf]  ;;  %v7968_v10 = vor.u32 %v11810_v58, %v7967_v56  ;;  %vm4174_vm11 = vcmp.gt.f32.partialorder %v14717_v18, 0.0 }
 0x1a9   :  { %3786 = vmatpush.bf16.msra.mxu2 %v8608_v28  ;;  %3762 = vmatpush.bf16.msra.mxu0 %v8032_v36  ;;  %v11874_v61 = vld [vmem:[%s19096_s3 + $0x22c] sm:$0xf0]  ;;  %v3534_v42 = vpop.f32.mrf.mxu2 }
 0x1aa   :  { %v9215_v63 = vld [vmem:[%s19096_s3 + $0x9d0] sm:$0xf]  ;;  %v8224_v14 = vor.u32 %v11874_v61, %v8223_v59 }
 0x1ab   :  { %3799 = vmatpush.bf16.msra.mxu3 %v8864_v32  ;;  %3775 = vmatpush.bf16.msra.mxu1 %v8288_v40  ;;  %v12122_v0 = vld [vmem:[%s19096_s3 + $0x9ec] sm:$0xf0] }
 0x1ac   :  { %v9471_v33 = vld [vmem:[%s19096_s3 + $0xbd0] sm:$0xf]  ;;  %v9216_v15 = vor.u32 %v12122_v0, %v9215_v63 }
 0x1ad   :  { %3787 = vmatpush.bf16.msra.mxu2 %v8576_v43  ;;  %v12186_v4 = vld [vmem:[%s19096_s3 + $0xbec] sm:$0xf0]  ;;  %3763 = vmatpush.bf16.msra.mxu0 %v8000_v52 }
 0x1ae   :  { %v8511_v5 = vld [vmem:[%s19096_s3 + $0x450] sm:$0xf]  ;;  %v9472_v19 = vor.u32 %v12186_v4, %v9471_v33 }
 0x1af   :  { %3800 = vmatpush.bf16.msra.mxu3 %v8832_v47  ;;  %v11946_v7 = vld [vmem:[%s19096_s3 + $0x46c] sm:$0xf0]  ;;  %3776 = vmatpush.bf16.msra.mxu1 %v8256_v57  ;;  %v3547_v47 = vpop.f32.mrf.mxu3 }
 0x1b0   :  { %v8767_v12 = vld [vmem:[%s19096_s3 + $0x650] sm:$0xf]  ;;  %v8512_v20 = vor.u32 %v11946_v7, %v8511_v5 }
 0x1b1   :  { %v12010_v13 = vld [vmem:[%s19096_s3 + $0x66c] sm:$0xf0]  ;;  %3788 = vmatpush.bf16.msra.mxu2 %v8544_v62  ;;  %3764 = vmatpush.bf16.msra.mxu0 %v7968_v10 }
 0x1b2   :  { %v9183_v16 = vld [vmem:[%s19096_s3 + $0x990] sm:$0xf]  ;;  %v8768_v26 = vor.u32 %v12010_v13, %v8767_v12  ;;  %v3558_v13 = vpop.f32.mrf.mxu0 }
 0x1b3   :  { %v12114_v21 = vld [vmem:[%s19096_s3 + $0x9ac] sm:$0xf0]  ;;  %3801 = vmatpush.bf16.msra.mxu3 %v8800_v3  ;;  %3777 = vmatpush.bf16.msra.mxu1 %v8224_v14 }
 0x1b4   :  { %v9439_v22 = vld [vmem:[%s19096_s3 + $0xb90] sm:$0xf]  ;;  %v9184_v34 = vor.u32 %v12114_v21, %v9183_v16  ;;  %3765 = vmatmul.bf16.vlgmr.msra.gmra.mxu0 %v13318_v50 }
 0x1b5   :  { %v12178_v25 = vld [vmem:[%s19096_s3 + $0xbac] sm:$0xf0]  ;;  %3809 = vmatpush.bf16.msrb.mxu0 %v9216_v15  ;;  %3789 = vmatpush.bf16.msra.mxu2 %v8512_v20  ;;  %v3571_v20 = vpop.f32.mrf.mxu1 }
 0x1b6   :  { %v8479_v23 = vld [vmem:[%s19096_s3 + $0x410] sm:$0xf]  ;;  %v9440_v38 = vor.u32 %v12178_v25, %v9439_v22  ;;  %3778 = vmatmul.bf16.vlgmr.msra.gmra.mxu1 %v13326_v55 }
 0x1b7   :  { %v11938_v27 = vld [vmem:[%s19096_s3 + $0x42c] sm:$0xf0]  ;;  %3822 = vmatpush.bf16.msrb.mxu1 %v9472_v19  ;;  %3802 = vmatpush.bf16.msra.mxu3 %v8768_v26  ;;  %v3559_v19 = vadd.f32 %v3558_v13, %v767_v1  ;;  %v11926_v1 = vld [vmem:[%s19096_s3 + $0x3d4] sm:$0xf] }
 0x1b8   :  { %v8735_v28 = vld [vmem:[%s19096_s3 + $0x610] sm:$0xf]  ;;  %v8480_v39 = vor.u32 %v11938_v27, %v8479_v23 }
 0x1b9   :  { %v12002_v29 = vld [vmem:[%s19096_s3 + $0x62c] sm:$0xf0]  ;;  %3810 = vmatpush.bf16.msrb.mxu0 %v9184_v34 }
 0x1ba   :  { %v9727_v11 = vld [vmem:[%s19096_s3 + $0xdd0] sm:$0xf]  ;;  %v8736_v43 = vor.u32 %v12002_v29, %v8735_v28  ;;  %3790 = vmatpush.bf16.msra.mxu2 %v8480_v39  ;;  %v3572_v28 = vadd.f32 %v3571_v20, %v3559_v19  ;;  %v3560_v47 = vpop.f32.mrf.mxu0 }
 0x1bb   :  { %v12250_v32 = vld [vmem:[%s19096_s3 + $0xdec] sm:$0xf0]  ;;  %3823 = vmatpush.bf16.msrb.mxu1 %v9440_v38  ;;  %v8385_v47 = vld [vmem:[%s19096_s3 + $0x370] sm:$0xf0] }
 0x1bc   :  { %v9983_v35 = vld [vmem:[%s19096_s3 + $0xfd0] sm:$0xf]  ;;  %v9728_v44 = vor.u32 %v12250_v32, %v9727_v11  ;;  %3803 = vmatpush.bf16.msra.mxu3 %v8736_v43 }
 0x1bd   :  { %v12314_v36 = vld [vmem:[%s19096_s3 + $0xfec] sm:$0xf0]  ;;  %3791 = vmatmul.bf16.vlgmr.msra.gmra.mxu2 %v13362_v17 }
 0x1be   :  { %v9151_v40 = vld [vmem:[%s19096_s3 + $0x950] sm:$0xf]  ;;  %v9984_v48 = vor.u32 %v12314_v36, %v9983_v35  ;;  %3835 = vmatpush.bf16.msrb.mxu2 %v9728_v44 }
 0x1bf   :  { %v12106_v41 = vld [vmem:[%s19096_s3 + $0x96c] sm:$0xf0]  ;;  %3804 = vmatmul.bf16.vlgmr.msra.gmra.mxu3 %v13373_v24 }
 0x1c0   :  { %v9407_v45 = vld [vmem:[%s19096_s3 + $0xb50] sm:$0xf]  ;;  %v9152_v52 = vor.u32 %v12106_v41, %v9151_v40  ;;  %3848 = vmatpush.bf16.msrb.mxu3 %v9984_v48 }
 0x1c1   :  { %v12170_v46 = vld [vmem:[%s19096_s3 + $0xb6c] sm:$0xf0] }
 0x1c2   :  { %v9695_v49 = vld [vmem:[%s19096_s3 + $0xd90] sm:$0xf]  ;;  %v9408_v56 = vor.u32 %v12170_v46, %v9407_v45  ;;  %3811 = vmatpush.bf16.msrb.mxu0 %v9152_v52  ;;  %v3573_v52 = vpop.f32.mrf.mxu1 }
 0x1c3   :  { %v12242_v51 = vld [vmem:[%s19096_s3 + $0xdac] sm:$0xf0]  ;;  %v8673_v52 = vld [vmem:[%s19096_s3 + $0x5b0] sm:$0xf0] }
 0x1c4   :  { %v9951_v53 = vld [vmem:[%s19096_s3 + $0xf90] sm:$0xf]  ;;  %v9696_v59 = vor.u32 %v12242_v51, %v9695_v49  ;;  %3824 = vmatpush.bf16.msrb.mxu1 %v9408_v56 }
 0x1c5   :  { %v12306_v54 = vld [vmem:[%s19096_s3 + $0xfac] sm:$0xf0] }
 0x1c6   :  { %v9119_v57 = vld [vmem:[%s19096_s3 + $0x910] sm:$0xf]  ;;  %v9952_v63 = vor.u32 %v12306_v54, %v9951_v53  ;;  %3836 = vmatpush.bf16.msrb.mxu2 %v9696_v59 }
 0x1c7   :  { %v12098_v58 = vld [vmem:[%s19096_s3 + $0x92c] sm:$0xf0] }
 0x1c8   :  { %v9375_v61 = vld [vmem:[%s19096_s3 + $0xb10] sm:$0xf]  ;;  %v9120_v3 = vor.u32 %v12098_v58, %v9119_v57  ;;  %3849 = vmatpush.bf16.msrb.mxu3 %v9952_v63 }
 0x1c9   :  { %v12162_v62 = vld [vmem:[%s19096_s3 + $0xb2c] sm:$0xf0] }
 0x1ca   :  { %v9663_v0 = vld [vmem:[%s19096_s3 + $0xd50] sm:$0xf]  ;;  %v9376_v7 = vor.u32 %v12162_v62, %v9375_v61  ;;  %3812 = vmatpush.bf16.msrb.mxu0 %v9120_v3  ;;  %v3584_v3 = vpop.f32.mrf.mxu2 }
 0x1cb   :  { %v12234_v33 = vld [vmem:[%s19096_s3 + $0xd6c] sm:$0xf0] }
 0x1cc   :  { %v9919_v4 = vld [vmem:[%s19096_s3 + $0xf50] sm:$0xf]  ;;  %v9664_v9 = vor.u32 %v12234_v33, %v9663_v0  ;;  %3825 = vmatpush.bf16.msrb.mxu1 %v9376_v7  ;;  %v11862_v0 = vld [vmem:[%s19096_s3 + $0x1d4] sm:$0xf] }
 0x1cd   :  { %v12298_v5 = vld [vmem:[%s19096_s3 + $0xf6c] sm:$0xf0]  ;;  %v8193_v33 = vld [vmem:[%s19096_s3 + $0x1f0] sm:$0xf0] }
 0x1ce   :  { %v9087_v8 = vld [vmem:[%s19096_s3 + $0x8d0] sm:$0xf]  ;;  %v9920_v14 = vor.u32 %v12298_v5, %v9919_v4  ;;  %3837 = vmatpush.bf16.msrb.mxu2 %v9664_v9  ;;  %v8449_v5 = vld [vmem:[%s19096_s3 + $0x3f0] sm:$0xf0]  ;;  %v3597_v9 = vpop.f32.mrf.mxu3 }
 0x1cf   :  { %v12090_v30 = vld [vmem:[%s19096_s3 + $0x8ec] sm:$0xf0]  ;;  %v8452_v20 = vor.u32 %v11926_v1, %v8449_v5  ;;  %v8641_v1 = vld [vmem:[%s19096_s3 + $0x570] sm:$0xf0] }
 0x1d0   :  { %v9343_v10 = vld [vmem:[%s19096_s3 + $0xad0] sm:$0xf]  ;;  %v9088_v21 = vor.u32 %v12090_v30, %v9087_v8  ;;  %3850 = vmatpush.bf16.msrb.mxu3 %v9920_v14  ;;  %v3585_v30 = vadd.f32 %v3584_v3, %v3572_v28  ;;  %v8897_v5 = vld [vmem:[%s19096_s3 + $0x770] sm:$0xf0] }
 0x1d1   :  { %v12154_v12 = vld [vmem:[%s19096_s3 + $0xaec] sm:$0xf0] }
 0x1d2   :  { %v9631_v15 = vld [vmem:[%s19096_s3 + $0xd10] sm:$0xf]  ;;  %v9344_v26 = vor.u32 %v12154_v12, %v9343_v10  ;;  %3813 = vmatpush.bf16.msrb.mxu0 %v9088_v21  ;;  %v14916_v19 = vadd.f32 %v3597_v9, %v3585_v30  ;;  %v8065_v30 = vld [vmem:[%s19096_s3 + $0xf0] sm:$0xf0] }
 0x1d3   :  { %v12226_v16 = vld [vmem:[%s19096_s3 + $0xd2c] sm:$0xf0] }
 0x1d4   :  { %v9887_v22 = vld [vmem:[%s19096_s3 + $0xf10] sm:$0xf]  ;;  %v9632_v29 = vor.u32 %v12226_v16, %v9631_v15  ;;  %3826 = vmatpush.bf16.msrb.mxu1 %v9344_v26  ;;  %v8196_v15 = vor.u32 %v11862_v0, %v8193_v33  ;;  %v11854_v16 = vld [vmem:[%s19096_s3 + $0x194] sm:$0xf] }
 0x1d5   :  { %v12290_v25 = vld [vmem:[%s19096_s3 + $0xf2c] sm:$0xf0]  ;;  %v8417_v26 = vld [vmem:[%s19096_s3 + $0x3b0] sm:$0xf0] }
 0x1d6   :  { %v9055_v23 = vld [vmem:[%s19096_s3 + $0x890] sm:$0xf]  ;;  %v9888_v34 = vor.u32 %v12290_v25, %v9887_v22  ;;  %3838 = vmatpush.bf16.msrb.mxu2 %v9632_v29  ;;  %v8161_v22 = vld [vmem:[%s19096_s3 + $0x1b0] sm:$0xf0] }
 0x1d7   :  { %v12082_v27 = vld [vmem:[%s19096_s3 + $0x8ac] sm:$0xf0]  ;;  %v11918_v25 = vld [vmem:[%s19096_s3 + $0x394] sm:$0xf] }
 0x1d8   :  { %v9311_v11 = vld [vmem:[%s19096_s3 + $0xa90] sm:$0xf]  ;;  %v9056_v38 = vor.u32 %v12082_v27, %v9055_v23  ;;  %3851 = vmatpush.bf16.msrb.mxu3 %v9888_v34  ;;  %v8705_v34 = vld [vmem:[%s19096_s3 + $0x5f0] sm:$0xf0] }
 0x1d9   :  { %v12146_v32 = vld [vmem:[%s19096_s3 + $0xaac] sm:$0xf0]  ;;  %v11974_v33 = vld [vmem:[%s19096_s3 + $0x554] sm:$0xf] }
 0x1da   :  { %v9599_v35 = vld [vmem:[%s19096_s3 + $0xcd0] sm:$0xf]  ;;  %v9312_v41 = vor.u32 %v12146_v32, %v9311_v11  ;;  %3814 = vmatpush.bf16.msrb.mxu0 %v9056_v38  ;;  %v11990_v32 = vld [vmem:[%s19096_s3 + $0x5d4] sm:$0xf]  ;;  %v8644_v9 = vor.u32 %v11974_v33, %v8641_v1 }
 0x1db   :  { %v12218_v36 = vld [vmem:[%s19096_s3 + $0xcec] sm:$0xf0]  ;;  %v8961_v38 = vld [vmem:[%s19096_s3 + $0x7f0] sm:$0xf0] }
 0x1dc   :  { %v9855_v39 = vld [vmem:[%s19096_s3 + $0xed0] sm:$0xf]  ;;  %v9600_v44 = vor.u32 %v12218_v36, %v9599_v35  ;;  %3827 = vmatpush.bf16.msrb.mxu1 %v9312_v41  ;;  %v8164_v35 = vor.u32 %v11854_v16, %v8161_v22  ;;  %v12054_v36 = vld [vmem:[%s19096_s3 + $0x7d4] sm:$0xf] }
 0x1dd   :  { %v12282_v40 = vld [vmem:[%s19096_s3 + $0xeec] sm:$0xf0]  ;;  %v11846_v41 = vld [vmem:[%s19096_s3 + $0x154] sm:$0xf] }
 0x1de   :  { %v9023_v42 = vld [vmem:[%s19096_s3 + $0x850] sm:$0xf]  ;;  %v9856_v48 = vor.u32 %v12282_v40, %v9855_v39  ;;  %3839 = vmatpush.bf16.msrb.mxu2 %v9600_v44  ;;  %v8420_v39 = vor.u32 %v11918_v25, %v8417_v26  ;;  %v8609_v16 = vld [vmem:[%s19096_s3 + $0x530] sm:$0xf0] }
 0x1df   :  { %v12074_v43 = vld [vmem:[%s19096_s3 + $0x86c] sm:$0xf0]  ;;  %v12030_v25 = vld [vmem:[%s19096_s3 + $0x714] sm:$0xf] }
 0x1e0   :  { %v9279_v45 = vld [vmem:[%s19096_s3 + $0xa50] sm:$0xf]  ;;  %v9024_v53 = vor.u32 %v12074_v43, %v9023_v42  ;;  %3852 = vmatpush.bf16.msrb.mxu3 %v9856_v48  ;;  %v8129_v42 = vld [vmem:[%s19096_s3 + $0x170] sm:$0xf0]  ;;  %v3586_v43 = vpop.f32.mrf.mxu2  ;;  %v3599_v48 = vpop.f32.mrf.mxu3 }
 0x1e1   :  { %v12138_v46 = vld [vmem:[%s19096_s3 + $0xa6c] sm:$0xf0]  ;;  %v8865_v26 = vld [vmem:[%s19096_s3 + $0x730] sm:$0xf0] }
 0x1e2   :  { %v9567_v49 = vld [vmem:[%s19096_s3 + $0xc90] sm:$0xf]  ;;  %v9280_v58 = vor.u32 %v12138_v46, %v9279_v45  ;;  %3815 = vmatpush.bf16.msrb.mxu0 %v9024_v53  ;;  %v8708_v45 = vor.u32 %v11990_v32, %v8705_v34  ;;  %v11910_v46 = vld [vmem:[%s19096_s3 + $0x354] sm:$0xf]  ;;  %v8132_v53 = vor.u32 %v11846_v41, %v8129_v42  ;;  %v8868_v34 = vor.u32 %v12030_v25, %v8865_v26 }
 0x1e3   :  { %v12210_v51 = vld [vmem:[%s19096_s3 + $0xcac] sm:$0xf0]  ;;  %v8289_v32 = vld [vmem:[%s19096_s3 + $0x2b0] sm:$0xf0] }
 0x1e4   :  { %v9823_v54 = vld [vmem:[%s19096_s3 + $0xe90] sm:$0xf]  ;;  %v9568_v63 = vor.u32 %v12210_v51, %v9567_v49  ;;  %3828 = vmatpush.bf16.msrb.mxu1 %v9280_v58  ;;  %v8964_v49 = vor.u32 %v12054_v36, %v8961_v38  ;;  %v11982_v51 = vld [vmem:[%s19096_s3 + $0x594] sm:$0xf] }
 0x1e5   :  { %v12274_v56 = vld [vmem:[%s19096_s3 + $0xeac] sm:$0xf0]  ;;  %v11838_v58 = vld [vmem:[%s19096_s3 + $0x114] sm:$0xf] }
 0x1e6   :  { %v8991_v57 = vld [vmem:[%s19096_s3 + $0x810] sm:$0xf]  ;;  %v9824_v4 = vor.u32 %v12274_v56, %v9823_v54  ;;  %3840 = vmatpush.bf16.msrb.mxu2 %v9568_v63  ;;  %v12046_v54 = vld [vmem:[%s19096_s3 + $0x794] sm:$0xf] }
 0x1e7   :  { %v12066_v59 = vld [vmem:[%s19096_s3 + $0x82c] sm:$0xf0]  ;;  %v8929_v56 = vld [vmem:[%s19096_s3 + $0x7b0] sm:$0xf0] }
 0x1e8   :  { %v9247_v61 = vld [vmem:[%s19096_s3 + $0xa10] sm:$0xf]  ;;  %v8992_v10 = vor.u32 %v12066_v59, %v8991_v57  ;;  %3853 = vmatpush.bf16.msrb.mxu3 %v9824_v4  ;;  %v8388_v57 = vor.u32 %v11910_v46, %v8385_v47  ;;  %v8097_v59 = vld [vmem:[%s19096_s3 + $0x130] sm:$0xf0]  ;;  %v8932_v0 = vor.u32 %v12046_v54, %v8929_v56 }
 0x1e9   :  { %v12130_v62 = vld [vmem:[%s19096_s3 + $0xa2c] sm:$0xf0]  ;;  %v8353_v63 = vld [vmem:[%s19096_s3 + $0x330] sm:$0xf0]  ;;  %v8100_v3 = vor.u32 %v11838_v58, %v8097_v59 }
 0x1ea   :  { %v9535_v7 = vld [vmem:[%s19096_s3 + $0xc50] sm:$0xf]  ;;  %v9248_v14 = vor.u32 %v12130_v62, %v9247_v61  ;;  %3816 = vmatpush.bf16.msrb.mxu0 %v8992_v10  ;;  %v8676_v61 = vor.u32 %v11982_v51, %v8673_v52  ;;  %v11902_v62 = vld [vmem:[%s19096_s3 + $0x314] sm:$0xf] }
 0x1eb   :  { %v12202_v8 = vld [vmem:[%s19096_s3 + $0xc6c] sm:$0xf0]  ;;  %v12038_v4 = vld [vmem:[%s19096_s3 + $0x754] sm:$0xf] }
 0x1ec   :  { %v9791_v12 = vld [vmem:[%s19096_s3 + $0xe50] sm:$0xf]  ;;  %v9536_v21 = vor.u32 %v12202_v8, %v9535_v7  ;;  %3829 = vmatpush.bf16.msrb.mxu1 %v9248_v14  ;;  %v8356_v7 = vor.u32 %v11902_v62, %v8353_v63  ;;  %v11830_v8 = vld [vmem:[%s19096_s3 + $0xd4] sm:$0xf]  ;;  %v8900_v14 = vor.u32 %v12038_v4, %v8897_v5 }
 0x1ed   :  { %v12266_v13 = vld [vmem:[%s19096_s3 + $0xe6c] sm:$0xf0]  ;;  %3817 = vmatmul.bf16.vlgmr.msrb.gmra.mxu0 %v13424_v60  ;;  %v11894_v10 = vld [vmem:[%s19096_s3 + $0x2d4] sm:$0xf]  ;;  %v8068_v22 = vor.u32 %v11830_v8, %v8065_v30 }
 0x1ee   :  { %v9792_v23 = vor.u32 %v12266_v13, %v9791_v12  ;;  %v9503_v27 = vld [vmem:[%s19096_s3 + $0xc10] sm:$0xf]  ;;  %3861 = vmatpush.bf16.msra.mxu0 %v8196_v15  ;;  %3841 = vmatpush.bf16.msrb.mxu2 %v9536_v21  ;;  %v8321_v12 = vld [vmem:[%s19096_s3 + $0x2f0] sm:$0xf0]  ;;  %v3610_v13 = vpop.f32.mrf.mxu0  ;;  %v3623_v21 = vpop.f32.mrf.mxu1 }
 0x1ef   :  { %v12194_v28 = vld [vmem:[%s19096_s3 + $0xc2c] sm:$0xf0]  ;;  %3830 = vmatmul.bf16.vlgmr.msrb.gmra.mxu1 %v13435_v2  ;;  %v11966_v15 = vld [vmem:[%s19096_s3 + $0x514] sm:$0xf] }
 0x1f0   :  { %v9759_v29 = vld [vmem:[%s19096_s3 + $0xe10] sm:$0xf]  ;;  %3874 = vmatpush.bf16.msra.mxu1 %v8452_v20  ;;  %v9504_v40 = vor.u32 %v12194_v28, %v9503_v27  ;;  %3854 = vmatpush.bf16.msrb.mxu3 %v9792_v23  ;;  %v3611_v20 = vadd.f32 %v3610_v13, %v14916_v19  ;;  %v8324_v23 = vor.u32 %v11894_v10, %v8321_v12  ;;  %v11822_v27 = vld [vmem:[%s19096_s3 + $0x94] sm:$0xf] }
 0x1f1   :  { %v12258_v11 = vld [vmem:[%s19096_s3 + $0xe2c] sm:$0xf0]  ;;  %v8033_v19 = vld [vmem:[%s19096_s3 + $0xb0] sm:$0xf0] }
 0x1f2   :  { %v9760_v44 = vor.u32 %v12258_v11, %v9759_v29  ;;  %3862 = vmatpush.bf16.msra.mxu0 %v8164_v35  ;;  %3842 = vmatpush.bf16.msrb.mxu2 %v9504_v40  ;;  %v3624_v28 = vadd.f32 %v3623_v21, %v3611_v20  ;;  %v8612_v29 = vor.u32 %v11966_v15, %v8609_v16  ;;  %v11886_v11 = vld [vmem:[%s19096_s3 + $0x294] sm:$0xf] }
 0x1f3   :  { %v11958_v35 = vld [vmem:[%s19096_s3 + $0x4d4] sm:$0xf]  ;;  %v8036_v38 = vor.u32 %v11822_v27, %v8033_v19  ;;  %v8292_v41 = vor.u32 %v11886_v11, %v8289_v32 }
 0x1f4   :  { %3875 = vmatpush.bf16.msra.mxu1 %v8420_v39  ;;  %3855 = vmatpush.bf16.msrb.mxu3 %v9760_v44  ;;  %v8577_v36 = vld [vmem:[%s19096_s3 + $0x4f0] sm:$0xf0] }
 0x1f5   :  { %3843 = vmatmul.bf16.vlgmr.msrb.gmra.mxu2 %v13472_v31  ;;  %v12022_v39 = vld [vmem:[%s19096_s3 + $0x6d4] sm:$0xf]  ;;  %v8580_v44 = vor.u32 %v11958_v35, %v8577_v36 }
 0x1f6   :  { %3887 = vmatpush.bf16.msra.mxu2 %v8708_v45  ;;  %3863 = vmatpush.bf16.msra.mxu0 %v8132_v53  ;;  %v8833_v40 = vld [vmem:[%s19096_s3 + $0x6f0] sm:$0xf0]  ;;  %v3612_v47 = vpop.f32.mrf.mxu0  ;;  %v3625_v52 = vpop.f32.mrf.mxu1 }
 0x1f7   :  { %3856 = vmatmul.bf16.vlgmr.msrb.gmra.mxu3 %v13483_v37  ;;  %v11814_v42 = vld [vmem:[%s19096_s3 + $0x54] sm:$0xf]  ;;  %v8836_v48 = vor.u32 %v12022_v39, %v8833_v40 }
 0x1f8   :  { %3900 = vmatpush.bf16.msra.mxu3 %v8964_v49  ;;  %3876 = vmatpush.bf16.msra.mxu1 %v8388_v57  ;;  %v8001_v43 = vld [vmem:[%s19096_s3 + $0x70] sm:$0xf0] }
 0x1f9   :  { %v11878_v45 = vld [vmem:[%s19096_s3 + $0x254] sm:$0xf]  ;;  %v8004_v53 = vor.u32 %v11814_v42, %v8001_v43 }
 0x1fa   :  { %3888 = vmatpush.bf16.msra.mxu2 %v8676_v61  ;;  %3864 = vmatpush.bf16.msra.mxu0 %v8100_v3  ;;  %v8257_v46 = vld [vmem:[%s19096_s3 + $0x270] sm:$0xf0]  ;;  %v3636_v3 = vpop.f32.mrf.mxu2 }
 0x1fb   :  { %v11950_v49 = vld [vmem:[%s19096_s3 + $0x494] sm:$0xf]  ;;  %v8260_v58 = vor.u32 %v11878_v45, %v8257_v46  ;;  %v3637_v30 = vadd.f32 %v3636_v3, %v3624_v28  ;;  %v15198_v3 = vld [vmem:[%s19098_s4] sm:$0xff] }
 0x1fc   :  { %3901 = vmatpush.bf16.msra.mxu3 %v8932_v0  ;;  %3877 = vmatpush.bf16.msra.mxu1 %v8356_v7  ;;  %v8545_v51 = vld [vmem:[%s19096_s3 + $0x4b0] sm:$0xf0] }
 0x1fd   :  { %v12014_v54 = vld [vmem:[%s19096_s3 + $0x694] sm:$0xf]  ;;  %v8548_v63 = vor.u32 %v11950_v49, %v8545_v51 }
 0x1fe   :  { %3889 = vmatpush.bf16.msra.mxu2 %v8644_v9  ;;  %3865 = vmatpush.bf16.msra.mxu0 %v8068_v22  ;;  %v8801_v56 = vld [vmem:[%s19096_s3 + $0x6b0] sm:$0xf0]  ;;  %v3649_v9 = vpop.f32.mrf.mxu3 }
 0x1ff   :  { %v11806_v57 = vld [vmem:[%s19096_s3 + $0x14] sm:$0xf]  ;;  %v8804_v4 = vor.u32 %v12014_v54, %v8801_v56  ;;  %v15115_v20 = vadd.f32 %v3649_v9, %v3637_v30 }
 0x200   :  { %3902 = vmatpush.bf16.msra.mxu3 %v8900_v14  ;;  %3878 = vmatpush.bf16.msra.mxu1 %v8324_v23  ;;  %v7969_v59 = vld [vmem:[%s19096_s3 + $0x30] sm:$0xf0] }
 0x201   :  { %v11870_v61 = vld [vmem:[%s19096_s3 + $0x214] sm:$0xf]  ;;  %v7972_v10 = vor.u32 %v11806_v57, %v7969_v59  ;;  %vm4175_vm12 = vcmp.gt.f32.partialorder %v15115_v20, 0.0 }
 0x202   :  { %3890 = vmatpush.bf16.msra.mxu2 %v8612_v29  ;;  %3866 = vmatpush.bf16.msra.mxu0 %v8036_v38  ;;  %v8225_v62 = vld [vmem:[%s19096_s3 + $0x230] sm:$0xf0]  ;;  %v3638_v43 = vpop.f32.mrf.mxu2 }
 0x203   :  { %v12118_v0 = vld [vmem:[%s19096_s3 + $0x9d4] sm:$0xf]  ;;  %v8228_v14 = vor.u32 %v11870_v61, %v8225_v62 }
 0x204   :  { %3903 = vmatpush.bf16.msra.mxu3 %v8868_v34  ;;  %3879 = vmatpush.bf16.msra.mxu1 %v8292_v41  ;;  %v9217_v33 = vld [vmem:[%s19096_s3 + $0x9f0] sm:$0xf0] }
 0x205   :  { %v12182_v1 = vld [vmem:[%s19096_s3 + $0xbd4] sm:$0xf]  ;;  %v9220_v15 = vor.u32 %v12118_v0, %v9217_v33 }
 0x206   :  { %3891 = vmatpush.bf16.msra.mxu2 %v8580_v44  ;;  %v9473_v5 = vld [vmem:[%s19096_s3 + $0xbf0] sm:$0xf0]  ;;  %3867 = vmatpush.bf16.msra.mxu0 %v8004_v53 }
 0x207   :  { %v11942_v7 = vld [vmem:[%s19096_s3 + $0x454] sm:$0xf]  ;;  %v9476_v21 = vor.u32 %v12182_v1, %v9473_v5 }
 0x208   :  { %3904 = vmatpush.bf16.msra.mxu3 %v8836_v48  ;;  %v8513_v8 = vld [vmem:[%s19096_s3 + $0x470] sm:$0xf0]  ;;  %3880 = vmatpush.bf16.msra.mxu1 %v8260_v58  ;;  %v3651_v48 = vpop.f32.mrf.mxu3 }
 0x209   :  { %v12006_v12 = vld [vmem:[%s19096_s3 + $0x654] sm:$0xf]  ;;  %v8516_v22 = vor.u32 %v11942_v7, %v8513_v8 }
 0x20a   :  { %v8769_v13 = vld [vmem:[%s19096_s3 + $0x670] sm:$0xf0]  ;;  %3892 = vmatpush.bf16.msra.mxu2 %v8548_v63  ;;  %3868 = vmatpush.bf16.msra.mxu0 %v7972_v10 }
 0x20b   :  { %v12110_v16 = vld [vmem:[%s19096_s3 + $0x994] sm:$0xf]  ;;  %v8772_v27 = vor.u32 %v12006_v12, %v8769_v13 }
 0x20c   :  { %v9185_v25 = vld [vmem:[%s19096_s3 + $0x9b0] sm:$0xf0]  ;;  %3905 = vmatpush.bf16.msra.mxu3 %v8804_v4  ;;  %3881 = vmatpush.bf16.msra.mxu1 %v8228_v14  ;;  %v768_v4 = vperm.slane %v15198_v3, 3 }
 0x20d   :  { %v12174_v26 = vld [vmem:[%s19096_s3 + $0xb94] sm:$0xf]  ;;  %v9188_v35 = vor.u32 %v12110_v16, %v9185_v25  ;;  %3869 = vmatmul.bf16.vlgmr.msra.gmra.mxu0 %v13318_v50 }
 0x20e   :  { %v9441_v23 = vld [vmem:[%s19096_s3 + $0xbb0] sm:$0xf0]  ;;  %3913 = vmatpush.bf16.msrb.mxu0 %v9220_v15  ;;  %3893 = vmatpush.bf16.msra.mxu2 %v8516_v22  ;;  %v3662_v15 = vpop.f32.mrf.mxu0 }
 0x20f   :  { %v11934_v19 = vld [vmem:[%s19096_s3 + $0x414] sm:$0xf]  ;;  %v9444_v39 = vor.u32 %v12174_v26, %v9441_v23  ;;  %3882 = vmatmul.bf16.vlgmr.msra.gmra.mxu1 %v13326_v55  ;;  %v3663_v25 = vadd.f32 %v3662_v15, %v768_v4  ;;  %v3675_v26 = vpop.f32.mrf.mxu1  ;;  %v8199_v4 = vld [vmem:[%s19096_s3 + $0x1d8] sm:$0xf] }
 0x210   :  { %v8481_v28 = vld [vmem:[%s19096_s3 + $0x430] sm:$0xf0]  ;;  %3926 = vmatpush.bf16.msrb.mxu1 %v9476_v21  ;;  %3906 = vmatpush.bf16.msra.mxu3 %v8772_v27 }
 0x211   :  { %v11998_v29 = vld [vmem:[%s19096_s3 + $0x614] sm:$0xf]  ;;  %v8484_v40 = vor.u32 %v11934_v19, %v8481_v28 }
 0x212   :  { %v8737_v11 = vld [vmem:[%s19096_s3 + $0x630] sm:$0xf0]  ;;  %3914 = vmatpush.bf16.msrb.mxu0 %v9188_v35 }
 0x213   :  { %v12246_v32 = vld [vmem:[%s19096_s3 + $0xdd4] sm:$0xf]  ;;  %v8740_v44 = vor.u32 %v11998_v29, %v8737_v11  ;;  %3894 = vmatpush.bf16.msra.mxu2 %v8484_v40 }
 0x214   :  { %v9729_v34 = vld [vmem:[%s19096_s3 + $0xdf0] sm:$0xf0]  ;;  %3927 = vmatpush.bf16.msrb.mxu1 %v9444_v39 }
 0x215   :  { %v12310_v36 = vld [vmem:[%s19096_s3 + $0xfd4] sm:$0xf]  ;;  %v9732_v45 = vor.u32 %v12246_v32, %v9729_v34  ;;  %3907 = vmatpush.bf16.msra.mxu3 %v8740_v44  ;;  %v3676_v32 = vadd.f32 %v3675_v26, %v3663_v25  ;;  %v8167_v26 = vld [vmem:[%s19096_s3 + $0x198] sm:$0xf] }
 0x216   :  { %v9985_v38 = vld [vmem:[%s19096_s3 + $0xff0] sm:$0xf0]  ;;  %3895 = vmatmul.bf16.vlgmr.msra.gmra.mxu2 %v13362_v17 }
 0x217   :  { %v12102_v41 = vld [vmem:[%s19096_s3 + $0x954] sm:$0xf]  ;;  %v9988_v49 = vor.u32 %v12310_v36, %v9985_v38  ;;  %3939 = vmatpush.bf16.msrb.mxu2 %v9732_v45 }
 0x218   :  { %v9153_v42 = vld [vmem:[%s19096_s3 + $0x970] sm:$0xf0]  ;;  %3908 = vmatmul.bf16.vlgmr.msra.gmra.mxu3 %v13373_v24 }
 0x219   :  { %v12166_v46 = vld [vmem:[%s19096_s3 + $0xb54] sm:$0xf]  ;;  %v9156_v53 = vor.u32 %v12102_v41, %v9153_v42  ;;  %3952 = vmatpush.bf16.msrb.mxu3 %v9988_v49 }
 0x21a   :  { %v9409_v47 = vld [vmem:[%s19096_s3 + $0xb70] sm:$0xf0] }
 0x21b   :  { %v12238_v51 = vld [vmem:[%s19096_s3 + $0xd94] sm:$0xf]  ;;  %v9412_v57 = vor.u32 %v12166_v46, %v9409_v47  ;;  %3915 = vmatpush.bf16.msrb.mxu0 %v9156_v53 }
 0x21c   :  { %v9697_v52 = vld [vmem:[%s19096_s3 + $0xdb0] sm:$0xf0] }
 0x21d   :  { %v12302_v54 = vld [vmem:[%s19096_s3 + $0xf94] sm:$0xf]  ;;  %v9700_v61 = vor.u32 %v12238_v51, %v9697_v52  ;;  %3928 = vmatpush.bf16.msrb.mxu1 %v9412_v57  ;;  %v3664_v51 = vpop.f32.mrf.mxu0 }
 0x21e   :  { %v9953_v56 = vld [vmem:[%s19096_s3 + $0xfb0] sm:$0xf0] }
 0x21f   :  { %v12094_v58 = vld [vmem:[%s19096_s3 + $0x914] sm:$0xf]  ;;  %v9956_v0 = vor.u32 %v12302_v54, %v9953_v56  ;;  %3940 = vmatpush.bf16.msrb.mxu2 %v9700_v61  ;;  %v3677_v56 = vpop.f32.mrf.mxu1 }
 0x220   :  { %v9121_v59 = vld [vmem:[%s19096_s3 + $0x930] sm:$0xf0] }
 0x221   :  { %v12158_v62 = vld [vmem:[%s19096_s3 + $0xb14] sm:$0xf]  ;;  %v9124_v5 = vor.u32 %v12094_v58, %v9121_v59  ;;  %3953 = vmatpush.bf16.msrb.mxu3 %v9956_v0 }
 0x222   :  { %v9377_v63 = vld [vmem:[%s19096_s3 + $0xb30] sm:$0xf0] }
 0x223   :  { %v12230_v33 = vld [vmem:[%s19096_s3 + $0xd54] sm:$0xf]  ;;  %v9380_v30 = vor.u32 %v12158_v62, %v9377_v63  ;;  %3916 = vmatpush.bf16.msrb.mxu0 %v9124_v5  ;;  %v11867_v5 = vld [vmem:[%s19096_s3 + $0x1f4] sm:$0xf0] }
 0x224   :  { %v9665_v1 = vld [vmem:[%s19096_s3 + $0xd70] sm:$0xf0]  ;;  %v8200_v25 = vor.u32 %v11867_v5, %v8199_v4  ;;  %v8359_v4 = vld [vmem:[%s19096_s3 + $0x318] sm:$0xf] }
 0x225   :  { %v12294_v7 = vld [vmem:[%s19096_s3 + $0xf54] sm:$0xf]  ;;  %v9668_v12 = vor.u32 %v12230_v33, %v9665_v1  ;;  %3929 = vmatpush.bf16.msrb.mxu1 %v9380_v30  ;;  %v11907_v5 = vld [vmem:[%s19096_s3 + $0x334] sm:$0xf0] }
 0x226   :  { %v9921_v8 = vld [vmem:[%s19096_s3 + $0xf70] sm:$0xf0] }
 0x227   :  { %v12086_v9 = vld [vmem:[%s19096_s3 + $0x8d4] sm:$0xf]  ;;  %v9924_v16 = vor.u32 %v12294_v7, %v9921_v8  ;;  %3941 = vmatpush.bf16.msrb.mxu2 %v9668_v12  ;;  %v8455_v7 = vld [vmem:[%s19096_s3 + $0x3d8] sm:$0xf]  ;;  %v3688_v8 = vpop.f32.mrf.mxu2 }
 0x228   :  { %v9089_v10 = vld [vmem:[%s19096_s3 + $0x8f0] sm:$0xf0] }
 0x229   :  { %v12150_v13 = vld [vmem:[%s19096_s3 + $0xad4] sm:$0xf]  ;;  %v9092_v23 = vor.u32 %v12086_v9, %v9089_v10  ;;  %3954 = vmatpush.bf16.msrb.mxu3 %v9924_v16  ;;  %v11931_v9 = vld [vmem:[%s19096_s3 + $0x3f4] sm:$0xf0] }
 0x22a   :  { %v9345_v14 = vld [vmem:[%s19096_s3 + $0xaf0] sm:$0xf0] }
 0x22b   :  { %v12222_v21 = vld [vmem:[%s19096_s3 + $0xd14] sm:$0xf]  ;;  %v9348_v28 = vor.u32 %v12150_v13, %v9345_v14  ;;  %3917 = vmatpush.bf16.msrb.mxu0 %v9092_v23  ;;  %v3689_v13 = vadd.f32 %v3688_v8, %v3676_v32  ;;  %v3701_v14 = vpop.f32.mrf.mxu3  ;;  %v8647_v8 = vld [vmem:[%s19096_s3 + $0x558] sm:$0xf] }
 0x22c   :  { %v9633_v22 = vld [vmem:[%s19096_s3 + $0xd30] sm:$0xf0] }
 0x22d   :  { %v12286_v27 = vld [vmem:[%s19096_s3 + $0xf14] sm:$0xf]  ;;  %v9636_v34 = vor.u32 %v12222_v21, %v9633_v22  ;;  %3930 = vmatpush.bf16.msrb.mxu1 %v9348_v28  ;;  %v15319_v23 = vadd.f32 %v3701_v14, %v3689_v13  ;;  %v11859_v28 = vld [vmem:[%s19096_s3 + $0x1b4] sm:$0xf0]  ;;  %v8360_v13 = vor.u32 %v11907_v5, %v8359_v4 }
 0x22e   :  { %v9889_v19 = vld [vmem:[%s19096_s3 + $0xf30] sm:$0xf0]  ;;  %v8071_v14 = vld [vmem:[%s19096_s3 + $0xd8] sm:$0xf] }
 0x22f   :  { %v12078_v29 = vld [vmem:[%s19096_s3 + $0x894] sm:$0xf]  ;;  %v9892_v38 = vor.u32 %v12286_v27, %v9889_v19  ;;  %3942 = vmatpush.bf16.msrb.mxu2 %v9636_v34  ;;  %v8456_v27 = vor.u32 %v11931_v9, %v8455_v7  ;;  %v11811_v4 = vld [vmem:[%s19096_s3 + $0x34] sm:$0xf0] }
 0x230   :  { %v9057_v11 = vld [vmem:[%s19096_s3 + $0x8b0] sm:$0xf0]  ;;  %v8231_v5 = vld [vmem:[%s19096_s3 + $0x218] sm:$0xf] }
 0x231   :  { %v12142_v35 = vld [vmem:[%s19096_s3 + $0xa94] sm:$0xf]  ;;  %v9060_v41 = vor.u32 %v12078_v29, %v9057_v11  ;;  %3955 = vmatpush.bf16.msrb.mxu3 %v9892_v38  ;;  %v8423_v29 = vld [vmem:[%s19096_s3 + $0x398] sm:$0xf] }
 0x232   :  { %v9313_v36 = vld [vmem:[%s19096_s3 + $0xab0] sm:$0xf0]  ;;  %v11923_v11 = vld [vmem:[%s19096_s3 + $0x3b4] sm:$0xf0] }
 0x233   :  { %v12214_v39 = vld [vmem:[%s19096_s3 + $0xcd4] sm:$0xf]  ;;  %v9316_v44 = vor.u32 %v12142_v35, %v9313_v36  ;;  %3918 = vmatpush.bf16.msrb.mxu0 %v9060_v41  ;;  %v8168_v41 = vor.u32 %v11859_v28, %v8167_v26 }
 0x234   :  { %v9601_v40 = vld [vmem:[%s19096_s3 + $0xcf0] sm:$0xf0] }
 0x235   :  { %v12278_v42 = vld [vmem:[%s19096_s3 + $0xed4] sm:$0xf]  ;;  %v9604_v47 = vor.u32 %v12214_v39, %v9601_v40  ;;  %3931 = vmatpush.bf16.msrb.mxu1 %v9316_v44  ;;  %v8711_v39 = vld [vmem:[%s19096_s3 + $0x5d8] sm:$0xf]  ;;  %v8424_v44 = vor.u32 %v11923_v11, %v8423_v29  ;;  %v3727_v29 = vpop.f32.mrf.mxu1 }
 0x236   :  { %v9857_v43 = vld [vmem:[%s19096_s3 + $0xef0] sm:$0xf0]  ;;  %v11995_v40 = vld [vmem:[%s19096_s3 + $0x5f4] sm:$0xf0] }
 0x237   :  { %v12070_v45 = vld [vmem:[%s19096_s3 + $0x854] sm:$0xf]  ;;  %v9860_v52 = vor.u32 %v12278_v42, %v9857_v43  ;;  %3943 = vmatpush.bf16.msrb.mxu2 %v9604_v47  ;;  %v8967_v42 = vld [vmem:[%s19096_s3 + $0x7d8] sm:$0xf]  ;;  %v8712_v51 = vor.u32 %v11995_v40, %v8711_v39 }
 0x238   :  { %v9025_v46 = vld [vmem:[%s19096_s3 + $0x870] sm:$0xf0]  ;;  %v12059_v43 = vld [vmem:[%s19096_s3 + $0x7f4] sm:$0xf0] }
 0x239   :  { %v12134_v48 = vld [vmem:[%s19096_s3 + $0xa54] sm:$0xf]  ;;  %v9028_v57 = vor.u32 %v12070_v45, %v9025_v46  ;;  %3956 = vmatpush.bf16.msrb.mxu3 %v9860_v52  ;;  %v8135_v46 = vld [vmem:[%s19096_s3 + $0x158] sm:$0xf]  ;;  %v8968_v56 = vor.u32 %v12059_v43, %v8967_v42 }
 0x23a   :  { %v9281_v49 = vld [vmem:[%s19096_s3 + $0xa70] sm:$0xf0]  ;;  %v11851_v47 = vld [vmem:[%s19096_s3 + $0x174] sm:$0xf0] }
 0x23b   :  { %v12206_v53 = vld [vmem:[%s19096_s3 + $0xc94] sm:$0xf]  ;;  %v9284_v62 = vor.u32 %v12134_v48, %v9281_v49  ;;  %3919 = vmatpush.bf16.msrb.mxu0 %v9028_v57  ;;  %v3690_v48 = vpop.f32.mrf.mxu2  ;;  %v8391_v52 = vld [vmem:[%s19096_s3 + $0x358] sm:$0xf] }
 0x23c   :  { %v9569_v54 = vld [vmem:[%s19096_s3 + $0xcb0] sm:$0xf0]  ;;  %v8679_v57 = vld [vmem:[%s19096_s3 + $0x598] sm:$0xf] }
 0x23d   :  { %v12270_v58 = vld [vmem:[%s19096_s3 + $0xe94] sm:$0xf]  ;;  %v9572_v1 = vor.u32 %v12206_v53, %v9569_v54  ;;  %3932 = vmatpush.bf16.msrb.mxu1 %v9284_v62  ;;  %v11915_v53 = vld [vmem:[%s19096_s3 + $0x374] sm:$0xf0]  ;;  %v3703_v54 = vpop.f32.mrf.mxu3 }
 0x23e   :  { %v9825_v59 = vld [vmem:[%s19096_s3 + $0xeb0] sm:$0xf0]  ;;  %v12051_v62 = vld [vmem:[%s19096_s3 + $0x7b4] sm:$0xf0] }
 0x23f   :  { %v12062_v61 = vld [vmem:[%s19096_s3 + $0x814] sm:$0xf]  ;;  %v9828_v30 = vor.u32 %v12270_v58, %v9825_v59  ;;  %3944 = vmatpush.bf16.msrb.mxu2 %v9572_v1  ;;  %v11987_v58 = vld [vmem:[%s19096_s3 + $0x5b4] sm:$0xf0]  ;;  %v8136_v59 = vor.u32 %v11851_v47, %v8135_v46 }
 0x240   :  { %v8993_v63 = vld [vmem:[%s19096_s3 + $0x830] sm:$0xf0]  ;;  %v8680_v1 = vor.u32 %v11987_v58, %v8679_v57  ;;  %v8295_v40 = vld [vmem:[%s19096_s3 + $0x298] sm:$0xf] }
 0x241   :  { %v12126_v0 = vld [vmem:[%s19096_s3 + $0xa14] sm:$0xf]  ;;  %v8996_v15 = vor.u32 %v12062_v61, %v8993_v63  ;;  %3957 = vmatpush.bf16.msrb.mxu3 %v9828_v30  ;;  %v8935_v61 = vld [vmem:[%s19096_s3 + $0x798] sm:$0xf]  ;;  %v8392_v63 = vor.u32 %v11915_v53, %v8391_v52 }
 0x242   :  { %v9249_v33 = vld [vmem:[%s19096_s3 + $0xa30] sm:$0xf0]  ;;  %v8936_v7 = vor.u32 %v12051_v62, %v8935_v61  ;;  %v11979_v30 = vld [vmem:[%s19096_s3 + $0x574] sm:$0xf0]  ;;  %v3729_v61 = vpop.f32.mrf.mxu1 }
 0x243   :  { %v12198_v10 = vld [vmem:[%s19096_s3 + $0xc54] sm:$0xf]  ;;  %v9252_v22 = vor.u32 %v12126_v0, %v9249_v33  ;;  %3920 = vmatpush.bf16.msrb.mxu0 %v8996_v15  ;;  %v8103_v0 = vld [vmem:[%s19096_s3 + $0x118] sm:$0xf] }
 0x244   :  { %v9537_v12 = vld [vmem:[%s19096_s3 + $0xc70] sm:$0xf0]  ;;  %v11843_v33 = vld [vmem:[%s19096_s3 + $0x134] sm:$0xf0] }
 0x245   :  { %v12262_v16 = vld [vmem:[%s19096_s3 + $0xe54] sm:$0xf]  ;;  %v9540_v19 = vor.u32 %v12198_v10, %v9537_v12  ;;  %3933 = vmatpush.bf16.msrb.mxu1 %v9252_v22  ;;  %v8104_v9 = vor.u32 %v11843_v33, %v8103_v0  ;;  %v8903_v10 = vld [vmem:[%s19096_s3 + $0x758] sm:$0xf] }
 0x246   :  { %v9793_v21 = vld [vmem:[%s19096_s3 + $0xe70] sm:$0xf0]  ;;  %3921 = vmatmul.bf16.vlgmr.msrb.gmra.mxu0 %v13424_v60  ;;  %v12043_v12 = vld [vmem:[%s19096_s3 + $0x774] sm:$0xf0] }
 0x247   :  { %v9796_v32 = vor.u32 %v12262_v16, %v9793_v21  ;;  %v12190_v34 = vld [vmem:[%s19096_s3 + $0xc14] sm:$0xf]  ;;  %3965 = vmatpush.bf16.msra.mxu0 %v8200_v25  ;;  %3945 = vmatpush.bf16.msrb.mxu2 %v9540_v19  ;;  %v11835_v15 = vld [vmem:[%s19096_s3 + $0xf4] sm:$0xf0]  ;;  %v8648_v16 = vor.u32 %v11979_v30, %v8647_v8  ;;  %v3714_v25 = vpop.f32.mrf.mxu0  ;;  %v8904_v26 = vor.u32 %v12043_v12, %v8903_v10  ;;  %v3740_v12 = vpop.f32.mrf.mxu2 }
 0x248   :  { %v9505_v35 = vld [vmem:[%s19096_s3 + $0xc30] sm:$0xf0]  ;;  %3934 = vmatmul.bf16.vlgmr.msrb.gmra.mxu1 %v13435_v2  ;;  %v8327_v21 = vld [vmem:[%s19096_s3 + $0x2d8] sm:$0xf]  ;;  %v3715_v28 = vadd.f32 %v3714_v25, %v15319_v23  ;;  %v8072_v11 = vor.u32 %v11835_v15, %v8071_v14 }
 0x249   :  { %v12254_v36 = vld [vmem:[%s19096_s3 + $0xe14] sm:$0xf]  ;;  %3978 = vmatpush.bf16.msra.mxu1 %v8456_v27  ;;  %v9508_v45 = vor.u32 %v12190_v34, %v9505_v35  ;;  %3958 = vmatpush.bf16.msrb.mxu3 %v9796_v32  ;;  %v11899_v22 = vld [vmem:[%s19096_s3 + $0x2f4] sm:$0xf0] }
 0x24a   :  { %v9761_v38 = vld [vmem:[%s19096_s3 + $0xe30] sm:$0xf0]  ;;  %v8615_v27 = vld [vmem:[%s19096_s3 + $0x518] sm:$0xf]  ;;  %v8328_v35 = vor.u32 %v11899_v22, %v8327_v21  ;;  %v3753_v22 = vpop.f32.mrf.mxu3 }
 0x24b   :  { %v9764_v49 = vor.u32 %v12254_v36, %v9761_v38  ;;  %3966 = vmatpush.bf16.msra.mxu0 %v8168_v41  ;;  %3946 = vmatpush.bf16.msrb.mxu2 %v9508_v45  ;;  %v11971_v19 = vld [vmem:[%s19096_s3 + $0x534] sm:$0xf0]  ;;  %v3728_v38 = vadd.f32 %v3727_v29, %v3715_v28 }
 0x24c   :  { %v8871_v32 = vld [vmem:[%s19096_s3 + $0x718] sm:$0xf]  ;;  %v8616_v39 = vor.u32 %v11971_v19, %v8615_v27 }
 0x24d   :  { %3979 = vmatpush.bf16.msra.mxu1 %v8424_v44  ;;  %3959 = vmatpush.bf16.msrb.mxu3 %v9764_v49  ;;  %v12035_v34 = vld [vmem:[%s19096_s3 + $0x734] sm:$0xf0]  ;;  %v3741_v21 = vadd.f32 %v3740_v12, %v3728_v38 }
 0x24e   :  { %3947 = vmatmul.bf16.vlgmr.msrb.gmra.mxu2 %v13472_v31  ;;  %v8039_v36 = vld [vmem:[%s19096_s3 + $0x98] sm:$0xf]  ;;  %v8872_v42 = vor.u32 %v12035_v34, %v8871_v32 }
 0x24f   :  { %3991 = vmatpush.bf16.msra.mxu2 %v8712_v51  ;;  %3967 = vmatpush.bf16.msra.mxu0 %v8136_v59  ;;  %v11827_v23 = vld [vmem:[%s19096_s3 + $0xb4] sm:$0xf0] }
 0x250   :  { %3960 = vmatmul.bf16.vlgmr.msrb.gmra.mxu3 %v13483_v37  ;;  %v11891_v41 = vld [vmem:[%s19096_s3 + $0x2b4] sm:$0xf0]  ;;  %v8040_v45 = vor.u32 %v11827_v23, %v8039_v36 }
 0x251   :  { %4004 = vmatpush.bf16.msra.mxu3 %v8968_v56  ;;  %3980 = vmatpush.bf16.msra.mxu1 %v8392_v63  ;;  %v8583_v43 = vld [vmem:[%s19096_s3 + $0x4d8] sm:$0xf]  ;;  %v8296_v48 = vor.u32 %v11891_v41, %v8295_v40  ;;  %v3716_v56 = vpop.f32.mrf.mxu0 }
 0x252   :  { %v11963_v44 = vld [vmem:[%s19096_s3 + $0x4f4] sm:$0xf0] }
 0x253   :  { %3992 = vmatpush.bf16.msra.mxu2 %v8680_v1  ;;  %3968 = vmatpush.bf16.msra.mxu0 %v8104_v9  ;;  %v8839_v46 = vld [vmem:[%s19096_s3 + $0x6d8] sm:$0xf]  ;;  %v8584_v52 = vor.u32 %v11963_v44, %v8583_v43 }
 0x254   :  { %v12027_v47 = vld [vmem:[%s19096_s3 + $0x6f4] sm:$0xf0] }
 0x255   :  { %4005 = vmatpush.bf16.msra.mxu3 %v8936_v7  ;;  %3981 = vmatpush.bf16.msra.mxu1 %v8360_v13  ;;  %v8007_v49 = vld [vmem:[%s19096_s3 + $0x58] sm:$0xf]  ;;  %v8840_v57 = vor.u32 %v12027_v47, %v8839_v46 }
 0x256   :  { %v11819_v51 = vld [vmem:[%s19096_s3 + $0x74] sm:$0xf0] }
 0x257   :  { %3993 = vmatpush.bf16.msra.mxu2 %v8648_v16  ;;  %3969 = vmatpush.bf16.msra.mxu0 %v8072_v11  ;;  %v8263_v53 = vld [vmem:[%s19096_s3 + $0x258] sm:$0xf]  ;;  %v8008_v62 = vor.u32 %v11819_v51, %v8007_v49  ;;  %v15518_v11 = vadd.f32 %v3753_v22, %v3741_v21 }
 0x258   :  { %v11883_v54 = vld [vmem:[%s19096_s3 + $0x274] sm:$0xf0] }
 0x259   :  { %4006 = vmatpush.bf16.msra.mxu3 %v8904_v26  ;;  %3982 = vmatpush.bf16.msra.mxu1 %v8328_v35  ;;  %v8551_v58 = vld [vmem:[%s19096_s3 + $0x498] sm:$0xf]  ;;  %v8264_v1 = vor.u32 %v11883_v54, %v8263_v53  ;;  %v3742_v53 = vpop.f32.mrf.mxu2  ;;  %vm4176_vm13 = vcmp.gt.f32.partialorder %v15518_v11, 0.0 }
 0x25a   :  { %v11955_v59 = vld [vmem:[%s19096_s3 + $0x4b4] sm:$0xf0] }
 0x25b   :  { %3994 = vmatpush.bf16.msra.mxu2 %v8616_v39  ;;  %3970 = vmatpush.bf16.msra.mxu0 %v8040_v45  ;;  %v8807_v63 = vld [vmem:[%s19096_s3 + $0x698] sm:$0xf]  ;;  %v8552_v8 = vor.u32 %v11955_v59, %v8551_v58  ;;  %v3755_v59 = vpop.f32.mrf.mxu3 }
 0x25c   :  { %v12019_v0 = vld [vmem:[%s19096_s3 + $0x6b4] sm:$0xf0] }
 0x25d   :  { %4007 = vmatpush.bf16.msra.mxu3 %v8872_v42  ;;  %v7975_v33 = vld [vmem:[%s19096_s3 + $0x18] sm:$0xf]  ;;  %3983 = vmatpush.bf16.msra.mxu1 %v8296_v48  ;;  %v8808_v13 = vor.u32 %v12019_v0, %v8807_v63 }
 0x25e   :  { %v11875_v7 = vld [vmem:[%s19096_s3 + $0x234] sm:$0xf0]  ;;  %v7976_v25 = vor.u32 %v11811_v4, %v7975_v33 }
 0x25f   :  { %3995 = vmatpush.bf16.msra.mxu2 %v8584_v52  ;;  %v9223_v30 = vld [vmem:[%s19096_s3 + $0x9d8] sm:$0xf]  ;;  %3971 = vmatpush.bf16.msra.mxu0 %v8008_v62  ;;  %v8232_v19 = vor.u32 %v11875_v7, %v8231_v5 }
 0x260   :  { %v12123_v9 = vld [vmem:[%s19096_s3 + $0x9f4] sm:$0xf0] }
 0x261   :  { %v9479_v10 = vld [vmem:[%s19096_s3 + $0xbd8] sm:$0xf]  ;;  %4008 = vmatpush.bf16.msra.mxu3 %v8840_v57  ;;  %3984 = vmatpush.bf16.msra.mxu1 %v8264_v1  ;;  %v9224_v28 = vor.u32 %v12123_v9, %v9223_v30 }
 0x262   :  { %v12187_v14 = vld [vmem:[%s19096_s3 + $0xbf4] sm:$0xf0] }
 0x263   :  { %v8519_v15 = vld [vmem:[%s19096_s3 + $0x458] sm:$0xf]  ;;  %3996 = vmatpush.bf16.msra.mxu2 %v8552_v8  ;;  %v9480_v32 = vor.u32 %v12187_v14, %v9479_v10  ;;  %3972 = vmatpush.bf16.msra.mxu0 %v7976_v25  ;;  %v769_v14 = vperm.slane %v15198_v3, 4 }
 0x264   :  { %v11947_v16 = vld [vmem:[%s19096_s3 + $0x474] sm:$0xf0] }
 0x265   :  { %v8775_v26 = vld [vmem:[%s19096_s3 + $0x658] sm:$0xf]  ;;  %v8520_v34 = vor.u32 %v11947_v16, %v8519_v15  ;;  %4009 = vmatpush.bf16.msra.mxu3 %v8808_v13  ;;  %3985 = vmatpush.bf16.msra.mxu1 %v8232_v19 }
 0x266   :  { %v12011_v27 = vld [vmem:[%s19096_s3 + $0x674] sm:$0xf0]  ;;  %3973 = vmatmul.bf16.vlgmr.msra.gmra.mxu0 %v13318_v50 }
 0x267   :  { %v9191_v29 = vld [vmem:[%s19096_s3 + $0x998] sm:$0xf]  ;;  %v8776_v38 = vor.u32 %v12011_v27, %v8775_v26  ;;  %4017 = vmatpush.bf16.msrb.mxu0 %v9224_v28  ;;  %3997 = vmatpush.bf16.msra.mxu2 %v8520_v34  ;;  %v3766_v28 = vpop.f32.mrf.mxu0 }
 0x268   :  { %v12115_v35 = vld [vmem:[%s19096_s3 + $0x9b4] sm:$0xf0]  ;;  %3986 = vmatmul.bf16.vlgmr.msra.gmra.mxu1 %v13326_v55 }
 0x269   :  { %v9447_v36 = vld [vmem:[%s19096_s3 + $0xb98] sm:$0xf]  ;;  %v9192_v45 = vor.u32 %v12115_v35, %v9191_v29  ;;  %4030 = vmatpush.bf16.msrb.mxu1 %v9480_v32  ;;  %4010 = vmatpush.bf16.msra.mxu3 %v8776_v38  ;;  %v3767_v35 = vadd.f32 %v3766_v28, %v769_v14  ;;  %v11863_v14 = vld [vmem:[%s19096_s3 + $0x1dc] sm:$0xf] }
 0x26a   :  { %v12179_v23 = vld [vmem:[%s19096_s3 + $0xbb4] sm:$0xf0] }
 0x26b   :  { %v8487_v39 = vld [vmem:[%s19096_s3 + $0x418] sm:$0xf]  ;;  %v9448_v48 = vor.u32 %v12179_v23, %v9447_v36  ;;  %4018 = vmatpush.bf16.msrb.mxu0 %v9192_v45  ;;  %v3779_v36 = vpop.f32.mrf.mxu1 }
 0x26c   :  { %v11939_v40 = vld [vmem:[%s19096_s3 + $0x434] sm:$0xf0] }
 0x26d   :  { %v8743_v41 = vld [vmem:[%s19096_s3 + $0x618] sm:$0xf]  ;;  %v8488_v49 = vor.u32 %v11939_v40, %v8487_v39  ;;  %4031 = vmatpush.bf16.msrb.mxu1 %v9448_v48 }
 0x26e   :  { %v12003_v42 = vld [vmem:[%s19096_s3 + $0x634] sm:$0xf0] }
 0x26f   :  { %v9735_v43 = vld [vmem:[%s19096_s3 + $0xdd8] sm:$0xf]  ;;  %v8744_v54 = vor.u32 %v12003_v42, %v8743_v41  ;;  %3998 = vmatpush.bf16.msra.mxu2 %v8488_v49 }
 0x270   :  { %v12251_v44 = vld [vmem:[%s19096_s3 + $0xdf4] sm:$0xf0] }
 0x271   :  { %v9991_v46 = vld [vmem:[%s19096_s3 + $0xfd8] sm:$0xf]  ;;  %v9736_v56 = vor.u32 %v12251_v44, %v9735_v43  ;;  %4011 = vmatpush.bf16.msra.mxu3 %v8744_v54  ;;  %v3780_v43 = vadd.f32 %v3779_v36, %v3767_v35  ;;  %v11855_v36 = vld [vmem:[%s19096_s3 + $0x19c] sm:$0xf] }
 0x272   :  { %v12315_v47 = vld [vmem:[%s19096_s3 + $0xff4] sm:$0xf0]  ;;  %3999 = vmatmul.bf16.vlgmr.msra.gmra.mxu2 %v13362_v17 }
 0x273   :  { %v9159_v51 = vld [vmem:[%s19096_s3 + $0x958] sm:$0xf]  ;;  %v9992_v61 = vor.u32 %v12315_v47, %v9991_v46  ;;  %4043 = vmatpush.bf16.msrb.mxu2 %v9736_v56 }
 0x274   :  { %v12107_v52 = vld [vmem:[%s19096_s3 + $0x974] sm:$0xf0]  ;;  %4012 = vmatmul.bf16.vlgmr.msra.gmra.mxu3 %v13373_v24 }
 0x275   :  { %v9415_v57 = vld [vmem:[%s19096_s3 + $0xb58] sm:$0xf]  ;;  %v9160_v0 = vor.u32 %v12107_v52, %v9159_v51  ;;  %4056 = vmatpush.bf16.msrb.mxu3 %v9992_v61 }
 0x276   :  { %v12171_v58 = vld [vmem:[%s19096_s3 + $0xb74] sm:$0xf0] }
 0x277   :  { %v9703_v62 = vld [vmem:[%s19096_s3 + $0xd98] sm:$0xf]  ;;  %v9416_v4 = vor.u32 %v12171_v58, %v9415_v57  ;;  %4019 = vmatpush.bf16.msrb.mxu0 %v9160_v0 }
 0x278   :  { %v12243_v63 = vld [vmem:[%s19096_s3 + $0xdb4] sm:$0xf0] }
 0x279   :  { %v9959_v33 = vld [vmem:[%s19096_s3 + $0xf98] sm:$0xf]  ;;  %v9704_v8 = vor.u32 %v12243_v63, %v9703_v62  ;;  %4032 = vmatpush.bf16.msrb.mxu1 %v9416_v4  ;;  %v3768_v62 = vpop.f32.mrf.mxu0 }
 0x27a   :  { %v12307_v1 = vld [vmem:[%s19096_s3 + $0xfb4] sm:$0xf0] }
 0x27b   :  { %v9127_v5 = vld [vmem:[%s19096_s3 + $0x918] sm:$0xf]  ;;  %v9960_v10 = vor.u32 %v12307_v1, %v9959_v33  ;;  %4044 = vmatpush.bf16.msrb.mxu2 %v9704_v8  ;;  %v3781_v1 = vpop.f32.mrf.mxu1 }
 0x27c   :  { %v12099_v7 = vld [vmem:[%s19096_s3 + $0x934] sm:$0xf0] }
 0x27d   :  { %v9383_v30 = vld [vmem:[%s19096_s3 + $0xb18] sm:$0xf]  ;;  %v9128_v15 = vor.u32 %v12099_v7, %v9127_v5  ;;  %4057 = vmatpush.bf16.msrb.mxu3 %v9960_v10 }
 0x27e   :  { %v12163_v9 = vld [vmem:[%s19096_s3 + $0xb34] sm:$0xf0] }
 0x27f   :  { %v9671_v12 = vld [vmem:[%s19096_s3 + $0xd58] sm:$0xf]  ;;  %v9384_v22 = vor.u32 %v12163_v9, %v9383_v30  ;;  %4020 = vmatpush.bf16.msrb.mxu0 %v9128_v15  ;;  %v8201_v15 = vld [vmem:[%s19096_s3 + $0x1f8] sm:$0xf0] }
 0x280   :  { %v12235_v13 = vld [vmem:[%s19096_s3 + $0xd74] sm:$0xf0]  ;;  %v8204_v35 = vor.u32 %v11863_v14, %v8201_v15  ;;  %v11903_v14 = vld [vmem:[%s19096_s3 + $0x31c] sm:$0xf] }
 0x281   :  { %v9927_v16 = vld [vmem:[%s19096_s3 + $0xf58] sm:$0xf]  ;;  %v9672_v26 = vor.u32 %v12235_v13, %v9671_v12  ;;  %4033 = vmatpush.bf16.msrb.mxu1 %v9384_v22  ;;  %v8361_v15 = vld [vmem:[%s19096_s3 + $0x338] sm:$0xf0] }
 0x282   :  { %v12299_v21 = vld [vmem:[%s19096_s3 + $0xf74] sm:$0xf0] }
 0x283   :  { %v9095_v25 = vld [vmem:[%s19096_s3 + $0x8d8] sm:$0xf]  ;;  %v9928_v29 = vor.u32 %v12299_v21, %v9927_v16  ;;  %4045 = vmatpush.bf16.msrb.mxu2 %v9672_v26  ;;  %v11927_v16 = vld [vmem:[%s19096_s3 + $0x3dc] sm:$0xf]  ;;  %v3792_v21 = vpop.f32.mrf.mxu2 }
 0x284   :  { %v12091_v3 = vld [vmem:[%s19096_s3 + $0x8f4] sm:$0xf0] }
 0x285   :  { %v9351_v27 = vld [vmem:[%s19096_s3 + $0xad8] sm:$0xf]  ;;  %v9096_v23 = vor.u32 %v12091_v3, %v9095_v25  ;;  %4058 = vmatpush.bf16.msrb.mxu3 %v9928_v29  ;;  %v8457_v25 = vld [vmem:[%s19096_s3 + $0x3f8] sm:$0xf0] }
 0x286   :  { %v12155_v19 = vld [vmem:[%s19096_s3 + $0xaf4] sm:$0xf0] }
 0x287   :  { %v9639_v32 = vld [vmem:[%s19096_s3 + $0xd18] sm:$0xf]  ;;  %v9352_v40 = vor.u32 %v12155_v19, %v9351_v27  ;;  %4021 = vmatpush.bf16.msrb.mxu0 %v9096_v23  ;;  %v3793_v27 = vadd.f32 %v3792_v21, %v3780_v43  ;;  %v3805_v19 = vpop.f32.mrf.mxu3  ;;  %v11975_v21 = vld [vmem:[%s19096_s3 + $0x55c] sm:$0xf] }
 0x288   :  { %v12227_v34 = vld [vmem:[%s19096_s3 + $0xd34] sm:$0xf0] }
 0x289   :  { %v9895_v38 = vld [vmem:[%s19096_s3 + $0xf18] sm:$0xf]  ;;  %v9640_v44 = vor.u32 %v12227_v34, %v9639_v32  ;;  %4034 = vmatpush.bf16.msrb.mxu1 %v9352_v40  ;;  %v15717_v23 = vadd.f32 %v3805_v19, %v3793_v27  ;;  %v8169_v40 = vld [vmem:[%s19096_s3 + $0x1b8] sm:$0xf0]  ;;  %v8364_v27 = vor.u32 %v11903_v14, %v8361_v15 }
 0x28a   :  { %v12291_v39 = vld [vmem:[%s19096_s3 + $0xf34] sm:$0xf0]  ;;  %v11831_v19 = vld [vmem:[%s19096_s3 + $0xdc] sm:$0xf] }
 0x28b   :  { %v9063_v41 = vld [vmem:[%s19096_s3 + $0x898] sm:$0xf]  ;;  %v9896_v47 = vor.u32 %v12291_v39, %v9895_v38  ;;  %4046 = vmatpush.bf16.msrb.mxu2 %v9640_v44  ;;  %v8460_v38 = vor.u32 %v11927_v16, %v8457_v25  ;;  %v7977_v14 = vld [vmem:[%s19096_s3 + $0x38] sm:$0xf0] }
 0x28c   :  { %v12083_v42 = vld [vmem:[%s19096_s3 + $0x8b4] sm:$0xf0]  ;;  %v11871_v15 = vld [vmem:[%s19096_s3 + $0x21c] sm:$0xf] }
 0x28d   :  { %v9319_v45 = vld [vmem:[%s19096_s3 + $0xa98] sm:$0xf]  ;;  %v9064_v51 = vor.u32 %v12083_v42, %v9063_v41  ;;  %4059 = vmatpush.bf16.msrb.mxu3 %v9896_v47  ;;  %v11919_v41 = vld [vmem:[%s19096_s3 + $0x39c] sm:$0xf] }
 0x28e   :  { %v12147_v46 = vld [vmem:[%s19096_s3 + $0xab4] sm:$0xf0]  ;;  %v8425_v42 = vld [vmem:[%s19096_s3 + $0x3b8] sm:$0xf0] }
 0x28f   :  { %v9607_v48 = vld [vmem:[%s19096_s3 + $0xcd8] sm:$0xf]  ;;  %v9320_v54 = vor.u32 %v12147_v46, %v9319_v45  ;;  %4022 = vmatpush.bf16.msrb.mxu0 %v9064_v51  ;;  %v8172_v51 = vor.u32 %v11855_v36, %v8169_v40 }
 0x290   :  { %v12219_v49 = vld [vmem:[%s19096_s3 + $0xcf4] sm:$0xf0] }
 0x291   :  { %v9863_v52 = vld [vmem:[%s19096_s3 + $0xed8] sm:$0xf]  ;;  %v9608_v58 = vor.u32 %v12219_v49, %v9607_v48  ;;  %4035 = vmatpush.bf16.msrb.mxu1 %v9320_v54  ;;  %v11991_v48 = vld [vmem:[%s19096_s3 + $0x5dc] sm:$0xf]  ;;  %v8428_v54 = vor.u32 %v11919_v41, %v8425_v42  ;;  %v3831_v41 = vpop.f32.mrf.mxu1 }
 0x292   :  { %v12283_v53 = vld [vmem:[%s19096_s3 + $0xef4] sm:$0xf0]  ;;  %v8713_v49 = vld [vmem:[%s19096_s3 + $0x5f8] sm:$0xf0] }
 0x293   :  { %v9031_v56 = vld [vmem:[%s19096_s3 + $0x858] sm:$0xf]  ;;  %v9864_v63 = vor.u32 %v12283_v53, %v9863_v52  ;;  %4047 = vmatpush.bf16.msrb.mxu2 %v9608_v58  ;;  %v12055_v52 = vld [vmem:[%s19096_s3 + $0x7dc] sm:$0xf]  ;;  %v8716_v62 = vor.u32 %v11991_v48, %v8713_v49 }
 0x294   :  { %v12075_v57 = vld [vmem:[%s19096_s3 + $0x874] sm:$0xf0]  ;;  %v8969_v53 = vld [vmem:[%s19096_s3 + $0x7f8] sm:$0xf0] }
 0x295   :  { %v9287_v59 = vld [vmem:[%s19096_s3 + $0xa58] sm:$0xf]  ;;  %v9032_v4 = vor.u32 %v12075_v57, %v9031_v56  ;;  %4060 = vmatpush.bf16.msrb.mxu3 %v9864_v63  ;;  %v11847_v57 = vld [vmem:[%s19096_s3 + $0x15c] sm:$0xf]  ;;  %v8972_v1 = vor.u32 %v12055_v52, %v8969_v53 }
 0x296   :  { %v12139_v61 = vld [vmem:[%s19096_s3 + $0xa74] sm:$0xf0]  ;;  %v8137_v58 = vld [vmem:[%s19096_s3 + $0x178] sm:$0xf0] }
 0x297   :  { %v9575_v0 = vld [vmem:[%s19096_s3 + $0xc98] sm:$0xf]  ;;  %v9288_v30 = vor.u32 %v12139_v61, %v9287_v59  ;;  %4023 = vmatpush.bf16.msrb.mxu0 %v9032_v4  ;;  %v3794_v59 = vpop.f32.mrf.mxu2  ;;  %v11911_v63 = vld [vmem:[%s19096_s3 + $0x35c] sm:$0xf] }
 0x298   :  { %v12211_v33 = vld [vmem:[%s19096_s3 + $0xcb4] sm:$0xf0]  ;;  %v11983_v4 = vld [vmem:[%s19096_s3 + $0x59c] sm:$0xf] }
 0x299   :  { %v9831_v5 = vld [vmem:[%s19096_s3 + $0xe98] sm:$0xf]  ;;  %v9576_v13 = vor.u32 %v12211_v33, %v9575_v0  ;;  %4036 = vmatpush.bf16.msrb.mxu1 %v9288_v30  ;;  %v8393_v0 = vld [vmem:[%s19096_s3 + $0x378] sm:$0xf0]  ;;  %v3807_v33 = vpop.f32.mrf.mxu3 }
 0x29a   :  { %v12275_v7 = vld [vmem:[%s19096_s3 + $0xeb4] sm:$0xf0]  ;;  %v8937_v30 = vld [vmem:[%s19096_s3 + $0x7b8] sm:$0xf0] }
 0x29b   :  { %v8999_v8 = vld [vmem:[%s19096_s3 + $0x818] sm:$0xf]  ;;  %v9832_v22 = vor.u32 %v12275_v7, %v9831_v5  ;;  %4048 = vmatpush.bf16.msrb.mxu2 %v9576_v13  ;;  %v8681_v5 = vld [vmem:[%s19096_s3 + $0x5b8] sm:$0xf0]  ;;  %v8140_v7 = vor.u32 %v11847_v57, %v8137_v58 }
 0x29c   :  { %v12067_v9 = vld [vmem:[%s19096_s3 + $0x834] sm:$0xf0]  ;;  %v8684_v13 = vor.u32 %v11983_v4, %v8681_v5  ;;  %v11887_v49 = vld [vmem:[%s19096_s3 + $0x29c] sm:$0xf] }
 0x29d   :  { %v9255_v10 = vld [vmem:[%s19096_s3 + $0xa18] sm:$0xf]  ;;  %v9000_v28 = vor.u32 %v12067_v9, %v8999_v8  ;;  %4061 = vmatpush.bf16.msrb.mxu3 %v9832_v22  ;;  %v12047_v8 = vld [vmem:[%s19096_s3 + $0x79c] sm:$0xf]  ;;  %v8396_v9 = vor.u32 %v11911_v63, %v8393_v0 }
 0x29e   :  { %v12131_v12 = vld [vmem:[%s19096_s3 + $0xa34] sm:$0xf0]  ;;  %v8940_v16 = vor.u32 %v12047_v8, %v8937_v30  ;;  %v8649_v22 = vld [vmem:[%s19096_s3 + $0x578] sm:$0xf0]  ;;  %v3833_v8 = vpop.f32.mrf.mxu1 }
 0x29f   :  { %v9543_v3 = vld [vmem:[%s19096_s3 + $0xc58] sm:$0xf]  ;;  %v9256_v34 = vor.u32 %v12131_v12, %v9255_v10  ;;  %4024 = vmatpush.bf16.msrb.mxu0 %v9000_v28  ;;  %v11839_v10 = vld [vmem:[%s19096_s3 + $0x11c] sm:$0xf] }
 0x2a0   :  { %v12203_v26 = vld [vmem:[%s19096_s3 + $0xc74] sm:$0xf0]  ;;  %v8105_v12 = vld [vmem:[%s19096_s3 + $0x138] sm:$0xf0] }
 0x2a1   :  { %v9799_v29 = vld [vmem:[%s19096_s3 + $0xe58] sm:$0xf]  ;;  %v9544_v39 = vor.u32 %v12203_v26, %v9543_v3  ;;  %4037 = vmatpush.bf16.msrb.mxu1 %v9256_v34  ;;  %v8108_v25 = vor.u32 %v11839_v10, %v8105_v12  ;;  %v12039_v3 = vld [vmem:[%s19096_s3 + $0x75c] sm:$0xf] }
 0x2a2   :  { %v12267_v32 = vld [vmem:[%s19096_s3 + $0xe74] sm:$0xf0]  ;;  %4025 = vmatmul.bf16.vlgmr.msrb.gmra.mxu0 %v13424_v60  ;;  %v8905_v26 = vld [vmem:[%s19096_s3 + $0x778] sm:$0xf0] }
 0x2a3   :  { %v9800_v43 = vor.u32 %v12267_v32, %v9799_v29  ;;  %v9511_v44 = vld [vmem:[%s19096_s3 + $0xc18] sm:$0xf]  ;;  %4069 = vmatpush.bf16.msra.mxu0 %v8204_v35  ;;  %4049 = vmatpush.bf16.msrb.mxu2 %v9544_v39  ;;  %v8073_v28 = vld [vmem:[%s19096_s3 + $0xf8] sm:$0xf0]  ;;  %v8652_v29 = vor.u32 %v11975_v21, %v8649_v22  ;;  %v3818_v35 = vpop.f32.mrf.mxu0  ;;  %v8908_v36 = vor.u32 %v12039_v3, %v8905_v26  ;;  %v3844_v26 = vpop.f32.mrf.mxu2 }
 0x2a4   :  { %v12195_v45 = vld [vmem:[%s19096_s3 + $0xc34] sm:$0xf0]  ;;  %4038 = vmatmul.bf16.vlgmr.msrb.gmra.mxu1 %v13435_v2  ;;  %v11895_v32 = vld [vmem:[%s19096_s3 + $0x2dc] sm:$0xf]  ;;  %v3819_v40 = vadd.f32 %v3818_v35, %v15717_v23  ;;  %v8076_v42 = vor.u32 %v11831_v19, %v8073_v28 }
 0x2a5   :  { %v9767_v46 = vld [vmem:[%s19096_s3 + $0xe18] sm:$0xf]  ;;  %4082 = vmatpush.bf16.msra.mxu1 %v8460_v38  ;;  %v9512_v56 = vor.u32 %v12195_v45, %v9511_v44  ;;  %4062 = vmatpush.bf16.msrb.mxu3 %v9800_v43  ;;  %v8329_v34 = vld [vmem:[%s19096_s3 + $0x2f8] sm:$0xf0] }
 0x2a6   :  { %v12259_v47 = vld [vmem:[%s19096_s3 + $0xe34] sm:$0xf0]  ;;  %v11967_v38 = vld [vmem:[%s19096_s3 + $0x51c] sm:$0xf]  ;;  %v8332_v45 = vor.u32 %v11895_v32, %v8329_v34  ;;  %v3857_v34 = vpop.f32.mrf.mxu3 }
 0x2a7   :  { %v9768_v61 = vor.u32 %v12259_v47, %v9767_v46  ;;  %4070 = vmatpush.bf16.msra.mxu0 %v8172_v51  ;;  %4050 = vmatpush.bf16.msrb.mxu2 %v9512_v56  ;;  %v8617_v39 = vld [vmem:[%s19096_s3 + $0x538] sm:$0xf0]  ;;  %v3832_v47 = vadd.f32 %v3831_v41, %v3819_v40 }
 0x2a8   :  { %v12031_v43 = vld [vmem:[%s19096_s3 + $0x71c] sm:$0xf]  ;;  %v8620_v48 = vor.u32 %v11967_v38, %v8617_v39 }
 0x2a9   :  { %4083 = vmatpush.bf16.msra.mxu1 %v8428_v54  ;;  %4063 = vmatpush.bf16.msrb.mxu3 %v9768_v61  ;;  %v8873_v44 = vld [vmem:[%s19096_s3 + $0x738] sm:$0xf0]  ;;  %v3845_v32 = vadd.f32 %v3844_v26, %v3832_v47 }
 0x2aa   :  { %4051 = vmatmul.bf16.vlgmr.msrb.gmra.mxu2 %v13472_v31  ;;  %v11823_v46 = vld [vmem:[%s19096_s3 + $0x9c] sm:$0xf]  ;;  %v8876_v52 = vor.u32 %v12031_v43, %v8873_v44 }
 0x2ab   :  { %4095 = vmatpush.bf16.msra.mxu2 %v8716_v62  ;;  %4071 = vmatpush.bf16.msra.mxu0 %v8140_v7  ;;  %v8041_v23 = vld [vmem:[%s19096_s3 + $0xb8] sm:$0xf0] }
 0x2ac   :  { %4064 = vmatmul.bf16.vlgmr.msrb.gmra.mxu3 %v13483_v37  ;;  %v8297_v51 = vld [vmem:[%s19096_s3 + $0x2b8] sm:$0xf0]  ;;  %v8044_v56 = vor.u32 %v11823_v46, %v8041_v23 }
 0x2ad   :  { %4108 = vmatpush.bf16.msra.mxu3 %v8972_v1  ;;  %4084 = vmatpush.bf16.msra.mxu1 %v8396_v9  ;;  %v11959_v53 = vld [vmem:[%s19096_s3 + $0x4dc] sm:$0xf]  ;;  %v8300_v59 = vor.u32 %v11887_v49, %v8297_v51  ;;  %v3820_v1 = vpop.f32.mrf.mxu0 }
 0x2ae   :  { %v8585_v54 = vld [vmem:[%s19096_s3 + $0x4f8] sm:$0xf0] }
 0x2af   :  { %4096 = vmatpush.bf16.msra.mxu2 %v8684_v13  ;;  %4072 = vmatpush.bf16.msra.mxu0 %v8108_v25  ;;  %v12023_v57 = vld [vmem:[%s19096_s3 + $0x6dc] sm:$0xf]  ;;  %v8588_v63 = vor.u32 %v11959_v53, %v8585_v54 }
 0x2b0   :  { %v8841_v58 = vld [vmem:[%s19096_s3 + $0x6f8] sm:$0xf0] }
 0x2b1   :  { %4109 = vmatpush.bf16.msra.mxu3 %v8940_v16  ;;  %4085 = vmatpush.bf16.msra.mxu1 %v8364_v27  ;;  %v11815_v61 = vld [vmem:[%s19096_s3 + $0x5c] sm:$0xf]  ;;  %v8844_v4 = vor.u32 %v12023_v57, %v8841_v58 }
 0x2b2   :  { %v8009_v62 = vld [vmem:[%s19096_s3 + $0x78] sm:$0xf0] }
 0x2b3   :  { %4097 = vmatpush.bf16.msra.mxu2 %v8652_v29  ;;  %4073 = vmatpush.bf16.msra.mxu0 %v8076_v42  ;;  %v11879_v0 = vld [vmem:[%s19096_s3 + $0x25c] sm:$0xf]  ;;  %v8012_v30 = vor.u32 %v11815_v61, %v8009_v62  ;;  %v15916_v42 = vadd.f32 %v3857_v34, %v3845_v32 }
 0x2b4   :  { %v8265_v33 = vld [vmem:[%s19096_s3 + $0x278] sm:$0xf0] }
 0x2b5   :  { %4110 = vmatpush.bf16.msra.mxu3 %v8908_v36  ;;  %4086 = vmatpush.bf16.msra.mxu1 %v8332_v45  ;;  %v11951_v5 = vld [vmem:[%s19096_s3 + $0x49c] sm:$0xf]  ;;  %v8268_v13 = vor.u32 %v11879_v0, %v8265_v33  ;;  %v3846_v0 = vpop.f32.mrf.mxu2  ;;  %vm4177_vm14 = vcmp.gt.f32.partialorder %v15916_v42, 0.0 }
 0x2b6   :  { %v8553_v7 = vld [vmem:[%s19096_s3 + $0x4b8] sm:$0xf0] }
 0x2b7   :  { %4098 = vmatpush.bf16.msra.mxu2 %v8620_v48  ;;  %4074 = vmatpush.bf16.msra.mxu0 %v8044_v56  ;;  %v12015_v9 = vld [vmem:[%s19096_s3 + $0x69c] sm:$0xf]  ;;  %v8556_v21 = vor.u32 %v11951_v5, %v8553_v7  ;;  %v3859_v7 = vpop.f32.mrf.mxu3 }
 0x2b8   :  { %v8809_v10 = vld [vmem:[%s19096_s3 + $0x6b8] sm:$0xf0] }
 0x2b9   :  { %4111 = vmatpush.bf16.msra.mxu3 %v8876_v52  ;;  %v11807_v12 = vld [vmem:[%s19096_s3 + $0x1c] sm:$0xf]  ;;  %4087 = vmatpush.bf16.msra.mxu1 %v8300_v59  ;;  %v8812_v27 = vor.u32 %v12015_v9, %v8809_v10 }
 0x2ba   :  { %v8233_v16 = vld [vmem:[%s19096_s3 + $0x238] sm:$0xf0]  ;;  %v7980_v35 = vor.u32 %v11807_v12, %v7977_v14 }
 0x2bb   :  { %4099 = vmatpush.bf16.msra.mxu2 %v8588_v63  ;;  %v12119_v22 = vld [vmem:[%s19096_s3 + $0x9dc] sm:$0xf]  ;;  %4075 = vmatpush.bf16.msra.mxu0 %v8012_v30  ;;  %v8236_v39 = vor.u32 %v11871_v15, %v8233_v16 }
 0x2bc   :  { %v9225_v25 = vld [vmem:[%s19096_s3 + $0x9f8] sm:$0xf0] }
 0x2bd   :  { %v12183_v3 = vld [vmem:[%s19096_s3 + $0xbdc] sm:$0xf]  ;;  %4112 = vmatpush.bf16.msra.mxu3 %v8844_v4  ;;  %4088 = vmatpush.bf16.msra.mxu1 %v8268_v13  ;;  %v9228_v40 = vor.u32 %v12119_v22, %v9225_v25 }
 0x2be   :  { %v9481_v19 = vld [vmem:[%s19096_s3 + $0xbf8] sm:$0xf0] }
 0x2bf   :  { %v11943_v28 = vld [vmem:[%s19096_s3 + $0x45c] sm:$0xf]  ;;  %4100 = vmatpush.bf16.msra.mxu2 %v8556_v21  ;;  %v9484_v43 = vor.u32 %v12183_v3, %v9481_v19  ;;  %4076 = vmatpush.bf16.msra.mxu0 %v7980_v35  ;;  %v16015_v35 = vpop.f32.mrf.mxu0 }
 0x2c0   :  { %v8521_v29 = vld [vmem:[%s19096_s3 + $0x478] sm:$0xf0] }
 0x2c1   :  { %v12007_v36 = vld [vmem:[%s19096_s3 + $0x65c] sm:$0xf]  ;;  %v8524_v44 = vor.u32 %v11943_v28, %v8521_v29  ;;  %4113 = vmatpush.bf16.msra.mxu3 %v8812_v27  ;;  %4089 = vmatpush.bf16.msra.mxu1 %v8236_v39 }
 0x2c2   :  { %v8777_v38 = vld [vmem:[%s19096_s3 + $0x678] sm:$0xf0]  ;;  %4077 = vmatmul.bf16.vlgmr.msra.gmra.mxu0 %v13318_v50 }
 0x2c3   :  { %v12111_v41 = vld [vmem:[%s19096_s3 + $0x99c] sm:$0xf]  ;;  %v8780_v47 = vor.u32 %v12007_v36, %v8777_v38  ;;  %4121 = vmatpush.bf16.msrb.mxu0 %v9228_v40  ;;  %4101 = vmatpush.bf16.msra.mxu2 %v8524_v44  ;;  %v16023_v40 = vpop.f32.mrf.mxu1 }
 0x2c4   :  { %v9193_v45 = vld [vmem:[%s19096_s3 + $0x9b8] sm:$0xf0]  ;;  %4090 = vmatmul.bf16.vlgmr.msra.gmra.mxu1 %v13326_v55 }
 0x2c5   :  { %v12175_v46 = vld [vmem:[%s19096_s3 + $0xb9c] sm:$0xf]  ;;  %v9196_v56 = vor.u32 %v12111_v41, %v9193_v45  ;;  %4134 = vmatpush.bf16.msrb.mxu1 %v9484_v43  ;;  %4114 = vmatpush.bf16.msra.mxu3 %v8780_v47 }
 0x2c6   :  { %v9449_v23 = vld [vmem:[%s19096_s3 + $0xbb8] sm:$0xf0] }
 0x2c7   :  { %v11935_v48 = vld [vmem:[%s19096_s3 + $0x41c] sm:$0xf]  ;;  %v9452_v59 = vor.u32 %v12175_v46, %v9449_v23  ;;  %4122 = vmatpush.bf16.msrb.mxu0 %v9196_v56 }
 0x2c8   :  { %v8489_v49 = vld [vmem:[%s19096_s3 + $0x438] sm:$0xf0] }
 0x2c9   :  { %v11999_v51 = vld [vmem:[%s19096_s3 + $0x61c] sm:$0xf]  ;;  %v8492_v61 = vor.u32 %v11935_v48, %v8489_v49  ;;  %4135 = vmatpush.bf16.msrb.mxu1 %v9452_v59 }
 0x2ca   :  { %v8745_v52 = vld [vmem:[%s19096_s3 + $0x638] sm:$0xf0] }
 0x2cb   :  { %v12247_v53 = vld [vmem:[%s19096_s3 + $0xddc] sm:$0xf]  ;;  %v8748_v33 = vor.u32 %v11999_v51, %v8745_v52  ;;  %4102 = vmatpush.bf16.msra.mxu2 %v8492_v61  ;;  %v3885_v7 = vpop.f32.mrf.mxu1 }
 0x2cc   :  { %v9737_v54 = vld [vmem:[%s19096_s3 + $0xdf8] sm:$0xf0]  ;;  %v10839_v7 = vld [vmem:[%s19099_s5 + $0x690] sm:$0xf] }
 0x2cd   :  { %v12311_v57 = vld [vmem:[%s19096_s3 + $0xfdc] sm:$0xf]  ;;  %v9740_v1 = vor.u32 %v12247_v53, %v9737_v54  ;;  %4115 = vmatpush.bf16.msra.mxu3 %v8748_v33  ;;  %v3872_v33 = vpop.f32.mrf.mxu0 }
 0x2ce   :  { %v9993_v58 = vld [vmem:[%s19096_s3 + $0xff8] sm:$0xf0]  ;;  %4103 = vmatmul.bf16.vlgmr.msra.gmra.mxu2 %v13362_v17 }
 0x2cf   :  { %v12103_v62 = vld [vmem:[%s19096_s3 + $0x95c] sm:$0xf]  ;;  %v9996_v8 = vor.u32 %v12311_v57, %v9993_v58  ;;  %4147 = vmatpush.bf16.msrb.mxu2 %v9740_v1 }
 0x2d0   :  { %v9161_v63 = vld [vmem:[%s19096_s3 + $0x978] sm:$0xf0]  ;;  %4116 = vmatmul.bf16.vlgmr.msra.gmra.mxu3 %v13373_v24 }
 0x2d1   :  { %v12167_v4 = vld [vmem:[%s19096_s3 + $0xb5c] sm:$0xf]  ;;  %v9164_v9 = vor.u32 %v12103_v62, %v9161_v63  ;;  %4160 = vmatpush.bf16.msrb.mxu3 %v9996_v8 }
 0x2d2   :  { %v9417_v5 = vld [vmem:[%s19096_s3 + $0xb78] sm:$0xf0] }
 0x2d3   :  { %v12239_v30 = vld [vmem:[%s19096_s3 + $0xd9c] sm:$0xf]  ;;  %v9420_v55 = vor.u32 %v12167_v4, %v9417_v5  ;;  %4123 = vmatpush.bf16.msrb.mxu0 %v9164_v9 }
 0x2d4   :  { %v9705_v50 = vld [vmem:[%s19096_s3 + $0xdb8] sm:$0xf0] }
 0x2d5   :  { %v12303_v10 = vld [vmem:[%s19096_s3 + $0xf9c] sm:$0xf]  ;;  %v9708_v15 = vor.u32 %v12239_v30, %v9705_v50  ;;  %4136 = vmatpush.bf16.msrb.mxu1 %v9420_v55 }
 0x2d6   :  { %v9961_v12 = vld [vmem:[%s19096_s3 + $0xfb8] sm:$0xf0] }
 0x2d7   :  { %v12095_v13 = vld [vmem:[%s19096_s3 + $0x91c] sm:$0xf]  ;;  %v9964_v22 = vor.u32 %v12303_v10, %v9961_v12  ;;  %4148 = vmatpush.bf16.msrb.mxu2 %v9708_v15  ;;  %v10195_v15 = vld [vmem:[%s19099_s5 + $0x188] sm:$0xf] }
 0x2d8   :  { %v9129_v14 = vld [vmem:[%s19096_s3 + $0x938] sm:$0xf0] }
 0x2d9   :  { %v12159_v16 = vld [vmem:[%s19096_s3 + $0xb1c] sm:$0xf]  ;;  %v9132_v26 = vor.u32 %v12095_v13, %v9129_v14  ;;  %4161 = vmatpush.bf16.msrb.mxu3 %v9964_v22  ;;  %v16100_v22 = vpop.f32.mrf.mxu2 }
 0x2da   :  { %v9385_v21 = vld [vmem:[%s19096_s3 + $0xb38] sm:$0xf0] }
 0x2db   :  { %v12231_v25 = vld [vmem:[%s19096_s3 + $0xd5c] sm:$0xf]  ;;  %v9388_v28 = vor.u32 %v12159_v16, %v9385_v21  ;;  %4124 = vmatpush.bf16.msrb.mxu0 %v9132_v26  ;;  %v12368_v16 = vld [vmem:[%s19099_s5 + $0x1a0] sm:$0xf0]  ;;  %v10419_v21 = vld [vmem:[%s19099_s5 + $0x348] sm:$0xf] }
 0x2dc   :  { %v9673_v3 = vld [vmem:[%s19096_s3 + $0xd78] sm:$0xf0] }
 0x2dd   :  { %v12295_v27 = vld [vmem:[%s19096_s3 + $0xf5c] sm:$0xf]  ;;  %v9676_v32 = vor.u32 %v12231_v25, %v9673_v3  ;;  %4137 = vmatpush.bf16.msrb.mxu1 %v9388_v28  ;;  %v12424_v3 = vld [vmem:[%s19099_s5 + $0x360] sm:$0xf0] }
 0x2de   :  { %v9929_v19 = vld [vmem:[%s19096_s3 + $0xf78] sm:$0xf0] }
 0x2df   :  { %v12087_v29 = vld [vmem:[%s19096_s3 + $0x8dc] sm:$0xf]  ;;  %v9932_v36 = vor.u32 %v12295_v27, %v9929_v19  ;;  %4149 = vmatpush.bf16.msrb.mxu2 %v9676_v32  ;;  %v16111_v19 = vpop.f32.mrf.mxu3 }
 0x2e0   :  { %v9097_v17 = vld [vmem:[%s19096_s3 + $0x8f8] sm:$0xf0] }
 0x2e1   :  { %v12151_v34 = vld [vmem:[%s19096_s3 + $0xadc] sm:$0xf]  ;;  %v9100_v41 = vor.u32 %v12087_v29, %v9097_v17  ;;  %4162 = vmatpush.bf16.msrb.mxu3 %v9932_v36  ;;  %v10420_v36 = vor.u32 %v12424_v3, %v10419_v21  ;;  %v12522_v21 = vld [vmem:[%s19099_s5 + $0x670] sm:$0xf0]  ;;  %v10083_v3 = vld [vmem:[%s19099_s5 + $0xa8] sm:$0xf] }
 0x2e2   :  { %v9353_v24 = vld [vmem:[%s19096_s3 + $0xaf8] sm:$0xf0] }
 0x2e3   :  { %v12223_v38 = vld [vmem:[%s19096_s3 + $0xd1c] sm:$0xf]  ;;  %v9356_v45 = vor.u32 %v12151_v34, %v9353_v24  ;;  %4125 = vmatpush.bf16.msrb.mxu0 %v9100_v41  ;;  %v10196_v34 = vor.u32 %v12368_v16, %v10195_v15  ;;  %v10167_v24 = vld [vmem:[%s19099_s5 + $0x150] sm:$0xf]  ;;  %v10811_v16 = vld [vmem:[%s19099_s5 + $0x658] sm:$0xf] }
 0x2e4   :  { %v9641_v39 = vld [vmem:[%s19096_s3 + $0xd38] sm:$0xf0]  ;;  %v10391_v41 = vld [vmem:[%s19099_s5 + $0x310] sm:$0xf] }
 0x2e5   :  { %v12287_v43 = vld [vmem:[%s19096_s3 + $0xf1c] sm:$0xf]  ;;  %v9644_v47 = vor.u32 %v12223_v38, %v9641_v39  ;;  %4138 = vmatpush.bf16.msrb.mxu1 %v9356_v45  ;;  %v12361_v39 = vld [vmem:[%s19099_s5 + $0x168] sm:$0xf0] }
 0x2e6   :  { %v9897_v44 = vld [vmem:[%s19096_s3 + $0xf38] sm:$0xf0] }
 0x2e7   :  { %v12079_v46 = vld [vmem:[%s19096_s3 + $0x89c] sm:$0xf]  ;;  %v9900_v51 = vor.u32 %v12287_v43, %v9897_v44  ;;  %4150 = vmatpush.bf16.msrb.mxu2 %v9644_v47  ;;  %v12417_v43 = vld [vmem:[%s19099_s5 + $0x328] sm:$0xf0]  ;;  %v3911_v33 = vpop.f32.mrf.mxu3 }
 0x2e8   :  { %v9065_v23 = vld [vmem:[%s19096_s3 + $0x8b8] sm:$0xf0] }
 0x2e9   :  { %v12143_v48 = vld [vmem:[%s19096_s3 + $0xa9c] sm:$0xf]  ;;  %v9068_v54 = vor.u32 %v12079_v46, %v9065_v23  ;;  %4163 = vmatpush.bf16.msrb.mxu3 %v9900_v51  ;;  %v10168_v51 = vor.u32 %v12361_v39, %v10167_v24 }
 0x2ea   :  { %v9321_v49 = vld [vmem:[%s19096_s3 + $0xab8] sm:$0xf0] }
 0x2eb   :  { %v12215_v52 = vld [vmem:[%s19096_s3 + $0xcdc] sm:$0xf]  ;;  %v9324_v58 = vor.u32 %v12143_v48, %v9321_v49  ;;  %4126 = vmatpush.bf16.msrb.mxu0 %v9068_v54  ;;  %v10643_v48 = vld [vmem:[%s19099_s5 + $0x508] sm:$0xf]  ;;  %v12480_v49 = vld [vmem:[%s19099_s5 + $0x520] sm:$0xf0]  ;;  %v10392_v54 = vor.u32 %v12417_v43, %v10391_v41 }
 0x2ec   :  { %v9609_v53 = vld [vmem:[%s19096_s3 + $0xcf8] sm:$0xf0]  ;;  %v10055_v41 = vld [vmem:[%s19099_s5 + $0x70] sm:$0xf]  ;;  %v12333_v43 = vld [vmem:[%s19099_s5 + $0x88] sm:$0xf0] }
 0x2ed   :  { %v12279_v56 = vld [vmem:[%s19096_s3 + $0xedc] sm:$0xf]  ;;  %v9612_v62 = vor.u32 %v12215_v52, %v9609_v53  ;;  %4139 = vmatpush.bf16.msrb.mxu1 %v9324_v58  ;;  %v10867_v52 = vld [vmem:[%s19099_s5 + $0x6c8] sm:$0xf]  ;;  %v12536_v53 = vld [vmem:[%s19099_s5 + $0x6e0] sm:$0xf0] }
 0x2ee   :  { %v9865_v57 = vld [vmem:[%s19096_s3 + $0xef8] sm:$0xf0]  ;;  %v12354_v58 = vld [vmem:[%s19099_s5 + $0x130] sm:$0xf0] }
 0x2ef   :  { %v12071_v59 = vld [vmem:[%s19096_s3 + $0x85c] sm:$0xf]  ;;  %v9868_v1 = vor.u32 %v12279_v56, %v9865_v57  ;;  %4151 = vmatpush.bf16.msrb.mxu2 %v9612_v62  ;;  %v10139_v57 = vld [vmem:[%s19099_s5 + $0x118] sm:$0xf]  ;;  %v10644_v62 = vor.u32 %v12480_v49, %v10643_v48  ;;  %v12452_v48 = vld [vmem:[%s19099_s5 + $0x440] sm:$0xf0]  ;;  %v10056_v49 = vor.u32 %v12333_v43, %v10055_v41 }
 0x2f0   :  { %v9033_v61 = vld [vmem:[%s19096_s3 + $0x878] sm:$0xf0] }
 0x2f1   :  { %v12135_v63 = vld [vmem:[%s19096_s3 + $0xa5c] sm:$0xf]  ;;  %v9036_v8 = vor.u32 %v12071_v59, %v9033_v61  ;;  %4164 = vmatpush.bf16.msrb.mxu3 %v9868_v1  ;;  %v3898_v59 = vpop.f32.mrf.mxu2  ;;  %v10868_v1 = vor.u32 %v12536_v53, %v10867_v52  ;;  %v12508_v52 = vld [vmem:[%s19099_s5 + $0x600] sm:$0xf0]  ;;  %v4181_v53 = vmul.f32 0.01, %v14411_v6 }
 0x2f2   :  { %v9289_v0 = vld [vmem:[%s19096_s3 + $0xa78] sm:$0xf0] }
 0x2f3   :  { %v12207_v4 = vld [vmem:[%s19096_s3 + $0xc9c] sm:$0xf]  ;;  %v9292_v10 = vor.u32 %v12135_v63, %v9289_v0  ;;  %4127 = vmatpush.bf16.msrb.mxu0 %v9036_v8  ;;  %v10363_v63 = vld [vmem:[%s19099_s5 + $0x2d8] sm:$0xf]  ;;  %v12410_v0 = vld [vmem:[%s19099_s5 + $0x2f0] sm:$0xf0] }
 0x2f4   :  { %v9577_v5 = vld [vmem:[%s19096_s3 + $0xcb8] sm:$0xf0]  ;;  %v12529_v8 = vld [vmem:[%s19099_s5 + $0x6a8] sm:$0xf0] }
 0x2f5   :  { %v12271_v30 = vld [vmem:[%s19096_s3 + $0xe9c] sm:$0xf]  ;;  %v9580_v14 = vor.u32 %v12207_v4, %v9577_v5  ;;  %4140 = vmatpush.bf16.msrb.mxu1 %v9292_v10  ;;  %v10615_v4 = vld [vmem:[%s19099_s5 + $0x4d0] sm:$0xf]  ;;  %v10140_v5 = vor.u32 %v12354_v58, %v10139_v57  ;;  %v10335_v10 = vld [vmem:[%s19099_s5 + $0x2a0] sm:$0xf] }
 0x2f6   :  { %v9833_v50 = vld [vmem:[%s19096_s3 + $0xeb8] sm:$0xf0]  ;;  %v12326_v57 = vld [vmem:[%s19099_s5 + $0x50] sm:$0xf0]  ;;  %v4182_v58 = vmul.f32 0.01, %v14717_v18 }
 0x2f7   :  { %v12063_v9 = vld [vmem:[%s19096_s3 + $0x81c] sm:$0xf]  ;;  %v9836_v25 = vor.u32 %v12271_v30, %v9833_v50  ;;  %4152 = vmatpush.bf16.msrb.mxu2 %v9580_v14  ;;  %v10111_v30 = vld [vmem:[%s19099_s5 + $0xe0] sm:$0xf]  ;;  %v12466_v14 = vld [vmem:[%s19099_s5 + $0x4b0] sm:$0xf0] }
 0x2f8   :  { %v9001_v12 = vld [vmem:[%s19096_s3 + $0x838] sm:$0xf0] }
 0x2f9   :  { %v12127_v55 = vld [vmem:[%s19096_s3 + $0xa1c] sm:$0xf]  ;;  %v9004_v28 = vor.u32 %v12063_v9, %v9001_v12  ;;  %4165 = vmatpush.bf16.msrb.mxu3 %v9836_v25 }
 0x2fa   :  { %v9257_v13 = vld [vmem:[%s19096_s3 + $0xa38] sm:$0xf0] }
 0x2fb   :  { %v12199_v26 = vld [vmem:[%s19096_s3 + $0xc5c] sm:$0xf]  ;;  %v9260_v32 = vor.u32 %v12127_v55, %v9257_v13  ;;  %4128 = vmatpush.bf16.msrb.mxu0 %v9004_v28  ;;  %v10840_v55 = vor.u32 %v12529_v8, %v10839_v7  ;;  %v10587_v13 = vld [vmem:[%s19099_s5 + $0x498] sm:$0xf]  ;;  %v16219_v28 = vpop.f32.mrf.mxu0  ;;  %v10727_v8 = vld [vmem:[%s19099_s5 + $0x5b0] sm:$0xf] }
 0x2fc   :  { %v9545_v27 = vld [vmem:[%s19096_s3 + $0xc78] sm:$0xf0] }
 0x2fd   :  { %v12263_v29 = vld [vmem:[%s19096_s3 + $0xe5c] sm:$0xf]  ;;  %v9548_v38 = vor.u32 %v12199_v26, %v9545_v27  ;;  %4141 = vmatpush.bf16.msrb.mxu1 %v9260_v32  ;;  %v10588_v26 = vor.u32 %v12466_v14, %v10587_v13  ;;  %v10307_v27 = vld [vmem:[%s19099_s5 + $0x268] sm:$0xf]  ;;  %v12592_v14 = vld [vmem:[%s19099_s5 + $0x8a0] sm:$0xf0] }
 0x2fe   :  { %v9801_v17 = vld [vmem:[%s19096_s3 + $0xe78] sm:$0xf0]  ;;  %4129 = vmatmul.bf16.vlgmr.msrb.gmra.mxu0 %v13424_v60  ;;  %v12473_v60 = vld [vmem:[%s19099_s5 + $0x4e8] sm:$0xf0]  ;;  %v11091_v13 = vld [vmem:[%s19099_s5 + $0x888] sm:$0xf] }
 0x2ff   :  { %v9804_v44 = vor.u32 %v12263_v29, %v9801_v17  ;;  %v12191_v45 = vld [vmem:[%s19096_s3 + $0xc1c] sm:$0xf]  ;;  %7037 = vmatpush.bf16.msra.mxu0 %v10196_v34  ;;  %4153 = vmatpush.bf16.msrb.mxu2 %v9548_v38  ;;  %v10616_v9 = vor.u32 %v12473_v60, %v10615_v4  ;;  %v10812_v29 = vor.u32 %v12522_v21, %v10811_v16  ;;  %v10559_v17 = vld [vmem:[%s19099_s5 + $0x460] sm:$0xf]  ;;  %v16227_v34 = vpop.f32.mrf.mxu1  ;;  %v10503_v4 = vld [vmem:[%s19099_s5 + $0x3f0] sm:$0xf]  ;;  %v16314_v16 = vpop.f32.mrf.mxu2 }
 0x300   :  { %v9513_v46 = vld [vmem:[%s19096_s3 + $0xc38] sm:$0xf0]  ;;  %4142 = vmatmul.bf16.vlgmr.msrb.gmra.mxu1 %v13435_v2  ;;  %v10364_v2 = vor.u32 %v12410_v0, %v10363_v63  ;;  %v16278_v63 = vld [vmem:[%s19098_s4] sm:$0xff]  ;;  %v12445_v60 = vld [vmem:[%s19099_s5 + $0x408] sm:$0xf0] }
 0x301   :  { %v12255_v23 = vld [vmem:[%s19096_s3 + $0xe1c] sm:$0xf]  ;;  %7050 = vmatpush.bf16.msra.mxu1 %v10420_v36  ;;  %v9516_v56 = vor.u32 %v12191_v45, %v9513_v46  ;;  %4166 = vmatpush.bf16.msrb.mxu3 %v9804_v44  ;;  %v10783_v36 = vld [vmem:[%s19099_s5 + $0x620] sm:$0xf]  ;;  %v10279_v45 = vld [vmem:[%s19099_s5 + $0x230] sm:$0xf] }
 0x302   :  { %v9769_v47 = vld [vmem:[%s19096_s3 + $0xe38] sm:$0xf0]  ;;  %v12389_v46 = vld [vmem:[%s19099_s5 + $0x248] sm:$0xf0]  ;;  %v770_v0 = vperm.slane %v16278_v63, 5 }
 0x303   :  { %v9772_v61 = vor.u32 %v12255_v23, %v9769_v47  ;;  %7038 = vmatpush.bf16.msra.mxu0 %v10168_v51  ;;  %4154 = vmatpush.bf16.msrb.mxu2 %v9516_v56  ;;  %v12347_v50 = vld [vmem:[%s19099_s5 + $0xf8] sm:$0xf0]  ;;  %v10531_v47 = vld [vmem:[%s19099_s5 + $0x428] sm:$0xf]  ;;  %v10027_v56 = vld [vmem:[%s19099_s5 + $0x38] sm:$0xf]  ;;  %v3924_v33 = vpop.f32.mrf.mxu0 }
 0x304   :  { %v12403_v12 = vld [vmem:[%s19099_s5 + $0x2b8] sm:$0xf0]  ;;  %v10112_v15 = vor.u32 %v12347_v50, %v10111_v30  ;;  %v10755_v51 = vld [vmem:[%s19099_s5 + $0x5e8] sm:$0xf]  ;;  %v10532_v59 = vor.u32 %v12452_v48, %v10531_v47  ;;  %v10028_v7 = vor.u32 %v12326_v57, %v10027_v56  ;;  %v9999_v30 = vld [vmem:[%s19099_s5] sm:$0xf]  ;;  %v3871_v41 = vadd.f32 %v16015_v35, %v770_v0 }
 0x305   :  { %7051 = vmatpush.bf16.msra.mxu1 %v10392_v54  ;;  %4167 = vmatpush.bf16.msrb.mxu3 %v9772_v61  ;;  %v10336_v25 = vor.u32 %v12403_v12, %v10335_v10  ;;  %v12459_v32 = vld [vmem:[%s19099_s5 + $0x478] sm:$0xf0]  ;;  %v10280_v54 = vor.u32 %v12389_v46, %v10279_v45  ;;  %v10251_v61 = vld [vmem:[%s19099_s5 + $0x1f8] sm:$0xf]  ;;  %v10223_v10 = vld [vmem:[%s19099_s5 + $0x1c0] sm:$0xf] }
 0x306   :  { %4155 = vmatmul.bf16.vlgmr.msrb.gmra.mxu2 %v13472_v31  ;;  %v12340_v31 = vld [vmem:[%s19099_s5 + $0xc0] sm:$0xf0]  ;;  %v12515_v38 = vld [vmem:[%s19099_s5 + $0x638] sm:$0xf0]  ;;  %v10560_v44 = vor.u32 %v12459_v32, %v10559_v17  ;;  %v4189_v17 = vsel %vm4173_vm10, %v14411_v6, %v4181_v53  ;;  %v4183_v32 = vmul.f32 0.01, %v15115_v20  ;;  %v3884_v57 = vadd.f32 %v16023_v40, %v3871_v41 }
 0x307   :  { %7063 = vmatpush.bf16.msra.mxu2 %v10644_v62  ;;  %7039 = vmatpush.bf16.msra.mxu0 %v10140_v5  ;;  %v10084_v24 = vor.u32 %v12340_v31, %v10083_v3  ;;  %v10784_v23 = vor.u32 %v12515_v38, %v10783_v36  ;;  %v12382_v62 = vld [vmem:[%s19099_s5 + $0x210] sm:$0xf0]  ;;  %v3937_v5 = vpop.f32.mrf.mxu1  ;;  %v12375_v12 = vld [vmem:[%s19099_s5 + $0x1d8] sm:$0xf0]  ;;  %v10475_v3 = vld [vmem:[%s19099_s5 + $0x3b8] sm:$0xf]  ;;  %v11092_v36 = vor.u32 %v12592_v14, %v11091_v13  ;;  %v3950_v0 = vpop.f32.mrf.mxu2 }
 0x308   :  { %4168 = vmatmul.bf16.vlgmr.msrb.gmra.mxu3 %v13483_v37  ;;  %v12396_v37 = vld [vmem:[%s19099_s5 + $0x280] sm:$0xf0]  ;;  %v10252_v50 = vor.u32 %v12382_v62, %v10251_v61  ;;  %v12438_v31 = vld [vmem:[%s19099_s5 + $0x3d0] sm:$0xf0]  ;;  %v11063_v38 = vld [vmem:[%s19099_s5 + $0x850] sm:$0xf]  ;;  %v16362_v48 = vpack.c.bf16 %v4189_v17, %v4189_v17  ;;  %v3897_v5 = vadd.f32 %v16100_v22, %v3884_v57 }
 0x309   :  { %7076 = vmatpush.bf16.msra.mxu3 %v10868_v1  ;;  %7052 = vmatpush.bf16.msra.mxu1 %v10364_v2  ;;  %v10308_v39 = vor.u32 %v12396_v37, %v10307_v27  ;;  %v10756_v1 = vor.u32 %v12508_v52, %v10755_v51  ;;  %v12501_v2 = vld [vmem:[%s19099_s5 + $0x5c8] sm:$0xf0]  ;;  %v10699_v37 = vld [vmem:[%s19099_s5 + $0x578] sm:$0xf]  ;;  %v11287_v45 = vld [vmem:[%s19099_s5 + $0xa10] sm:$0xf] }
 0x30a   :  { %v10728_v21 = vor.u32 %v12501_v2, %v10727_v8  ;;  %v12585_v6 = vld [vmem:[%s19099_s5 + $0x868] sm:$0xf0]  ;;  %v12431_v35 = vld [vmem:[%s19099_s5 + $0x398] sm:$0xf0]  ;;  %v10671_v47 = vld [vmem:[%s19099_s5 + $0x540] sm:$0xf]  ;;  %v3910_v14 = vadd.f32 %v16111_v19, %v3897_v5 }
 0x30b   :  { %7064 = vmatpush.bf16.msra.mxu2 %v10616_v9  ;;  %7040 = vmatpush.bf16.msra.mxu0 %v10112_v15  ;;  %v12319_v9 = vld [vmem:[%s19099_s5 + $0x18] sm:$0xf0]  ;;  %v11315_v15 = vld [vmem:[%s19099_s5 + $0xa48] sm:$0xf]  ;;  %v12641_v46 = vld [vmem:[%s19099_s5 + $0xa28] sm:$0xf0]  ;;  %v11064_v56 = vor.u32 %v12585_v6, %v11063_v38  ;;  %v16444_v17 = vpop.f32.mrf.mxu0 }
 0x30c   :  { %v10000_v27 = vor.u32 %v12319_v9, %v9999_v30  ;;  %v11539_v51 = vld [vmem:[%s19099_s5 + $0xc08] sm:$0xf]  ;;  %v12704_v52 = vld [vmem:[%s19099_s5 + $0xc20] sm:$0xf0]  ;;  %v11035_v61 = vld [vmem:[%s19099_s5 + $0x818] sm:$0xf] }
 0x30d   :  { %7077 = vmatpush.bf16.msra.mxu3 %v10840_v55  ;;  %7053 = vmatpush.bf16.msra.mxu1 %v10336_v25  ;;  %v10504_v55 = vor.u32 %v12445_v60, %v10503_v4  ;;  %v12648_v25 = vld [vmem:[%s19099_s5 + $0xa60] sm:$0xf0]  ;;  %v12578_v62 = vld [vmem:[%s19099_s5 + $0x830] sm:$0xf0]  ;;  %v11259_v40 = vld [vmem:[%s19099_s5 + $0x9d8] sm:$0xf]  ;;  %v4191_v60 = vsel %vm4175_vm12, %v15115_v20, %v4183_v32 }
 0x30e   :  { %v11316_v43 = vor.u32 %v12648_v25, %v11315_v15  ;;  %v12634_v4 = vld [vmem:[%s19099_s5 + $0x9f0] sm:$0xf0]  ;;  %v11511_v8 = vld [vmem:[%s19099_s5 + $0xbd0] sm:$0xf]  ;;  %v12697_v2 = vld [vmem:[%s19099_s5 + $0xbe8] sm:$0xf0] }
 0x30f   :  { %7065 = vmatpush.bf16.msra.mxu2 %v10588_v26  ;;  %7041 = vmatpush.bf16.msra.mxu0 %v10084_v24  ;;  %v16325_v26 = vpop.f32.mrf.mxu3  ;;  %v10224_v24 = vor.u32 %v12375_v12, %v10223_v10  ;;  %v11260_v20 = vor.u32 %v12634_v4, %v11259_v40  ;;  %v11007_v22 = vld [vmem:[%s19099_s5 + $0x7e0] sm:$0xf]  ;;  %v12571_v9 = vld [vmem:[%s19099_s5 + $0x7f8] sm:$0xf0]  ;;  %v16412_v10 = vpack.c.bf16 %v4191_v60, %v4191_v60  ;;  %v11483_v15 = vld [vmem:[%s19099_s5 + $0xb98] sm:$0xf] }
 0x310   :  { %v11512_v12 = vor.u32 %v12697_v2, %v11511_v8  ;;  %v11008_v25 = vor.u32 %v12571_v9, %v11007_v22  ;;  %v10979_v19 = vld [vmem:[%s19099_s5 + $0x7a8] sm:$0xf]  ;;  %v11455_v32 = vld [vmem:[%s19099_s5 + $0xb60] sm:$0xf]  ;;  %v12599_v4 = vld [vmem:[%s19099_s5 + $0x8d8] sm:$0xf0] }
 0x311   :  { %7078 = vmatpush.bf16.msra.mxu3 %v10812_v29  ;;  %7054 = vmatpush.bf16.msra.mxu1 %v10308_v39  ;;  %v12494_v29 = vld [vmem:[%s19099_s5 + $0x590] sm:$0xf0]  ;;  %v4190_v39 = vsel %vm4174_vm11, %v14717_v18, %v4182_v58  ;;  %v10447_v18 = vld [vmem:[%s19099_s5 + $0x380] sm:$0xf]  ;;  %v11288_v58 = vor.u32 %v12641_v46, %v11287_v45  ;;  %v11175_v45 = vld [vmem:[%s19099_s5 + $0x930] sm:$0xf] }
 0x312   :  { %v16373_v53 = vpack.c.bf16 %v4190_v39, %v4190_v39  ;;  %v11119_v40 = vld [vmem:[%s19099_s5 + $0x8c0] sm:$0xf]  ;;  %v12365_v60 = vld [vmem:[%s19099_s5 + $0x18c] sm:$0xf]  ;;  %v10421_v2 = vld [vmem:[%s19099_s5 + $0x364] sm:$0xf0] }
 0x313   :  { %7066 = vmatpush.bf16.msra.mxu2 %v10560_v44  ;;  %7042 = vmatpush.bf16.msra.mxu0 %v10056_v49  ;;  %v10476_v44 = vor.u32 %v12438_v31, %v10475_v3  ;;  %v12487_v49 = vld [vmem:[%s19099_s5 + $0x558] sm:$0xf0]  ;;  %v3923_v3 = vadd.f32 %v16219_v28, %v3910_v14  ;;  %v12620_v28 = vld [vmem:[%s19099_s5 + $0x980] sm:$0xf0]  ;;  %v3976_v57 = vpop.f32.mrf.mxu0  ;;  %v12421_v8 = vld [vmem:[%s19099_s5 + $0x34c] sm:$0xf] }
 0x314   :  { %v10672_v33 = vor.u32 %v12487_v49, %v10671_v47  ;;  %v10923_v49 = vld [vmem:[%s19099_s5 + $0x738] sm:$0xf]  ;;  %v12662_v22 = vld [vmem:[%s19099_s5 + $0xad0] sm:$0xf0] }
 0x315   :  { %7079 = vmatpush.bf16.msra.mxu3 %v10784_v23  ;;  %7055 = vmatpush.bf16.msra.mxu1 %v10280_v54  ;;  %v10700_v23 = vor.u32 %v12494_v29, %v10699_v37  ;;  %v4184_v54 = vmul.f32 0.01, %v15518_v11  ;;  %v11203_v29 = vld [vmem:[%s19099_s5 + $0x968] sm:$0xf]  ;;  %v3936_v39 = vadd.f32 %v16227_v34, %v3923_v3  ;;  %v12613_v34 = vld [vmem:[%s19099_s5 + $0x948] sm:$0xf0] }
 0x316   :  { %v11204_v41 = vor.u32 %v12620_v28, %v11203_v29  ;;  %v11176_v47 = vor.u32 %v12613_v34, %v11175_v45  ;;  %v12358_v14 = vld [vmem:[%s19099_s5 + $0x154] sm:$0xf]  ;;  %v10169_v3 = vld [vmem:[%s19099_s5 + $0x16c] sm:$0xf0]  ;;  %v12477_v29 = vld [vmem:[%s19099_s5 + $0x50c] sm:$0xf] }
 0x317   :  { %7067 = vmatpush.bf16.msra.mxu2 %v10532_v59  ;;  %7043 = vmatpush.bf16.msra.mxu0 %v10028_v7  ;;  %v10448_v59 = vor.u32 %v12431_v35, %v10447_v18  ;;  %v3963_v7 = vpop.f32.mrf.mxu3  ;;  %v4192_v30 = vsel %vm4176_vm13, %v15518_v11, %v4184_v54  ;;  %v11231_v11 = vld [vmem:[%s19099_s5 + $0x9a0] sm:$0xf]  ;;  %v3949_v46 = vadd.f32 %v16314_v16, %v3936_v39  ;;  %v12676_v18 = vld [vmem:[%s19099_s5 + $0xb40] sm:$0xf0]  ;;  %v12550_v16 = vld [vmem:[%s19099_s5 + $0x750] sm:$0xf0] }
 0x318   :  { %v16420_v13 = vpack.c.bf16 %v4192_v30, %v4192_v30  ;;  %v12606_v54 = vld [vmem:[%s19099_s5 + $0x910] sm:$0xf0]  ;;  %v10924_v0 = vor.u32 %v12550_v16, %v10923_v49  ;;  %v10197_v7 = vld [vmem:[%s19099_s5 + $0x1a4] sm:$0xf0]  ;;  %v10172_v39 = vor.u32 %v12358_v14, %v10169_v3  ;;  %v12351_v34 = vld [vmem:[%s19099_s5 + $0x11c] sm:$0xf] }
 0x319   :  { %7080 = vmatpush.bf16.msra.mxu3 %v10756_v1  ;;  %7056 = vmatpush.bf16.msra.mxu1 %v10252_v50  ;;  %v11540_v1 = vor.u32 %v12704_v52, %v11539_v51  ;;  %v11036_v50 = vor.u32 %v12578_v62, %v11035_v61  ;;  %v11147_v52 = vld [vmem:[%s19099_s5 + $0x8f8] sm:$0xf]  ;;  %v4185_v61 = vmul.f32 0.01, %v15916_v42  ;;  %v10645_v28 = vld [vmem:[%s19099_s5 + $0x524] sm:$0xf0] }
 0x31a   :  { %v12470_v49 = vld [vmem:[%s19099_s5 + $0x4d4] sm:$0xf]  ;;  %v11679_v14 = vld [vmem:[%s19099_s5 + $0xd20] sm:$0xf] }
 0x31b   :  { %7068 = vmatpush.bf16.msra.mxu2 %v10504_v55  ;;  %7044 = vmatpush.bf16.msra.mxu0 %v10000_v27  ;;  %v12627_v55 = vld [vmem:[%s19099_s5 + $0x9b8] sm:$0xf0]  ;;  %v12564_v27 = vld [vmem:[%s19099_s5 + $0x7c0] sm:$0xf0] }
 0x31c   :  { %v11232_v31 = vor.u32 %v12627_v55, %v11231_v11  ;;  %v10980_v38 = vor.u32 %v12564_v27, %v10979_v19  ;;  %v11120_v11 = vor.u32 %v12599_v4, %v11119_v40  ;;  %v10200_v55 = vor.u32 %v12365_v60, %v10197_v7  ;;  %v10393_v19 = vld [vmem:[%s19099_s5 + $0x32c] sm:$0xf0]  ;;  %v10589_v40 = vld [vmem:[%s19099_s5 + $0x4b4] sm:$0xf0]  ;;  %v12746_v4 = vld [vmem:[%s19099_s5 + $0xd70] sm:$0xf0] }
 0x31d   :  { %7081 = vmatpush.bf16.msra.mxu3 %v10728_v21  ;;  %7057 = vmatpush.bf16.msra.mxu1 %v10224_v24  ;;  %v12690_v21 = vld [vmem:[%s19099_s5 + $0xbb0] sm:$0xf0]  ;;  %v12683_v24 = vld [vmem:[%s19099_s5 + $0xb78] sm:$0xf0] }
 0x31e   :  { %7045 = vmatmul.bf16.vlgmr.msra.gmra.mxu0 %v16362_v48  ;;  %v11484_v37 = vor.u32 %v12690_v21, %v11483_v15  ;;  %v11456_v6 = vor.u32 %v12683_v24, %v11455_v32  ;;  %v4193_v15 = vsel %vm4177_vm14, %v15916_v42, %v4185_v61  ;;  %v10424_v21 = vor.u32 %v12421_v8, %v10421_v2  ;;  %v11343_v42 = vld [vmem:[%s19099_s5 + $0xa80] sm:$0xf]  ;;  %v11763_v32 = vld [vmem:[%s19099_s5 + $0xdc8] sm:$0xf]  ;;  %v12760_v24 = vld [vmem:[%s19099_s5 + $0xde0] sm:$0xf0] }
 0x31f   :  { %7089 = vmatpush.bf16.msrb.mxu0 %v11092_v36  ;;  %7069 = vmatpush.bf16.msra.mxu2 %v10476_v44  ;;  %v16452_v36 = vpop.f32.mrf.mxu1  ;;  %v12557_v44 = vld [vmem:[%s19099_s5 + $0x788] sm:$0xf0]  ;;  %v16527_v9 = vpop.f32.mrf.mxu3  ;;  %v10113_v61 = vld [vmem:[%s19099_s5 + $0xfc] sm:$0xf0]  ;;  %v10085_v2 = vld [vmem:[%s19099_s5 + $0xc4] sm:$0xf0] }
 0x320   :  { %7058 = vmatmul.bf16.vlgmr.msra.gmra.mxu1 %v16373_v53  ;;  %v12337_v8 = vld [vmem:[%s19099_s5 + $0xac] sm:$0xf] }
 0x321   :  { %7102 = vmatpush.bf16.msrb.mxu1 %v11316_v43  ;;  %7082 = vmatpush.bf16.msra.mxu3 %v10700_v23  ;;  %v10951_v43 = vld [vmem:[%s19099_s5 + $0x770] sm:$0xf]  ;;  %v11427_v23 = vld [vmem:[%s19099_s5 + $0xb28] sm:$0xf]  ;;  %v10088_v3 = vor.u32 %v12337_v8, %v10085_v2  ;;  %v11595_v8 = vld [vmem:[%s19099_s5 + $0xc78] sm:$0xf] }
 0x322   :  { %v10952_v35 = vor.u32 %v12557_v44, %v10951_v43  ;;  %v11428_v51 = vor.u32 %v12676_v18, %v11427_v23  ;;  %v771_v44 = vperm.slane %v16278_v63, 6  ;;  %v10648_v18 = vor.u32 %v12477_v29, %v10645_v28  ;;  %v10281_v29 = vld [vmem:[%s19099_s5 + $0x24c] sm:$0xf0]  ;;  %v12449_v28 = vld [vmem:[%s19099_s5 + $0x42c] sm:$0xf] }
 0x323   :  { %7090 = vmatpush.bf16.msrb.mxu0 %v11064_v56  ;;  %7070 = vmatpush.bf16.msra.mxu2 %v10448_v59  ;;  %v3962_v56 = vadd.f32 %v16325_v26, %v3949_v46  ;;  %v12669_v59 = vld [vmem:[%s19099_s5 + $0xb08] sm:$0xf0]  ;;  %v12543_v26 = vld [vmem:[%s19099_s5 + $0x718] sm:$0xf0]  ;;  %v10141_v46 = vld [vmem:[%s19099_s5 + $0x134] sm:$0xf0] }
 0x324   :  { %v12718_v2 = vld [vmem:[%s19099_s5 + $0xc90] sm:$0xf0] }
 0x325   :  { %7103 = vmatpush.bf16.msrb.mxu1 %v11288_v58  ;;  %7083 = vmatpush.bf16.msra.mxu3 %v10672_v33  ;;  %v11399_v58 = vld [vmem:[%s19099_s5 + $0xaf0] sm:$0xf]  ;;  %v10895_v33 = vld [vmem:[%s19099_s5 + $0x700] sm:$0xf]  ;;  %v4186_v30 = vmul.f32 0.01, %v3962_v56 }
 0x326   :  { %7071 = vmatmul.bf16.vlgmr.msra.gmra.mxu2 %v16412_v10  ;;  %v11400_v5 = vor.u32 %v12669_v59, %v11399_v58  ;;  %vm4178_vm15 = vcmp.gt.f32.partialorder %v3962_v56, 0.0  ;;  %v12344_v59 = vld [vmem:[%s19099_s5 + $0xe4] sm:$0xf] }
 0x327   :  { %7115 = vmatpush.bf16.msrb.mxu2 %v11540_v1  ;;  %7091 = vmatpush.bf16.msrb.mxu0 %v11036_v50  ;;  %v3989_v62 = vpop.f32.mrf.mxu1  ;;  %v11148_v1 = vor.u32 %v12606_v54, %v11147_v52  ;;  %v16519_v50 = vpop.f32.mrf.mxu2  ;;  %v4194_v27 = vsel %vm4178_vm15, %v3962_v56, %v4186_v30  ;;  %v11735_v52 = vld [vmem:[%s19099_s5 + $0xd90] sm:$0xf]  ;;  %v12753_v54 = vld [vmem:[%s19099_s5 + $0xda8] sm:$0xf0]  ;;  %v10144_v56 = vor.u32 %v12351_v34, %v10141_v46  ;;  %v12323_v34 = vld [vmem:[%s19099_s5 + $0x3c] sm:$0xf] }
 0x328   :  { %7084 = vmatmul.bf16.vlgmr.msra.gmra.mxu3 %v16420_v13  ;;  %v16564_v43 = vpack.c.bf16 %v4194_v27, %v4194_v27  ;;  %v4015_v16 = vpop.f32.mrf.mxu3  ;;  %v11736_v57 = vor.u32 %v12753_v54, %v11735_v52  ;;  %v3975_v62 = vadd.f32 %v16444_v17, %v771_v44  ;;  %v11707_v17 = vld [vmem:[%s19099_s5 + $0xd58] sm:$0xf]  ;;  %v10116_v60 = vor.u32 %v12344_v59, %v10113_v61  ;;  %v12330_v27 = vld [vmem:[%s19099_s5 + $0x74] sm:$0xf]  ;;  %v12725_v52 = vld [vmem:[%s19099_s5 + $0xcc8] sm:$0xf0] }
 0x329   :  { %7104 = vmatpush.bf16.msrb.mxu1 %v11260_v20  ;;  %v11371_v20 = vld [vmem:[%s19099_s5 + $0xab8] sm:$0xf]  ;;  %v10505_v16 = vld [vmem:[%s19099_s5 + $0x40c] sm:$0xf0]  ;;  %v12372_v59 = vld [vmem:[%s19099_s5 + $0x1c4] sm:$0xf] }
 0x32a   :  { %v3988_v30 = vadd.f32 %v16452_v36, %v3975_v62  ;;  %v10561_v36 = vld [vmem:[%s19099_s5 + $0x47c] sm:$0xf0]  ;;  %v10029_v46 = vld [vmem:[%s19099_s5 + $0x54] sm:$0xf0] }
 0x32b   :  { %7116 = vmatpush.bf16.msrb.mxu2 %v11512_v12  ;;  %7092 = vmatpush.bf16.msrb.mxu0 %v11008_v25  ;;  %v10896_v12 = vor.u32 %v12543_v26, %v10895_v33  ;;  %v11372_v25 = vor.u32 %v12662_v22, %v11371_v20  ;;  %v12400_v33 = vld [vmem:[%s19099_s5 + $0x2a4] sm:$0xf]  ;;  %v10337_v26 = vld [vmem:[%s19099_s5 + $0x2bc] sm:$0xf0]  ;;  %v12393_v22 = vld [vmem:[%s19099_s5 + $0x26c] sm:$0xf] }
 0x32c   :  { %v10340_v7 = vor.u32 %v12400_v33, %v10337_v26  ;;  %v12589_v33 = vld [vmem:[%s19099_s5 + $0x88c] sm:$0xf]  ;;  %v11093_v26 = vld [vmem:[%s19099_s5 + $0x8a4] sm:$0xf0] }
 0x32d   :  { %7105 = vmatpush.bf16.msrb.mxu1 %v11232_v31  ;;  %v12414_v31 = vld [vmem:[%s19099_s5 + $0x314] sm:$0xf] }
 0x32f   :  { %7117 = vmatpush.bf16.msrb.mxu2 %v11484_v37  ;;  %7093 = vmatpush.bf16.msrb.mxu0 %v10980_v38  ;;  %v12655_v37 = vld [vmem:[%s19099_s5 + $0xa98] sm:$0xf0]  ;;  %v16562_v38 = vpack.c.bf16 %v4193_v15, %v4193_v15  ;;  %v4002_v23 = vpop.f32.mrf.mxu2 }
 0x330   :  { %v11344_v45 = vor.u32 %v12655_v37, %v11343_v42  ;;  %v12739_v15 = vld [vmem:[%s19099_s5 + $0xd38] sm:$0xf0]  ;;  %v10057_v42 = vld [vmem:[%s19099_s5 + $0x8c] sm:$0xf0] }
 0x331   :  { %7106 = vmatpush.bf16.msrb.mxu1 %v11204_v41  ;;  %v11764_v41 = vor.u32 %v12760_v24, %v11763_v32  ;;  %v10533_v32 = vld [vmem:[%s19099_s5 + $0x444] sm:$0xf0]  ;;  %v10060_v44 = vor.u32 %v12330_v27, %v10057_v42  ;;  %v10449_v27 = vld [vmem:[%s19099_s5 + $0x39c] sm:$0xf0]  ;;  %v12701_v42 = vld [vmem:[%s19099_s5 + $0xc0c] sm:$0xf] }
 0x332   :  { %v11651_v24 = vld [vmem:[%s19099_s5 + $0xce8] sm:$0xf] }
 0x333   :  { %7118 = vmatpush.bf16.msrb.mxu2 %v11456_v6  ;;  %7094 = vmatpush.bf16.msrb.mxu0 %v10952_v35  ;;  %v10396_v6 = vor.u32 %v12414_v31, %v10393_v19  ;;  %v12407_v35 = vld [vmem:[%s19099_s5 + $0x2dc] sm:$0xf]  ;;  %v11680_v31 = vor.u32 %v12739_v15, %v11679_v14  ;;  %v11065_v14 = vld [vmem:[%s19099_s5 + $0x86c] sm:$0xf0]  ;;  %v12638_v15 = vld [vmem:[%s19099_s5 + $0xa14] sm:$0xf] }
 0x334   :  { %7128 = vmatpush.bf16.msrb.mxu3 %v11764_v41 }
 0x335   :  { %7107 = vmatpush.bf16.msrb.mxu1 %v11176_v47  ;;  %v10365_v47 = vld [vmem:[%s19099_s5 + $0x2f4] sm:$0xf0] }
 0x336   :  { %v10368_v58 = vor.u32 %v12407_v35, %v10365_v47  ;;  %v10253_v35 = vld [vmem:[%s19099_s5 + $0x214] sm:$0xf0]  ;;  %v12442_v47 = vld [vmem:[%s19099_s5 + $0x3f4] sm:$0xf] }
 0x337   :  { %7119 = vmatpush.bf16.msrb.mxu2 %v11428_v51  ;;  %7095 = vmatpush.bf16.msrb.mxu0 %v10924_v0  ;;  %v10617_v51 = vld [vmem:[%s19099_s5 + $0x4ec] sm:$0xf0] }
 0x338   :  { %v10620_v0 = vor.u32 %v12470_v49, %v10617_v51  ;;  %7129 = vmatpush.bf16.msrb.mxu3 %v11736_v57  ;;  %v11623_v51 = vld [vmem:[%s19099_s5 + $0xcb0] sm:$0xf]  ;;  %v12316_v57 = vld [vmem:[%s19099_s5 + $0x4] sm:$0xf] }
 0x339   :  { %7108 = vmatpush.bf16.msrb.mxu1 %v11148_v1  ;;  %v12463_v1 = vld [vmem:[%s19099_s5 + $0x49c] sm:$0xf]  ;;  %v11624_v61 = vor.u32 %v12725_v52, %v11623_v51  ;;  %v11513_v52 = vld [vmem:[%s19099_s5 + $0xbec] sm:$0xf0] }
 0x33a   :  { %v10592_v20 = vor.u32 %v12463_v1, %v10589_v40  ;;  %v10508_v40 = vor.u32 %v12442_v47, %v10505_v16  ;;  %v12631_v47 = vld [vmem:[%s19099_s5 + $0x9dc] sm:$0xf]  ;;  %v12694_v16 = vld [vmem:[%s19099_s5 + $0xbd4] sm:$0xf] }
 0x33b   :  { %7120 = vmatpush.bf16.msrb.mxu2 %v11400_v5  ;;  %7096 = vmatpush.bf16.msrb.mxu0 %v10896_v12  ;;  %v11708_v5 = vor.u32 %v12746_v4, %v11707_v17  ;;  %v10309_v12 = vld [vmem:[%s19099_s5 + $0x284] sm:$0xf0]  ;;  %v12645_v17 = vld [vmem:[%s19099_s5 + $0xa4c] sm:$0xf] }
 0x33c   :  { %v10312_v19 = vor.u32 %v12393_v22, %v10309_v12  ;;  %v11317_v4 = vld [vmem:[%s19099_s5 + $0xa64] sm:$0xf0]  ;;  %v12582_v12 = vld [vmem:[%s19099_s5 + $0x854] sm:$0xf] }
 0x33d   :  { %7109 = vmatpush.bf16.msrb.mxu1 %v11120_v11  ;;  %v12456_v11 = vld [vmem:[%s19099_s5 + $0x464] sm:$0xf]  ;;  %7130 = vmatpush.bf16.msrb.mxu3 %v11708_v5  ;;  %v4052_v5 = vpop.f32.mrf.mxu2 }
 0x33e   :  { %7097 = vmatmul.bf16.vlgmr.msrb.gmra.mxu0 %v16562_v38  ;;  %v10564_v37 = vor.u32 %v12456_v11, %v10561_v36  ;;  %v11596_v11 = vor.u32 %v12718_v2, %v11595_v8  ;;  %v11096_v36 = vor.u32 %v12589_v33, %v11093_v26  ;;  %v12624_v33 = vld [vmem:[%s19099_s5 + $0x9a4] sm:$0xf]  ;;  %v11233_v26 = vld [vmem:[%s19099_s5 + $0x9bc] sm:$0xf0]  ;;  %v12561_v8 = vld [vmem:[%s19099_s5 + $0x7ac] sm:$0xf] }
 0x33f   :  { %7141 = vmatpush.bf16.msra.mxu0 %v10200_v55  ;;  %7121 = vmatpush.bf16.msrb.mxu2 %v11372_v25  ;;  %v4026_v55 = vpop.f32.mrf.mxu0  ;;  %v4039_v25 = vpop.f32.mrf.mxu1  ;;  %v10981_v2 = vld [vmem:[%s19099_s5 + $0x7c4] sm:$0xf0] }
 0x340   :  { %7110 = vmatmul.bf16.vlgmr.msrb.gmra.mxu1 %v16564_v43 }
 0x341   :  { %7154 = vmatpush.bf16.msra.mxu1 %v10424_v21  ;;  %v4001_v21 = vadd.f32 %v16519_v50, %v3988_v30  ;;  %v12386_v50 = vld [vmem:[%s19099_s5 + $0x234] sm:$0xf]  ;;  %7131 = vmatpush.bf16.msrb.mxu3 %v11680_v31 }
 0x343   :  { %7142 = vmatpush.bf16.msra.mxu0 %v10172_v39  ;;  %7122 = vmatpush.bf16.msrb.mxu2 %v11344_v45  ;;  %v12732_v39 = vld [vmem:[%s19099_s5 + $0xd00] sm:$0xf0]  ;;  %v4014_v41 = vadd.f32 %v16527_v9, %v4001_v21  ;;  %v10284_v45 = vor.u32 %v12386_v50, %v10281_v29  ;;  %v12379_v9 = vld [vmem:[%s19099_s5 + $0x1fc] sm:$0xf]  ;;  %v11289_v21 = vld [vmem:[%s19099_s5 + $0xa2c] sm:$0xf0] }
 0x344   :  { %v10256_v62 = vor.u32 %v12379_v9, %v10253_v35  ;;  %v11567_v50 = vld [vmem:[%s19099_s5 + $0xc40] sm:$0xf]  ;;  %v12711_v29 = vld [vmem:[%s19099_s5 + $0xc58] sm:$0xf0] }
 0x345   :  { %7155 = vmatpush.bf16.msra.mxu1 %v10396_v6  ;;  %v11652_v6 = vor.u32 %v12732_v39, %v11651_v24  ;;  %v4027_v23 = vadd.f32 %v4026_v55, %v4014_v41  ;;  %v12533_v24 = vld [vmem:[%s19099_s5 + $0x6cc] sm:$0xf]  ;;  %v11068_v39 = vor.u32 %v12582_v12, %v11065_v14  ;;  %v11292_v41 = vor.u32 %v12638_v15, %v11289_v21  ;;  %v4054_v9 = vpop.f32.mrf.mxu2  ;;  %v12680_v12 = vld [vmem:[%s19099_s5 + $0xb64] sm:$0xf]  ;;  %v10785_v14 = vld [vmem:[%s19099_s5 + $0x63c] sm:$0xf0] }
 0x346   :  { %v10984_v21 = vor.u32 %v12561_v8, %v10981_v2 }
 0x347   :  { %7167 = vmatpush.bf16.msra.mxu2 %v10648_v18  ;;  %7143 = vmatpush.bf16.msra.mxu0 %v10144_v56  ;;  %v10536_v18 = vor.u32 %v12449_v28, %v10533_v32  ;;  %v4028_v49 = vpop.f32.mrf.mxu0  ;;  %v4041_v54 = vpop.f32.mrf.mxu1  ;;  %v10032_v56 = vor.u32 %v12323_v34, %v10029_v46  ;;  %v4040_v1 = vadd.f32 %v4039_v25, %v4027_v23  ;;  %v12575_v34 = vld [vmem:[%s19099_s5 + $0x81c] sm:$0xf]  ;;  %v11037_v46 = vld [vmem:[%s19099_s5 + $0x834] sm:$0xf0] }
 0x348   :  { %7132 = vmatpush.bf16.msrb.mxu3 %v11652_v6  ;;  %v11568_v32 = vor.u32 %v12711_v29, %v11567_v50  ;;  %v11261_v49 = vld [vmem:[%s19099_s5 + $0x9f4] sm:$0xf0]  ;;  %v12526_v54 = vld [vmem:[%s19099_s5 + $0x694] sm:$0xf]  ;;  %v12673_v50 = vld [vmem:[%s19099_s5 + $0xb2c] sm:$0xf] }
 0x349   :  { %7156 = vmatpush.bf16.msra.mxu1 %v10368_v58  ;;  %v10001_v58 = vld [vmem:[%s19099_s5 + $0x1c] sm:$0xf0]  ;;  %v4053_v30 = vadd.f32 %v4052_v5, %v4040_v1  ;;  %v12687_v1 = vld [vmem:[%s19099_s5 + $0xb9c] sm:$0xf]  ;;  %v11429_v29 = vld [vmem:[%s19099_s5 + $0xb44] sm:$0xf0] }
 0x34a   :  { %v10004_v22 = vor.u32 %v12316_v57, %v10001_v58  ;;  %v11040_v57 = vor.u32 %v12575_v34, %v11037_v46  ;;  %v12603_v34 = vld [vmem:[%s19099_s5 + $0x8fc] sm:$0xf]  ;;  %v11149_v46 = vld [vmem:[%s19099_s5 + $0x914] sm:$0xf0] }
 0x34b   :  { %7168 = vmatpush.bf16.msra.mxu2 %v10620_v0  ;;  %7144 = vmatpush.bf16.msra.mxu0 %v10116_v60  ;;  %v10225_v0 = vld [vmem:[%s19099_s5 + $0x1dc] sm:$0xf0]  ;;  %v12435_v60 = vld [vmem:[%s19099_s5 + $0x3bc] sm:$0xf] }
 0x34c   :  { %7133 = vmatpush.bf16.msrb.mxu3 %v11624_v61  ;;  %v10228_v55 = vor.u32 %v12372_v59, %v10225_v0  ;;  %v11264_v59 = vor.u32 %v12631_v47, %v11261_v49  ;;  %v12568_v61 = vld [vmem:[%s19099_s5 + $0x7e4] sm:$0xf]  ;;  %v11516_v0 = vor.u32 %v12694_v16, %v11513_v52  ;;  %v12498_v47 = vld [vmem:[%s19099_s5 + $0x5b4] sm:$0xf]  ;;  %v10729_v49 = vld [vmem:[%s19099_s5 + $0x5cc] sm:$0xf0] }
 0x34d   :  { %7157 = vmatpush.bf16.msra.mxu1 %v10340_v7  ;;  %v10477_v7 = vld [vmem:[%s19099_s5 + $0x3d4] sm:$0xf0]  ;;  %v12540_v52 = vld [vmem:[%s19099_s5 + $0x704] sm:$0xf] }
 0x34e   :  { %v10480_v31 = vor.u32 %v12435_v60, %v10477_v7  ;;  %v11236_v7 = vor.u32 %v12624_v33, %v11233_v26  ;;  %v10427_v33 = vld [vmem:[%s19099_s5 + $0x350] sm:$0xf]  ;;  %v12425_v26 = vld [vmem:[%s19099_s5 + $0x368] sm:$0xf0] }
 0x34f   :  { %7169 = vmatpush.bf16.msra.mxu2 %v10592_v20  ;;  %7145 = vmatpush.bf16.msra.mxu0 %v10088_v3  ;;  %v4065_v20 = vpop.f32.mrf.mxu3  ;;  %v11320_v3 = vor.u32 %v12645_v17, %v11317_v4  ;;  %v12519_v17 = vld [vmem:[%s19099_s5 + $0x65c] sm:$0xf]  ;;  %v10813_v4 = vld [vmem:[%s19099_s5 + $0x674] sm:$0xf0]  ;;  %v16844_v15 = vpop.f32.mrf.mxu1 }
 0x350   :  { %v4066_v25 = vadd.f32 %v4065_v20, %v4053_v30  ;;  %7134 = vmatpush.bf16.msrb.mxu3 %v11596_v11  ;;  %v10816_v5 = vor.u32 %v12519_v17, %v10813_v4  ;;  %v12617_v20 = vld [vmem:[%s19099_s5 + $0x96c] sm:$0xf]  ;;  %v16833_v11 = vpop.f32.mrf.mxu0  ;;  %v11373_v17 = vld [vmem:[%s19099_s5 + $0xad4] sm:$0xf0]  ;;  %v12491_v4 = vld [vmem:[%s19099_s5 + $0x57c] sm:$0xf] }
 0x351   :  { %7158 = vmatpush.bf16.msra.mxu1 %v10312_v19  ;;  %v12428_v19 = vld [vmem:[%s19099_s5 + $0x384] sm:$0xf] }
 0x352   :  { %vm4179_vm0 = vcmp.gt.f32.partialorder %v4066_v25, 0.0  ;;  %v4187_v28 = vmul.f32 0.01, %v4066_v25 }
 0x353   :  { %7170 = vmatpush.bf16.msra.mxu2 %v10564_v37  ;;  %7146 = vmatpush.bf16.msra.mxu0 %v10060_v44  ;;  %v11541_v37 = vld [vmem:[%s19099_s5 + $0xc24] sm:$0xf0] }
 0x354   :  { %v10869_v44 = vld [vmem:[%s19099_s5 + $0x6e4] sm:$0xf0]  ;;  %v4195_v6 = vsel %vm4179_vm0, %v4066_v25, %v4187_v28  ;;  %v11544_v35 = vor.u32 %v12701_v42, %v11541_v37  ;;  %7135 = vmatpush.bf16.msrb.mxu3 %v11568_v32  ;;  %v12610_v42 = vld [vmem:[%s19099_s5 + $0x934] sm:$0xf]  ;;  %v11177_v37 = vld [vmem:[%s19099_s5 + $0x94c] sm:$0xf0] }
 0x355   :  { %7159 = vmatpush.bf16.msra.mxu1 %v10284_v45  ;;  %v10452_v45 = vor.u32 %v12428_v19, %v10449_v27  ;;  %v10872_v23 = vor.u32 %v12533_v24, %v10869_v44  ;;  %v10953_v19 = vld [vmem:[%s19099_s5 + $0x78c] sm:$0xf0]  ;;  %v12505_v28 = vld [vmem:[%s19099_s5 + $0x5ec] sm:$0xf]  ;;  %v10757_v32 = vld [vmem:[%s19099_s5 + $0x604] sm:$0xf0] }
 0x356   :  { %v12547_v44 = vld [vmem:[%s19099_s5 + $0x73c] sm:$0xf] }
 0x357   :  { %7171 = vmatpush.bf16.msra.mxu2 %v10536_v18  ;;  %7147 = vmatpush.bf16.msra.mxu0 %v10032_v56  ;;  %v16771_v18 = vpack.c.bf16 %v4195_v6, %v4195_v6  ;;  %v4067_v51 = vpop.f32.mrf.mxu3  ;;  %v10841_v56 = vld [vmem:[%s19099_s5 + $0x6ac] sm:$0xf0]  ;;  %v10925_v6 = vld [vmem:[%s19099_s5 + $0x754] sm:$0xf0]  ;;  %v4093_v16 = vpop.f32.mrf.mxu1 }
 0x358   :  { %7180 = vmatpush.bf16.msra.mxu3 %v10872_v23  ;;  %v10844_v58 = vor.u32 %v12526_v54, %v10841_v56  ;;  %v12666_v23 = vld [vmem:[%s19099_s5 + $0xaf4] sm:$0xf]  ;;  %v4080_v9 = vpop.f32.mrf.mxu0  ;;  %v10928_v51 = vor.u32 %v12547_v44, %v10925_v6  ;;  %v10897_v54 = vld [vmem:[%s19099_s5 + $0x71c] sm:$0xf0]  ;;  %v12596_v56 = vld [vmem:[%s19099_s5 + $0x8c4] sm:$0xf] }
 0x359   :  { %7160 = vmatpush.bf16.msra.mxu1 %v10256_v62  ;;  %7123 = vmatmul.bf16.vlgmr.msrb.gmra.mxu2 %v16771_v18  ;;  %v11009_v62 = vld [vmem:[%s19099_s5 + $0x7fc] sm:$0xf0]  ;;  %v12411_v6 = vld [vmem:[%s19099_s5 + $0x2f8] sm:$0xf0]  ;;  %v10119_v9 = vld [vmem:[%s19099_s5 + $0xe8] sm:$0xf] }
 0x35a   :  { %v11012_v60 = vor.u32 %v12568_v61, %v11009_v62  ;;  %v10203_v61 = vld [vmem:[%s19099_s5 + $0x190] sm:$0xf]  ;;  %v12369_v62 = vld [vmem:[%s19099_s5 + $0x1a8] sm:$0xf0]  ;;  %v10371_v44 = vld [vmem:[%s19099_s5 + $0x2e0] sm:$0xf] }
 0x35b   :  { %7172 = vmatpush.bf16.msra.mxu2 %v10508_v40  ;;  %7148 = vmatpush.bf16.msra.mxu0 %v10004_v22  ;;  %v11485_v40 = vld [vmem:[%s19099_s5 + $0xbb4] sm:$0xf0]  ;;  %v11205_v22 = vld [vmem:[%s19099_s5 + $0x984] sm:$0xf0] }
 0x35c   :  { %7181 = vmatpush.bf16.msra.mxu3 %v10844_v58  ;;  %v11488_v30 = vor.u32 %v12687_v1, %v11485_v40  ;;  %v11152_v58 = vor.u32 %v12603_v34, %v11149_v46  ;;  %v12659_v1 = vld [vmem:[%s19099_s5 + $0xabc] sm:$0xf]  ;;  %v16922_v40 = vpop.f32.mrf.mxu2  ;;  %v12474_v34 = vld [vmem:[%s19099_s5 + $0x4f0] sm:$0xf0]  ;;  %v10343_v16 = vld [vmem:[%s19099_s5 + $0x2a8] sm:$0xf] }
 0x35d   :  { %7161 = vmatpush.bf16.msra.mxu1 %v10228_v55  ;;  %v11457_v55 = vld [vmem:[%s19099_s5 + $0xb7c] sm:$0xf0] }
 0x35e   :  { %7149 = vmatmul.bf16.vlgmr.msra.gmra.mxu0 %v16362_v48  ;;  %v11460_v27 = vor.u32 %v12680_v12, %v11457_v55  ;;  %v10428_v12 = vor.u32 %v12425_v26, %v10427_v33  ;;  %v11376_v55 = vor.u32 %v12659_v1, %v11373_v17  ;;  %v10567_v26 = vld [vmem:[%s19099_s5 + $0x468] sm:$0xf]  ;;  %v12460_v1 = vld [vmem:[%s19099_s5 + $0x480] sm:$0xf0] }
 0x35f   :  { %7193 = vmatpush.bf16.msrb.mxu0 %v11096_v36  ;;  %7173 = vmatpush.bf16.msra.mxu2 %v10480_v31  ;;  %v12512_v36 = vld [vmem:[%s19099_s5 + $0x624] sm:$0xf]  ;;  %v12554_v31 = vld [vmem:[%s19099_s5 + $0x774] sm:$0xf] }
 0x360   :  { %7162 = vmatmul.bf16.vlgmr.msra.gmra.mxu1 %v16373_v53  ;;  %7182 = vmatpush.bf16.msra.mxu3 %v10816_v5  ;;  %v10788_v25 = vor.u32 %v12512_v36, %v10785_v14  ;;  %v10956_v24 = vor.u32 %v12554_v31, %v10953_v19  ;;  %v16933_v5 = vpop.f32.mrf.mxu3  ;;  %v10399_v36 = vld [vmem:[%s19099_s5 + $0x318] sm:$0xf]  ;;  %v12418_v14 = vld [vmem:[%s19099_s5 + $0x330] sm:$0xf0]  ;;  %v10673_v31 = vld [vmem:[%s19099_s5 + $0x55c] sm:$0xf0] }
 0x361   :  { %7206 = vmatpush.bf16.msrb.mxu1 %v11320_v3  ;;  %v11208_v3 = vor.u32 %v12617_v20, %v11205_v22  ;;  %v10175_v20 = vld [vmem:[%s19099_s5 + $0x158] sm:$0xf]  ;;  %v12362_v22 = vld [vmem:[%s19099_s5 + $0x170] sm:$0xf0]  ;;  %v10651_v19 = vld [vmem:[%s19099_s5 + $0x510] sm:$0xf] }
 0x363   :  { %7194 = vmatpush.bf16.msrb.mxu0 %v11068_v39  ;;  %7174 = vmatpush.bf16.msra.mxu2 %v10452_v45  ;;  %v10760_v39 = vor.u32 %v12505_v28, %v10757_v32  ;;  %v11432_v45 = vor.u32 %v12673_v50, %v11429_v29  ;;  %v10400_v50 = vor.u32 %v12418_v14, %v10399_v36  ;;  %v10147_v28 = vld [vmem:[%s19099_s5 + $0x120] sm:$0xf]  ;;  %v12355_v32 = vld [vmem:[%s19099_s5 + $0x138] sm:$0xf0] }
 0x364   :  { %7183 = vmatpush.bf16.msra.mxu3 %v10788_v25  ;;  %v11345_v25 = vld [vmem:[%s19099_s5 + $0xa9c] sm:$0xf0]  ;;  %v10148_v46 = vor.u32 %v12355_v32, %v10147_v28  ;;  %v12320_v32 = vld [vmem:[%s19099_s5 + $0x20] sm:$0xf0] }
 0x365   :  { %7207 = vmatpush.bf16.msrb.mxu1 %v11292_v41  ;;  %v11180_v41 = vor.u32 %v12610_v42, %v11177_v37  ;;  %v10176_v37 = vor.u32 %v12362_v22, %v10175_v20  ;;  %v10539_v20 = vld [vmem:[%s19099_s5 + $0x430] sm:$0xf]  ;;  %v12453_v22 = vld [vmem:[%s19099_s5 + $0x448] sm:$0xf0]  ;;  %v10035_v14 = vld [vmem:[%s19099_s5 + $0x40] sm:$0xf] }
 0x367   :  { %7219 = vmatpush.bf16.msrb.mxu2 %v11544_v35  ;;  %7195 = vmatpush.bf16.msrb.mxu0 %v11040_v57  ;;  %v11401_v35 = vld [vmem:[%s19099_s5 + $0xb0c] sm:$0xf0]  ;;  %v10732_v57 = vor.u32 %v12498_v47, %v10729_v49 }
 0x368   :  { %7184 = vmatpush.bf16.msra.mxu3 %v10760_v39  ;;  %v4106_v39 = vpop.f32.mrf.mxu2 }
 0x369   :  { %7208 = vmatpush.bf16.msrb.mxu1 %v11264_v59  ;;  %7175 = vmatmul.bf16.vlgmr.msra.gmra.mxu2 %v16412_v10  ;;  %v11121_v59 = vld [vmem:[%s19099_s5 + $0x8dc] sm:$0xf0]  ;;  %v12376_v39 = vld [vmem:[%s19099_s5 + $0x1e0] sm:$0xf0] }
 0x36a   :  { %v11124_v2 = vor.u32 %v12596_v56, %v11121_v59 }
 0x36b   :  { %7220 = vmatpush.bf16.msrb.mxu2 %v11516_v0  ;;  %7196 = vmatpush.bf16.msrb.mxu0 %v11012_v60  ;;  %v11404_v0 = vor.u32 %v12666_v23, %v11401_v35  ;;  %v10701_v60 = vld [vmem:[%s19099_s5 + $0x594] sm:$0xf0]  ;;  %v10372_v23 = vor.u32 %v12411_v6, %v10371_v44  ;;  %v12348_v35 = vld [vmem:[%s19099_s5 + $0x100] sm:$0xf0]  ;;  %v11099_v6 = vld [vmem:[%s19099_s5 + $0x890] sm:$0xf] }
 0x36c   :  { %7185 = vmatpush.bf16.msra.mxu3 %v10732_v57  ;;  %v10704_v8 = vor.u32 %v12491_v4, %v10701_v60  ;;  %v10091_v57 = vld [vmem:[%s19099_s5 + $0xb0] sm:$0xf] }
 0x36d   :  { %7209 = vmatpush.bf16.msrb.mxu1 %v11236_v7  ;;  %v10900_v7 = vor.u32 %v12540_v52, %v10897_v54  ;;  %v10595_v52 = vld [vmem:[%s19099_s5 + $0x4a0] sm:$0xf]  ;;  %v12467_v54 = vld [vmem:[%s19099_s5 + $0x4b8] sm:$0xf0] }
 0x36f   :  { %7221 = vmatpush.bf16.msrb.mxu2 %v11488_v30  ;;  %7197 = vmatpush.bf16.msrb.mxu0 %v10984_v21  ;;  %v10204_v30 = vor.u32 %v12369_v62, %v10203_v61  ;;  %v12652_v21 = vld [vmem:[%s19099_s5 + $0xa84] sm:$0xf]  ;;  %v10596_v61 = vor.u32 %v12467_v54, %v10595_v52  ;;  %v10315_v62 = vld [vmem:[%s19099_s5 + $0x270] sm:$0xf]  ;;  %v12757_v52 = vld [vmem:[%s19099_s5 + $0xdcc] sm:$0xf] }
 0x370   :  { %7186 = vmatpush.bf16.msra.mxu3 %v10704_v8  ;;  %v11348_v29 = vor.u32 %v12652_v21, %v11345_v25  ;;  %v12334_v8 = vld [vmem:[%s19099_s5 + $0x90] sm:$0xf0]  ;;  %v12327_v21 = vld [vmem:[%s19099_s5 + $0x58] sm:$0xf0] }
 0x371   :  { %7210 = vmatpush.bf16.msrb.mxu1 %v11208_v3  ;;  %v12484_v3 = vld [vmem:[%s19099_s5 + $0x544] sm:$0xf] }
 0x372   :  { %v10676_v42 = vor.u32 %v12484_v3, %v10673_v31  ;;  %v10540_v3 = vor.u32 %v12453_v22, %v10539_v20  ;;  %v10259_v31 = vld [vmem:[%s19099_s5 + $0x200] sm:$0xf]  ;;  %v12750_v22 = vld [vmem:[%s19099_s5 + $0xd94] sm:$0xf] }
 0x373   :  { %7222 = vmatpush.bf16.msrb.mxu2 %v11460_v27  ;;  %7198 = vmatpush.bf16.msrb.mxu0 %v10956_v24  ;;  %v12481_v27 = vld [vmem:[%s19099_s5 + $0x528] sm:$0xf0]  ;;  %v772_v24 = vperm.slane %v16278_v63, 7  ;;  %v10623_v63 = vld [vmem:[%s19099_s5 + $0x4d8] sm:$0xf] }
 0x374   :  { %7187 = vmatpush.bf16.msra.mxu3 %v10676_v42  ;;  %v10624_v49 = vor.u32 %v12474_v34, %v10623_v63  ;;  %v12446_v42 = vld [vmem:[%s19099_s5 + $0x410] sm:$0xf0]  ;;  %v11323_v63 = vld [vmem:[%s19099_s5 + $0xa50] sm:$0xf] }
 0x375   :  { %7211 = vmatpush.bf16.msrb.mxu1 %v11180_v41  ;;  %v10652_v41 = vor.u32 %v12481_v27, %v10651_v19  ;;  %v4079_v47 = vadd.f32 %v16833_v11, %v772_v24  ;;  %v10120_v11 = vor.u32 %v12348_v35, %v10119_v9  ;;  %v10511_v27 = vld [vmem:[%s19099_s5 + $0x3f8] sm:$0xf]  ;;  %v10231_v24 = vld [vmem:[%s19099_s5 + $0x1c8] sm:$0xf]  ;;  %v12439_v9 = vld [vmem:[%s19099_s5 + $0x3d8] sm:$0xf0] }
 0x376   :  { %v10512_v44 = vor.u32 %v12446_v42, %v10511_v27  ;;  %v11015_v27 = vld [vmem:[%s19099_s5 + $0x7e8] sm:$0xf]  ;;  %v12572_v42 = vld [vmem:[%s19099_s5 + $0x800] sm:$0xf0] }
 0x377   :  { %7223 = vmatpush.bf16.msrb.mxu2 %v11432_v45  ;;  %7199 = vmatpush.bf16.msrb.mxu0 %v10928_v51  ;;  %v4119_v45 = vpop.f32.mrf.mxu3  ;;  %v12404_v51 = vld [vmem:[%s19099_s5 + $0x2c0] sm:$0xf0]  ;;  %v4092_v59 = vadd.f32 %v16844_v15, %v4079_v47 }
 0x378   :  { %v10344_v56 = vor.u32 %v12404_v51, %v10343_v16  ;;  %v12593_v45 = vld [vmem:[%s19099_s5 + $0x8a8] sm:$0xf0]  ;;  %v10232_v16 = vor.u32 %v12376_v39, %v10231_v24  ;;  %v12628_v24 = vld [vmem:[%s19099_s5 + $0x9c0] sm:$0xf0] }
 0x379   :  { %7212 = vmatpush.bf16.msrb.mxu1 %v11152_v58  ;;  %v12341_v58 = vld [vmem:[%s19099_s5 + $0xc8] sm:$0xf0]  ;;  %v4105_v15 = vadd.f32 %v16922_v40, %v4092_v59  ;;  %v12390_v40 = vld [vmem:[%s19099_s5 + $0x250] sm:$0xf0]  ;;  %v11100_v51 = vor.u32 %v12593_v45, %v11099_v6  ;;  %v12691_v6 = vld [vmem:[%s19099_s5 + $0xbb8] sm:$0xf0] }
 0x37a   :  { %v10092_v4 = vor.u32 %v12341_v58, %v10091_v57  ;;  %v11765_v57 = vld [vmem:[%s19099_s5 + $0xde4] sm:$0xf0]  ;;  %v11071_v58 = vld [vmem:[%s19099_s5 + $0x858] sm:$0xf]  ;;  %v12586_v59 = vld [vmem:[%s19099_s5 + $0x870] sm:$0xf0] }
 0x37b   :  { %7224 = vmatpush.bf16.msrb.mxu2 %v11404_v0  ;;  %7200 = vmatpush.bf16.msrb.mxu0 %v10900_v7  ;;  %v12397_v0 = vld [vmem:[%s19099_s5 + $0x288] sm:$0xf0]  ;;  %v4130_v33 = vpop.f32.mrf.mxu0  ;;  %v10063_v7 = vld [vmem:[%s19099_s5 + $0x78] sm:$0xf] }
 0x37c   :  { %v10316_v60 = vor.u32 %v12397_v0, %v10315_v62  ;;  %v12642_v62 = vld [vmem:[%s19099_s5 + $0xa30] sm:$0xf0]  ;;  %v10455_v0 = vld [vmem:[%s19099_s5 + $0x388] sm:$0xf] }
 0x37d   :  { %7213 = vmatpush.bf16.msrb.mxu1 %v11124_v2  ;;  %v4143_v17 = vpop.f32.mrf.mxu1  ;;  %v10568_v2 = vor.u32 %v12460_v1, %v10567_v26  ;;  %v12432_v26 = vld [vmem:[%s19099_s5 + $0x3a0] sm:$0xf0]  ;;  %v11072_v1 = vor.u32 %v12586_v59, %v11071_v58  ;;  %v10959_v58 = vld [vmem:[%s19099_s5 + $0x778] sm:$0xf]  ;;  %v12558_v59 = vld [vmem:[%s19099_s5 + $0x790] sm:$0xf0] }
 0x37e   :  { %7201 = vmatmul.bf16.vlgmr.msrb.gmra.mxu0 %v16562_v38  ;;  %v10456_v20 = vor.u32 %v12432_v26, %v10455_v0  ;;  %v12729_v0 = vld [vmem:[%s19099_s5 + $0xcec] sm:$0xf] }
 0x37f   :  { %7245 = vmatpush.bf16.msra.mxu0 %v10204_v30  ;;  %7225 = vmatpush.bf16.msrb.mxu2 %v11376_v55  ;;  %v10287_v30 = vld [vmem:[%s19099_s5 + $0x238] sm:$0xf]  ;;  %v10064_v55 = vor.u32 %v12334_v8, %v10063_v7  ;;  %v11043_v8 = vld [vmem:[%s19099_s5 + $0x820] sm:$0xf] }
 0x380   :  { %7214 = vmatmul.bf16.vlgmr.msrb.gmra.mxu1 %v16564_v43  ;;  %v10288_v36 = vor.u32 %v12390_v40, %v10287_v30 }
 0x381   :  { %7258 = vmatpush.bf16.msra.mxu1 %v10428_v12  ;;  %v4118_v12 = vadd.f32 %v16933_v5, %v4105_v15  ;;  %v12383_v5 = vld [vmem:[%s19099_s5 + $0x218] sm:$0xf0]  ;;  %v11547_v15 = vld [vmem:[%s19099_s5 + $0xc10] sm:$0xf] }
 0x382   :  { %v10260_v28 = vor.u32 %v12383_v5, %v10259_v31  ;;  %v12698_v31 = vld [vmem:[%s19099_s5 + $0xbf0] sm:$0xf0] }
 0x383   :  { %7246 = vmatpush.bf16.msra.mxu0 %v10176_v37  ;;  %7226 = vmatpush.bf16.msrb.mxu2 %v11348_v29  ;;  %v4131_v25 = vadd.f32 %v4130_v33, %v4118_v12  ;;  %v4132_v19 = vpop.f32.mrf.mxu0  ;;  %v10007_v29 = vld [vmem:[%s19099_s5 + $0x8] sm:$0xf]  ;;  %v11737_v12 = vld [vmem:[%s19099_s5 + $0xdac] sm:$0xf0] }
 0x384   :  { %v11740_v5 = vor.u32 %v12750_v22, %v11737_v12  ;;  %v17155_v19 = vld [vmem:[%s19100_s6] sm:$0xff]  ;;  %v11625_v22 = vld [vmem:[%s19099_s5 + $0xccc] sm:$0xf0] }
 0x385   :  { %7259 = vmatpush.bf16.msra.mxu1 %v10400_v50  ;;  %v4145_v37 = vpop.f32.mrf.mxu1  ;;  %v10036_v50 = vor.u32 %v12327_v21, %v10035_v14  ;;  %v11267_v14 = vld [vmem:[%s19099_s5 + $0x9e0] sm:$0xf]  ;;  %v12635_v21 = vld [vmem:[%s19099_s5 + $0x9f8] sm:$0xf0]  ;;  %v4719_v39 = vperm.slane %v17155_v19, 0 }
 0x386   :  { %7227 = vmatmul.bf16.vlgmr.msrb.gmra.mxu2 %v16771_v18  ;;  %v11268_v37 = vor.u32 %v12635_v21, %v11267_v14  ;;  %v12607_v14 = vld [vmem:[%s19099_s5 + $0x918] sm:$0xf0] }
 0x387   :  { %7271 = vmatpush.bf16.msra.mxu2 %v10652_v41  ;;  %7247 = vmatpush.bf16.msra.mxu0 %v10148_v46  ;;  %v4144_v41 = vadd.f32 %v4143_v17, %v4131_v25  ;;  %v12649_v46 = vld [vmem:[%s19099_s5 + $0xa68] sm:$0xf0] }
 0x388   :  { %v12705_v17 = vld [vmem:[%s19099_s5 + $0xc28] sm:$0xf0] }
 0x389   :  { %7260 = vmatpush.bf16.msra.mxu1 %v10372_v23  ;;  %v4156_v34 = vpop.f32.mrf.mxu2  ;;  %v10483_v23 = vld [vmem:[%s19099_s5 + $0x3c0] sm:$0xf] }
 0x38a   :  { %v4157_v35 = vadd.f32 %v4156_v34, %v4144_v41  ;;  %v11016_v41 = vor.u32 %v12572_v42, %v11015_v27  ;;  %v12565_v34 = vld [vmem:[%s19099_s5 + $0x7c8] sm:$0xf0]  ;;  %v12715_v27 = vld [vmem:[%s19099_s5 + $0xc7c] sm:$0xf]  ;;  %v10903_v42 = vld [vmem:[%s19099_s5 + $0x708] sm:$0xf] }
 0x38b   :  { %7272 = vmatpush.bf16.msra.mxu2 %v10624_v49  ;;  %7248 = vmatpush.bf16.msra.mxu0 %v10120_v11  ;;  %v4169_v47 = vpop.f32.mrf.mxu3  ;;  %v10008_v49 = vor.u32 %v12320_v32, %v10007_v29  ;;  %v11324_v11 = vor.u32 %v12649_v46, %v11323_v63  ;;  %v11709_v29 = vld [vmem:[%s19099_s5 + $0xd74] sm:$0xf0]  ;;  %v11239_v32 = vld [vmem:[%s19099_s5 + $0x9a8] sm:$0xf]  ;;  %v10987_v63 = vld [vmem:[%s19099_s5 + $0x7b0] sm:$0xf] }
 0x38c   :  { %v4170_v54 = vadd.f32 %v4169_v47, %v4157_v35  ;;  %v11240_v46 = vor.u32 %v12628_v24, %v11239_v32  ;;  %v10205_v32 = vld [vmem:[%s19099_s5 + $0x1ac] sm:$0xf0] }
 0x38d   :  { %7261 = vmatpush.bf16.msra.mxu1 %v10344_v56  ;;  %v10484_v56 = vor.u32 %v12439_v9, %v10483_v23  ;;  %v12736_v23 = vld [vmem:[%s19099_s5 + $0xd24] sm:$0xf]  ;;  %v11681_v9 = vld [vmem:[%s19099_s5 + $0xd3c] sm:$0xf0] }
 0x38e   :  { %vm4180_vm1 = vcmp.gt.f32.partialorder %v4170_v54, 0.0  ;;  %v4188_v33 = vmul.f32 0.01, %v4170_v54 }
 0x38f   :  { %7273 = vmatpush.bf16.msra.mxu2 %v10596_v61  ;;  %7249 = vmatpush.bf16.msra.mxu0 %v10092_v4  ;;  %v11295_v61 = vld [vmem:[%s19099_s5 + $0xa18] sm:$0xf] }
 0x390   :  { %v4196_v4 = vsel %vm4180_vm1, %v4170_v54, %v4188_v33  ;;  %v11296_v7 = vor.u32 %v12642_v62, %v11295_v61  ;;  %v10988_v54 = vor.u32 %v12565_v34, %v10987_v63  ;;  %v11653_v33 = vld [vmem:[%s19099_s5 + $0xd04] sm:$0xf0] }
 0x391   :  { %7262 = vmatpush.bf16.msra.mxu1 %v10316_v60  ;;  %v11768_v60 = vor.u32 %v12757_v52, %v11765_v57  ;;  %v17129_v30 = vpack.c.bf16 %v4196_v4, %v4196_v4  ;;  %v4158_v40 = vpop.f32.mrf.mxu2  ;;  %v11684_v57 = vor.u32 %v12736_v23, %v11681_v9  ;;  %v11435_v4 = vld [vmem:[%s19099_s5 + $0xb30] sm:$0xf]  ;;  %v11379_v23 = vld [vmem:[%s19099_s5 + $0xac0] sm:$0xf]  ;;  %v12663_v9 = vld [vmem:[%s19099_s5 + $0xad8] sm:$0xf0] }
 0x393   :  { %7274 = vmatpush.bf16.msra.mxu2 %v10568_v2  ;;  %7250 = vmatpush.bf16.msra.mxu0 %v10064_v55  ;;  %v12579_v2 = vld [vmem:[%s19099_s5 + $0x838] sm:$0xf0]  ;;  %v4171_v55 = vpop.f32.mrf.mxu3 }
 0x394   :  { %7136 = vmatmul.bf16.vlgmr.msrb.gmra.mxu3 %v17129_v30  ;;  %v11044_v25 = vor.u32 %v12579_v2, %v11043_v8  ;;  %v10931_v8 = vld [vmem:[%s19099_s5 + $0x740] sm:$0xf]  ;;  %v12551_v2 = vld [vmem:[%s19099_s5 + $0x758] sm:$0xf0] }
 0x395   :  { %7263 = vmatpush.bf16.msra.mxu1 %v10288_v36  ;;  %v11548_v36 = vor.u32 %v12705_v17, %v11547_v15  ;;  %7232 = vmatpush.bf16.msrb.mxu3 %v11768_v60  ;;  %v12614_v15 = vld [vmem:[%s19099_s5 + $0x950] sm:$0xf0]  ;;  %v10960_v17 = vor.u32 %v12558_v59, %v10959_v58  ;;  %v12677_v60 = vld [vmem:[%s19099_s5 + $0xb48] sm:$0xf0]  ;;  %v12359_v58 = vld [vmem:[%s19099_s5 + $0x15c] sm:$0xf] }
 0x396   :  { %v11436_v55 = vor.u32 %v12677_v60, %v11435_v4  ;;  %v10177_v59 = vld [vmem:[%s19099_s5 + $0x174] sm:$0xf0] }
 0x397   :  { %7275 = vmatpush.bf16.msra.mxu2 %v10540_v3  ;;  %7251 = vmatpush.bf16.msra.mxu0 %v10036_v50  ;;  %v11519_v3 = vld [vmem:[%s19099_s5 + $0xbd8] sm:$0xf]  ;;  %v12743_v50 = vld [vmem:[%s19099_s5 + $0xd5c] sm:$0xf]  ;;  %v10180_v4 = vor.u32 %v12359_v58, %v10177_v59  ;;  %v12509_v59 = vld [vmem:[%s19099_s5 + $0x608] sm:$0xf0] }
 0x398   :  { %v11712_v45 = vor.u32 %v12743_v50, %v11709_v29  ;;  %v11597_v29 = vld [vmem:[%s19099_s5 + $0xc94] sm:$0xf0] }
 0x399   :  { %7264 = vmatpush.bf16.msra.mxu1 %v10260_v28  ;;  %v11520_v28 = vor.u32 %v12698_v31, %v11519_v3  ;;  %7233 = vmatpush.bf16.msrb.mxu3 %v11740_v5  ;;  %v11407_v3 = vld [vmem:[%s19099_s5 + $0xaf8] sm:$0xf]  ;;  %v12670_v31 = vld [vmem:[%s19099_s5 + $0xb10] sm:$0xf0] }
 0x39b   :  { %7276 = vmatpush.bf16.msra.mxu2 %v10512_v44  ;;  %7252 = vmatpush.bf16.msra.mxu0 %v10008_v49  ;;  %v11491_v44 = vld [vmem:[%s19099_s5 + $0xba0] sm:$0xf]  ;;  %v7046_v35 = vpop.f32.mrf.mxu0  ;;  %v11211_v49 = vld [vmem:[%s19099_s5 + $0x970] sm:$0xf] }
 0x39c   :  { %v11492_v47 = vor.u32 %v12691_v6, %v11491_v44  ;;  %v12600_v44 = vld [vmem:[%s19099_s5 + $0x8e0] sm:$0xf0]  ;;  %v12422_v6 = vld [vmem:[%s19099_s5 + $0x354] sm:$0xf] }
 0x39d   :  { %7265 = vmatpush.bf16.msra.mxu1 %v10232_v16  ;;  %v12621_v16 = vld [vmem:[%s19099_s5 + $0x988] sm:$0xf0]  ;;  %v7059_v52 = vpop.f32.mrf.mxu1  ;;  %7234 = vmatpush.bf16.msrb.mxu3 %v11712_v45 }
 0x39e   :  { %7253 = vmatmul.bf16.vlgmr.msra.gmra.mxu0 %v16362_v48  ;;  %v11212_v62 = vor.u32 %v12621_v16, %v11211_v49  ;;  %v12708_v49 = vld [vmem:[%s19099_s5 + $0xc44] sm:$0xf] }
 0x39f   :  { %7297 = vmatpush.bf16.msrb.mxu0 %v11100_v51  ;;  %7277 = vmatpush.bf16.msra.mxu2 %v10484_v56  ;;  %v7047_v51 = vadd.f32 %v7046_v35, %v4719_v39  ;;  %v12684_v56 = vld [vmem:[%s19099_s5 + $0xb80] sm:$0xf0]  ;;  %v11408_v39 = vor.u32 %v12670_v31, %v11407_v3  ;;  %v11600_v35 = vor.u32 %v12715_v27, %v11597_v29  ;;  %v10819_v27 = vld [vmem:[%s19099_s5 + $0x660] sm:$0xf]  ;;  %v10121_v29 = vld [vmem:[%s19099_s5 + $0x104] sm:$0xf0] }
 0x3a0   :  { %7266 = vmatmul.bf16.vlgmr.msra.gmra.mxu1 %v16373_v53 }
 0x3a1   :  { %7310 = vmatpush.bf16.msrb.mxu1 %v11324_v11  ;;  %v11463_v11 = vld [vmem:[%s19099_s5 + $0xb68] sm:$0xf]  ;;  %v7060_v61 = vadd.f32 %v7059_v52, %v7047_v51  ;;  %7235 = vmatpush.bf16.msrb.mxu3 %v11684_v57  ;;  %v11569_v52 = vld [vmem:[%s19099_s5 + $0xc5c] sm:$0xf0]  ;;  %v11380_v57 = vor.u32 %v12663_v9, %v11379_v23  ;;  %v10093_v9 = vld [vmem:[%s19099_s5 + $0xcc] sm:$0xf0] }
 0x3a2   :  { %v11464_v26 = vor.u32 %v12684_v56, %v11463_v11  ;;  %v12537_v11 = vld [vmem:[%s19099_s5 + $0x6e8] sm:$0xf0] }
 0x3a3   :  { %7298 = vmatpush.bf16.msrb.mxu0 %v11072_v1  ;;  %7278 = vmatpush.bf16.msra.mxu2 %v10456_v20  ;;  %v11183_v1 = vld [vmem:[%s19099_s5 + $0x938] sm:$0xf]  ;;  %v12722_v20 = vld [vmem:[%s19099_s5 + $0xcb4] sm:$0xf]  ;;  %v7048_v12 = vpop.f32.mrf.mxu0 }
 0x3a4   :  { %v11184_v40 = vor.u32 %v12614_v15, %v11183_v1  ;;  %7188 = vmatmul.bf16.vlgmr.msra.gmra.mxu3 %v16420_v13  ;;  %v11628_v5 = vor.u32 %v12722_v20, %v11625_v22  ;;  %v12478_v1 = vld [vmem:[%s19099_s5 + $0x514] sm:$0xf]  ;;  %v10653_v15 = vld [vmem:[%s19099_s5 + $0x52c] sm:$0xf0]  ;;  %v12352_v20 = vld [vmem:[%s19099_s5 + $0x124] sm:$0xf] }
 0x3a5   :  { %7311 = vmatpush.bf16.msrb.mxu1 %v11296_v7  ;;  %v11656_v7 = vor.u32 %v12729_v0, %v11653_v33  ;;  %v7061_v21 = vpop.f32.mrf.mxu1  ;;  %v11351_v0 = vld [vmem:[%s19099_s5 + $0xa88] sm:$0xf]  ;;  %v12656_v33 = vld [vmem:[%s19099_s5 + $0xaa0] sm:$0xf0]  ;;  %v10656_v12 = vor.u32 %v12478_v1, %v10653_v15  ;;  %v12450_v1 = vld [vmem:[%s19099_s5 + $0x434] sm:$0xf] }
 0x3a6   :  { %7279 = vmatmul.bf16.vlgmr.msra.gmra.mxu2 %v16412_v10  ;;  %v12471_v21 = vld [vmem:[%s19099_s5 + $0x4dc] sm:$0xf]  ;;  %v10541_v15 = vld [vmem:[%s19099_s5 + $0x44c] sm:$0xf0] }
 0x3a7   :  { %7323 = vmatpush.bf16.msrb.mxu2 %v11548_v36  ;;  %7299 = vmatpush.bf16.msrb.mxu0 %v11044_v25  ;;  %v11155_v36 = vld [vmem:[%s19099_s5 + $0x900] sm:$0xf]  ;;  %v10932_v25 = vor.u32 %v12551_v2, %v10931_v8  ;;  %v11352_v8 = vor.u32 %v12656_v33, %v11351_v0  ;;  %v10847_v2 = vld [vmem:[%s19099_s5 + $0x698] sm:$0xf]  ;;  %v12387_v33 = vld [vmem:[%s19099_s5 + $0x23c] sm:$0xf] }
 0x3a8   :  { %7236 = vmatpush.bf16.msrb.mxu3 %v11656_v7  ;;  %v11156_v50 = vor.u32 %v12607_v14, %v11155_v36  ;;  %v12408_v36 = vld [vmem:[%s19099_s5 + $0x2e4] sm:$0xf]  ;;  %v10373_v14 = vld [vmem:[%s19099_s5 + $0x2fc] sm:$0xf0]  ;;  %v10065_v0 = vld [vmem:[%s19099_s5 + $0x94] sm:$0xf0] }
 0x3a9   :  { %7312 = vmatpush.bf16.msrb.mxu1 %v11268_v37  ;;  %v12544_v37 = vld [vmem:[%s19099_s5 + $0x720] sm:$0xf0]  ;;  %v7072_v24 = vpop.f32.mrf.mxu2 }
 0x3aa   :  { %v7073_v45 = vadd.f32 %v7072_v24, %v7060_v61  ;;  %v10904_v34 = vor.u32 %v12544_v37, %v10903_v42  ;;  %v12415_v61 = vld [vmem:[%s19099_s5 + $0x31c] sm:$0xf]  ;;  %v12345_v37 = vld [vmem:[%s19099_s5 + $0xec] sm:$0xf]  ;;  %v12464_v24 = vld [vmem:[%s19099_s5 + $0x4a4] sm:$0xf] }
 0x3ab   :  { %7324 = vmatpush.bf16.msrb.mxu2 %v11520_v28  ;;  %7300 = vmatpush.bf16.msrb.mxu0 %v11016_v41  ;;  %v12366_v28 = vld [vmem:[%s19099_s5 + $0x194] sm:$0xf]  ;;  %v11127_v41 = vld [vmem:[%s19099_s5 + $0x8c8] sm:$0xf]  ;;  %v7085_v63 = vpop.f32.mrf.mxu3  ;;  %v12523_v42 = vld [vmem:[%s19099_s5 + $0x678] sm:$0xf0] }
 0x3ac   :  { %7237 = vmatpush.bf16.msrb.mxu3 %v11628_v5  ;;  %v17295_v16 = vadd.f32 %v7085_v63, %v7073_v45  ;;  %v11128_v51 = vor.u32 %v12600_v44, %v11127_v41  ;;  %v10376_v5 = vor.u32 %v12408_v36, %v10373_v14  ;;  %v10820_v41 = vor.u32 %v12523_v42, %v10819_v27  ;;  %v10791_v45 = vld [vmem:[%s19099_s5 + $0x628] sm:$0xf]  ;;  %v12516_v63 = vld [vmem:[%s19099_s5 + $0x640] sm:$0xf0]  ;;  %v12443_v14 = vld [vmem:[%s19099_s5 + $0x3fc] sm:$0xf] }
 0x3ad   :  { %7313 = vmatpush.bf16.msrb.mxu1 %v11240_v46  ;;  %v10429_v46 = vld [vmem:[%s19099_s5 + $0x36c] sm:$0xf0]  ;;  %v10124_v44 = vor.u32 %v12345_v37, %v10121_v29  ;;  %v12495_v27 = vld [vmem:[%s19099_s5 + $0x598] sm:$0xf0]  ;;  %v12317_v42 = vld [vmem:[%s19099_s5 + $0xc] sm:$0xf] }
 0x3ae   :  { %v10432_v56 = vor.u32 %v12422_v6, %v10429_v46  ;;  %v10009_v37 = vld [vmem:[%s19099_s5 + $0x24] sm:$0xf0]  ;;  %v12373_v29 = vld [vmem:[%s19099_s5 + $0x1cc] sm:$0xf] }
 0x3af   :  { %7325 = vmatpush.bf16.msrb.mxu2 %v11492_v47  ;;  %7301 = vmatpush.bf16.msrb.mxu0 %v10988_v54  ;;  %v10208_v47 = vor.u32 %v12366_v28, %v10205_v32  ;;  %v10875_v54 = vld [vmem:[%s19099_s5 + $0x6d0] sm:$0xf]  ;;  %v12401_v28 = vld [vmem:[%s19099_s5 + $0x2ac] sm:$0xf]  ;;  %v10345_v32 = vld [vmem:[%s19099_s5 + $0x2c4] sm:$0xf0] }
 0x3b0   :  { %7238 = vmatpush.bf16.msrb.mxu3 %v11600_v35  ;;  %v10348_v6 = vor.u32 %v12401_v28, %v10345_v32  ;;  %v12394_v35 = vld [vmem:[%s19099_s5 + $0x274] sm:$0xf]  ;;  %v10233_v28 = vld [vmem:[%s19099_s5 + $0x1e4] sm:$0xf0] }
 0x3b1   :  { %7314 = vmatpush.bf16.msrb.mxu1 %v11212_v62  ;;  %v10401_v62 = vld [vmem:[%s19099_s5 + $0x334] sm:$0xf0]  ;;  %v7074_v60 = vpop.f32.mrf.mxu2  ;;  %v12590_v32 = vld [vmem:[%s19099_s5 + $0x894] sm:$0xf] }
 0x3b2   :  { %v10404_v7 = vor.u32 %v12415_v61, %v10401_v62  ;;  %v12331_v61 = vld [vmem:[%s19099_s5 + $0x7c] sm:$0xf] }
 0x3b3   :  { %7326 = vmatpush.bf16.msrb.mxu2 %v11464_v26  ;;  %7302 = vmatpush.bf16.msrb.mxu0 %v10960_v17  ;;  %v11572_v26 = vor.u32 %v12708_v49, %v11569_v52  ;;  %v10876_v17 = vor.u32 %v12537_v11, %v10875_v54  ;;  %v7087_v22 = vpop.f32.mrf.mxu3  ;;  %v12457_v52 = vld [vmem:[%s19099_s5 + $0x46c] sm:$0xf]  ;;  %v10569_v54 = vld [vmem:[%s19099_s5 + $0x484] sm:$0xf0]  ;;  %v10792_v11 = vor.u32 %v12516_v63, %v10791_v45  ;;  %v10485_v45 = vld [vmem:[%s19099_s5 + $0x3dc] sm:$0xf0] }
 0x3b4   :  { %v10572_v62 = vor.u32 %v12457_v52, %v10569_v54  ;;  %v10037_v22 = vld [vmem:[%s19099_s5 + $0x5c] sm:$0xf0]  ;;  %v10012_v63 = vor.u32 %v12317_v42, %v10009_v37  ;;  %v12583_v52 = vld [vmem:[%s19099_s5 + $0x85c] sm:$0xf]  ;;  %v11073_v54 = vld [vmem:[%s19099_s5 + $0x874] sm:$0xf0] }
 0x3b5   :  { %7315 = vmatpush.bf16.msrb.mxu1 %v11184_v40  ;;  %v12530_v40 = vld [vmem:[%s19099_s5 + $0x6b0] sm:$0xf0]  ;;  %7239 = vmatpush.bf16.msrb.mxu3 %v11572_v26  ;;  %v10289_v26 = vld [vmem:[%s19099_s5 + $0x254] sm:$0xf0]  ;;  %v11493_v42 = vld [vmem:[%s19099_s5 + $0xbbc] sm:$0xf0] }
 0x3b6   :  { %v10848_v3 = vor.u32 %v12530_v40, %v10847_v2  ;;  %v10292_v60 = vor.u32 %v12387_v33, %v10289_v26  ;;  %v12324_v2 = vld [vmem:[%s19099_s5 + $0x44] sm:$0xf]  ;;  %v11076_v33 = vor.u32 %v12583_v52, %v11073_v54  ;;  %v12733_v52 = vld [vmem:[%s19099_s5 + $0xd08] sm:$0xf0]  ;;  %v12555_v54 = vld [vmem:[%s19099_s5 + $0x77c] sm:$0xf] }
 0x3b7   :  { %7327 = vmatpush.bf16.msrb.mxu2 %v11436_v55  ;;  %7303 = vmatpush.bf16.msrb.mxu0 %v10932_v25  ;;  %v10149_v55 = vld [vmem:[%s19099_s5 + $0x13c] sm:$0xf0]  ;;  %v10625_v25 = vld [vmem:[%s19099_s5 + $0x4f4] sm:$0xf0] }
 0x3b8   :  { %v10152_v31 = vor.u32 %v12352_v20, %v10149_v55  ;;  %7240 = vmatmul.bf16.vlgmr.msrb.gmra.mxu3 %v17129_v30  ;;  %v10544_v20 = vor.u32 %v12450_v1, %v10541_v15  ;;  %v10261_v55 = vld [vmem:[%s19099_s5 + $0x21c] sm:$0xf0]  ;;  %v11743_v15 = vld [vmem:[%s19099_s5 + $0xd98] sm:$0xf] }
 0x3b9   :  { %7316 = vmatpush.bf16.msrb.mxu1 %v11156_v50  ;;  %7284 = vmatpush.bf16.msra.mxu3 %v10876_v17  ;;  %v10628_v50 = vor.u32 %v12471_v21, %v10625_v25  ;;  %v10513_v21 = vld [vmem:[%s19099_s5 + $0x414] sm:$0xf0] }
 0x3bb   :  { %7328 = vmatpush.bf16.msrb.mxu2 %v11408_v39  ;;  %7304 = vmatpush.bf16.msrb.mxu0 %v10904_v34  ;;  %v10597_v39 = vld [vmem:[%s19099_s5 + $0x4bc] sm:$0xf0]  ;;  %v12338_v34 = vld [vmem:[%s19099_s5 + $0xb4] sm:$0xf]  ;;  %v7098_v46 = vpop.f32.mrf.mxu0 }
 0x3bc   :  { %v10600_v23 = vor.u32 %v12464_v24, %v10597_v39  ;;  %v7099_v49 = vadd.f32 %v7098_v46, %v17295_v16  ;;  %v10763_v16 = vld [vmem:[%s19099_s5 + $0x5f0] sm:$0xf]  ;;  %v12646_v39 = vld [vmem:[%s19099_s5 + $0xa54] sm:$0xf]  ;;  %v10679_v46 = vld [vmem:[%s19099_s5 + $0x548] sm:$0xf] }
 0x3bd   :  { %7317 = vmatpush.bf16.msrb.mxu1 %v11128_v51  ;;  %7285 = vmatpush.bf16.msra.mxu3 %v10848_v3  ;;  %v7111_v51 = vpop.f32.mrf.mxu1  ;;  %v10764_v17 = vor.u32 %v12509_v59, %v10763_v16  ;;  %v10707_v3 = vld [vmem:[%s19099_s5 + $0x580] sm:$0xf]  ;;  %v11101_v24 = vld [vmem:[%s19099_s5 + $0x8ac] sm:$0xf0]  ;;  %v10457_v16 = vld [vmem:[%s19099_s5 + $0x3a4] sm:$0xf0] }
 0x3be   :  { %7305 = vmatmul.bf16.vlgmr.msrb.gmra.mxu0 %v16562_v38 }
 0x3bf   :  { %7349 = vmatpush.bf16.msra.mxu0 %v10208_v47  ;;  %7329 = vmatpush.bf16.msrb.mxu2 %v11380_v57  ;;  %v10317_v47 = vld [vmem:[%s19099_s5 + $0x28c] sm:$0xf0]  ;;  %v10096_v57 = vor.u32 %v12338_v34, %v10093_v9  ;;  %v10236_v34 = vor.u32 %v12373_v29, %v10233_v28 }
 0x3c0   :  { %7318 = vmatmul.bf16.vlgmr.msrb.gmra.mxu1 %v16564_v43  ;;  %v10320_v58 = vor.u32 %v12394_v35, %v10317_v47  ;;  %v12488_v35 = vld [vmem:[%s19099_s5 + $0x560] sm:$0xf0]  ;;  %v11771_v47 = vld [vmem:[%s19099_s5 + $0xdd0] sm:$0xf] }
 0x3c1   :  { %7362 = vmatpush.bf16.msra.mxu1 %v10432_v56  ;;  %7286 = vmatpush.bf16.msra.mxu3 %v10820_v41  ;;  %v17407_v56 = vadd.f32 %v7111_v51, %v7099_v49  ;;  %v11325_v41 = vld [vmem:[%s19099_s5 + $0xa6c] sm:$0xf0]  ;;  %v12761_v49 = vld [vmem:[%s19099_s5 + $0xde8] sm:$0xf0]  ;;  %v10680_v59 = vor.u32 %v12488_v35, %v10679_v46 }
 0x3c2   :  { %v11328_v9 = vor.u32 %v12646_v39, %v11325_v41  ;;  %v12562_v39 = vld [vmem:[%s19099_s5 + $0x7b4] sm:$0xf]  ;;  %v12681_v46 = vld [vmem:[%s19099_s5 + $0xb6c] sm:$0xf] }
 0x3c3   :  { %7350 = vmatpush.bf16.msra.mxu0 %v10180_v4  ;;  %7330 = vmatpush.bf16.msrb.mxu2 %v11352_v8  ;;  %v10068_v4 = vor.u32 %v12331_v61, %v10065_v0  ;;  %v12502_v8 = vld [vmem:[%s19099_s5 + $0x5d0] sm:$0xf0]  ;;  %v7100_v40 = vpop.f32.mrf.mxu0  ;;  %v11772_v0 = vor.u32 %v12761_v49, %v11771_v47 }
 0x3c4   :  { %v12702_v61 = vld [vmem:[%s19099_s5 + $0xc14] sm:$0xf]  ;;  %v12695_v40 = vld [vmem:[%s19099_s5 + $0xbdc] sm:$0xf] }
 0x3c5   :  { %7363 = vmatpush.bf16.msra.mxu1 %v10404_v7  ;;  %7287 = vmatpush.bf16.msra.mxu3 %v10792_v11  ;;  %v10735_v7 = vld [vmem:[%s19099_s5 + $0x5b8] sm:$0xf]  ;;  %v7113_v36 = vpop.f32.mrf.mxu1  ;;  %v12639_v11 = vld [vmem:[%s19099_s5 + $0xa1c] sm:$0xf] }
 0x3c6   :  { %7331 = vmatmul.bf16.vlgmr.msrb.gmra.mxu2 %v16771_v18  ;;  %v10736_v25 = vor.u32 %v12502_v8, %v10735_v7  ;;  %v11045_v7 = vld [vmem:[%s19099_s5 + $0x83c] sm:$0xf0]  ;;  %v12632_v8 = vld [vmem:[%s19099_s5 + $0x9e4] sm:$0xf] }
 0x3c7   :  { %7375 = vmatpush.bf16.msra.mxu2 %v10656_v12  ;;  %7351 = vmatpush.bf16.msra.mxu0 %v10152_v31  ;;  %v12380_v12 = vld [vmem:[%s19099_s5 + $0x204] sm:$0xf]  ;;  %v10040_v31 = vor.u32 %v12324_v2, %v10037_v22  ;;  %v11269_v2 = vld [vmem:[%s19099_s5 + $0x9fc] sm:$0xf0] }
 0x3c8   :  { %v11272_v36 = vor.u32 %v12632_v8, %v11269_v2  ;;  %v10933_v8 = vld [vmem:[%s19099_s5 + $0x75c] sm:$0xf0]  ;;  %v12604_v2 = vld [vmem:[%s19099_s5 + $0x904] sm:$0xf] }
 0x3c9   :  { %7364 = vmatpush.bf16.msra.mxu1 %v10376_v5  ;;  %7288 = vmatpush.bf16.msra.mxu3 %v10764_v17  ;;  %v10264_v5 = vor.u32 %v12380_v12, %v10261_v55  ;;  %v12754_v17 = vld [vmem:[%s19099_s5 + $0xdb0] sm:$0xf0]  ;;  %v4720_v12 = vperm.slane %v17155_v19, 1 }
 0x3ca   :  { %v11744_v22 = vor.u32 %v12754_v17, %v11743_v15  ;;  %v11631_v15 = vld [vmem:[%s19099_s5 + $0xcb8] sm:$0xf]  ;;  %v12726_v17 = vld [vmem:[%s19099_s5 + $0xcd0] sm:$0xf0] }
 0x3cb   :  { %7376 = vmatpush.bf16.msra.mxu2 %v10628_v50  ;;  %7352 = vmatpush.bf16.msra.mxu0 %v10124_v44  ;;  %v10516_v50 = vor.u32 %v12443_v14, %v10513_v21  ;;  %v10708_v44 = vor.u32 %v12495_v27, %v10707_v3  ;;  %v11715_v14 = vld [vmem:[%s19099_s5 + $0xd60] sm:$0xf]  ;;  %v12747_v21 = vld [vmem:[%s19099_s5 + $0xd78] sm:$0xf0]  ;;  %v11017_v3 = vld [vmem:[%s19099_s5 + $0x804] sm:$0xf0] }
 0x3cc   :  { %v12688_v27 = vld [vmem:[%s19099_s5 + $0xba4] sm:$0xf]  ;;  %v11716_v37 = vor.u32 %v12747_v21, %v11715_v14  ;;  %v12719_v21 = vld [vmem:[%s19099_s5 + $0xc98] sm:$0xf0] }
 0x3cd   :  { %7365 = vmatpush.bf16.msra.mxu1 %v10348_v6  ;;  %7289 = vmatpush.bf16.msra.mxu3 %v10736_v25  ;;  %v12436_v6 = vld [vmem:[%s19099_s5 + $0x3c4] sm:$0xf]  ;;  %v12569_v25 = vld [vmem:[%s19099_s5 + $0x7ec] sm:$0xf] }
 0x3ce   :  { %v10488_v51 = vor.u32 %v12436_v6, %v10485_v45  ;;  %v11020_v29 = vor.u32 %v12569_v25, %v11017_v3  ;;  %v11496_v6 = vor.u32 %v12688_v27, %v11493_v42  ;;  %v10989_v45 = vld [vmem:[%s19099_s5 + $0x7cc] sm:$0xf0]  ;;  %v12541_v25 = vld [vmem:[%s19099_s5 + $0x70c] sm:$0xf]  ;;  %v10211_v27 = vld [vmem:[%s19099_s5 + $0x198] sm:$0xf] }
 0x3cf   :  { %7377 = vmatpush.bf16.msra.mxu2 %v10600_v23  ;;  %7353 = vmatpush.bf16.msra.mxu0 %v10096_v57  ;;  %v11104_v23 = vor.u32 %v12590_v32, %v11101_v24  ;;  %v11297_v57 = vld [vmem:[%s19099_s5 + $0xa34] sm:$0xf0]  ;;  %v11687_v32 = vld [vmem:[%s19099_s5 + $0xd28] sm:$0xf]  ;;  %v12740_v24 = vld [vmem:[%s19099_s5 + $0xd40] sm:$0xf0]  ;;  %v10992_v47 = vor.u32 %v12562_v39, %v10989_v45 }
 0x3d0   :  { %v11300_v26 = vor.u32 %v12639_v11, %v11297_v57  ;;  %v11688_v35 = vor.u32 %v12740_v24, %v11687_v32  ;;  %v10961_v57 = vld [vmem:[%s19099_s5 + $0x794] sm:$0xf0]  ;;  %v12370_v42 = vld [vmem:[%s19099_s5 + $0x1b0] sm:$0xf0]  ;;  %v11381_v32 = vld [vmem:[%s19099_s5 + $0xadc] sm:$0xf0] }
 0x3d1   :  { %7366 = vmatpush.bf16.msra.mxu1 %v10320_v58  ;;  %7290 = vmatpush.bf16.msra.mxu3 %v10708_v44  ;;  %v12429_v58 = vld [vmem:[%s19099_s5 + $0x38c] sm:$0xf] }
 0x3d2   :  { %v10460_v1 = vor.u32 %v12429_v58, %v10457_v16  ;;  %v12611_v58 = vld [vmem:[%s19099_s5 + $0x93c] sm:$0xf]  ;;  %v11185_v16 = vld [vmem:[%s19099_s5 + $0x954] sm:$0xf0] }
 0x3d3   :  { %7378 = vmatpush.bf16.msra.mxu2 %v10572_v62  ;;  %7354 = vmatpush.bf16.msra.mxu0 %v10068_v4  ;;  %v11549_v62 = vld [vmem:[%s19099_s5 + $0xc2c] sm:$0xf0]  ;;  %v12576_v4 = vld [vmem:[%s19099_s5 + $0x824] sm:$0xf] }
 0x3d4   :  { %v11048_v55 = vor.u32 %v12576_v4, %v11045_v7  ;;  %v12548_v4 = vld [vmem:[%s19099_s5 + $0x744] sm:$0xf] }
 0x3d5   :  { %7367 = vmatpush.bf16.msra.mxu1 %v10292_v60  ;;  %v11552_v60 = vor.u32 %v12702_v61, %v11549_v62  ;;  %7291 = vmatpush.bf16.msra.mxu3 %v10680_v59  ;;  %v12674_v59 = vld [vmem:[%s19099_s5 + $0xb34] sm:$0xf]  ;;  %v11437_v61 = vld [vmem:[%s19099_s5 + $0xb4c] sm:$0xf0] }
 0x3d6   :  { %v11440_v7 = vor.u32 %v12674_v59, %v11437_v61 }
 0x3d7   :  { %7379 = vmatpush.bf16.msra.mxu2 %v10544_v20  ;;  %7355 = vmatpush.bf16.msra.mxu0 %v10040_v31  ;;  %v11521_v20 = vld [vmem:[%s19099_s5 + $0xbf4] sm:$0xf0]  ;;  %v12625_v31 = vld [vmem:[%s19099_s5 + $0x9ac] sm:$0xf] }
 0x3d8   :  { %7292 = vmatmul.bf16.vlgmr.msra.gmra.mxu3 %v16420_v13  ;;  %v11524_v19 = vor.u32 %v12695_v40, %v11521_v20  ;;  %v11157_v40 = vld [vmem:[%s19099_s5 + $0x91c] sm:$0xf0]  ;;  %v12667_v20 = vld [vmem:[%s19099_s5 + $0xafc] sm:$0xf] }
 0x3d9   :  { %7368 = vmatpush.bf16.msra.mxu1 %v10264_v5  ;;  %7336 = vmatpush.bf16.msrb.mxu3 %v11772_v0  ;;  %v11241_v5 = vld [vmem:[%s19099_s5 + $0x9c4] sm:$0xf0]  ;;  %v11160_v14 = vor.u32 %v12604_v2, %v11157_v40  ;;  %v12475_v2 = vld [vmem:[%s19099_s5 + $0x4f8] sm:$0xf0] }
 0x3da   :  { %v11244_v28 = vor.u32 %v12625_v31, %v11241_v5  ;;  %v12597_v31 = vld [vmem:[%s19099_s5 + $0x8cc] sm:$0xf]  ;;  %v11129_v5 = vld [vmem:[%s19099_s5 + $0x8e4] sm:$0xf0] }
 0x3db   :  { %7380 = vmatpush.bf16.msra.mxu2 %v10516_v50  ;;  %7356 = vmatpush.bf16.msra.mxu0 %v10012_v63  ;;  %v7150_v50 = vpop.f32.mrf.mxu0  ;;  %v12618_v63 = vld [vmem:[%s19099_s5 + $0x974] sm:$0xf] }
 0x3dc   :  { %v7151_v41 = vadd.f32 %v7150_v50, %v4720_v12  ;;  %v17632_v0 = vpop.f32.mrf.mxu2  ;;  %v11632_v12 = vor.u32 %v12726_v17, %v11631_v15  ;;  %v12426_v50 = vld [vmem:[%s19099_s5 + $0x370] sm:$0xf0]  ;;  %v12356_v17 = vld [vmem:[%s19099_s5 + $0x140] sm:$0xf0] }
 0x3dd   :  { %7369 = vmatpush.bf16.msra.mxu1 %v10236_v34  ;;  %7337 = vmatpush.bf16.msrb.mxu3 %v11744_v22  ;;  %v7163_v44 = vpop.f32.mrf.mxu1  ;;  %v11213_v34 = vld [vmem:[%s19099_s5 + $0x98c] sm:$0xf0]  ;;  %v11409_v22 = vld [vmem:[%s19099_s5 + $0xb14] sm:$0xf0] }
 0x3de   :  { %7357 = vmatmul.bf16.vlgmr.msra.gmra.mxu0 %v16362_v48  ;;  %v11216_v49 = vor.u32 %v12618_v63, %v11213_v34  ;;  %v11412_v3 = vor.u32 %v12667_v20, %v11409_v22  ;;  %v12712_v63 = vld [vmem:[%s19099_s5 + $0xc60] sm:$0xf0]  ;;  %v12534_v34 = vld [vmem:[%s19099_s5 + $0x6d4] sm:$0xf] }
 0x3df   :  { %7401 = vmatpush.bf16.msrb.mxu0 %v11104_v23  ;;  %7381 = vmatpush.bf16.msra.mxu2 %v10488_v51  ;;  %v11465_v23 = vld [vmem:[%s19099_s5 + $0xb84] sm:$0xf0]  ;;  %v11659_v51 = vld [vmem:[%s19099_s5 + $0xcf0] sm:$0xf] }
 0x3e0   :  { %7370 = vmatmul.bf16.vlgmr.msra.gmra.mxu1 %v16373_v53  ;;  %v11468_v11 = vor.u32 %v12681_v46, %v11465_v23  ;;  %v11660_v62 = vor.u32 %v12733_v52, %v11659_v51  ;;  %v10877_v46 = vld [vmem:[%s19099_s5 + $0x6ec] sm:$0xf0]  ;;  %v12419_v51 = vld [vmem:[%s19099_s5 + $0x338] sm:$0xf0]  ;;  %v12653_v52 = vld [vmem:[%s19099_s5 + $0xa8c] sm:$0xf] }
 0x3e1   :  { %7414 = vmatpush.bf16.msrb.mxu1 %v11328_v9  ;;  %v17606_v9 = vadd.f32 %v7163_v44, %v7151_v41  ;;  %7338 = vmatpush.bf16.msrb.mxu3 %v11716_v37  ;;  %v10435_v37 = vld [vmem:[%s19099_s5 + $0x358] sm:$0xf]  ;;  %v11132_v41 = vor.u32 %v12597_v31, %v11129_v5  ;;  %v11575_v44 = vld [vmem:[%s19099_s5 + $0xc48] sm:$0xf]  ;;  %v12468_v31 = vld [vmem:[%s19099_s5 + $0x4c0] sm:$0xf0] }
 0x3e2   :  { %v10436_v45 = vor.u32 %v12426_v50, %v10435_v37 }
 0x3e3   :  { %7402 = vmatpush.bf16.msrb.mxu0 %v11076_v33  ;;  %7382 = vmatpush.bf16.msra.mxu2 %v10460_v1  ;;  %v7152_v33 = vpop.f32.mrf.mxu0  ;;  %v11188_v1 = vor.u32 %v12611_v58, %v11185_v16  ;;  %v12482_v58 = vld [vmem:[%s19099_s5 + $0x530] sm:$0xf0]  ;;  %v10880_v16 = vor.u32 %v12534_v34, %v10877_v46 }
 0x3e4   :  { %v7126_v24 = vpop.f32.mrf.mxu2  ;;  %v12527_v33 = vld [vmem:[%s19099_s5 + $0x69c] sm:$0xf] }
 0x3e5   :  { %7415 = vmatpush.bf16.msrb.mxu1 %v11300_v26  ;;  %7339 = vmatpush.bf16.msrb.mxu3 %v11688_v35  ;;  %v10964_v26 = vor.u32 %v12555_v54, %v10961_v57  ;;  %v10183_v35 = vld [vmem:[%s19099_s5 + $0x160] sm:$0xf]  ;;  %v11353_v54 = vld [vmem:[%s19099_s5 + $0xaa4] sm:$0xf0]  ;;  %v10659_v57 = vld [vmem:[%s19099_s5 + $0x518] sm:$0xf] }
 0x3e6   :  { %7383 = vmatmul.bf16.vlgmr.msra.gmra.mxu2 %v16412_v10  ;;  %v10660_v15 = vor.u32 %v12482_v58, %v10659_v57  ;;  %v10547_v57 = vld [vmem:[%s19099_s5 + $0x438] sm:$0xf]  ;;  %v12454_v58 = vld [vmem:[%s19099_s5 + $0x450] sm:$0xf0] }
 0x3e7   :  { %7427 = vmatpush.bf16.msrb.mxu2 %v11552_v60  ;;  %7403 = vmatpush.bf16.msrb.mxu0 %v11048_v55  ;;  %v7165_v60 = vpop.f32.mrf.mxu1  ;;  %v11603_v55 = vld [vmem:[%s19099_s5 + $0xc80] sm:$0xf] }
 0x3e8   :  { %v12412_v60 = vld [vmem:[%s19099_s5 + $0x300] sm:$0xf0] }
 0x3e9   :  { %7416 = vmatpush.bf16.msrb.mxu1 %v11272_v36  ;;  %7340 = vmatpush.bf16.msrb.mxu3 %v11660_v62  ;;  %v10936_v36 = vor.u32 %v12548_v4, %v10933_v8  ;;  %v11356_v62 = vor.u32 %v12653_v52, %v11353_v54  ;;  %v10379_v4 = vld [vmem:[%s19099_s5 + $0x2e8] sm:$0xf]  ;;  %v10631_v8 = vld [vmem:[%s19099_s5 + $0x4e0] sm:$0xf]  ;;  %v12335_v52 = vld [vmem:[%s19099_s5 + $0x98] sm:$0xf0] }
 0x3ea   :  { %v10295_v54 = vld [vmem:[%s19099_s5 + $0x240] sm:$0xf] }
 0x3eb   :  { %7428 = vmatpush.bf16.msrb.mxu2 %v11524_v19  ;;  %7404 = vmatpush.bf16.msrb.mxu0 %v11020_v29  ;;  %v10905_v19 = vld [vmem:[%s19099_s5 + $0x724] sm:$0xf0]  ;;  %v11604_v29 = vor.u32 %v12719_v21, %v11603_v55  ;;  %v12520_v55 = vld [vmem:[%s19099_s5 + $0x664] sm:$0xf]  ;;  %v12349_v21 = vld [vmem:[%s19099_s5 + $0x108] sm:$0xf0] }
 0x3ec   :  { %v10908_v39 = vor.u32 %v12541_v25, %v10905_v19  ;;  %v10351_v25 = vld [vmem:[%s19099_s5 + $0x2b0] sm:$0xf]  ;;  %v12405_v19 = vld [vmem:[%s19099_s5 + $0x2c8] sm:$0xf0] }
 0x3ed   :  { %7417 = vmatpush.bf16.msrb.mxu1 %v11244_v28  ;;  %7341 = vmatpush.bf16.msrb.mxu3 %v11632_v12  ;;  %v12660_v28 = vld [vmem:[%s19099_s5 + $0xac4] sm:$0xf]  ;;  %v10380_v12 = vor.u32 %v12412_v60, %v10379_v4  ;;  %v10352_v50 = vor.u32 %v12405_v19, %v10351_v25  ;;  %v10267_v60 = vld [vmem:[%s19099_s5 + $0x208] sm:$0xf]  ;;  %v10239_v19 = vld [vmem:[%s19099_s5 + $0x1d0] sm:$0xf] }
 0x3ee   :  { %v11384_v23 = vor.u32 %v12660_v28, %v11381_v32  ;;  %v10793_v28 = vld [vmem:[%s19099_s5 + $0x644] sm:$0xf0]  ;;  %v10099_v32 = vld [vmem:[%s19099_s5 + $0xb8] sm:$0xf]  ;;  %v12328_v4 = vld [vmem:[%s19099_s5 + $0x60] sm:$0xf0] }
 0x3ef   :  { %7429 = vmatpush.bf16.msrb.mxu2 %v11496_v6  ;;  %7405 = vmatpush.bf16.msrb.mxu0 %v10992_v47  ;;  %v10212_v6 = vor.u32 %v12370_v42, %v10211_v27  ;;  %v12363_v47 = vld [vmem:[%s19099_s5 + $0x178] sm:$0xf0] }
 0x3f0   :  { %v10184_v59 = vor.u32 %v12363_v47, %v10183_v35  ;;  %v12506_v35 = vld [vmem:[%s19099_s5 + $0x5f4] sm:$0xf]  ;;  %v10765_v47 = vld [vmem:[%s19099_s5 + $0x60c] sm:$0xf0] }
 0x3f1   :  { %7418 = vmatpush.bf16.msrb.mxu1 %v11216_v49  ;;  %v10407_v49 = vld [vmem:[%s19099_s5 + $0x320] sm:$0xf]  ;;  %7342 = vmatpush.bf16.msrb.mxu3 %v11604_v29  ;;  %v12513_v29 = vld [vmem:[%s19099_s5 + $0x62c] sm:$0xf] }
 0x3f2   :  { %v10408_v61 = vor.u32 %v12419_v51, %v10407_v49  ;;  %v10796_v34 = vor.u32 %v12513_v29, %v10793_v28  ;;  %v10071_v49 = vld [vmem:[%s19099_s5 + $0x80] sm:$0xf]  ;;  %v10491_v28 = vld [vmem:[%s19099_s5 + $0x3c8] sm:$0xf] }
 0x3f3   :  { %7430 = vmatpush.bf16.msrb.mxu2 %v11468_v11  ;;  %7406 = vmatpush.bf16.msrb.mxu0 %v10964_v26  ;;  %v11576_v11 = vor.u32 %v12712_v63, %v11575_v44  ;;  %v10849_v26 = vld [vmem:[%s19099_s5 + $0x6b4] sm:$0xf0]  ;;  %v12398_v44 = vld [vmem:[%s19099_s5 + $0x290] sm:$0xf0]  ;;  %v12461_v63 = vld [vmem:[%s19099_s5 + $0x488] sm:$0xf0] }
 0x3f4   :  { %v10852_v20 = vor.u32 %v12527_v33, %v10849_v26  ;;  %v12499_v26 = vld [vmem:[%s19099_s5 + $0x5bc] sm:$0xf] }
 0x3f5   :  { %7419 = vmatpush.bf16.msrb.mxu1 %v11188_v1  ;;  %v10155_v1 = vld [vmem:[%s19099_s5 + $0x128] sm:$0xf]  ;;  %7343 = vmatpush.bf16.msrb.mxu3 %v11576_v11  ;;  %v12391_v11 = vld [vmem:[%s19099_s5 + $0x258] sm:$0xf0] }
 0x3f6   :  { %v10156_v22 = vor.u32 %v12356_v17, %v10155_v1  ;;  %v10296_v33 = vor.u32 %v12391_v11, %v10295_v54  ;;  %v10737_v1 = vld [vmem:[%s19099_s5 + $0x5d4] sm:$0xf0]  ;;  %v10548_v17 = vor.u32 %v12454_v58, %v10547_v57  ;;  %v12433_v54 = vld [vmem:[%s19099_s5 + $0x3a8] sm:$0xf0]  ;;  %v12706_v58 = vld [vmem:[%s19099_s5 + $0xc30] sm:$0xf0] }
 0x3f7   :  { %7431 = vmatpush.bf16.msrb.mxu2 %v11440_v7  ;;  %7407 = vmatpush.bf16.msrb.mxu0 %v10936_v36  ;;  %v7176_v7 = vpop.f32.mrf.mxu2  ;;  %v10821_v36 = vld [vmem:[%s19099_s5 + $0x67c] sm:$0xf0]  ;;  %v11555_v57 = vld [vmem:[%s19099_s5 + $0xc18] sm:$0xf] }
 0x3f8   :  { %v17757_v40 = vadd.f32 %v7176_v7, %v17606_v9  ;;  %7344 = vmatmul.bf16.vlgmr.msrb.gmra.mxu3 %v17129_v30  ;;  %v10632_v9 = vor.u32 %v12475_v2, %v10631_v8  ;;  %v10824_v27 = vor.u32 %v12520_v55, %v10821_v36  ;;  %v12384_v7 = vld [vmem:[%s19099_s5 + $0x220] sm:$0xf0]  ;;  %v10519_v8 = vld [vmem:[%s19099_s5 + $0x400] sm:$0xf]  ;;  %v12447_v2 = vld [vmem:[%s19099_s5 + $0x418] sm:$0xf0] }
 0x3f9   :  { %7420 = vmatpush.bf16.msrb.mxu1 %v11160_v14  ;;  %7388 = vmatpush.bf16.msra.mxu3 %v10880_v16  ;;  %v10127_v14 = vld [vmem:[%s19099_s5 + $0xf0] sm:$0xf]  ;;  %v10268_v36 = vor.u32 %v12384_v7, %v10267_v60  ;;  %v10520_v25 = vor.u32 %v12447_v2, %v10519_v8  ;;  %v12636_v60 = vld [vmem:[%s19099_s5 + $0xa00] sm:$0xf0]  ;;  %v11527_v7 = vld [vmem:[%s19099_s5 + $0xbe0] sm:$0xf] }
 0x3fa   :  { %v10128_v37 = vor.u32 %v12349_v21, %v10127_v14  ;;  %v10709_v14 = vld [vmem:[%s19099_s5 + $0x59c] sm:$0xf0]  ;;  %v12321_v21 = vld [vmem:[%s19099_s5 + $0x28] sm:$0xf0]  ;;  %v12699_v8 = vld [vmem:[%s19099_s5 + $0xbf8] sm:$0xf0] }
 0x3fb   :  { %7432 = vmatpush.bf16.msrb.mxu2 %v11412_v3  ;;  %7408 = vmatpush.bf16.msrb.mxu0 %v10908_v39  ;;  %v10603_v3 = vld [vmem:[%s19099_s5 + $0x4a8] sm:$0xf]  ;;  %v17785_v5 = vpop.f32.mrf.mxu0  ;;  %v12342_v39 = vld [vmem:[%s19099_s5 + $0xd0] sm:$0xf0] }
 0x3fc   :  { %v10604_v24 = vor.u32 %v12468_v31, %v10603_v3  ;;  %v10100_v46 = vor.u32 %v12342_v39, %v10099_v32  ;;  %v12377_v3 = vld [vmem:[%s19099_s5 + $0x1e8] sm:$0xf0]  ;;  %v11107_v31 = vld [vmem:[%s19099_s5 + $0x898] sm:$0xf]  ;;  %v12440_v32 = vld [vmem:[%s19099_s5 + $0x3e0] sm:$0xf0] }
 0x3fd   :  { %7421 = vmatpush.bf16.msrb.mxu1 %v11132_v41  ;;  %7389 = vmatpush.bf16.msra.mxu3 %v10852_v20  ;;  %v17787_v42 = vpop.f32.mrf.mxu1  ;;  %v10323_v41 = vld [vmem:[%s19099_s5 + $0x278] sm:$0xf]  ;;  %v10240_v39 = vor.u32 %v12377_v3, %v10239_v19  ;;  %v12573_v19 = vld [vmem:[%s19099_s5 + $0x808] sm:$0xf0]  ;;  %v11247_v3 = vld [vmem:[%s19099_s5 + $0x9b0] sm:$0xf] }
 0x3fe   :  { %7409 = vmatmul.bf16.vlgmr.msrb.gmra.mxu0 %v16562_v38 }
 0x3ff   :  { %7453 = vmatpush.bf16.msra.mxu0 %v10212_v6  ;;  %7433 = vmatpush.bf16.msrb.mxu2 %v11384_v23  ;;  %v7178_v6 = vpop.f32.mrf.mxu2  ;;  %v10324_v23 = vor.u32 %v12398_v44, %v10323_v41  ;;  %v12485_v41 = vld [vmem:[%s19099_s5 + $0x54c] sm:$0xf] }
 0x400   :  { %7422 = vmatmul.bf16.vlgmr.msrb.gmra.mxu1 %v16564_v43 }
 0x401   :  { %7466 = vmatpush.bf16.msra.mxu1 %v10436_v45  ;;  %v10575_v45 = vld [vmem:[%s19099_s5 + $0x470] sm:$0xf]  ;;  %7390 = vmatpush.bf16.msra.mxu3 %v10824_v27  ;;  %v12594_v27 = vld [vmem:[%s19099_s5 + $0x8b0] sm:$0xf0] }
 0x402   :  { %v10576_v51 = vor.u32 %v12461_v63, %v10575_v45  ;;  %v11108_v44 = vor.u32 %v12594_v27, %v11107_v31  ;;  %v10681_v45 = vld [vmem:[%s19099_s5 + $0x564] sm:$0xf0]  ;;  %v12758_v63 = vld [vmem:[%s19099_s5 + $0xdd4] sm:$0xf]  ;;  %v12629_v31 = vld [vmem:[%s19099_s5 + $0x9c8] sm:$0xf0] }
 0x403   :  { %7454 = vmatpush.bf16.msra.mxu0 %v10184_v59  ;;  %7434 = vmatpush.bf16.msrb.mxu2 %v11356_v62  ;;  %v7204_v16 = vpop.f32.mrf.mxu0  ;;  %v10768_v59 = vor.u32 %v12506_v35, %v10765_v47  ;;  %v10072_v62 = vor.u32 %v12335_v52, %v10071_v49  ;;  %v12587_v35 = vld [vmem:[%s19099_s5 + $0x878] sm:$0xf0]  ;;  %v11303_v47 = vld [vmem:[%s19099_s5 + $0xa20] sm:$0xf]  ;;  %v10463_v52 = vld [vmem:[%s19099_s5 + $0x390] sm:$0xf]  ;;  %v10684_v11 = vor.u32 %v12485_v41, %v10681_v45 }
 0x404   :  { %v12737_v41 = vld [vmem:[%s19099_s5 + $0xd2c] sm:$0xf] }
 0x405   :  { %7467 = vmatpush.bf16.msra.mxu1 %v10408_v61  ;;  %7391 = vmatpush.bf16.msra.mxu3 %v10796_v34  ;;  %v7217_v61 = vpop.f32.mrf.mxu1  ;;  %v11773_v34 = vld [vmem:[%s19099_s5 + $0xdec] sm:$0xf0] }
 0x406   :  { %7435 = vmatmul.bf16.vlgmr.msrb.gmra.mxu2 %v16771_v18  ;;  %v11776_v16 = vor.u32 %v12758_v63, %v11773_v34  ;;  %v12566_v34 = vld [vmem:[%s19099_s5 + $0x7d0] sm:$0xf0] }
 0x407   :  { %7479 = vmatpush.bf16.msra.mxu2 %v10660_v15  ;;  %7455 = vmatpush.bf16.msra.mxu0 %v10156_v22  ;;  %v10043_v15 = vld [vmem:[%s19099_s5 + $0x48] sm:$0xf]  ;;  %v10740_v22 = vor.u32 %v12499_v26, %v10737_v1  ;;  %v11745_v26 = vld [vmem:[%s19099_s5 + $0xdb4] sm:$0xf0] }
 0x408   :  { %v10044_v55 = vor.u32 %v12328_v4, %v10043_v15  ;;  %v11051_v1 = vld [vmem:[%s19099_s5 + $0x828] sm:$0xf]  ;;  %v11556_v15 = vor.u32 %v12706_v58, %v11555_v57  ;;  %v10967_v57 = vld [vmem:[%s19099_s5 + $0x780] sm:$0xf]  ;;  %v7125_v58 = vadd.f32 %v17632_v0, %v17407_v56  ;;  %v11443_v56 = vld [vmem:[%s19099_s5 + $0xb38] sm:$0xf] }
 0x409   :  { %7468 = vmatpush.bf16.msra.mxu1 %v10380_v12  ;;  %7392 = vmatpush.bf16.msra.mxu3 %v10768_v59  ;;  %v17861_v20 = vpop.f32.mrf.mxu2  ;;  %v12492_v12 = vld [vmem:[%s19099_s5 + $0x584] sm:$0xf]  ;;  %v11275_v4 = vld [vmem:[%s19099_s5 + $0x9e8] sm:$0xf]  ;;  %v12678_v0 = vld [vmem:[%s19099_s5 + $0xb50] sm:$0xf0] }
 0x40a   :  { %v10712_v29 = vor.u32 %v12492_v12, %v10709_v14  ;;  %v12744_v14 = vld [vmem:[%s19099_s5 + $0xd64] sm:$0xf] }
 0x40b   :  { %7480 = vmatpush.bf16.msra.mxu2 %v10632_v9  ;;  %7456 = vmatpush.bf16.msra.mxu0 %v10128_v37  ;;  %v10015_v9 = vld [vmem:[%s19099_s5 + $0x10] sm:$0xf]  ;;  %v11331_v37 = vld [vmem:[%s19099_s5 + $0xa58] sm:$0xf] }
 0x40d   :  { %7469 = vmatpush.bf16.msra.mxu1 %v10352_v50  ;;  %v12650_v50 = vld [vmem:[%s19099_s5 + $0xa70] sm:$0xf0]  ;;  %7393 = vmatpush.bf16.msra.mxu3 %v10740_v22  ;;  %v17964_v22 = vld [vmem:[%s19100_s6] sm:$0xff] }
 0x40e   :  { %v11332_v6 = vor.u32 %v12650_v50, %v11331_v37  ;;  %v4721_v12 = vperm.slane %v17964_v22, 2  ;;  %v11499_v37 = vld [vmem:[%s19099_s5 + $0xba8] sm:$0xf]  ;;  %v12692_v50 = vld [vmem:[%s19099_s5 + $0xbc0] sm:$0xf0] }
 0x40f   :  { %7481 = vmatpush.bf16.msra.mxu2 %v10604_v24  ;;  %7457 = vmatpush.bf16.msra.mxu0 %v10100_v46  ;;  %v10016_v24 = vor.u32 %v12321_v21, %v10015_v9  ;;  %v10492_v46 = vor.u32 %v12440_v32, %v10491_v28  ;;  %v11717_v9 = vld [vmem:[%s19099_s5 + $0xd7c] sm:$0xf0]  ;;  %v11023_v21 = vld [vmem:[%s19099_s5 + $0x7f0] sm:$0xf]  ;;  %v11500_v63 = vor.u32 %v12692_v50, %v11499_v37 }
 0x410   :  { %v11720_v32 = vor.u32 %v12744_v14, %v11717_v9  ;;  %v11163_v14 = vld [vmem:[%s19099_s5 + $0x908] sm:$0xf]  ;;  %v12608_v9 = vld [vmem:[%s19099_s5 + $0x920] sm:$0xf0] }
 0x411   :  { %7470 = vmatpush.bf16.msra.mxu1 %v10324_v23  ;;  %v11079_v23 = vld [vmem:[%s19099_s5 + $0x860] sm:$0xf]  ;;  %7394 = vmatpush.bf16.msra.mxu3 %v10712_v29  ;;  %v7230_v49 = vpop.f32.mrf.mxu2  ;;  %v11164_v50 = vor.u32 %v12608_v9, %v11163_v14  ;;  %v12531_v14 = vld [vmem:[%s19099_s5 + $0x6b8] sm:$0xf0]  ;;  %v12353_v9 = vld [vmem:[%s19099_s5 + $0x12c] sm:$0xf] }
 0x412   :  { %v11080_v59 = vor.u32 %v12587_v35, %v11079_v23  ;;  %v12622_v23 = vld [vmem:[%s19099_s5 + $0x990] sm:$0xf0]  ;;  %v11471_v35 = vld [vmem:[%s19099_s5 + $0xb70] sm:$0xf] }
 0x413   :  { %7482 = vmatpush.bf16.msra.mxu2 %v10576_v51  ;;  %7458 = vmatpush.bf16.msra.mxu0 %v10072_v62  ;;  %v12643_v51 = vld [vmem:[%s19099_s5 + $0xa38] sm:$0xf0]  ;;  %v10464_v62 = vor.u32 %v12433_v54, %v10463_v52  ;;  %v12730_v54 = vld [vmem:[%s19099_s5 + $0xcf4] sm:$0xf] }
 0x414   :  { %v11304_v61 = vor.u32 %v12643_v51, %v11303_v47  ;;  %v12685_v47 = vld [vmem:[%s19099_s5 + $0xb88] sm:$0xf0] }
 0x415   :  { %7471 = vmatpush.bf16.msra.mxu1 %v10296_v33  ;;  %v12751_v33 = vld [vmem:[%s19099_s5 + $0xd9c] sm:$0xf]  ;;  %7395 = vmatpush.bf16.msra.mxu3 %v10684_v11  ;;  %v11661_v11 = vld [vmem:[%s19099_s5 + $0xd0c] sm:$0xf0] }
 0x416   :  { %v11748_v2 = vor.u32 %v12751_v33, %v11745_v26 }
 0x417   :  { %7483 = vmatpush.bf16.msra.mxu2 %v10548_v17  ;;  %7459 = vmatpush.bf16.msra.mxu0 %v10044_v55  ;;  %v12580_v17 = vld [vmem:[%s19099_s5 + $0x840] sm:$0xf0]  ;;  %v7137_v33 = vpop.f32.mrf.mxu3 }
 0x418   :  { %v11052_v55 = vor.u32 %v12580_v17, %v11051_v1  ;;  %7396 = vmatmul.bf16.vlgmr.msra.gmra.mxu3 %v16420_v13  ;;  %v7138_v1 = vadd.f32 %v7137_v33, %v7125_v58  ;;  %v11664_v17 = vor.u32 %v12730_v54, %v11661_v11  ;;  %v10883_v58 = vld [vmem:[%s19099_s5 + $0x6d8] sm:$0xf]  ;;  %v10185_v33 = vld [vmem:[%s19099_s5 + $0x17c] sm:$0xf0] }
 0x419   :  { %7472 = vmatpush.bf16.msra.mxu1 %v10268_v36  ;;  %7440 = vmatpush.bf16.msrb.mxu3 %v11776_v16  ;;  %v11276_v36 = vor.u32 %v12636_v60, %v11275_v4  ;;  %v11472_v16 = vor.u32 %v12685_v47, %v11471_v35  ;;  %v12723_v4 = vld [vmem:[%s19099_s5 + $0xcbc] sm:$0xf]  ;;  %v12664_v35 = vld [vmem:[%s19099_s5 + $0xae0] sm:$0xf0] }
 0x41b   :  { %7484 = vmatpush.bf16.msra.mxu2 %v10520_v25  ;;  %7460 = vmatpush.bf16.msra.mxu0 %v10016_v24  ;;  %v11528_v25 = vor.u32 %v12699_v8, %v11527_v7  ;;  %v7254_v27 = vpop.f32.mrf.mxu0  ;;  %v11024_v24 = vor.u32 %v12573_v19, %v11023_v21  ;;  %v11633_v8 = vld [vmem:[%s19099_s5 + $0xcd4] sm:$0xf0]  ;;  %v11415_v21 = vld [vmem:[%s19099_s5 + $0xb00] sm:$0xf] }
 0x41c   :  { %v7255_v29 = vadd.f32 %v7254_v27, %v4721_v12  ;;  %v12552_v12 = vld [vmem:[%s19099_s5 + $0x760] sm:$0xf0] }
 0x41d   :  { %7473 = vmatpush.bf16.msra.mxu1 %v10240_v39  ;;  %7441 = vmatpush.bf16.msrb.mxu3 %v11748_v2  ;;  %v7267_v28 = vpop.f32.mrf.mxu1  ;;  %v11248_v39 = vor.u32 %v12629_v31, %v11247_v3  ;;  %v10939_v2 = vld [vmem:[%s19099_s5 + $0x748] sm:$0xf]  ;;  %v11636_v3 = vor.u32 %v12723_v4, %v11633_v8  ;;  %v12716_v31 = vld [vmem:[%s19099_s5 + $0xc84] sm:$0xf]  ;;  %v12479_v4 = vld [vmem:[%s19099_s5 + $0x51c] sm:$0xf] }
 0x41e   :  { %7461 = vmatmul.bf16.vlgmr.msra.gmra.mxu0 %v16362_v48  ;;  %v7268_v45 = vadd.f32 %v7267_v28, %v7255_v29  ;;  %v10940_v37 = vor.u32 %v12552_v12, %v10939_v2  ;;  %v11605_v29 = vld [vmem:[%s19099_s5 + $0xc9c] sm:$0xf0]  ;;  %v10911_v28 = vld [vmem:[%s19099_s5 + $0x710] sm:$0xf] }
 0x41f   :  { %7505 = vmatpush.bf16.msrb.mxu0 %v11108_v44  ;;  %7485 = vmatpush.bf16.msra.mxu2 %v10492_v46  ;;  %v11689_v44 = vld [vmem:[%s19099_s5 + $0xd44] sm:$0xf0]  ;;  %v11219_v46 = vld [vmem:[%s19099_s5 + $0x978] sm:$0xf] }
 0x420   :  { %7474 = vmatmul.bf16.vlgmr.msra.gmra.mxu1 %v16373_v53  ;;  %v11692_v49 = vor.u32 %v12737_v41, %v11689_v44  ;;  %v11220_v52 = vor.u32 %v12622_v23, %v11219_v46  ;;  %v12601_v41 = vld [vmem:[%s19099_s5 + $0x8e8] sm:$0xf0]  ;;  %v12367_v44 = vld [vmem:[%s19099_s5 + $0x19c] sm:$0xf]  ;;  %v11608_v46 = vor.u32 %v12716_v31, %v11605_v29  ;;  %v11387_v23 = vld [vmem:[%s19099_s5 + $0xac8] sm:$0xf] }
 0x421   :  { %7518 = vmatpush.bf16.msrb.mxu1 %v11332_v6  ;;  %v10995_v6 = vld [vmem:[%s19099_s5 + $0x7b8] sm:$0xf]  ;;  %7442 = vmatpush.bf16.msrb.mxu3 %v11720_v32  ;;  %v12545_v32 = vld [vmem:[%s19099_s5 + $0x728] sm:$0xf0]  ;;  %v10381_v31 = vld [vmem:[%s19099_s5 + $0x304] sm:$0xf0] }
 0x422   :  { %v10996_v51 = vor.u32 %v12566_v34, %v10995_v6  ;;  %v7139_v6 = vpop.f32.mrf.mxu3  ;;  %v10437_v34 = vld [vmem:[%s19099_s5 + $0x374] sm:$0xf0]  ;;  %v10912_v47 = vor.u32 %v12545_v32, %v10911_v28 }
 0x423   :  { %7506 = vmatpush.bf16.msrb.mxu0 %v11080_v59  ;;  %7486 = vmatpush.bf16.msra.mxu2 %v10464_v62  ;;  %v12559_v59 = vld [vmem:[%s19099_s5 + $0x798] sm:$0xf0]  ;;  %v7256_v26 = vpop.f32.mrf.mxu0 }
 0x424   :  { %v12615_v62 = vld [vmem:[%s19099_s5 + $0x958] sm:$0xf0]  ;;  %v10968_v60 = vor.u32 %v12559_v59, %v10967_v57  ;;  %v12360_v59 = vld [vmem:[%s19099_s5 + $0x164] sm:$0xf] }
 0x425   :  { %7519 = vmatpush.bf16.msrb.mxu1 %v11304_v61  ;;  %v11191_v61 = vld [vmem:[%s19099_s5 + $0x940] sm:$0xf]  ;;  %7443 = vmatpush.bf16.msrb.mxu3 %v11692_v49  ;;  %v12416_v26 = vld [vmem:[%s19099_s5 + $0x324] sm:$0xf]  ;;  %v10188_v8 = vor.u32 %v12360_v59, %v10185_v33  ;;  %v12339_v59 = vld [vmem:[%s19099_s5 + $0xbc] sm:$0xf] }
 0x426   :  { %7487 = vmatmul.bf16.vlgmr.msra.gmra.mxu2 %v16412_v10  ;;  %v11192_v7 = vor.u32 %v12615_v62, %v11191_v61  ;;  %v11388_v62 = vor.u32 %v12664_v35, %v11387_v23  ;;  %v12465_v35 = vld [vmem:[%s19099_s5 + $0x4ac] sm:$0xf] }
 0x427   :  { %7531 = vmatpush.bf16.msrb.mxu2 %v11556_v15  ;;  %7507 = vmatpush.bf16.msrb.mxu0 %v11052_v55  ;;  %v7269_v15 = vpop.f32.mrf.mxu1  ;;  %v11789_v55 = vmul.f32 -1.442695, %v7138_v1  ;;  %v11359_v1 = vld [vmem:[%s19099_s5 + $0xa90] sm:$0xf] }
 0x428   :  { %v12657_v15 = vld [vmem:[%s19099_s5 + $0xaa8] sm:$0xf0] }
 0x429   :  { %7520 = vmatpush.bf16.msrb.mxu1 %v11276_v36  ;;  %v11444_v36 = vor.u32 %v12678_v0, %v11443_v56  ;;  %12764 = vpow2.f32 %v11789_v55  ;;  %7444 = vmatpush.bf16.msrb.mxu3 %v11664_v17  ;;  %v7280_v19 = vpop.f32.mrf.mxu2  ;;  %v10409_v0 = vld [vmem:[%s19099_s5 + $0x33c] sm:$0xf0]  ;;  %v11360_v12 = vor.u32 %v12657_v15, %v11359_v1  ;;  %v10325_v1 = vld [vmem:[%s19099_s5 + $0x294] sm:$0xf0]  ;;  %v12458_v15 = vld [vmem:[%s19099_s5 + $0x474] sm:$0xf] }
 0x42a   :  { %v18070_v27 = vadd.f32 %v7280_v19, %v7268_v45  ;;  %v10213_v45 = vld [vmem:[%s19099_s5 + $0x1b4] sm:$0xf0]  ;;  %v10412_v2 = vor.u32 %v12416_v26, %v10409_v0  ;;  %v7189_v55 = vpop.f32.mrf.mxu3  ;;  %v10157_v19 = vld [vmem:[%s19099_s5 + $0x144] sm:$0xf0]  ;;  %v12395_v0 = vld [vmem:[%s19099_s5 + $0x27c] sm:$0xf] }
 0x42b   :  { %7532 = vmatpush.bf16.msrb.mxu2 %v11528_v25  ;;  %7508 = vmatpush.bf16.msrb.mxu0 %v11024_v24  ;;  %v12671_v25 = vld [vmem:[%s19099_s5 + $0xb18] sm:$0xf0]  ;;  %v10216_v11 = vor.u32 %v12367_v44, %v10213_v45  ;;  %v10160_v32 = vor.u32 %v12353_v9, %v10157_v19  ;;  %v12346_v44 = vld [vmem:[%s19099_s5 + $0xf4] sm:$0xf]  ;;  %v10129_v45 = vld [vmem:[%s19099_s5 + $0x10c] sm:$0xf0] }
 0x42c   :  { %v11416_v24 = vor.u32 %v12671_v25, %v11415_v21  ;;  %v7190_v21 = vadd.f32 %v7189_v55, %v17757_v40  ;;  %v10633_v40 = vld [vmem:[%s19099_s5 + $0x4fc] sm:$0xf0]  ;;  %v10328_v55 = vor.u32 %v12395_v0, %v10325_v1  ;;  %v11333_v0 = vld [vmem:[%s19099_s5 + $0xa74] sm:$0xf0] }
 0x42d   :  { %7521 = vmatpush.bf16.msrb.mxu1 %v11248_v39  ;;  %v11135_v39 = vld [vmem:[%s19099_s5 + $0x8d0] sm:$0xf]  ;;  %7445 = vmatpush.bf16.msrb.mxu3 %v11636_v3  ;;  %v12409_v3 = vld [vmem:[%s19099_s5 + $0x2ec] sm:$0xf] }
 0x42e   :  { %v11136_v49 = vor.u32 %v12601_v41, %v11135_v39  ;;  %v10827_v39 = vld [vmem:[%s19099_s5 + $0x668] sm:$0xf]  ;;  %v12524_v41 = vld [vmem:[%s19099_s5 + $0x680] sm:$0xf0] }
 0x42f   :  { %7533 = vmatpush.bf16.msrb.mxu2 %v11500_v63  ;;  %7509 = vmatpush.bf16.msrb.mxu0 %v10996_v51  ;;  %v12423_v63 = vld [vmem:[%s19099_s5 + $0x35c] sm:$0xf]  ;;  %v12709_v51 = vld [vmem:[%s19099_s5 + $0xc4c] sm:$0xf]  ;;  %v12765_v54 = vpop.eup %12764 }
 0x430   :  { %v10440_v57 = vor.u32 %v12423_v63, %v10437_v34  ;;  %v18120_v61 = vadd.f32 1.0, %v12765_v54  ;;  %v12402_v63 = vld [vmem:[%s19099_s5 + $0x2b4] sm:$0xf]  ;;  %v10353_v34 = vld [vmem:[%s19099_s5 + $0x2cc] sm:$0xf0] }
 0x431   :  { %7522 = vmatpush.bf16.msrb.mxu1 %v11220_v52  ;;  %v11577_v52 = vld [vmem:[%s19099_s5 + $0xc64] sm:$0xf0]  ;;  %7446 = vmatpush.bf16.msrb.mxu3 %v11608_v46  ;;  %v7282_v56 = vpop.f32.mrf.mxu2  ;;  %v12517_v54 = vld [vmem:[%s19099_s5 + $0x648] sm:$0xf0] }
 0x432   :  { %12766 = vrcp.f32 %v18120_v61  ;;  %v11580_v17 = vor.u32 %v12709_v51, %v11577_v52  ;;  %v10828_v52 = vor.u32 %v12524_v41, %v10827_v39  ;;  %v7802_v26 = vand.u32 2147483647, %v18120_v61  ;;  %v10743_v39 = vld [vmem:[%s19099_s5 + $0x5c0] sm:$0xf]  ;;  %v12503_v41 = vld [vmem:[%s19099_s5 + $0x5d8] sm:$0xf0] }
 0x433   :  { %7534 = vmatpush.bf16.msrb.mxu2 %v11472_v16  ;;  %7510 = vmatpush.bf16.msrb.mxu0 %v10968_v60  ;;  %v12538_v16 = vld [vmem:[%s19099_s5 + $0x6f0] sm:$0xf0]  ;;  %v10661_v60 = vld [vmem:[%s19099_s5 + $0x534] sm:$0xf0]  ;;  %vm7798_vm3 = vweird.f32 %v18120_v61 }
 0x434   :  { %v10664_v25 = vor.u32 %v12479_v4, %v10661_v60  ;;  %vm7803_vm5 = vcmp.eq.f32.partialorder %v7802_v26, 8.507059e+37  ;;  %v11109_v26 = vld [vmem:[%s19099_s5 + $0x8b4] sm:$0xf0] }
 0x435   :  { %7523 = vmatpush.bf16.msrb.mxu1 %v11192_v7  ;;  %v10884_v7 = vor.u32 %v12538_v16, %v10883_v58  ;;  %7447 = vmatpush.bf16.msrb.mxu3 %v11580_v17  ;;  %v10356_v58 = vor.u32 %v12402_v63, %v10353_v34  ;;  %v7191_v16 = vpop.f32.mrf.mxu3  ;;  %v10577_v17 = vld [vmem:[%s19099_s5 + $0x48c] sm:$0xf0]  ;;  %v10269_v63 = vld [vmem:[%s19099_s5 + $0x224] sm:$0xf0] }
 0x436   :  { %v10580_v9 = vor.u32 %v12458_v15, %v10577_v17  ;;  %v12437_v15 = vld [vmem:[%s19099_s5 + $0x3cc] sm:$0xf]  ;;  %v10493_v17 = vld [vmem:[%s19099_s5 + $0x3e4] sm:$0xf0] }
 0x437   :  { %7535 = vmatpush.bf16.msrb.mxu2 %v11444_v36  ;;  %7511 = vmatpush.bf16.msrb.mxu0 %v10940_v37  ;;  %v10855_v36 = vld [vmem:[%s19099_s5 + $0x6a0] sm:$0xf]  ;;  %v12472_v37 = vld [vmem:[%s19099_s5 + $0x4e4] sm:$0xf] }
 0x438   :  { %v10856_v29 = vor.u32 %v12531_v14, %v10855_v36  ;;  %v18172_v28 = vpop.eup %12766  ;;  %7448 = vmatmul.bf16.vlgmr.msrb.gmra.mxu3 %v17129_v30  ;;  %v10636_v6 = vor.u32 %v12472_v37, %v10633_v40  ;;  %v10073_v36 = vld [vmem:[%s19099_s5 + $0x9c] sm:$0xf0]  ;;  %v10549_v37 = vld [vmem:[%s19099_s5 + $0x454] sm:$0xf0] }
 0x439   :  { %7524 = vmatpush.bf16.msrb.mxu1 %v11164_v50  ;;  %7492 = vmatpush.bf16.msra.mxu3 %v10884_v7  ;;  %v7203_v50 = vadd.f32 %v17785_v5, %v7190_v21  ;;  %v7794_v5 = vmul.f32 %v18172_v28, %v18120_v61  ;;  %vm7799_vm2 = vweird.f32 %v18172_v28  ;;  %v10771_v7 = vld [vmem:[%s19099_s5 + $0x5f8] sm:$0xf]  ;;  %v12388_v21 = vld [vmem:[%s19099_s5 + $0x244] sm:$0xf] }
 0x43a   :  { %vm7800_vm4 = vmor %vm7798_vm3, %vm7799_vm2 }
 0x43b   :  { %7536 = vmatpush.bf16.msrb.mxu2 %v11416_v24  ;;  %7512 = vmatpush.bf16.msrb.mxu0 %v10912_v47  ;;  %v10384_v24 = vor.u32 %v12409_v3, %v10381_v31  ;;  %v7216_v46 = vadd.f32 %v17787_v42, %v7203_v50  ;;  %v18196_v23 = vpop.f32.mrf.mxu0  ;;  %v10605_v47 = vld [vmem:[%s19099_s5 + $0x4c4] sm:$0xf0]  ;;  %v10799_v42 = vld [vmem:[%s19099_s5 + $0x630] sm:$0xf]  ;;  %v12451_v31 = vld [vmem:[%s19099_s5 + $0x43c] sm:$0xf] }
 0x43c   :  { %v10608_v56 = vor.u32 %v12465_v35, %v10605_v47  ;;  %v10800_v60 = vor.u32 %v12517_v54, %v10799_v42  ;;  %v10521_v35 = vld [vmem:[%s19099_s5 + $0x41c] sm:$0xf0] }
 0x43d   :  { %7525 = vmatpush.bf16.msrb.mxu1 %v11136_v49  ;;  %v7795_v49 = vsub.f32 1.0, %v7794_v5  ;;  %7493 = vmatpush.bf16.msra.mxu3 %v10856_v29  ;;  %v18205_v51 = vpop.f32.mrf.mxu1  ;;  %v7229_v29 = vadd.f32 %v17861_v20, %v7216_v46  ;;  %v10552_v20 = vor.u32 %v12451_v31, %v10549_v37  ;;  %v12444_v46 = vld [vmem:[%s19099_s5 + $0x404] sm:$0xf]  ;;  %v11305_v31 = vld [vmem:[%s19099_s5 + $0xa3c] sm:$0xf0] }
 0x43e   :  { %7513 = vmatmul.bf16.vlgmr.msrb.gmra.mxu0 %v16562_v38  ;;  %v10524_v16 = vor.u32 %v12444_v46, %v10521_v35  ;;  %v12430_v37 = vld [vmem:[%s19099_s5 + $0x394] sm:$0xf]  ;;  %v12633_v46 = vld [vmem:[%s19099_s5 + $0x9ec] sm:$0xf]  ;;  %v11277_v35 = vld [vmem:[%s19099_s5 + $0xa04] sm:$0xf0] }
 0x43f   :  { %7557 = vmatpush.bf16.msra.mxu0 %v10216_v11  ;;  %7537 = vmatpush.bf16.msrb.mxu2 %v11388_v62  ;;  %v7804_v11 = vand.u32 2147483648, %v18120_v61  ;;  %v10101_v62 = vld [vmem:[%s19099_s5 + $0xd4] sm:$0xf0]  ;;  %v7796_v33 = vmul.f32 %v18172_v28, %v7795_v49  ;;  %v12332_v61 = vld [vmem:[%s19099_s5 + $0x84] sm:$0xf]  ;;  %v10744_v49 = vor.u32 %v12503_v41, %v10743_v39 }
 0x440   :  { %7526 = vmatmul.bf16.vlgmr.msrb.gmra.mxu1 %v16564_v43 }
 0x441   :  { %7570 = vmatpush.bf16.msra.mxu1 %v10440_v57  ;;  %v10132_v57 = vor.u32 %v12346_v44, %v10129_v45  ;;  %v7797_v4 = vadd.f32 %v18172_v28, %v7796_v33  ;;  %7494 = vmatpush.bf16.msra.mxu3 %v10828_v52  ;;  %v12325_v44 = vld [vmem:[%s19099_s5 + $0x4c] sm:$0xf]  ;;  %v10715_v52 = vld [vmem:[%s19099_s5 + $0x588] sm:$0xf]  ;;  %v12591_v33 = vld [vmem:[%s19099_s5 + $0x89c] sm:$0xf] }
 0x442   :  { %v12381_v45 = vld [vmem:[%s19099_s5 + $0x20c] sm:$0xf] }
 0x443   :  { %7558 = vmatpush.bf16.msra.mxu0 %v10188_v8  ;;  %7538 = vmatpush.bf16.msrb.mxu2 %v11360_v12  ;;  %v12510_v8 = vld [vmem:[%s19099_s5 + $0x610] sm:$0xf0]  ;;  %v10104_v12 = vor.u32 %v12339_v59, %v10101_v62  ;;  %v7801_v14 = vsel %vm7800_vm4, %v18172_v28, %v7797_v4  ;;  %v7308_v3 = vpop.f32.mrf.mxu0  ;;  %v10076_v28 = vor.u32 %v12332_v61, %v10073_v36  ;;  %v10241_v62 = vld [vmem:[%s19099_s5 + $0x1ec] sm:$0xf0]  ;;  %v11779_v61 = vld [vmem:[%s19099_s5 + $0xdd8] sm:$0xf] }
 0x444   :  { %v10772_v50 = vor.u32 %v12510_v8, %v10771_v7  ;;  %v10272_v54 = vor.u32 %v12381_v45, %v10269_v63  ;;  %v12374_v59 = vld [vmem:[%s19099_s5 + $0x1d4] sm:$0xf]  ;;  %v10687_v8 = vld [vmem:[%s19099_s5 + $0x550] sm:$0xf]  ;;  %v11053_v63 = vld [vmem:[%s19099_s5 + $0x844] sm:$0xf0] }
 0x445   :  { %7571 = vmatpush.bf16.msra.mxu1 %v10412_v2  ;;  %v7805_v2 = vor.u32 1.1754944e-38, %v7804_v11  ;;  %7495 = vmatpush.bf16.msra.mxu3 %v10800_v60  ;;  %v7321_v40 = vpop.f32.mrf.mxu1  ;;  %v12496_v11 = vld [vmem:[%s19099_s5 + $0x5a0] sm:$0xf0]  ;;  %v10244_v60 = vor.u32 %v12374_v59, %v10241_v62  ;;  %v12762_v36 = vld [vmem:[%s19099_s5 + $0xdf0] sm:$0xf0] }
 0x446   :  { %7539 = vmatmul.bf16.vlgmr.msrb.gmra.mxu2 %v16771_v18  ;;  %v10716_v1 = vor.u32 %v12496_v11, %v10715_v52  ;;  %v10465_v40 = vld [vmem:[%s19099_s5 + $0x3ac] sm:$0xf0]  ;;  %v11280_v11 = vor.u32 %v12633_v46, %v11277_v35  ;;  %v12626_v62 = vld [vmem:[%s19099_s5 + $0x9b4] sm:$0xf] }
 0x447   :  { %7583 = vmatpush.bf16.msra.mxu2 %v10664_v25  ;;  %7559 = vmatpush.bf16.msra.mxu0 %v10160_v32  ;;  %v10297_v25 = vld [vmem:[%s19099_s5 + $0x25c] sm:$0xf0]  ;;  %v7806_v19 = vsel %vm7803_vm5, %v7805_v2, %v7801_v14  ;;  %v11112_v2 = vor.u32 %v12591_v33, %v11109_v26  ;;  %v10496_v14 = vor.u32 %v12437_v15, %v10493_v17  ;;  %v11025_v59 = vld [vmem:[%s19099_s5 + $0x80c] sm:$0xf0]  ;;  %v11501_v15 = vld [vmem:[%s19099_s5 + $0xbc4] sm:$0xf0] }
 0x448   :  { %7898 = vst [vmem:[%s19101_s7] sm:$0xff] %v7806_v19  ;;  %v10300_v32 = vor.u32 %v12388_v21, %v10297_v25  ;;  %v12584_v21 = vld [vmem:[%s19099_s5 + $0x864] sm:$0xf]  ;;  %v11081_v25 = vld [vmem:[%s19099_s5 + $0x87c] sm:$0xf0]  ;;  %v11249_v33 = vld [vmem:[%s19099_s5 + $0x9cc] sm:$0xf0] }
 0x449   :  { %7572 = vmatpush.bf16.msra.mxu1 %v10384_v24  ;;  %v7241_v24 = vpop.f32.mrf.mxu3  ;;  %v18286_v34 = vpop.f32.mrf.mxu2  ;;  %7496 = vmatpush.bf16.msra.mxu3 %v10772_v50  ;;  %v12640_v19 = vld [vmem:[%s19099_s5 + $0xa24] sm:$0xf]  ;;  %v11084_v39 = vor.u32 %v12584_v21, %v11081_v25  ;;  %v12619_v21 = vld [vmem:[%s19099_s5 + $0x97c] sm:$0xf]  ;;  %v11221_v25 = vld [vmem:[%s19099_s5 + $0x994] sm:$0xf0] }
 0x44a   :  { %v7242_v5 = vadd.f32 %v7241_v24, %v7229_v29  ;;  %v11780_v24 = vor.u32 %v12762_v36, %v11779_v61  ;;  %v11308_v41 = vor.u32 %v12640_v19, %v11305_v31  ;;  %v10997_v61 = vld [vmem:[%s19099_s5 + $0x7d4] sm:$0xf0]  ;;  %v11473_v31 = vld [vmem:[%s19099_s5 + $0xb8c] sm:$0xf0] }
 0x44b   :  { %7584 = vmatpush.bf16.msra.mxu2 %v10636_v6  ;;  %7560 = vmatpush.bf16.msra.mxu0 %v10132_v57  ;;  %v10045_v6 = vld [vmem:[%s19099_s5 + $0x64] sm:$0xf0]  ;;  %v12318_v57 = vld [vmem:[%s19099_s5 + $0x14] sm:$0xf] }
 0x44c   :  { %v11790_v47 = vmul.f32 -1.442695, %v7242_v5  ;;  %v10048_v42 = vor.u32 %v12325_v44, %v10045_v6  ;;  %v10468_v44 = vor.u32 %v12430_v37, %v10465_v40  ;;  %v11751_v5 = vld [vmem:[%s19099_s5 + $0xda0] sm:$0xf]  ;;  %v12577_v6 = vld [vmem:[%s19099_s5 + $0x82c] sm:$0xf] }
 0x44d   :  { %7573 = vmatpush.bf16.msra.mxu1 %v10356_v58  ;;  %v10017_v58 = vld [vmem:[%s19099_s5 + $0x2c] sm:$0xf0]  ;;  %7497 = vmatpush.bf16.msra.mxu3 %v10744_v49  ;;  %v11529_v49 = vld [vmem:[%s19099_s5 + $0xbfc] sm:$0xf0] }
 0x44e   :  { %12768 = vpow2.f32 %v11790_v47  ;;  %v10020_v4 = vor.u32 %v12318_v57, %v10017_v58  ;;  %v12696_v47 = vld [vmem:[%s19099_s5 + $0xbe4] sm:$0xf]  ;;  %v11723_v57 = vld [vmem:[%s19099_s5 + $0xd68] sm:$0xf] }
 0x44f   :  { %7585 = vmatpush.bf16.msra.mxu2 %v10608_v56  ;;  %7561 = vmatpush.bf16.msra.mxu0 %v10104_v12  ;;  %v12647_v56 = vld [vmem:[%s19099_s5 + $0xa5c] sm:$0xf]  ;;  %v12748_v58 = vld [vmem:[%s19099_s5 + $0xd80] sm:$0xf0] }
 0x450   :  { %v11336_v12 = vor.u32 %v12647_v56, %v11333_v0 }
 0x451   :  { %7574 = vmatpush.bf16.msra.mxu1 %v10328_v55  ;;  %v7243_v7 = vpop.f32.mrf.mxu3  ;;  %v12489_v55 = vld [vmem:[%s19099_s5 + $0x568] sm:$0xf0]  ;;  %7498 = vmatpush.bf16.msra.mxu3 %v10716_v1 }
 0x452   :  { %v10688_v29 = vor.u32 %v12489_v55, %v10687_v8  ;;  %v12689_v1 = vld [vmem:[%s19099_s5 + $0xbac] sm:$0xf]  ;;  %v11695_v7 = vld [vmem:[%s19099_s5 + $0xd30] sm:$0xf]  ;;  %v12563_v55 = vld [vmem:[%s19099_s5 + $0x7bc] sm:$0xf] }
 0x453   :  { %7586 = vmatpush.bf16.msra.mxu2 %v10580_v9  ;;  %7562 = vmatpush.bf16.msra.mxu0 %v10076_v28  ;;  %v7334_v9 = vpop.f32.mrf.mxu2  ;;  %v12703_v28 = vld [vmem:[%s19099_s5 + $0xc1c] sm:$0xf] }
 0x454   :  { %v12769_v3 = vpop.eup %12768  ;;  %v11504_v9 = vor.u32 %v12689_v1, %v11501_v15  ;;  %v12668_v1 = vld [vmem:[%s19099_s5 + $0xb04] sm:$0xf]  ;;  %v11417_v15 = vld [vmem:[%s19099_s5 + $0xb1c] sm:$0xf0] }
 0x455   :  { %7575 = vmatpush.bf16.msra.mxu1 %v10300_v32  ;;  %v18360_v50 = vadd.f32 1.0, %v12769_v3  ;;  %v11557_v32 = vld [vmem:[%s19099_s5 + $0xc34] sm:$0xf0]  ;;  %7499 = vmatpush.bf16.msra.mxu3 %v10688_v29  ;;  %v12682_v3 = vld [vmem:[%s19099_s5 + $0xb74] sm:$0xf] }
 0x456   :  { %v11560_v45 = vor.u32 %v12703_v28, %v11557_v32  ;;  %v11000_v28 = vor.u32 %v12563_v55, %v10997_v61  ;;  %v11224_v32 = vor.u32 %v12619_v21, %v11221_v25  ;;  %v11420_v55 = vor.u32 %v12668_v1, %v11417_v15  ;;  %v12598_v61 = vld [vmem:[%s19099_s5 + $0x8d4] sm:$0xf]  ;;  %v12371_v21 = vld [vmem:[%s19099_s5 + $0x1b8] sm:$0xf0]  ;;  %v10443_v25 = vld [vmem:[%s19099_s5 + $0x360] sm:$0xf] }
 0x457   :  { %7587 = vmatpush.bf16.msra.mxu2 %v10552_v20  ;;  %7563 = vmatpush.bf16.msra.mxu0 %v10048_v42  ;;  %12770 = vrcp.f32 %v18360_v50  ;;  %v12755_v20 = vld [vmem:[%s19099_s5 + $0xdb8] sm:$0xf0]  ;;  %v4722_v42 = vperm.slane %v17964_v22, 3  ;;  %v11532_v22 = vor.u32 %v12696_v47, %v11529_v49  ;;  %v7819_v19 = vand.u32 2147483648, %v18360_v50  ;;  %v11445_v47 = vld [vmem:[%s19099_s5 + $0xb54] sm:$0xf0] }
 0x458   :  { %v11752_v52 = vor.u32 %v12755_v20, %v11751_v5  ;;  %7500 = vmatmul.bf16.vlgmr.msra.gmra.mxu3 %v16420_v13  ;;  %v7817_v40 = vand.u32 2147483647, %v18360_v50  ;;  %vm7813_vm7 = vweird.f32 %v18360_v50  ;;  %v11476_v5 = vor.u32 %v12682_v3, %v11473_v31  ;;  %v10969_v20 = vld [vmem:[%s19099_s5 + $0x79c] sm:$0xf0]  ;;  %v12661_v31 = vld [vmem:[%s19099_s5 + $0xacc] sm:$0xf] }
 0x459   :  { %7576 = vmatpush.bf16.msra.mxu1 %v10272_v54  ;;  %7544 = vmatpush.bf16.msrb.mxu3 %v11780_v24  ;;  %v11056_v54 = vor.u32 %v12577_v6, %v11053_v63  ;;  %v11667_v24 = vld [vmem:[%s19099_s5 + $0xcf8] sm:$0xf]  ;;  %v12612_v6 = vld [vmem:[%s19099_s5 + $0x944] sm:$0xf]  ;;  %v7820_v63 = vor.u32 1.1754944e-38, %v7819_v19 }
 0x45a   :  { %vm7818_vm9 = vcmp.eq.f32.partialorder %v7817_v40, 8.507059e+37  ;;  %v12427_v19 = vld [vmem:[%s19099_s5 + $0x378] sm:$0xf0] }
 0x45b   :  { %7588 = vmatpush.bf16.msra.mxu2 %v10524_v16  ;;  %7564 = vmatpush.bf16.msra.mxu0 %v10020_v4  ;;  %v12570_v16 = vld [vmem:[%s19099_s5 + $0x7f4] sm:$0xf]  ;;  %v7358_v56 = vpop.f32.mrf.mxu0 }
 0x45c   :  { %v7359_v4 = vadd.f32 %v7358_v56, %v4722_v42  ;;  %v11028_v8 = vor.u32 %v12570_v16, %v11025_v59  ;;  %v11639_v42 = vld [vmem:[%s19099_s5 + $0xcc0] sm:$0xf]  ;;  %v12727_v16 = vld [vmem:[%s19099_s5 + $0xcd8] sm:$0xf0]  ;;  %v10941_v59 = vld [vmem:[%s19099_s5 + $0x764] sm:$0xf0] }
 0x45d   :  { %7577 = vmatpush.bf16.msra.mxu1 %v10244_v60  ;;  %v12771_v26 = vpop.eup %12770  ;;  %v7371_v0 = vpop.f32.mrf.mxu1  ;;  %7545 = vmatpush.bf16.msrb.mxu3 %v11752_v52  ;;  %v11724_v60 = vor.u32 %v12748_v58, %v11723_v57  ;;  %v11165_v56 = vld [vmem:[%s19099_s5 + $0x924] sm:$0xf0] }
 0x45e   :  { %7565 = vmatmul.bf16.vlgmr.msra.gmra.mxu0 %v16362_v48  ;;  %v7809_v17 = vmul.f32 %v12771_v26, %v18360_v50  ;;  %vm7814_vm6 = vweird.f32 %v12771_v26  ;;  %v12675_v50 = vld [vmem:[%s19099_s5 + $0xb3c] sm:$0xf]  ;;  %v7293_v58 = vpop.f32.mrf.mxu3 }
 0x45f   :  { %7609 = vmatpush.bf16.msrb.mxu0 %v11112_v2  ;;  %7589 = vmatpush.bf16.msra.mxu2 %v10496_v14  ;;  %v11252_v2 = vor.u32 %v12626_v62, %v11249_v33  ;;  %v7372_v14 = vadd.f32 %v7371_v0, %v7359_v4  ;;  %vm7815_vm8 = vmor %vm7813_vm7, %vm7814_vm6  ;;  %v7294_v62 = vadd.f32 %v7293_v58, %v18070_v27  ;;  %v12528_v58 = vld [vmem:[%s19099_s5 + $0x6a4] sm:$0xf] }
 0x460   :  { %7578 = vmatmul.bf16.vlgmr.msra.gmra.mxu1 %v16373_v53  ;;  %v7810_v36 = vsub.f32 1.0, %v7809_v17  ;;  %v11448_v33 = vor.u32 %v12675_v50, %v11445_v47  ;;  %v11640_v4 = vor.u32 %v12727_v16, %v11639_v42  ;;  %v11361_v50 = vld [vmem:[%s19099_s5 + $0xaac] sm:$0xf0]  ;;  %v10857_v16 = vld [vmem:[%s19099_s5 + $0x6bc] sm:$0xf0] }
 0x461   :  { %7622 = vmatpush.bf16.msrb.mxu1 %v11336_v12  ;;  %v12741_v12 = vld [vmem:[%s19099_s5 + $0xd48] sm:$0xf0]  ;;  %7546 = vmatpush.bf16.msrb.mxu3 %v11724_v60  ;;  %v7307_v27 = vadd.f32 %v18196_v23, %v7294_v62  ;;  %v11611_v60 = vld [vmem:[%s19099_s5 + $0xc88] sm:$0xf]  ;;  %v10913_v23 = vld [vmem:[%s19099_s5 + $0x72c] sm:$0xf0]  ;;  %v10860_v1 = vor.u32 %v12528_v58, %v10857_v16 }
 0x462   :  { %v7811_v37 = vmul.f32 %v12771_v26, %v7810_v36  ;;  %v11696_v29 = vor.u32 %v12741_v12, %v11695_v7  ;;  %v12542_v12 = vld [vmem:[%s19099_s5 + $0x714] sm:$0xf]  ;;  %v11137_v36 = vld [vmem:[%s19099_s5 + $0x8ec] sm:$0xf0]  ;;  %v12357_v62 = vld [vmem:[%s19099_s5 + $0x148] sm:$0xf0] }
 0x463   :  { %7610 = vmatpush.bf16.msrb.mxu0 %v11084_v39  ;;  %7590 = vmatpush.bf16.msra.mxu2 %v10468_v44  ;;  %v12734_v39 = vld [vmem:[%s19099_s5 + $0xd10] sm:$0xf0]  ;;  %v7360_v46 = vpop.f32.mrf.mxu0  ;;  %v11140_v40 = vor.u32 %v12598_v61, %v11137_v36  ;;  %v10611_v36 = vld [vmem:[%s19099_s5 + $0x4b0] sm:$0xf]  ;;  %v12500_v16 = vld [vmem:[%s19099_s5 + $0x5c4] sm:$0xf] }
 0x464   :  { %v7812_v44 = vadd.f32 %v12771_v26, %v7811_v37  ;;  %v11668_v52 = vor.u32 %v12734_v39, %v11667_v24  ;;  %v10916_v37 = vor.u32 %v12542_v12, %v10913_v23  ;;  %v10444_v24 = vor.u32 %v12427_v19, %v10443_v25  ;;  %v12713_v39 = vld [vmem:[%s19099_s5 + $0xc68] sm:$0xf0]  ;;  %v12420_v46 = vld [vmem:[%s19099_s5 + $0x340] sm:$0xf0]  ;;  %v10359_v12 = vld [vmem:[%s19099_s5 + $0x2b8] sm:$0xf] }
 0x465   :  { %7623 = vmatpush.bf16.msrb.mxu1 %v11308_v41  ;;  %v12556_v41 = vld [vmem:[%s19099_s5 + $0x784] sm:$0xf]  ;;  %v7373_v35 = vpop.f32.mrf.mxu1  ;;  %7547 = vmatpush.bf16.msrb.mxu3 %v11696_v29  ;;  %v12406_v23 = vld [vmem:[%s19099_s5 + $0x2d0] sm:$0xf0] }
 0x466   :  { %7591 = vmatmul.bf16.vlgmr.msra.gmra.mxu2 %v16412_v10  ;;  %v7816_v49 = vsel %vm7815_vm8, %v12771_v26, %v7812_v44  ;;  %v12605_v26 = vld [vmem:[%s19099_s5 + $0x90c] sm:$0xf]  ;;  %v7295_v29 = vpop.f32.mrf.mxu3  ;;  %v10885_v44 = vld [vmem:[%s19099_s5 + $0x6f4] sm:$0xf0]  ;;  %v12654_v35 = vld [vmem:[%s19099_s5 + $0xa94] sm:$0xf]  ;;  %v10360_v19 = vor.u32 %v12406_v23, %v10359_v12 }
 0x467   :  { %7635 = vmatpush.bf16.msrb.mxu2 %v11560_v45  ;;  %7611 = vmatpush.bf16.msrb.mxu0 %v11056_v54  ;;  %v11193_v45 = vld [vmem:[%s19099_s5 + $0x95c] sm:$0xf0]  ;;  %v7821_v54 = vsel %vm7818_vm9, %v7820_v63, %v7816_v49  ;;  %v10415_v63 = vld [vmem:[%s19099_s5 + $0x328] sm:$0xf]  ;;  %v12322_v12 = vld [vmem:[%s19099_s5 + $0x30] sm:$0xf0] }
 0x468   :  { %v11196_v57 = vor.u32 %v12612_v6, %v11193_v45  ;;  %7899 = vst [vmem:[%s19101_s7 + $0x8] sm:$0xff] %v7821_v54  ;;  %v10191_v6 = vld [vmem:[%s19099_s5 + $0x168] sm:$0xf]  ;;  %v12364_v45 = vld [vmem:[%s19099_s5 + $0x180] sm:$0xf0] }
 0x469   :  { %7624 = vmatpush.bf16.msrb.mxu1 %v11280_v11  ;;  %v10972_v11 = vor.u32 %v12556_v41, %v10969_v20  ;;  %v7384_v0 = vpop.f32.mrf.mxu2  ;;  %7548 = vmatpush.bf16.msrb.mxu3 %v11668_v52  ;;  %v12535_v41 = vld [vmem:[%s19099_s5 + $0x6dc] sm:$0xf]  ;;  %v10667_v49 = vld [vmem:[%s19099_s5 + $0x520] sm:$0xf]  ;;  %v10192_v54 = vor.u32 %v12364_v45, %v10191_v6  ;;  %v10079_v6 = vld [vmem:[%s19099_s5 + $0x88] sm:$0xf] }
 0x46a   :  { %v18504_v17 = vadd.f32 %v7384_v0, %v7372_v14  ;;  %v10219_v14 = vld [vmem:[%s19099_s5 + $0x1a0] sm:$0xf]  ;;  %v12483_v52 = vld [vmem:[%s19099_s5 + $0x538] sm:$0xf0]  ;;  %v10888_v42 = vor.u32 %v12535_v41, %v10885_v44  ;;  %v12476_v0 = vld [vmem:[%s19099_s5 + $0x500] sm:$0xf0] }
 0x46b   :  { %7636 = vmatpush.bf16.msrb.mxu2 %v11532_v22  ;;  %7612 = vmatpush.bf16.msrb.mxu0 %v11028_v8  ;;  %v12549_v22 = vld [vmem:[%s19099_s5 + $0x74c] sm:$0xf]  ;;  %v11168_v8 = vor.u32 %v12605_v26, %v11165_v56  ;;  %v10639_v56 = vld [vmem:[%s19099_s5 + $0x4e8] sm:$0xf]  ;;  %v10331_v29 = vld [vmem:[%s19099_s5 + $0x280] sm:$0xf] }
 0x46c   :  { %v10944_v7 = vor.u32 %v12549_v22, %v10941_v59  ;;  %v10163_v22 = vld [vmem:[%s19099_s5 + $0x130] sm:$0xf]  ;;  %v10668_v59 = vor.u32 %v12483_v52, %v10667_v49  ;;  %v12413_v26 = vld [vmem:[%s19099_s5 + $0x308] sm:$0xf0]  ;;  %v10555_v49 = vld [vmem:[%s19099_s5 + $0x440] sm:$0xf] }
 0x46d   :  { %7625 = vmatpush.bf16.msrb.mxu1 %v11252_v2  ;;  %v12720_v2 = vld [vmem:[%s19099_s5 + $0xca0] sm:$0xf0]  ;;  %7549 = vmatpush.bf16.msrb.mxu3 %v11640_v4  ;;  %v10164_v15 = vor.u32 %v12357_v62, %v10163_v22  ;;  %v12521_v4 = vld [vmem:[%s19099_s5 + $0x66c] sm:$0xf]  ;;  %v12455_v52 = vld [vmem:[%s19099_s5 + $0x458] sm:$0xf0] }
 0x46e   :  { %v11612_v3 = vor.u32 %v12720_v2, %v11611_v60  ;;  %v10829_v60 = vld [vmem:[%s19099_s5 + $0x684] sm:$0xf0]  ;;  %v12350_v2 = vld [vmem:[%s19099_s5 + $0x110] sm:$0xf0]  ;;  %v10745_v22 = vld [vmem:[%s19099_s5 + $0x5dc] sm:$0xf0] }
 0x46f   :  { %7637 = vmatpush.bf16.msrb.mxu2 %v11504_v9  ;;  %7613 = vmatpush.bf16.msrb.mxu0 %v11000_v28  ;;  %v18528_v9 = vadd.f32 %v18205_v51, %v7307_v27  ;;  %v11389_v51 = vld [vmem:[%s19099_s5 + $0xae4] sm:$0xf0]  ;;  %v11583_v28 = vld [vmem:[%s19099_s5 + $0xc50] sm:$0xf] }
 0x470   :  { %v11584_v47 = vor.u32 %v12713_v39, %v11583_v28  ;;  %v12399_v28 = vld [vmem:[%s19099_s5 + $0x298] sm:$0xf0] }
 0x471   :  { %7626 = vmatpush.bf16.msrb.mxu1 %v11224_v32  ;;  %v10220_v32 = vor.u32 %v12371_v21, %v10219_v14  ;;  %v7386_v20 = vpop.f32.mrf.mxu2  ;;  %7550 = vmatpush.bf16.msrb.mxu3 %v11612_v3  ;;  %v12469_v14 = vld [vmem:[%s19099_s5 + $0x4c8] sm:$0xf0]  ;;  %v10832_v21 = vor.u32 %v12521_v4, %v10829_v60  ;;  %v12514_v3 = vld [vmem:[%s19099_s5 + $0x634] sm:$0xf]  ;;  %v10332_v44 = vor.u32 %v12399_v28, %v10331_v29 }
 0x472   :  { %v10773_v20 = vld [vmem:[%s19099_s5 + $0x614] sm:$0xf0]  ;;  %v12493_v4 = vld [vmem:[%s19099_s5 + $0x58c] sm:$0xf] }
 0x473   :  { %7638 = vmatpush.bf16.msrb.mxu2 %v11476_v5  ;;  %7614 = vmatpush.bf16.msrb.mxu0 %v10972_v11  ;;  %v11392_v5 = vor.u32 %v12661_v31, %v11389_v51  ;;  %v10416_v11 = vor.u32 %v12420_v46, %v10415_v63  ;;  %v10801_v31 = vld [vmem:[%s19099_s5 + $0x64c] sm:$0xf0]  ;;  %v10107_v51 = vld [vmem:[%s19099_s5 + $0xc0] sm:$0xf]  ;;  %v12336_v63 = vld [vmem:[%s19099_s5 + $0xa0] sm:$0xf0] }
 0x474   :  { %v10804_v39 = vor.u32 %v12514_v3, %v10801_v31  ;;  %v10303_v46 = vld [vmem:[%s19099_s5 + $0x248] sm:$0xf]  ;;  %v12651_v3 = vld [vmem:[%s19099_s5 + $0xa78] sm:$0xf0] }
 0x475   :  { %7627 = vmatpush.bf16.msrb.mxu1 %v11196_v57  ;;  %v11364_v57 = vor.u32 %v12654_v35, %v11361_v50  ;;  %7551 = vmatpush.bf16.msrb.mxu3 %v11584_v47  ;;  %v12392_v35 = vld [vmem:[%s19099_s5 + $0x260] sm:$0xf0] }
 0x477   :  { %7639 = vmatpush.bf16.msrb.mxu2 %v11448_v33  ;;  %7615 = vmatpush.bf16.msrb.mxu0 %v10944_v7  ;;  %v10387_v33 = vld [vmem:[%s19099_s5 + $0x2f0] sm:$0xf]  ;;  %v10135_v7 = vld [vmem:[%s19099_s5 + $0xf8] sm:$0xf] }
 0x478   :  { %v10388_v27 = vor.u32 %v12413_v26, %v10387_v33  ;;  %7552 = vmatmul.bf16.vlgmr.msrb.gmra.mxu3 %v17129_v30  ;;  %v10136_v25 = vor.u32 %v12350_v2, %v10135_v7  ;;  %v10275_v33 = vld [vmem:[%s19099_s5 + $0x210] sm:$0xf]  ;;  %v12385_v26 = vld [vmem:[%s19099_s5 + $0x228] sm:$0xf0]  ;;  %v10023_v2 = vld [vmem:[%s19099_s5 + $0x18] sm:$0xf] }
 0x479   :  { %7628 = vmatpush.bf16.msrb.mxu1 %v11168_v8  ;;  %7596 = vmatpush.bf16.msra.mxu3 %v10888_v42  ;;  %v10640_v8 = vor.u32 %v12476_v0, %v10639_v56  ;;  %v10527_v0 = vld [vmem:[%s19099_s5 + $0x408] sm:$0xf]  ;;  %v10276_v7 = vor.u32 %v12385_v26, %v10275_v33  ;;  %v12581_v33 = vld [vmem:[%s19099_s5 + $0x848] sm:$0xf0]  ;;  %v11283_v26 = vld [vmem:[%s19099_s5 + $0x9f0] sm:$0xf] }
 0x47b   :  { %7640 = vmatpush.bf16.msrb.mxu2 %v11420_v55  ;;  %7616 = vmatpush.bf16.msrb.mxu0 %v10916_v37  ;;  %v18626_v55 = vpop.f32.mrf.mxu0  ;;  %v10612_v37 = vor.u32 %v12469_v14, %v10611_v36  ;;  %v7345_v58 = vpop.f32.mrf.mxu3  ;;  %v10247_v36 = vld [vmem:[%s19099_s5 + $0x1d8] sm:$0xf]  ;;  %v12378_v14 = vld [vmem:[%s19099_s5 + $0x1f0] sm:$0xf0] }
 0x47c   :  { %v10248_v29 = vor.u32 %v12378_v14, %v10247_v36  ;;  %v11255_v36 = vld [vmem:[%s19099_s5 + $0x9b8] sm:$0xf]  ;;  %v12630_v14 = vld [vmem:[%s19099_s5 + $0x9d0] sm:$0xf0] }
 0x47d   :  { %7629 = vmatpush.bf16.msrb.mxu1 %v11140_v40  ;;  %v18628_v61 = vpop.f32.mrf.mxu1  ;;  %7597 = vmatpush.bf16.msra.mxu3 %v10860_v1  ;;  %v12343_v40 = vld [vmem:[%s19099_s5 + $0xd8] sm:$0xf0]  ;;  %v12448_v1 = vld [vmem:[%s19099_s5 + $0x420] sm:$0xf0] }
 0x47e   :  { %7617 = vmatmul.bf16.vlgmr.msrb.gmra.mxu0 %v16562_v38  ;;  %v10108_v41 = vor.u32 %v12343_v40, %v10107_v51  ;;  %v10528_v23 = vor.u32 %v12448_v1, %v10527_v0  ;;  %v10499_v51 = vld [vmem:[%s19099_s5 + $0x3d0] sm:$0xf]  ;;  %v10024_v40 = vor.u32 %v12322_v12, %v10023_v2  ;;  %v12637_v0 = vld [vmem:[%s19099_s5 + $0xa08] sm:$0xf0]  ;;  %v11031_v2 = vld [vmem:[%s19099_s5 + $0x7f8] sm:$0xf] }
 0x47f   :  { %7661 = vmatpush.bf16.msra.mxu0 %v10220_v32  ;;  %7641 = vmatpush.bf16.msrb.mxu2 %v11392_v5  ;;  %v10583_v32 = vld [vmem:[%s19099_s5 + $0x478] sm:$0xf]  ;;  %v12507_v5 = vld [vmem:[%s19099_s5 + $0x5fc] sm:$0xf] }
 0x480   :  { %7630 = vmatmul.bf16.vlgmr.msrb.gmra.mxu1 %v16564_v43  ;;  %v10776_v42 = vor.u32 %v12507_v5, %v10773_v20  ;;  %v11781_v5 = vld [vmem:[%s19099_s5 + $0xdf4] sm:$0xf0] }
 0x481   :  { %7674 = vmatpush.bf16.msra.mxu1 %v10444_v24  ;;  %v12462_v24 = vld [vmem:[%s19099_s5 + $0x490] sm:$0xf0]  ;;  %7598 = vmatpush.bf16.msra.mxu3 %v10832_v21  ;;  %v11115_v21 = vld [vmem:[%s19099_s5 + $0x8a0] sm:$0xf] }
 0x482   :  { %v10584_v45 = vor.u32 %v12462_v24, %v10583_v32  ;;  %v12486_v32 = vld [vmem:[%s19099_s5 + $0x554] sm:$0xf] }
 0x483   :  { %7662 = vmatpush.bf16.msra.mxu0 %v10192_v54  ;;  %7642 = vmatpush.bf16.msrb.mxu2 %v11364_v57  ;;  %v7412_v50 = vpop.f32.mrf.mxu0  ;;  %v7333_v54 = vadd.f32 %v18286_v34, %v18528_v9  ;;  %v10304_v57 = vor.u32 %v12392_v35, %v10303_v46  ;;  %v10556_v34 = vor.u32 %v12455_v52, %v10555_v49  ;;  %v12329_v9 = vld [vmem:[%s19099_s5 + $0x68] sm:$0xf0]  ;;  %v7347_v28 = vpop.f32.mrf.mxu3  ;;  %v11311_v46 = vld [vmem:[%s19099_s5 + $0xa28] sm:$0xf]  ;;  %v12434_v49 = vld [vmem:[%s19099_s5 + $0x3b0] sm:$0xf0] }
 0x484   :  { %v12644_v50 = vld [vmem:[%s19099_s5 + $0xa40] sm:$0xf0] }
 0x485   :  { %7675 = vmatpush.bf16.msra.mxu1 %v10416_v11  ;;  %v7425_v47 = vpop.f32.mrf.mxu1  ;;  %7599 = vmatpush.bf16.msra.mxu3 %v10804_v39  ;;  %v10080_v11 = vor.u32 %v12336_v63, %v10079_v6  ;;  %v7346_v62 = vadd.f32 %v7345_v58, %v7333_v54  ;;  %v12588_v63 = vld [vmem:[%s19099_s5 + $0x880] sm:$0xf0]  ;;  %v11563_v54 = vld [vmem:[%s19099_s5 + $0xc20] sm:$0xf] }
 0x486   :  { %7643 = vmatmul.bf16.vlgmr.msrb.gmra.mxu2 %v16771_v18  ;;  %v10471_v47 = vld [vmem:[%s19099_s5 + $0x398] sm:$0xf] }
 0x487   :  { %7687 = vmatpush.bf16.msra.mxu2 %v10668_v59  ;;  %7663 = vmatpush.bf16.msra.mxu0 %v10164_v15  ;;  %v10051_v59 = vld [vmem:[%s19099_s5 + $0x50] sm:$0xf]  ;;  %v11791_v15 = vmul.f32 -1.442695, %v7346_v62  ;;  %v11753_v62 = vld [vmem:[%s19099_s5 + $0xdbc] sm:$0xf0] }
 0x488   :  { %v10052_v60 = vor.u32 %v12329_v9, %v10051_v59  ;;  %v12752_v59 = vld [vmem:[%s19099_s5 + $0xda4] sm:$0xf] }
 0x489   :  { %7676 = vmatpush.bf16.msra.mxu1 %v10388_v27  ;;  %v18705_v56 = vpop.f32.mrf.mxu2  ;;  %7600 = vmatpush.bf16.msra.mxu3 %v10776_v42  ;;  %v10748_v27 = vor.u32 %v12500_v16, %v10745_v22  ;;  %12772 = vpow2.f32 %v11791_v15  ;;  %v11312_v16 = vor.u32 %v12644_v50, %v11311_v46  ;;  %v10472_v22 = vor.u32 %v12434_v49, %v10471_v47  ;;  %v18817_v15 = vld [vmem:[%s19100_s6] sm:$0xff]  ;;  %v12686_v46 = vld [vmem:[%s19099_s5 + $0xb90] sm:$0xf0] }
 0x48a   :  { %v11756_v1 = vor.u32 %v12752_v59, %v11753_v62  ;;  %v11199_v59 = vld [vmem:[%s19099_s5 + $0x948] sm:$0xf]  ;;  %v12616_v62 = vld [vmem:[%s19099_s5 + $0x960] sm:$0xf0] }
 0x48b   :  { %7688 = vmatpush.bf16.msra.mxu2 %v10640_v8  ;;  %7664 = vmatpush.bf16.msra.mxu0 %v10136_v25  ;;  %v10717_v8 = vld [vmem:[%s19099_s5 + $0x5a4] sm:$0xf0]  ;;  %v12595_v25 = vld [vmem:[%s19099_s5 + $0x8b8] sm:$0xf0] }
 0x48c   :  { %v10720_v31 = vor.u32 %v12493_v4, %v10717_v8  ;;  %v11116_v24 = vor.u32 %v12595_v25, %v11115_v21  ;;  %v11725_v8 = vld [vmem:[%s19099_s5 + $0xd84] sm:$0xf0] }
 0x48d   :  { %7677 = vmatpush.bf16.msra.mxu1 %v10360_v19  ;;  %v11339_v19 = vld [vmem:[%s19099_s5 + $0xa60] sm:$0xf]  ;;  %7601 = vmatpush.bf16.msra.mxu3 %v10748_v27  ;;  %v4723_v27 = vperm.slane %v18817_v15, 4 }
 0x48e   :  { %v11340_v39 = vor.u32 %v12651_v3, %v11339_v19  ;;  %v11507_v3 = vld [vmem:[%s19099_s5 + $0xbb0] sm:$0xf] }
 0x48f   :  { %7689 = vmatpush.bf16.msra.mxu2 %v10612_v37  ;;  %7665 = vmatpush.bf16.msra.mxu0 %v10108_v41  ;;  %v12441_v37 = vld [vmem:[%s19099_s5 + $0x3e8] sm:$0xf0]  ;;  %v10689_v41 = vld [vmem:[%s19099_s5 + $0x56c] sm:$0xf0]  ;;  %v12773_v35 = vpop.eup %12772 }
 0x490   :  { %v10500_v20 = vor.u32 %v12441_v37, %v10499_v51  ;;  %v18779_v52 = vadd.f32 1.0, %v12773_v35  ;;  %v10692_v42 = vor.u32 %v12486_v32, %v10689_v41  ;;  %v11256_v32 = vor.u32 %v12630_v14, %v11255_v36  ;;  %v11171_v36 = vld [vmem:[%s19099_s5 + $0x910] sm:$0xf]  ;;  %v12609_v14 = vld [vmem:[%s19099_s5 + $0x928] sm:$0xf0] }
 0x491   :  { %7678 = vmatpush.bf16.msra.mxu1 %v10332_v44  ;;  %v12759_v44 = vld [vmem:[%s19099_s5 + $0xddc] sm:$0xf]  ;;  %v7438_v6 = vpop.f32.mrf.mxu2  ;;  %7602 = vmatpush.bf16.msra.mxu3 %v10720_v31  ;;  %v12693_v31 = vld [vmem:[%s19099_s5 + $0xbc8] sm:$0xf0] }
 0x492   :  { %12774 = vrcp.f32 %v18779_v52  ;;  %v12623_v6 = vld [vmem:[%s19099_s5 + $0x998] sm:$0xf0]  ;;  %v7832_v50 = vand.u32 2147483647, %v18779_v52  ;;  %vm7828_vm11 = vweird.f32 %v18779_v52 }
 0x493   :  { %7690 = vmatpush.bf16.msra.mxu2 %v10584_v45  ;;  %7666 = vmatpush.bf16.msra.mxu0 %v10080_v11  ;;  %v11087_v45 = vld [vmem:[%s19099_s5 + $0x868] sm:$0xf]  ;;  %v12707_v11 = vld [vmem:[%s19099_s5 + $0xc38] sm:$0xf0] }
 0x494   :  { %v11088_v58 = vor.u32 %v12588_v63, %v11087_v45  ;;  %v11564_v9 = vor.u32 %v12707_v11, %v11563_v54  ;;  %v7834_v45 = vand.u32 2147483648, %v18779_v52  ;;  %v11479_v63 = vld [vmem:[%s19099_s5 + $0xb78] sm:$0xf]  ;;  %v12731_v54 = vld [vmem:[%s19099_s5 + $0xcfc] sm:$0xf]  ;;  %vm7833_vm13 = vcmp.eq.f32.partialorder %v7832_v50, 8.507059e+37 }
 0x495   :  { %7679 = vmatpush.bf16.msra.mxu1 %v10304_v57  ;;  %v11784_v57 = vor.u32 %v12759_v44, %v11781_v5  ;;  %7603 = vmatpush.bf16.msra.mxu3 %v10692_v42  ;;  %v11508_v5 = vor.u32 %v12693_v31, %v11507_v3  ;;  %v11669_v11 = vld [vmem:[%s19099_s5 + $0xd14] sm:$0xf0] }
 0x497   :  { %7691 = vmatpush.bf16.msra.mxu2 %v10556_v34  ;;  %7667 = vmatpush.bf16.msra.mxu0 %v10052_v60  ;;  %v11059_v34 = vld [vmem:[%s19099_s5 + $0x830] sm:$0xf]  ;;  %v11284_v60 = vor.u32 %v12637_v0, %v11283_v26  ;;  %v12679_v26 = vld [vmem:[%s19099_s5 + $0xb58] sm:$0xf0] }
 0x498   :  { %v11060_v4 = vor.u32 %v12581_v33, %v11059_v34  ;;  %7604 = vmatmul.bf16.vlgmr.msra.gmra.mxu3 %v16420_v13  ;;  %v12775_v21 = vpop.eup %12774  ;;  %v7835_v34 = vor.u32 1.1754944e-38, %v7834_v45 }
 0x499   :  { %7680 = vmatpush.bf16.msra.mxu1 %v10276_v7  ;;  %7648 = vmatpush.bf16.msrb.mxu3 %v11784_v57  ;;  %v12745_v7 = vld [vmem:[%s19099_s5 + $0xd6c] sm:$0xf]  ;;  %v7824_v51 = vmul.f32 %v12775_v21, %v18779_v52  ;;  %vm7829_vm10 = vweird.f32 %v12775_v21  ;;  %v10975_v57 = vld [vmem:[%s19099_s5 + $0x788] sm:$0xf]  ;;  %v11451_v52 = vld [vmem:[%s19099_s5 + $0xb40] sm:$0xf] }
 0x49a   :  { %vm7830_vm12 = vmor %vm7828_vm11, %vm7829_vm10 }
 0x49b   :  { %7692 = vmatpush.bf16.msra.mxu2 %v10528_v23  ;;  %7668 = vmatpush.bf16.msra.mxu0 %v10024_v40  ;;  %v12574_v23 = vld [vmem:[%s19099_s5 + $0x810] sm:$0xf0]  ;;  %v7462_v25 = vpop.f32.mrf.mxu0  ;;  %v11728_v40 = vor.u32 %v12745_v7, %v11725_v8  ;;  %v7825_v41 = vsub.f32 1.0, %v7824_v51  ;;  %v11641_v7 = vld [vmem:[%s19099_s5 + $0xcdc] sm:$0xf0] }
 0x49c   :  { %v7463_v37 = vadd.f32 %v7462_v25, %v4723_v27  ;;  %v11032_v28 = vor.u32 %v12574_v23, %v11031_v2  ;;  %v10947_v8 = vld [vmem:[%s19099_s5 + $0x750] sm:$0xf]  ;;  %v12553_v2 = vld [vmem:[%s19099_s5 + $0x768] sm:$0xf0]  ;;  %v11452_v23 = vor.u32 %v12679_v26, %v11451_v52  ;;  %v11423_v25 = vld [vmem:[%s19099_s5 + $0xb08] sm:$0xf] }
 0x49d   :  { %7681 = vmatpush.bf16.msra.mxu1 %v10248_v29  ;;  %v7475_v19 = vpop.f32.mrf.mxu1  ;;  %7649 = vmatpush.bf16.msrb.mxu3 %v11756_v1  ;;  %v12738_v29 = vld [vmem:[%s19099_s5 + $0xd34] sm:$0xf]  ;;  %v7826_v35 = vmul.f32 %v12775_v21, %v7825_v41  ;;  %v10948_v51 = vor.u32 %v12553_v2, %v10947_v8  ;;  %v11395_v41 = vld [vmem:[%s19099_s5 + $0xad0] sm:$0xf]  ;;  %v12511_v26 = vld [vmem:[%s19099_s5 + $0x618] sm:$0xf0] }
 0x49e   :  { %7669 = vmatmul.bf16.vlgmr.msra.gmra.mxu0 %v16362_v48  ;;  %v11535_v48 = vld [vmem:[%s19099_s5 + $0xbe8] sm:$0xf]  ;;  %v7476_v44 = vadd.f32 %v7475_v19, %v7463_v37  ;;  %v12672_v19 = vld [vmem:[%s19099_s5 + $0xb20] sm:$0xf0]  ;;  %v11172_v37 = vor.u32 %v12609_v14, %v11171_v36 }
 0x49f   :  { %7713 = vmatpush.bf16.msrb.mxu0 %v11116_v24  ;;  %7693 = vmatpush.bf16.msra.mxu2 %v10500_v20  ;;  %v11697_v24 = vld [vmem:[%s19099_s5 + $0xd4c] sm:$0xf0]  ;;  %v11227_v20 = vld [vmem:[%s19099_s5 + $0x980] sm:$0xf] }
 0x4a0   :  { %7682 = vmatmul.bf16.vlgmr.msra.gmra.mxu1 %v16373_v53  ;;  %v12700_v53 = vld [vmem:[%s19099_s5 + $0xc00] sm:$0xf0]  ;;  %v11700_v47 = vor.u32 %v12738_v29, %v11697_v24  ;;  %v11228_v42 = vor.u32 %v12623_v6, %v11227_v20  ;;  %v11613_v29 = vld [vmem:[%s19099_s5 + $0xca4] sm:$0xf0]  ;;  %v11143_v24 = vld [vmem:[%s19099_s5 + $0x8d8] sm:$0xf] }
 0x4a1   :  { %7726 = vmatpush.bf16.msrb.mxu1 %v11340_v39  ;;  %v11536_v12 = vor.u32 %v12700_v53, %v11535_v48  ;;  %v11003_v39 = vld [vmem:[%s19099_s5 + $0x7c0] sm:$0xf]  ;;  %7650 = vmatpush.bf16.msrb.mxu3 %v11728_v40  ;;  %v11672_v48 = vor.u32 %v12731_v54, %v11669_v11  ;;  %v12724_v53 = vld [vmem:[%s19099_s5 + $0xcc4] sm:$0xf]  ;;  %v12717_v40 = vld [vmem:[%s19099_s5 + $0xc8c] sm:$0xf] }
 0x4a2   :  { %v11644_v31 = vor.u32 %v12724_v53, %v11641_v7 }
 0x4a3   :  { %7714 = vmatpush.bf16.msrb.mxu0 %v11088_v58  ;;  %7694 = vmatpush.bf16.msra.mxu2 %v10472_v22  ;;  %v7827_v58 = vadd.f32 %v12775_v21, %v7826_v35  ;;  %v12560_v22 = vld [vmem:[%s19099_s5 + $0x7a0] sm:$0xf0]  ;;  %v10891_v35 = vld [vmem:[%s19099_s5 + $0x6e0] sm:$0xf] }
 0x4a4   :  { %v10976_v27 = vor.u32 %v12560_v22, %v10975_v57 }
 0x4a5   :  { %7727 = vmatpush.bf16.msrb.mxu1 %v11312_v16  ;;  %v11480_v16 = vor.u32 %v12686_v46, %v11479_v63  ;;  %v7477_v33 = vpop.f32.mrf.mxu1  ;;  %v7831_v0 = vsel %vm7830_vm12, %v12775_v21, %v7827_v58  ;;  %7651 = vmatpush.bf16.msrb.mxu3 %v11700_v47  ;;  %v11585_v46 = vld [vmem:[%s19099_s5 + $0xc6c] sm:$0xf0]  ;;  %v12539_v47 = vld [vmem:[%s19099_s5 + $0x6f8] sm:$0xf0]  ;;  %v10863_v58 = vld [vmem:[%s19099_s5 + $0x6a8] sm:$0xf] }
 0x4a6   :  { %7695 = vmatmul.bf16.vlgmr.msra.gmra.mxu2 %v16412_v10  ;;  %v12567_v10 = vld [vmem:[%s19099_s5 + $0x7d8] sm:$0xf0]  ;;  %v7836_v1 = vsel %vm7833_vm13, %v7835_v34, %v7831_v0  ;;  %v10892_v11 = vor.u32 %v12539_v47, %v10891_v35  ;;  %v12518_v33 = vld [vmem:[%s19099_s5 + $0x650] sm:$0xf0] }
 0x4a7   :  { %7739 = vmatpush.bf16.msrb.mxu2 %v11564_v9  ;;  %7715 = vmatpush.bf16.msrb.mxu0 %v11060_v4  ;;  %v11004_v49 = vor.u32 %v12567_v10, %v11003_v39  ;;  %v7464_v9 = vpop.f32.mrf.mxu0  ;;  %v11200_v4 = vor.u32 %v12616_v62, %v11199_v59  ;;  %7900 = vst [vmem:[%s19101_s7 + $0x10] sm:$0xff] %v7836_v1  ;;  %v12602_v39 = vld [vmem:[%s19099_s5 + $0x8f0] sm:$0xf0]  ;;  %v10835_v59 = vld [vmem:[%s19099_s5 + $0x670] sm:$0xf] }
 0x4a8   :  { %v11144_v6 = vor.u32 %v12602_v39, %v11143_v24  ;;  %v12525_v62 = vld [vmem:[%s19099_s5 + $0x688] sm:$0xf0]  ;;  %v10807_v9 = vld [vmem:[%s19099_s5 + $0x638] sm:$0xf]  ;;  %v4724_v24 = vperm.slane %v18817_v15, 5 }
 0x4a9   :  { %7728 = vmatpush.bf16.msrb.mxu1 %v11284_v60  ;;  %v7397_v60 = vpop.f32.mrf.mxu3  ;;  %v7488_v21 = vpop.f32.mrf.mxu2  ;;  %7652 = vmatpush.bf16.msrb.mxu3 %v11672_v48  ;;  %v10808_v52 = vor.u32 %v12518_v33, %v10807_v9  ;;  %v11731_v39 = vld [vmem:[%s19099_s5 + $0xd70] sm:$0xf] }
 0x4aa   :  { %v18928_v3 = vadd.f32 %v7488_v21, %v7476_v44  ;;  %v12665_v44 = vld [vmem:[%s19099_s5 + $0xae8] sm:$0xf0]  ;;  %v10695_v21 = vld [vmem:[%s19099_s5 + $0x558] sm:$0xf] }
 0x4ab   :  { %7740 = vmatpush.bf16.msrb.mxu2 %v11536_v12  ;;  %7716 = vmatpush.bf16.msrb.mxu0 %v11032_v28  ;;  %v7398_v12 = vadd.f32 %v7397_v60, %v18504_v17  ;;  %v10919_v28 = vld [vmem:[%s19099_s5 + $0x718] sm:$0xf]  ;;  %v11396_v63 = vor.u32 %v12665_v44, %v11395_v41  ;;  %v12504_v60 = vld [vmem:[%s19099_s5 + $0x5e0] sm:$0xf0] }
 0x4ad   :  { %7729 = vmatpush.bf16.msrb.mxu1 %v11256_v32  ;;  %v7411_v17 = vadd.f32 %v18626_v55, %v7398_v12  ;;  %v11424_v55 = vor.u32 %v12672_v19, %v11423_v25  ;;  %v12546_v32 = vld [vmem:[%s19099_s5 + $0x730] sm:$0xf0]  ;;  %7653 = vmatpush.bf16.msrb.mxu3 %v11644_v31  ;;  %v11787_v19 = vld [vmem:[%s19099_s5 + $0xde0] sm:$0xf] }
 0x4ae   :  { %v10920_v20 = vor.u32 %v12546_v32, %v10919_v28  ;;  %v12490_v25 = vld [vmem:[%s19099_s5 + $0x570] sm:$0xf0]  ;;  %v11759_v28 = vld [vmem:[%s19099_s5 + $0xda8] sm:$0xf] }
 0x4af   :  { %7741 = vmatpush.bf16.msrb.mxu2 %v11508_v5  ;;  %7717 = vmatpush.bf16.msrb.mxu0 %v11004_v49  ;;  %v7424_v10 = vadd.f32 %v18628_v61, %v7411_v17  ;;  %v11616_v5 = vor.u32 %v12717_v40, %v11613_v29  ;;  %v12710_v61 = vld [vmem:[%s19099_s5 + $0xc54] sm:$0xf]  ;;  %v11367_v49 = vld [vmem:[%s19099_s5 + $0xa98] sm:$0xf]  ;;  %v12763_v17 = vld [vmem:[%s19099_s5 + $0xdf8] sm:$0xf0] }
 0x4b0   :  { %v11588_v54 = vor.u32 %v12710_v61, %v11585_v46  ;;  %v11788_v29 = vor.u32 %v12763_v17, %v11787_v19  ;;  %v12742_v61 = vld [vmem:[%s19099_s5 + $0xd50] sm:$0xf0] }
 0x4b1   :  { %7730 = vmatpush.bf16.msrb.mxu1 %v11228_v42  ;;  %v7399_v45 = vpop.f32.mrf.mxu3  ;;  %v7490_v50 = vpop.f32.mrf.mxu2  ;;  %v12658_v42 = vld [vmem:[%s19099_s5 + $0xab0] sm:$0xf0]  ;;  %7654 = vmatpush.bf16.msrb.mxu3 %v11616_v5  ;;  %v7437_v1 = vadd.f32 %v18705_v56, %v7424_v10  ;;  %v12497_v56 = vld [vmem:[%s19099_s5 + $0x5a8] sm:$0xf0] }
 0x4b2   :  { %v11368_v57 = vor.u32 %v12658_v42, %v11367_v49  ;;  %v12749_v10 = vld [vmem:[%s19099_s5 + $0xd88] sm:$0xf0]  ;;  %v11675_v42 = vld [vmem:[%s19099_s5 + $0xd00] sm:$0xf] }
 0x4b3   :  { %7742 = vmatpush.bf16.msrb.mxu2 %v11480_v16  ;;  %7718 = vmatpush.bf16.msrb.mxu0 %v10976_v27  ;;  %v12532_v16 = vld [vmem:[%s19099_s5 + $0x6c0] sm:$0xf0] }
 0x4b4   :  { %v10864_v22 = vor.u32 %v12532_v16, %v10863_v58 }
 0x4b5   :  { %7731 = vmatpush.bf16.msrb.mxu1 %v11200_v4  ;;  %7655 = vmatpush.bf16.msrb.mxu3 %v11588_v54  ;;  %v10751_v4 = vld [vmem:[%s19099_s5 + $0x5c8] sm:$0xf]  ;;  %v12735_v54 = vld [vmem:[%s19099_s5 + $0xd18] sm:$0xf0] }
 0x4b6   :  { %v10752_v12 = vor.u32 %v12504_v60, %v10751_v4 }
 0x4b7   :  { %7743 = vmatpush.bf16.msrb.mxu2 %v11452_v23  ;;  %7719 = vmatpush.bf16.msrb.mxu0 %v10948_v51  ;;  %v10723_v23 = vld [vmem:[%s19099_s5 + $0x590] sm:$0xf] }
 0x4b8   :  { %7656 = vmatmul.bf16.vlgmr.msrb.gmra.mxu3 %v17129_v30  ;;  %v10724_v36 = vor.u32 %v12497_v56, %v10723_v23 }
 0x4b9   :  { %7732 = vmatpush.bf16.msrb.mxu1 %v11172_v37  ;;  %7700 = vmatpush.bf16.msra.mxu3 %v10892_v11  ;;  %v10696_v37 = vor.u32 %v12490_v25, %v10695_v21 }
 0x4bb   :  { %7744 = vmatpush.bf16.msrb.mxu2 %v11424_v55  ;;  %7720 = vmatpush.bf16.msrb.mxu0 %v10920_v20  ;;  %v18989_v34 = vpop.f32.mrf.mxu0  ;;  %v7449_v27 = vpop.f32.mrf.mxu3  ;;  %v12756_v55 = vld [vmem:[%s19099_s5 + $0xdc0] sm:$0xf0]  ;;  %v11732_v20 = vor.u32 %v12749_v10, %v11731_v39 }
 0x4bc   :  { %v7450_v7 = vadd.f32 %v7449_v27, %v7437_v1  ;;  %v11760_v32 = vor.u32 %v12756_v55, %v11759_v28  ;;  %v12721_v1 = vld [vmem:[%s19099_s5 + $0xca8] sm:$0xf0] }
 0x4bd   :  { %7733 = vmatpush.bf16.msrb.mxu1 %v11144_v6  ;;  %7701 = vmatpush.bf16.msra.mxu3 %v10864_v22  ;;  %v11676_v22 = vor.u32 %v12735_v54, %v11675_v42 }
 0x4be   :  { %7721 = vmatmul.bf16.vlgmr.msrb.gmra.mxu0 %v16562_v38  ;;  %v18991_v38 = vpop.f32.mrf.mxu1  ;;  %v11792_v2 = vmul.f32 -1.442695, %v7450_v7 }
 0x4bf   :  { %7745 = vmatpush.bf16.msrb.mxu2 %v11396_v63  ;;  %v11703_v63 = vld [vmem:[%s19099_s5 + $0xd38] sm:$0xf] }
 0x4c0   :  { %7734 = vmatmul.bf16.vlgmr.msrb.gmra.mxu1 %v16564_v43  ;;  %v10836_v43 = vor.u32 %v12525_v62, %v10835_v59  ;;  %12776 = vpow2.f32 %v11792_v2  ;;  %v11647_v62 = vld [vmem:[%s19099_s5 + $0xcc8] sm:$0xf] }
 0x4c2   :  { %7702 = vmatpush.bf16.msra.mxu3 %v10836_v43  ;;  %v12728_v43 = vld [vmem:[%s19099_s5 + $0xce0] sm:$0xf0] }
 0x4c3   :  { %7746 = vmatpush.bf16.msrb.mxu2 %v11368_v57  ;;  %v7516_v0 = vpop.f32.mrf.mxu0  ;;  %v7451_v14 = vpop.f32.mrf.mxu3 }
 0x4c6   :  { %7747 = vmatmul.bf16.vlgmr.msrb.gmra.mxu2 %v16771_v18  ;;  %v10779_v18 = vld [vmem:[%s19099_s5 + $0x600] sm:$0xf]  ;;  %v7529_v48 = vpop.f32.mrf.mxu1  ;;  %7703 = vmatpush.bf16.msra.mxu3 %v10808_v52  ;;  %v12777_v51 = vpop.eup %12776 }
 0x4c7   :  { %v10780_v53 = vor.u32 %v12511_v26, %v10779_v18  ;;  %v7789_v40 = vadd.f32 1.0, %v12777_v51  ;;  %v11648_v26 = vor.u32 %v12728_v43, %v11647_v62 }
 0x4c9   :  { %v19012_v8 = vpop.f32.mrf.mxu2  ;;  %12778 = vrcp.f32 %v7789_v40  ;;  %v7849_v50 = vand.u32 2147483648, %v7789_v40  ;;  %v7847_v49 = vand.u32 2147483647, %v7789_v40  ;;  %vm7843_vm15 = vweird.f32 %v7789_v40 }
 0x4ca   :  { %7704 = vmatpush.bf16.msra.mxu3 %v10780_v53  ;;  %v11619_v53 = vld [vmem:[%s19099_s5 + $0xc90] sm:$0xf] }
 0x4cb   :  { %v7850_v57 = vor.u32 1.1754944e-38, %v7849_v50  ;;  %vm7848_vm1 = vcmp.eq.f32.partialorder %v7847_v49, 8.507059e+37  ;;  %v11620_v4 = vor.u32 %v12721_v1, %v11619_v53 }
 0x4ce   :  { %7705 = vmatpush.bf16.msra.mxu3 %v10752_v12 }
 0x4cf   :  { %v12779_v41 = vpop.eup %12778 }
 0x4d0   :  { %v7839_v6 = vmul.f32 %v12779_v41, %v7789_v40  ;;  %vm7844_vm14 = vweird.f32 %v12779_v41  ;;  %v4725_v40 = vperm.slane %v18817_v15, 6 }
 0x4d1   :  { %v7542_v31 = vpop.f32.mrf.mxu2  ;;  %vm7845_vm0 = vmor %vm7843_vm15, %vm7844_vm14 }
 0x4d2   :  { %7706 = vmatpush.bf16.msra.mxu3 %v10724_v36  ;;  %v7840_v46 = vsub.f32 1.0, %v7839_v6 }
 0x4d4   :  { %v7841_v47 = vmul.f32 %v12779_v41, %v7840_v46 }
 0x4d6   :  { %7707 = vmatpush.bf16.msra.mxu3 %v10696_v37  ;;  %v7842_v11 = vadd.f32 %v12779_v41, %v7841_v47 }
 0x4d8   :  { %v7846_v59 = vsel %vm7845_vm0, %v12779_v41, %v7842_v11 }
 0x4d9   :  { %7708 = vmatmul.bf16.vlgmr.msra.gmra.mxu3 %v16420_v13  ;;  %v11704_v13 = vor.u32 %v12742_v61, %v11703_v63  ;;  %v7851_v9 = vsel %vm7848_vm1, %v7850_v57, %v7846_v59 }
 0x4da   :  { %7752 = vmatpush.bf16.msrb.mxu3 %v11788_v29  ;;  %7901 = vst [vmem:[%s19101_s7 + $0x18] sm:$0xff] %v7851_v9 }
 0x4db   :  { %v7566_v44 = vpop.f32.mrf.mxu0  ;;  %v7501_v33 = vpop.f32.mrf.mxu3 }
 0x4dc   :  { %v7567_v45 = vadd.f32 %v7566_v44, %v4724_v24  ;;  %v7502_v52 = vadd.f32 %v7501_v33, %v18928_v3  ;;  %v11591_v3 = vld [vmem:[%s19099_s5 + $0xc58] sm:$0xf] }
 0x4dd   :  { %v7579_v5 = vpop.f32.mrf.mxu1 }
 0x4de   :  { %7753 = vmatpush.bf16.msrb.mxu3 %v11760_v32  ;;  %v7580_v35 = vadd.f32 %v7579_v5, %v7567_v45  ;;  %v7515_v0 = vadd.f32 %v18989_v34, %v7502_v52  ;;  %v12714_v34 = vld [vmem:[%s19099_s5 + $0xc70] sm:$0xf0] }
 0x4df   :  { %v11592_v2 = vor.u32 %v12714_v34, %v11591_v3 }
 0x4e0   :  { %v7528_v27 = vadd.f32 %v18991_v38, %v7515_v0 }
 0x4e2   :  { %7754 = vmatpush.bf16.msrb.mxu3 %v11732_v20  ;;  %v7541_v36 = vadd.f32 %v19012_v8, %v7528_v27 }
 0x4e3   :  { %v7568_v58 = vpop.f32.mrf.mxu0  ;;  %v7503_v60 = vpop.f32.mrf.mxu3 }
 0x4e5   :  { %v7581_v16 = vpop.f32.mrf.mxu1 }
 0x4e6   :  { %7755 = vmatpush.bf16.msrb.mxu3 %v11704_v13 }
 0x4e9   :  { %v7592_v18 = vpop.f32.mrf.mxu2 }
 0x4ea   :  { %7756 = vmatpush.bf16.msrb.mxu3 %v11676_v22  ;;  %v7593_v48 = vadd.f32 %v7592_v18, %v7580_v35 }
 0x4ee   :  { %7757 = vmatpush.bf16.msrb.mxu3 %v11648_v26 }
 0x4f1   :  { %v7594_v7 = vpop.f32.mrf.mxu2 }
 0x4f2   :  { %7758 = vmatpush.bf16.msrb.mxu3 %v11620_v4 }
 0x4f6   :  { %7759 = vmatpush.bf16.msrb.mxu3 %v11592_v2 }
 0x4f9   :  { %7760 = vmatmul.bf16.vlgmr.msrb.gmra.mxu3 %v17129_v30 }
 0x4fb   :  { %v7618_v12 = vpop.f32.mrf.mxu0  ;;  %v7553_v14 = vpop.f32.mrf.mxu3 }
 0x4fc   :  { %v7554_v21 = vadd.f32 %v7553_v14, %v7541_v36 }
 0x4fd   :  { %v7631_v23 = vpop.f32.mrf.mxu1 }
 0x4fe   :  { %v11793_v19 = vmul.f32 -1.442695, %v7554_v21 }
 0x500   :  { %12780 = vpow2.f32 %v11793_v19 }
 0x503   :  { %v7620_v38 = vpop.f32.mrf.mxu0  ;;  %v7555_v17 = vpop.f32.mrf.mxu3 }
 0x505   :  { %v7633_v56 = vpop.f32.mrf.mxu1 }
 0x506   :  { %v12781_v51 = vpop.eup %12780 }
 0x507   :  { %v7790_v37 = vadd.f32 1.0, %v12781_v51 }
 0x509   :  { %v7644_v25 = vpop.f32.mrf.mxu2  ;;  %12782 = vrcp.f32 %v7790_v37  ;;  %v7864_v8 = vand.u32 2147483648, %v7790_v37  ;;  %v7862_v41 = vand.u32 2147483647, %v7790_v37  ;;  %vm7858_vm3 = vweird.f32 %v7790_v37 }
 0x50b   :  { %v7865_v5 = vor.u32 1.1754944e-38, %v7864_v8  ;;  %vm7863_vm5 = vcmp.eq.f32.partialorder %v7862_v41, 8.507059e+37 }
 0x50f   :  { %v12783_v29 = vpop.eup %12782 }
 0x510   :  { %v7854_v55 = vmul.f32 %v12783_v29, %v7790_v37  ;;  %vm7859_vm2 = vweird.f32 %v12783_v29 }
 0x511   :  { %v7646_v31 = vpop.f32.mrf.mxu2  ;;  %vm7860_vm4 = vmor %vm7858_vm3, %vm7859_vm2 }
 0x512   :  { %v7855_v24 = vsub.f32 1.0, %v7854_v55 }
 0x514   :  { %v7856_v10 = vmul.f32 %v12783_v29, %v7855_v24 }
 0x516   :  { %v7857_v44 = vadd.f32 %v12783_v29, %v7856_v10 }
 0x518   :  { %v7861_v45 = vsel %vm7860_vm4, %v12783_v29, %v7857_v44 }
 0x519   :  { %v7866_v15 = vsel %vm7863_vm5, %v7865_v5, %v7861_v45 }
 0x51a   :  { %7902 = vst [vmem:[%s19101_s7 + $0x20] sm:$0xff] %v7866_v15 }
 0x51b   :  { %v7670_v30 = vpop.f32.mrf.mxu0  ;;  %v7605_v63 = vpop.f32.mrf.mxu3 }
 0x51c   :  { %v7671_v32 = vadd.f32 %v7670_v30, %v4725_v40  ;;  %v7606_v61 = vadd.f32 %v7605_v63, %v7593_v48 }
 0x51d   :  { %v7683_v28 = vpop.f32.mrf.mxu1 }
 0x51e   :  { %v7684_v39 = vadd.f32 %v7683_v28, %v7671_v32  ;;  %v7619_v35 = vadd.f32 %v7618_v12, %v7606_v61 }
 0x520   :  { %v7632_v13 = vadd.f32 %v7631_v23, %v7619_v35 }
 0x522   :  { %v7645_v58 = vadd.f32 %v7644_v25, %v7632_v13 }
 0x523   :  { %v7672_v20 = vpop.f32.mrf.mxu0  ;;  %v7607_v47 = vpop.f32.mrf.mxu3 }
 0x525   :  { %v7685_v6 = vpop.f32.mrf.mxu1 }
 0x529   :  { %v7696_v46 = vpop.f32.mrf.mxu2 }
 0x52a   :  { %v7697_v50 = vadd.f32 %v7696_v46, %v7684_v39 }
 0x531   :  { %v7698_v49 = vpop.f32.mrf.mxu2 }
 0x53b   :  { %v7722_v42 = vpop.f32.mrf.mxu0  ;;  %v7657_v16 = vpop.f32.mrf.mxu3 }
 0x53c   :  { %v7658_v22 = vadd.f32 %v7657_v16, %v7645_v58 }
 0x53d   :  { %v7735_v54 = vpop.f32.mrf.mxu1 }
 0x53e   :  { %v11794_v62 = vmul.f32 -1.442695, %v7658_v22 }
 0x540   :  { %12784 = vpow2.f32 %v11794_v62 }
 0x543   :  { %v7724_v11 = vpop.f32.mrf.mxu0  ;;  %v7659_v43 = vpop.f32.mrf.mxu3 }
 0x545   :  { %v7737_v57 = vpop.f32.mrf.mxu1 }
 0x546   :  { %v12785_v33 = vpop.eup %12784 }
 0x547   :  { %v7791_v52 = vadd.f32 1.0, %v12785_v33 }
 0x549   :  { %v7748_v59 = vpop.f32.mrf.mxu2  ;;  %12786 = vrcp.f32 %v7791_v52  ;;  %v7879_v48 = vand.u32 2147483648, %v7791_v52  ;;  %v7877_v1 = vand.u32 2147483647, %v7791_v52  ;;  %vm7873_vm7 = vweird.f32 %v7791_v52 }
 0x54b   :  { %v7880_v4 = vor.u32 1.1754944e-38, %v7879_v48  ;;  %vm7878_vm9 = vcmp.eq.f32.partialorder %v7877_v1, 8.507059e+37 }
 0x54f   :  { %v12787_v18 = vpop.eup %12786 }
 0x550   :  { %v7869_v26 = vmul.f32 %v12787_v18, %v7791_v52  ;;  %vm7874_vm6 = vweird.f32 %v12787_v18 }
 0x551   :  { %v7750_v9 = vpop.f32.mrf.mxu2  ;;  %vm7875_vm8 = vmor %vm7873_vm7, %vm7874_vm6 }
 0x552   :  { %v7870_v0 = vsub.f32 1.0, %v7869_v26 }
 0x554   :  { %v7871_v53 = vmul.f32 %v12787_v18, %v7870_v0 }
 0x556   :  { %v7872_v27 = vadd.f32 %v12787_v18, %v7871_v53 }
 0x558   :  { %v7876_v3 = vsel %vm7875_vm8, %v12787_v18, %v7872_v27 }
 0x559   :  { %v7881_v60 = vsel %vm7878_vm9, %v7880_v4, %v7876_v3 }
 0x55a   :  { %7903 = vst [vmem:[%s19101_s7 + $0x28] sm:$0xff] %v7881_v60 }
 0x55c   :  { %v7709_v34 = vpop.f32.mrf.mxu3 }
 0x55d   :  { %v7710_v7 = vadd.f32 %v7709_v34, %v7697_v50 }
 0x55f   :  { %v7723_v2 = vadd.f32 %v7722_v42, %v7710_v7 }
 0x561   :  { %v7736_v12 = vadd.f32 %v7735_v54, %v7723_v2 }
 0x563   :  { %v7749_v38 = vadd.f32 %v7748_v59, %v7736_v12 }
 0x564   :  { %v7711_v23 = vpop.f32.mrf.mxu3 }
 0x57c   :  { %v7761_v56 = vpop.f32.mrf.mxu3 }
 0x57d   :  { %v7762_v36 = vadd.f32 %v7761_v56, %v7749_v38 }
 0x57f   :  { %v11795_v14 = vmul.f32 -1.442695, %v7762_v36 }
 0x581   :  { %12788 = vpow2.f32 %v11795_v14 }
 0x584   :  { %v7763_v21 = vpop.f32.mrf.mxu3 }
 0x587   :  { %v12789_v25 = vpop.eup %12788 }
 0x588   :  { %v7792_v19 = vadd.f32 1.0, %v12789_v25 }
 0x58a   :  { %12790 = vrcp.f32 %v7792_v19  ;;  %v7894_v37 = vand.u32 2147483648, %v7792_v19  ;;  %v7892_v29 = vand.u32 2147483647, %v7792_v19  ;;  %vm7888_vm11 = vweird.f32 %v7792_v19 }
 0x58c   :  { %v7895_v28 = vor.u32 1.1754944e-38, %v7894_v37  ;;  %vm7893_vm13 = vcmp.eq.f32.partialorder %v7892_v29, 8.507059e+37 }
 0x590   :  { %v12791_v17 = vpop.eup %12790 }
 0x591   :  { %v7884_v31 = vmul.f32 %v12791_v17, %v7792_v19  ;;  %vm7889_vm10 = vweird.f32 %v12791_v17 }
 0x592   :  { %vm7890_vm12 = vmor %vm7888_vm11, %vm7889_vm10 }
 0x593   :  { %v7885_v51 = vsub.f32 1.0, %v7884_v31 }
 0x595   :  { %v7886_v40 = vmul.f32 %v12791_v17, %v7885_v51 }
 0x597   :  { %v7887_v30 = vadd.f32 %v12791_v17, %v7886_v40 }
 0x599   :  { %v7891_v55 = vsel %vm7890_vm12, %v12791_v17, %v7887_v30 }
 0x59a   :  { %v7896_v32 = vsel %vm7893_vm13, %v7895_v28, %v7891_v55 }
 0x59b   :  { %7904 = vst [vmem:[%s19101_s7 + $0x30] sm:$0xff] %v7896_v32 }

</bundles_post_ra>
